<compile_context>
chip_gen: v7x
topology: tpu7x:2x2x1
jax: 0.10.0
libtpu: 0.0.40
codegen_flags: <defaults>
</compile_context>

<pallas_src>
import jax
import jax.numpy as jnp
from jax import lax
from jax.experimental import pallas as pl
from jax.experimental.pallas import tpu as pltpu

BN_EPS = 1e-5
LANE = 128                               # pad channel dims to a multiple of this


def _round_up(v, m):
    return (v + m - 1) // m * m


def _vmem_budgets():
    """(scoped VMEM limit, row-tile byte budget) chosen per TPU generation."""
    try:
        cap = int(pltpu.get_tpu_info().vmem_capacity_bytes)
    except Exception:                                  # unknown -> assume v7x-like
        cap = 64 * 1024 * 1024
    if cap >= 100 * 1024 * 1024:                       # v5e / v6e: 128 MiB VMEM
        return 96 * 1024 * 1024, 24 * 1024 * 1024
    return 48 * 1024 * 1024, 12 * 1024 * 1024          # v7x: 64 MiB per TensorCore


def _pick_row_tile(m_rows, bytes_per_row, budget):
    """Power-of-two row tile within budget; M is padded up to a multiple of it."""
    tm = 2048
    while tm > 8 and tm * bytes_per_row > budget:
        tm //= 2
    while tm > 8 and tm >= 2 * _round_up(m_rows, 8):   # don't dwarf the problem
        tm //= 2
    return max(tm, 8)


def _pick_image_batch(n_imgs, per_image_bytes, budget):
    """Largest divisor of n_imgs whose per-step footprint fits the budget."""
    best = 1
    for b in range(1, n_imgs + 1):
        if n_imgs % b == 0 and b * per_image_bytes <= budget:
            best = b
    return best


# --------------------------------------------------------------------------- #
# Kernels
# --------------------------------------------------------------------------- #
def _conv1x1_stats_kernel(x_ref, w_ref, y_ref, st_ref):
    """y = x @ w (bf16 MXU inputs, f32 accum); per-tile channel sum / sum-sq."""
    y = jnp.dot(x_ref[...], w_ref[...], preferred_element_type=jnp.float32)
    st_ref[0, 0:1, :] = jnp.sum(y, axis=0, keepdims=True)        # stats from f32
    st_ref[0, 1:2, :] = jnp.sum(y * y, axis=0, keepdims=True)
    y_ref[...] = y.astype(y_ref.dtype)                           # bf16 store


def _bn_relu_conv1x1_stats_kernel(x_ref, s_ref, b_ref, w_ref, y_ref, st_ref,
                                  *, tm, m_valid, needs_mask):
    """h = relu(bn(x)); y = h @ w; per-tile channel stats of y (pre-cast f32)."""
    h = jnp.maximum(x_ref[...].astype(jnp.float32) * s_ref[...] + b_ref[...], 0.0)
    if needs_mask:
        # Rows beyond the true M (grid padding) would otherwise contribute
        # relu(bias) to the bn3 batch statistics -> zero them.
        rid = pl.program_id(0) * tm + lax.broadcasted_iota(jnp.int32, h.shape, 0)
        h = jnp.where(rid < m_valid, h, 0.0)
    y = jnp.dot(h.astype(jnp.bfloat16), w_ref[...],
                preferred_element_type=jnp.float32)
    st_ref[0, 0:1, :] = jnp.sum(y, axis=0, keepdims=True)
    st_ref[0, 1:2, :] = jnp.sum(y * y, axis=0, keepdims=True)
    y_ref[...] = y.astype(y_ref.dtype)


def _bn_relu_conv3x3_stats_kernel(x_ref, s_ref, b_ref, w_ref, y_ref, st_ref,
                                  pad_ref):
    """Per B-image block: h = relu(bn1(x)); y = conv3x3(h) (stride 1, pad 1).

    The bf16 padded scratch gets halo-only zeroing and a single interior write
    each step (no cross-step dependence -> grid stays 'parallel' / megacore
    safe).  Nine direct-window matmuls accumulate in f32 values (no zeros init,
    no concatenated-window temporaries); stats come from the f32 accumulator.
    """
    B, H, W, C = x_ref.shape
    s = s_ref[...].reshape(1, 1, 1, C)
    b = b_ref[...].reshape(1, 1, 1, C)
    h = jnp.maximum(x_ref[...].astype(jnp.float32) * s + b, 0.0).astype(jnp.bfloat16)

    zrow = jnp.zeros((B, 1, W + 2, C), jnp.bfloat16)
    zcol = jnp.zeros((B, H + 2, 1, C), jnp.bfloat16)
    pad_ref[:, 0:1, :, :] = zrow
    pad_ref[:, H + 1:H + 2, :, :] = zrow
    pad_ref[:, :, 0:1, :] = zcol
    pad_ref[:, :, W + 1:W + 2, :] = zcol
    pad_ref[:, 1:H + 1, 1:W + 1, :] = h

    acc = None
    for ky in range(3):                                       # static, unrolled
        for kx in range(3):
            win = pad_ref[:, ky:ky + H, kx:kx + W, :].reshape(B * H * W, C)
            p = jnp.dot(win, w_ref[ky, kx], preferred_element_type=jnp.float32)
            acc = p if acc is None else acc + p

    st_ref[0, 0:1, :] = jnp.sum(acc, axis=0, keepdims=True)
    st_ref[0, 1:2, :] = jnp.sum(acc * acc, axis=0, keepdims=True)
    y_ref[...] = acc.reshape(B, H, W, C).astype(y_ref.dtype)


def _bn_add_relu_kernel(y_ref, x_ref, s_ref, b_ref, out_ref):
    """out = relu(bn3(y) + x)  (identity residual; bf16 inputs, f32 math)."""
    out = (y_ref[...].astype(jnp.float32) * s_ref[...] + b_ref[...]
           + x_ref[...].astype(jnp.float32))
    out_ref[...] = jnp.maximum(out, 0.0)


# --------------------------------------------------------------------------- #
# Wrapper
# --------------------------------------------------------------------------- #
def _bn_scale_bias(stats, count, gamma, beta):
    """Reduce per-tile (sum, sum-sq) stats -> folded BN scale/bias (f32)."""
    s = jnp.sum(stats, axis=0)                                  # (2, C)
    mean = s[0] / count
    var = jnp.maximum(s[1] / count - mean * mean, 0.0)
    scale = gamma * lax.rsqrt(var + BN_EPS)                     # (1, C)
    bias = beta - mean * scale                                  # (1, C)
    return scale.astype(jnp.float32), bias.astype(jnp.float32)


def bottleneck_forward_nhwc(x_nhwc, params):
    """BottleneckCustom forward (stride=1, groups=1, dilation=1, no downsample).

    NHWC in / NHWC out (kept end-to-end; see bottleneck_forward for an NCHW
    adapter matching the PyTorch layout).
    """
    x = x_nhwc.astype(jnp.float32)
    N, H, W, Cin = x.shape
    width = params["w1"].shape[1]
    Cout = params["w3"].shape[1]
    assert Cin == Cout, "identity residual requires inplanes == planes*expansion"

    # ---- lane-dense channel padding (padded channels stay exactly zero) ---- #
    Cp_in = _round_up(Cin, LANE)
    Cp_w = _round_up(width, LANE)
    Cp_out = _round_up(Cout, LANE)

    def padc(a, c):                                  # pad last dim to c channels
        if a.shape[-1] == c:
            return a
        return jnp.pad(a, [(0, 0)] * (a.ndim - 1) + [(0, c - a.shape[-1])])

    w1 = padc(jnp.pad(params["w1"], ((0, Cp_in - Cin), (0, 0))), Cp_w).astype(jnp.bfloat16)
    w3 = padc(jnp.pad(params["w3"], ((0, Cp_w - width), (0, 0))), Cp_out).astype(jnp.bfloat16)
    w2 = jnp.pad(params["w2"],
                 ((0, 0), (0, 0), (0, Cp_w - width), (0, Cp_w - width))).astype(jnp.bfloat16)
    g1, b1 = padc(params["g1"], Cp_w), padc(params["b1"], Cp_w)
    g2, b2 = padc(params["g2"], Cp_w), padc(params["b2"], Cp_w)
    g3, b3 = padc(params["g3"], Cp_out), padc(params["b3"], Cp_out)

    M = N * H * W
    count = float(M)                                 # true element count for BN

    vmem_limit, tile_budget = _vmem_budgets()
    per_row = 4 * (Cp_in + Cp_w + 3 * Cp_out)        # rough double-buffered bytes/row
    TM = _pick_row_tile(M, per_row, tile_budget)
    Mp = _round_up(M, TM)                            # padded-M gridding (robust tiles)
    G = Mp // TM
    needs_mask = Mp != M
    cparams = pltpu.CompilerParams(dimension_semantics=("parallel",),
                                   vmem_limit_bytes=vmem_limit)

    # residual / conv1 input: bf16, lane-padded channels, rows padded to Mp.
    # Padded rows are zero -> they contribute exactly 0 to bn1's sum / sum-sq.
    x2d = padc(x, Cp_in).reshape(M, Cp_in)
    x2d = jnp.pad(x2d, ((0, Mp - M), (0, 0))).astype(jnp.bfloat16)

    # ---- conv1 (1x1) + stats ---------------------------------------------- #
    y1, st1 = pl.pallas_call(
        _conv1x1_stats_kernel,
        grid_spec=pltpu.PrefetchScalarGridSpec(
            num_scalar_prefetch=0, grid=(G,),
            in_specs=[pl.BlockSpec((TM, Cp_in), lambda i: (i, 0)),
                      pl.BlockSpec((Cp_in, Cp_w), lambda i: (0, 0))],
            out_specs=[pl.BlockSpec((TM, Cp_w), lambda i: (i, 0)),
                       pl.BlockSpec((1, 2, Cp_w), lambda i: (i, 0, 0))]),
        out_shape=(jax.ShapeDtypeStruct((Mp, Cp_w), jnp.bfloat16),
                   jax.ShapeDtypeStruct((G, 2, Cp_w), jnp.float32)),
        compiler_params=cparams,
    )(x2d, w1)
    s1, bb1 = _bn_scale_bias(st1, count, g1, b1)

    # ---- bn1 + relu + conv2 (3x3) + stats, B images per grid step ----------- #
    per_img = H * W * Cp_w * 16 + (H + 2) * (W + 2) * Cp_w * 2   # rough bytes/image
    B = _pick_image_batch(N, per_img, max(tile_budget, per_img))
    y1_img = y1[:M].reshape(N, H, W, Cp_w)            # free bitcast when Mp == M

    y2, st2 = pl.pallas_call(
        _bn_relu_conv3x3_stats_kernel,
        grid_spec=pltpu.PrefetchScalarGridSpec(
            num_scalar_prefetch=0, grid=(N // B,),
            in_specs=[pl.BlockSpec((B, H, W, Cp_w), lambda n: (n, 0, 0, 0)),
                      pl.BlockSpec((1, Cp_w), lambda n: (0, 0)),
                      pl.BlockSpec((1, Cp_w), lambda n: (0, 0)),
                      pl.BlockSpec((3, 3, Cp_w, Cp_w), lambda n: (0, 0, 0, 0))],
            out_specs=[pl.BlockSpec((B, H, W, Cp_w), lambda n: (n, 0, 0, 0)),
                       pl.BlockSpec((1, 2, Cp_w), lambda n: (n, 0, 0))],
            scratch_shapes=[pltpu.VMEM((B, H + 2, W + 2, Cp_w), jnp.bfloat16)]),
        out_shape=(jax.ShapeDtypeStruct((N, H, W, Cp_w), jnp.bfloat16),
                   jax.ShapeDtypeStruct((N // B, 2, Cp_w), jnp.float32)),
        compiler_params=cparams,
    )(y1_img, s1, bb1, w2)
    s2, bb2 = _bn_scale_bias(st2, count, g2, b2)

    # ---- bn2 + relu + conv3 (1x1) + stats (padded rows masked in-kernel) ---- #
    y2f = jnp.pad(y2.reshape(M, Cp_w), ((0, Mp - M), (0, 0)))

    def _stage3_kernel(x_ref, s_ref, b_ref, w_ref, y_ref, st_ref):
        _bn_relu_conv1x1_stats_kernel(x_ref, s_ref, b_ref, w_ref, y_ref, st_ref,
                                      tm=TM, m_valid=M, needs_mask=needs_mask)

    y3, st3 = pl.pallas_call(
        _stage3_kernel,
        grid_spec=pltpu.PrefetchScalarGridSpec(
            num_scalar_prefetch=0, grid=(G,),
            in_specs=[pl.BlockSpec((TM, Cp_w), lambda i: (i, 0)),
                      pl.BlockSpec((1, Cp_w), lambda i: (0, 0)),
                      pl.BlockSpec((1, Cp_w), lambda i: (0, 0)),
                      pl.BlockSpec((Cp_w, Cp_out), lambda i: (0, 0))],
            out_specs=[pl.BlockSpec((TM, Cp_out), lambda i: (i, 0)),
                       pl.BlockSpec((1, 2, Cp_out), lambda i: (i, 0, 0))]),
        out_shape=(jax.ShapeDtypeStruct((Mp, Cp_out), jnp.bfloat16),
                   jax.ShapeDtypeStruct((G, 2, Cp_out), jnp.float32)),
        compiler_params=cparams,
    )(y2f, s2, bb2, w3)
    s3, bb3 = _bn_scale_bias(st3, count, g3, b3)

    # ---- bn3 + identity residual + relu (x re-read here, bf16) -------------- #
    out2d = pl.pallas_call(
        _bn_add_relu_kernel,
        grid_spec=pltpu.PrefetchScalarGridSpec(
            num_scalar_prefetch=0, grid=(G,),
            in_specs=[pl.BlockSpec((TM, Cp_out), lambda i: (i, 0)),
                      pl.BlockSpec((TM, Cp_in), lambda i: (i, 0)),
                      pl.BlockSpec((1, Cp_out), lambda i: (0, 0)),
                      pl.BlockSpec((1, Cp_out), lambda i: (0, 0))],
            out_specs=pl.BlockSpec((TM, Cp_out), lambda i: (i, 0))),
        out_shape=jax.ShapeDtypeStruct((Mp, Cp_out), jnp.float32),
        compiler_params=cparams,
    )(y3, x2d, s3, bb3)

    out = out2d[:M].reshape(N, H, W, Cp_out)[..., :Cout]
    return out.astype(x_nhwc.dtype)


def bottleneck_forward(x_nchw, params):
    """NCHW adapter (PyTorch layout parity).  Prefer the NHWC entry point:
    the boundary transposes cost an extra HBM round-trip each."""
    x = jnp.transpose(x_nchw, (0, 2, 3, 1))
    y = bottleneck_forward_nhwc(x, params)
    return jnp.transpose(y, (0, 3, 1, 2))


# --------------------------------------------------------------------------- #
# Params + pure-JAX reference
# --------------------------------------------------------------------------- #
def init_params(key, inplanes, planes, base_width=64, groups=1):
    width = int(planes * (base_width / 64.0)) * groups
    cout = planes * 4                                   # expansion = 4
    k1, k2, k3 = jax.random.split(key, 3)
    return {
        "w1": 0.1 * jax.random.normal(k1, (inplanes, width), jnp.float32),
        "g1": jnp.ones((1, width), jnp.float32),
        "b1": jnp.zeros((1, width), jnp.float32),
        "w2": 0.1 * jax.random.normal(k2, (3, 3, width, width), jnp.float32),
        "g2": jnp.full((1, width), 0.9, jnp.float32),
        "b2": jnp.full((1, width), 0.05, jnp.float32),
        "w3": 0.1 * jax.random.normal(k3, (width, cout), jnp.float32),
        "g3": jnp.ones((1, cout), jnp.float32),
        "b3": jnp.zeros((1, cout), jnp.float32),
    }


def reference_forward_nhwc(x_nhwc, params):
    """Pure-JAX f32 reference (batch-statistic BN, same weight convention)."""
    prec = lax.Precision.HIGHEST
    x = x_nhwc.astype(jnp.float32)
    N, H, W, _ = x.shape

    def bn(h, g, b):
        m = jnp.mean(h, axis=(0, 1, 2), keepdims=True)
        v = jnp.mean((h - m) ** 2, axis=(0, 1, 2), keepdims=True)
        return (h - m) * lax.rsqrt(v + BN_EPS) * g.reshape(1, 1, 1, -1) + b.reshape(1, 1, 1, -1)

    h = jnp.einsum("nhwc,cd->nhwd", x, params["w1"], precision=prec)
    h = jax.nn.relu(bn(h, params["g1"], params["b1"]))
    hp = jnp.pad(h, ((0, 0), (1, 1), (1, 1), (0, 0)))
    acc = jnp.zeros_like(h)
    for ky in range(3):
        for kx in range(3):
            acc = acc + jnp.einsum("nhwc,cd->nhwd", hp[:, ky:ky + H, kx:kx + W, :],
                                   params["w2"][ky, kx], precision=prec)
    h = jax.nn.relu(bn(acc, params["g2"], params["b2"]))
    h = jnp.einsum("nhwc,cd->nhwd", h, params["w3"], precision=prec)
    h = bn(h, params["g3"], params["b3"])
    return jax.nn.relu(h + x)


if __name__ == "__main__":
    # Small deterministic example: inplanes == planes * expansion == 16 so the
    # identity residual is valid (downsample=None, stride=1).
    inplanes, planes = 16, 4
    N, H, W = 2, 16, 16

    key = jax.random.PRNGKey(0)
    kx, kp = jax.random.split(key)
    x = jax.random.normal(kx, (N, H, W, inplanes), jnp.float32)     # NHWC
    params = init_params(kp, inplanes, planes)

    fwd = jax.jit(bottleneck_forward_nhwc)
    out = fwd(x, params)
    jax.block_until_ready(out)

    assert out.shape == (N, H, W, planes * 4)
    assert bool(jnp.all(jnp.isfinite(out))) and bool(jnp.all(out >= 0.0))

    # Loose-tolerance check vs a pure-JAX f32 reference (kernel uses bf16 MXU
    # inputs and bf16 inter-stage activations, so exact equality is not expected).
    ref = reference_forward_nhwc(x, params)
    max_err = float(jnp.max(jnp.abs(out - ref)))
    mean_err = float(jnp.mean(jnp.abs(out - ref)))
    assert max_err < 0.5 and mean_err < 0.05, f"max={max_err} mean={mean_err}"
    print("KERNEL_OK")
</pallas_src>

<mosaic_0001>
module attributes {stable_mosaic.version = 11 : i64} {
  func.func @_conv1x1_stats_kernel(%arg0: i32, %arg1: memref<512x128xbf16, #tpu.memory_space<vmem>>, %arg2: memref<128x128xbf16, #tpu.memory_space<vmem>>, %arg3: memref<512x128xbf16, #tpu.memory_space<vmem>>, %arg4: memref<1x2x128xf32, #tpu.memory_space<vmem>>) attributes {dimension_semantics = [#tpu.dimension_semantics<parallel>], iteration_bounds = array<i64: 1>, scalar_prefetch = 0 : i64, scratch_operands = 0 : i64, tpu.core_type = #tpu.core_type<tc>, window_params = [{transform_indices = @transform_0, window_bounds = array<i64: 512, 128>}, {pipeline_mode = #tpu.pipeline_mode<synchronous>, transform_indices = @transform_1, window_bounds = array<i64: 128, 128>}, {transform_indices = @transform_2, window_bounds = array<i64: 512, 128>}, {transform_indices = @transform_3, window_bounds = array<i64: 1, 2, 128>}]} {
    %c0 = arith.constant 0 : index
    %c0_0 = arith.constant 0 : index
    %0 = vector.load %arg1[%c0, %c0_0] : memref<512x128xbf16, #tpu.memory_space<vmem>>, vector<512x128xbf16>
    %c0_1 = arith.constant 0 : index
    %c0_2 = arith.constant 0 : index
    %1 = vector.load %arg2[%c0_1, %c0_2] : memref<128x128xbf16, #tpu.memory_space<vmem>>, vector<128x128xbf16>
    %cst = arith.constant dense<0.000000e+00> : vector<512x128xf32>
    %2 = tpu.matmul %0, %1, %cst {dimension_numbers = #tpu.dot_dimension_numbers<[1], [0], [0], [1], [0, 0, 1, 1], [], []>} : vector<512x128xbf16>, vector<128x128xbf16>, vector<512x128xf32> -> vector<512x128xf32>
    %cst_3 = arith.constant dense<0.000000e+00> : vector<128xf32>
    %3 = vector.multi_reduction <add>, %2, %cst_3 [0] : vector<512x128xf32> to vector<128xf32>
    %4 = vector.shape_cast %3 : vector<128xf32> to vector<1x128xf32>
    %c0_4 = arith.constant 0 : index
    %c0_5 = arith.constant 0 : index
    %c0_6 = arith.constant 0 : index
    %5 = vector.load %arg4[%c0_4, %c0_5, %c0_6] : memref<1x2x128xf32, #tpu.memory_space<vmem>>, vector<1x1x128xf32>
    %6 = vector.shape_cast %5 : vector<1x1x128xf32> to vector<1x128xf32>
    %7 = vector.shape_cast %4 : vector<1x128xf32> to vector<1x1x128xf32>
    tpu.vector_store %arg4[%c0_4, %c0_5, %c0_6], %7 {strides = array<i32>} : memref<1x2x128xf32, #tpu.memory_space<vmem>>, vector<1x1x128xf32>,
    %8 = arith.mulf %2, %2 : vector<512x128xf32>
    %cst_7 = arith.constant dense<0.000000e+00> : vector<128xf32>
    %9 = vector.multi_reduction <add>, %8, %cst_7 [0] : vector<512x128xf32> to vector<128xf32>
    %10 = vector.shape_cast %9 : vector<128xf32> to vector<1x128xf32>
    %c0_8 = arith.constant 0 : index
    %c1 = arith.constant 1 : index
    %c0_9 = arith.constant 0 : index
    %11 = vector.load %arg4[%c0_8, %c1, %c0_9] : memref<1x2x128xf32, #tpu.memory_space<vmem>>, vector<1x1x128xf32>
    %12 = vector.shape_cast %11 : vector<1x1x128xf32> to vector<1x128xf32>
    %13 = vector.shape_cast %10 : vector<1x128xf32> to vector<1x1x128xf32>
    tpu.vector_store %arg4[%c0_8, %c1, %c0_9], %13 {strides = array<i32>} : memref<1x2x128xf32, #tpu.memory_space<vmem>>, vector<1x1x128xf32>,
    %14 = arith.truncf %2 : vector<512x128xf32> to vector<512x128xbf16>
    %c0_10 = arith.constant 0 : index
    %c0_11 = arith.constant 0 : index
    %15 = vector.load %arg3[%c0_10, %c0_11] : memref<512x128xbf16, #tpu.memory_space<vmem>>, vector<512x128xbf16>
    tpu.vector_store %arg3[%c0_10, %c0_11], %14 {strides = array<i32>} : memref<512x128xbf16, #tpu.memory_space<vmem>>, vector<512x128xbf16>,
    return
  }
  func.func @transform_0(%arg0: i32) -> (i32, i32) {
    %c0_i32 = arith.constant 0 : i32
    %c0_i32_0 = arith.constant 0 : i32
    return %arg0, %c0_i32 : i32, i32
  }
  func.func @transform_1(%arg0: i32) -> (i32, i32) {
    %c0_i32 = arith.constant 0 : i32
    %c0_i32_0 = arith.constant 0 : i32
    %c0_i32_1 = arith.constant 0 : i32
    return %c0_i32, %c0_i32_0 : i32, i32
  }
  func.func @transform_2(%arg0: i32) -> (i32, i32) {
    %c0_i32 = arith.constant 0 : i32
    %c0_i32_0 = arith.constant 0 : i32
    return %arg0, %c0_i32 : i32, i32
  }
  func.func @transform_3(%arg0: i32) -> (i32, i32, i32) {
    %c0_i32 = arith.constant 0 : i32
    %c0_i32_0 = arith.constant 0 : i32
    %c0_i32_1 = arith.constant 0 : i32
    return %arg0, %c0_i32, %c0_i32_0 : i32, i32, i32
  }
}

module attributes {stable_mosaic.version = 11 : i64} {
  func.func @_stage3_kernel(%arg0: i32, %arg1: memref<512x128xbf16, #tpu.memory_space<vmem>>, %arg2: memref<1x128xf32, #tpu.memory_space<vmem>>, %arg3: memref<1x128xf32, #tpu.memory_space<vmem>>, %arg4: memref<128x128xbf16, #tpu.memory_space<vmem>>, %arg5: memref<512x128xbf16, #tpu.memory_space<vmem>>, %arg6: memref<1x2x128xf32, #tpu.memory_space<vmem>>) attributes {dimension_semantics = [#tpu.dimension_semantics<parallel>], iteration_bounds = array<i64: 1>, scalar_prefetch = 0 : i64, scratch_operands = 0 : i64, tpu.core_type = #tpu.core_type<tc>, window_params = [{transform_indices = @transform_0, window_bounds = array<i64: 512, 128>}, {pipeline_mode = #tpu.pipeline_mode<synchronous>, transform_indices = @transform_1, window_bounds = array<i64: 1, 128>}, {pipeline_mode = #tpu.pipeline_mode<synchronous>, transform_indices = @transform_2, window_bounds = array<i64: 1, 128>}, {pipeline_mode = #tpu.pipeline_mode<synchronous>, transform_indices = @transform_3, window_bounds = array<i64: 128, 128>}, {transform_indices = @transform_4, window_bounds = array<i64: 512, 128>}, {transform_indices = @transform_5, window_bounds = array<i64: 1, 2, 128>}]} {
    %c0 = arith.constant 0 : index
    %c0_0 = arith.constant 0 : index
    %0 = vector.load %arg1[%c0, %c0_0] : memref<512x128xbf16, #tpu.memory_space<vmem>>, vector<512x128xbf16>
    %1 = arith.extf %0 : vector<512x128xbf16> to vector<512x128xf32>
    %c0_1 = arith.constant 0 : index
    %c0_2 = arith.constant 0 : index
    %2 = vector.load %arg2[%c0_1, %c0_2] : memref<1x128xf32, #tpu.memory_space<vmem>>, vector<1x128xf32>
    %3 = vector.broadcast %2 : vector<1x128xf32> to vector<512x128xf32>
    %4 = arith.mulf %1, %3 : vector<512x128xf32>
    %c0_3 = arith.constant 0 : index
    %c0_4 = arith.constant 0 : index
    %5 = vector.load %arg3[%c0_3, %c0_4] : memref<1x128xf32, #tpu.memory_space<vmem>>, vector<1x128xf32>
    %6 = vector.broadcast %5 : vector<1x128xf32> to vector<512x128xf32>
    %7 = arith.addf %4, %6 : vector<512x128xf32>
    %cst = arith.constant 0.000000e+00 : f32
    %8 = vector.broadcast %cst : f32 to vector<512x128xf32>
    %9 = arith.maximumf %7, %8 : vector<512x128xf32>
    %10 = arith.truncf %9 : vector<512x128xf32> to vector<512x128xbf16>
    %c0_5 = arith.constant 0 : index
    %c0_6 = arith.constant 0 : index
    %11 = vector.load %arg4[%c0_5, %c0_6] : memref<128x128xbf16, #tpu.memory_space<vmem>>, vector<128x128xbf16>
    %cst_7 = arith.constant dense<0.000000e+00> : vector<512x128xf32>
    %12 = tpu.matmul %10, %11, %cst_7 {dimension_numbers = #tpu.dot_dimension_numbers<[1], [0], [0], [1], [0, 0, 1, 1], [], []>} : vector<512x128xbf16>, vector<128x128xbf16>, vector<512x128xf32> -> vector<512x128xf32>
    %cst_8 = arith.constant dense<0.000000e+00> : vector<128xf32>
    %13 = vector.multi_reduction <add>, %12, %cst_8 [0] : vector<512x128xf32> to vector<128xf32>
    %14 = vector.shape_cast %13 : vector<128xf32> to vector<1x128xf32>
    %c0_9 = arith.constant 0 : index
    %c0_10 = arith.constant 0 : index
    %c0_11 = arith.constant 0 : index
    %15 = vector.load %arg6[%c0_9, %c0_10, %c0_11] : memref<1x2x128xf32, #tpu.memory_space<vmem>>, vector<1x1x128xf32>
    %16 = vector.shape_cast %15 : vector<1x1x128xf32> to vector<1x128xf32>
    %17 = vector.shape_cast %14 : vector<1x128xf32> to vector<1x1x128xf32>
    tpu.vector_store %arg6[%c0_9, %c0_10, %c0_11], %17 {strides = array<i32>} : memref<1x2x128xf32, #tpu.memory_space<vmem>>, vector<1x1x128xf32>,
    %18 = arith.mulf %12, %12 : vector<512x128xf32>
    %cst_12 = arith.constant dense<0.000000e+00> : vector<128xf32>
    %19 = vector.multi_reduction <add>, %18, %cst_12 [0] : vector<512x128xf32> to vector<128xf32>
    %20 = vector.shape_cast %19 : vector<128xf32> to vector<1x128xf32>
    %c0_13 = arith.constant 0 : index
    %c1 = arith.constant 1 : index
    %c0_14 = arith.constant 0 : index
    %21 = vector.load %arg6[%c0_13, %c1, %c0_14] : memref<1x2x128xf32, #tpu.memory_space<vmem>>, vector<1x1x128xf32>
    %22 = vector.shape_cast %21 : vector<1x1x128xf32> to vector<1x128xf32>
    %23 = vector.shape_cast %20 : vector<1x128xf32> to vector<1x1x128xf32>
    tpu.vector_store %arg6[%c0_13, %c1, %c0_14], %23 {strides = array<i32>} : memref<1x2x128xf32, #tpu.memory_space<vmem>>, vector<1x1x128xf32>,
    %24 = arith.truncf %12 : vector<512x128xf32> to vector<512x128xbf16>
    %c0_15 = arith.constant 0 : index
    %c0_16 = arith.constant 0 : index
    %25 = vector.load %arg5[%c0_15, %c0_16] : memref<512x128xbf16, #tpu.memory_space<vmem>>, vector<512x128xbf16>
    tpu.vector_store %arg5[%c0_15, %c0_16], %24 {strides = array<i32>} : memref<512x128xbf16, #tpu.memory_space<vmem>>, vector<512x128xbf16>,
    return
  }
  func.func @transform_0(%arg0: i32) -> (i32, i32) {
    %c0_i32 = arith.constant 0 : i32
    %c0_i32_0 = arith.constant 0 : i32
    return %arg0, %c0_i32 : i32, i32
  }
  func.func @transform_1(%arg0: i32) -> (i32, i32) {
    %c0_i32 = arith.constant 0 : i32
    %c0_i32_0 = arith.constant 0 : i32
    %c0_i32_1 = arith.constant 0 : i32
    return %c0_i32, %c0_i32_0 : i32, i32
  }
  func.func @transform_2(%arg0: i32) -> (i32, i32) {
    %c0_i32 = arith.constant 0 : i32
    %c0_i32_0 = arith.constant 0 : i32
    %c0_i32_1 = arith.constant 0 : i32
    return %c0_i32, %c0_i32_0 : i32, i32
  }
  func.func @transform_3(%arg0: i32) -> (i32, i32) {
    %c0_i32 = arith.constant 0 : i32
    %c0_i32_0 = arith.constant 0 : i32
    %c0_i32_1 = arith.constant 0 : i32
    return %c0_i32, %c0_i32_0 : i32, i32
  }
  func.func @transform_4(%arg0: i32) -> (i32, i32) {
    %c0_i32 = arith.constant 0 : i32
    %c0_i32_0 = arith.constant 0 : i32
    return %arg0, %c0_i32 : i32, i32
  }
  func.func @transform_5(%arg0: i32) -> (i32, i32, i32) {
    %c0_i32 = arith.constant 0 : i32
    %c0_i32_0 = arith.constant 0 : i32
    %c0_i32_1 = arith.constant 0 : i32
    return %arg0, %c0_i32, %c0_i32_0 : i32, i32, i32
  }
}

module attributes {stable_mosaic.version = 11 : i64} {
  func.func @_bn_relu_conv3x3_stats_kernel(%arg0: i32, %arg1: memref<2x16x16x128xbf16, #tpu.memory_space<vmem>>, %arg2: memref<1x128xf32, #tpu.memory_space<vmem>>, %arg3: memref<1x128xf32, #tpu.memory_space<vmem>>, %arg4: memref<3x3x128x128xbf16, #tpu.memory_space<vmem>>, %arg5: memref<2x16x16x128xbf16, #tpu.memory_space<vmem>>, %arg6: memref<1x2x128xf32, #tpu.memory_space<vmem>>, %arg7: memref<2x18x18x128xbf16, #tpu.memory_space<vmem>>) attributes {dimension_semantics = [#tpu.dimension_semantics<parallel>], iteration_bounds = array<i64: 1>, scalar_prefetch = 0 : i64, scratch_operands = 1 : i64, tpu.core_type = #tpu.core_type<tc>, window_params = [{transform_indices = @transform_0, window_bounds = array<i64: 2, 16, 16, 128>}, {pipeline_mode = #tpu.pipeline_mode<synchronous>, transform_indices = @transform_1, window_bounds = array<i64: 1, 128>}, {pipeline_mode = #tpu.pipeline_mode<synchronous>, transform_indices = @transform_2, window_bounds = array<i64: 1, 128>}, {pipeline_mode = #tpu.pipeline_mode<synchronous>, transform_indices = @transform_3, window_bounds = array<i64: 3, 3, 128, 128>}, {transform_indices = @transform_4, window_bounds = array<i64: 2, 16, 16, 128>}, {transform_indices = @transform_5, window_bounds = array<i64: 1, 2, 128>}]} {
    %c0 = arith.constant 0 : index
    %c0_0 = arith.constant 0 : index
    %0 = vector.load %arg2[%c0, %c0_0] : memref<1x128xf32, #tpu.memory_space<vmem>>, vector<1x128xf32>
    %1 = vector.shape_cast %0 : vector<1x128xf32> to vector<1x1x1x128xf32>
    %c0_1 = arith.constant 0 : index
    %c0_2 = arith.constant 0 : index
    %2 = vector.load %arg3[%c0_1, %c0_2] : memref<1x128xf32, #tpu.memory_space<vmem>>, vector<1x128xf32>
    %3 = vector.shape_cast %2 : vector<1x128xf32> to vector<1x1x1x128xf32>
    %c0_3 = arith.constant 0 : index
    %c0_4 = arith.constant 0 : index
    %c0_5 = arith.constant 0 : index
    %c0_6 = arith.constant 0 : index
    %4 = vector.load %arg1[%c0_3, %c0_4, %c0_5, %c0_6] : memref<2x16x16x128xbf16, #tpu.memory_space<vmem>>, vector<2x16x16x128xbf16>
    %5 = arith.extf %4 : vector<2x16x16x128xbf16> to vector<2x16x16x128xf32>
    %6 = vector.broadcast %1 : vector<1x1x1x128xf32> to vector<2x16x16x128xf32>
    %7 = arith.mulf %5, %6 : vector<2x16x16x128xf32>
    %8 = vector.broadcast %3 : vector<1x1x1x128xf32> to vector<2x16x16x128xf32>
    %9 = arith.addf %7, %8 : vector<2x16x16x128xf32>
    %cst = arith.constant 0.000000e+00 : f32
    %10 = vector.broadcast %cst : f32 to vector<2x16x16x128xf32>
    %11 = arith.maximumf %9, %10 : vector<2x16x16x128xf32>
    %12 = arith.truncf %11 : vector<2x16x16x128xf32> to vector<2x16x16x128xbf16>
    %cst_7 = arith.constant 0.000000e+00 : bf16
    %13 = vector.broadcast %cst_7 : bf16 to vector<2x1x18x128xbf16>
    %cst_8 = arith.constant 0.000000e+00 : bf16
    %14 = vector.broadcast %cst_8 : bf16 to vector<2x18x1x128xbf16>
    %c0_9 = arith.constant 0 : index
    %c0_10 = arith.constant 0 : index
    %c0_11 = arith.constant 0 : index
    %c0_12 = arith.constant 0 : index
    %15 = vector.load %arg7[%c0_9, %c0_10, %c0_11, %c0_12] : memref<2x18x18x128xbf16, #tpu.memory_space<vmem>>, vector<2x1x18x128xbf16>
    tpu.vector_store %arg7[%c0_9, %c0_10, %c0_11, %c0_12], %13 {strides = array<i32>} : memref<2x18x18x128xbf16, #tpu.memory_space<vmem>>, vector<2x1x18x128xbf16>,
    %c0_13 = arith.constant 0 : index
    %c17 = arith.constant 17 : index
    %c0_14 = arith.constant 0 : index
    %c0_15 = arith.constant 0 : index
    %16 = vector.load %arg7[%c0_13, %c17, %c0_14, %c0_15] : memref<2x18x18x128xbf16, #tpu.memory_space<vmem>>, vector<2x1x18x128xbf16>
    tpu.vector_store %arg7[%c0_13, %c17, %c0_14, %c0_15], %13 {strides = array<i32>} : memref<2x18x18x128xbf16, #tpu.memory_space<vmem>>, vector<2x1x18x128xbf16>,
    %c0_16 = arith.constant 0 : index
    %c0_17 = arith.constant 0 : index
    %c0_18 = arith.constant 0 : index
    %c0_19 = arith.constant 0 : index
    %17 = vector.load %arg7[%c0_16, %c0_17, %c0_18, %c0_19] : memref<2x18x18x128xbf16, #tpu.memory_space<vmem>>, vector<2x18x1x128xbf16>
    tpu.vector_store %arg7[%c0_16, %c0_17, %c0_18, %c0_19], %14 {strides = array<i32>} : memref<2x18x18x128xbf16, #tpu.memory_space<vmem>>, vector<2x18x1x128xbf16>,
    %c0_20 = arith.constant 0 : index
    %c0_21 = arith.constant 0 : index
    %c17_22 = arith.constant 17 : index
    %c0_23 = arith.constant 0 : index
    %18 = vector.load %arg7[%c0_20, %c0_21, %c17_22, %c0_23] : memref<2x18x18x128xbf16, #tpu.memory_space<vmem>>, vector<2x18x1x128xbf16>
    tpu.vector_store %arg7[%c0_20, %c0_21, %c17_22, %c0_23], %14 {strides = array<i32>} : memref<2x18x18x128xbf16, #tpu.memory_space<vmem>>, vector<2x18x1x128xbf16>,
    %c0_24 = arith.constant 0 : index
    %c1 = arith.constant 1 : index
    %c1_25 = arith.constant 1 : index
    %c0_26 = arith.constant 0 : index
    %19 = vector.load %arg7[%c0_24, %c1, %c1_25, %c0_26] : memref<2x18x18x128xbf16, #tpu.memory_space<vmem>>, vector<2x16x16x128xbf16>
    tpu.vector_store %arg7[%c0_24, %c1, %c1_25, %c0_26], %12 {strides = array<i32>} : memref<2x18x18x128xbf16, #tpu.memory_space<vmem>>, vector<2x16x16x128xbf16>,
    %c0_27 = arith.constant 0 : index
    %c0_28 = arith.constant 0 : index
    %c0_29 = arith.constant 0 : index
    %c0_30 = arith.constant 0 : index
    %20 = vector.load %arg7[%c0_27, %c0_28, %c0_29, %c0_30] : memref<2x18x18x128xbf16, #tpu.memory_space<vmem>>, vector<2x16x16x128xbf16>
    %21 = vector.shape_cast %20 : vector<2x16x16x128xbf16> to vector<512x128xbf16>
    %c0_31 = arith.constant 0 : index
    %c0_32 = arith.constant 0 : index
    %c0_33 = arith.constant 0 : index
    %c0_34 = arith.constant 0 : index
    %22 = vector.load %arg4[%c0_31, %c0_32, %c0_33, %c0_34] : memref<3x3x128x128xbf16, #tpu.memory_space<vmem>>, vector<1x1x128x128xbf16>
    %23 = vector.shape_cast %22 : vector<1x1x128x128xbf16> to vector<128x128xbf16>
    %cst_35 = arith.constant dense<0.000000e+00> : vector<512x128xf32>
    %24 = tpu.matmul %21, %23, %cst_35 {dimension_numbers = #tpu.dot_dimension_numbers<[1], [0], [0], [1], [0, 0, 1, 1], [], []>} : vector<512x128xbf16>, vector<128x128xbf16>, vector<512x128xf32> -> vector<512x128xf32>
    %c0_36 = arith.constant 0 : index
    %c0_37 = arith.constant 0 : index
    %c1_38 = arith.constant 1 : index
    %c0_39 = arith.constant 0 : index
    %25 = vector.load %arg7[%c0_36, %c0_37, %c1_38, %c0_39] : memref<2x18x18x128xbf16, #tpu.memory_space<vmem>>, vector<2x16x16x128xbf16>
    %26 = vector.shape_cast %25 : vector<2x16x16x128xbf16> to vector<512x128xbf16>
    %c0_40 = arith.constant 0 : index
    %c1_41 = arith.constant 1 : index
    %c0_42 = arith.constant 0 : index
    %c0_43 = arith.constant 0 : index
    %27 = vector.load %arg4[%c0_40, %c1_41, %c0_42, %c0_43] : memref<3x3x128x128xbf16, #tpu.memory_space<vmem>>, vector<1x1x128x128xbf16>
    %28 = vector.shape_cast %27 : vector<1x1x128x128xbf16> to vector<128x128xbf16>
    %cst_44 = arith.constant dense<0.000000e+00> : vector<512x128xf32>
    %29 = tpu.matmul %26, %28, %cst_44 {dimension_numbers = #tpu.dot_dimension_numbers<[1], [0], [0], [1], [0, 0, 1, 1], [], []>} : vector<512x128xbf16>, vector<128x128xbf16>, vector<512x128xf32> -> vector<512x128xf32>
    %30 = arith.addf %24, %29 : vector<512x128xf32>
    %c0_45 = arith.constant 0 : index
    %c0_46 = arith.constant 0 : index
    %c2 = arith.constant 2 : index
    %c0_47 = arith.constant 0 : index
    %31 = vector.load %arg7[%c0_45, %c0_46, %c2, %c0_47] : memref<2x18x18x128xbf16, #tpu.memory_space<vmem>>, vector<2x16x16x128xbf16>
    %32 = vector.shape_cast %31 : vector<2x16x16x128xbf16> to vector<512x128xbf16>
    %c0_48 = arith.constant 0 : index
    %c2_49 = arith.constant 2 : index
    %c0_50 = arith.constant 0 : index
    %c0_51 = arith.constant 0 : index
    %33 = vector.load %arg4[%c0_48, %c2_49, %c0_50, %c0_51] : memref<3x3x128x128xbf16, #tpu.memory_space<vmem>>, vector<1x1x128x128xbf16>
    %34 = vector.shape_cast %33 : vector<1x1x128x128xbf16> to vector<128x128xbf16>
    %cst_52 = arith.constant dense<0.000000e+00> : vector<512x128xf32>
    %35 = tpu.matmul %32, %34, %cst_52 {dimension_numbers = #tpu.dot_dimension_numbers<[1], [0], [0], [1], [0, 0, 1, 1], [], []>} : vector<512x128xbf16>, vector<128x128xbf16>, vector<512x128xf32> -> vector<512x128xf32>
    %36 = arith.addf %30, %35 : vector<512x128xf32>
    %c0_53 = arith.constant 0 : index
    %c1_54 = arith.constant 1 : index
    %c0_55 = arith.constant 0 : index
    %c0_56 = arith.constant 0 : index
    %37 = vector.load %arg7[%c0_53, %c1_54, %c0_55, %c0_56] : memref<2x18x18x128xbf16, #tpu.memory_space<vmem>>, vector<2x16x16x128xbf16>
    %38 = vector.shape_cast %37 : vector<2x16x16x128xbf16> to vector<512x128xbf16>
    %c1_57 = arith.constant 1 : index
    %c0_58 = arith.constant 0 : index
    %c0_59 = arith.constant 0 : index
    %c0_60 = arith.constant 0 : index
    %39 = vector.load %arg4[%c1_57, %c0_58, %c0_59, %c0_60] : memref<3x3x128x128xbf16, #tpu.memory_space<vmem>>, vector<1x1x128x128xbf16>
    %40 = vector.shape_cast %39 : vector<1x1x128x128xbf16> to vector<128x128xbf16>
    %cst_61 = arith.constant dense<0.000000e+00> : vector<512x128xf32>
    %41 = tpu.matmul %38, %40, %cst_61 {dimension_numbers = #tpu.dot_dimension_numbers<[1], [0], [0], [1], [0, 0, 1, 1], [], []>} : vector<512x128xbf16>, vector<128x128xbf16>, vector<512x128xf32> -> vector<512x128xf32>
    %42 = arith.addf %36, %41 : vector<512x128xf32>
    %c0_62 = arith.constant 0 : index
    %c1_63 = arith.constant 1 : index
    %c1_64 = arith.constant 1 : index
    %c0_65 = arith.constant 0 : index
    %43 = vector.load %arg7[%c0_62, %c1_63, %c1_64, %c0_65] : memref<2x18x18x128xbf16, #tpu.memory_space<vmem>>, vector<2x16x16x128xbf16>
    %44 = vector.shape_cast %43 : vector<2x16x16x128xbf16> to vector<512x128xbf16>
    %c1_66 = arith.constant 1 : index
    %c1_67 = arith.constant 1 : index
    %c0_68 = arith.constant 0 : index
    %c0_69 = arith.constant 0 : index
    %45 = vector.load %arg4[%c1_66, %c1_67, %c0_68, %c0_69] : memref<3x3x128x128xbf16, #tpu.memory_space<vmem>>, vector<1x1x128x128xbf16>
    %46 = vector.shape_cast %45 : vector<1x1x128x128xbf16> to vector<128x128xbf16>
    %cst_70 = arith.constant dense<0.000000e+00> : vector<512x128xf32>
    %47 = tpu.matmul %44, %46, %cst_70 {dimension_numbers = #tpu.dot_dimension_numbers<[1], [0], [0], [1], [0, 0, 1, 1], [], []>} : vector<512x128xbf16>, vector<128x128xbf16>, vector<512x128xf32> -> vector<512x128xf32>
    %48 = arith.addf %42, %47 : vector<512x128xf32>
    %c0_71 = arith.constant 0 : index
    %c1_72 = arith.constant 1 : index
    %c2_73 = arith.constant 2 : index
    %c0_74 = arith.constant 0 : index
    %49 = vector.load %arg7[%c0_71, %c1_72, %c2_73, %c0_74] : memref<2x18x18x128xbf16, #tpu.memory_space<vmem>>, vector<2x16x16x128xbf16>
    %50 = vector.shape_cast %49 : vector<2x16x16x128xbf16> to vector<512x128xbf16>
    %c1_75 = arith.constant 1 : index
    %c2_76 = arith.constant 2 : index
    %c0_77 = arith.constant 0 : index
    %c0_78 = arith.constant 0 : index
    %51 = vector.load %arg4[%c1_75, %c2_76, %c0_77, %c0_78] : memref<3x3x128x128xbf16, #tpu.memory_space<vmem>>, vector<1x1x128x128xbf16>
    %52 = vector.shape_cast %51 : vector<1x1x128x128xbf16> to vector<128x128xbf16>
    %cst_79 = arith.constant dense<0.000000e+00> : vector<512x128xf32>
    %53 = tpu.matmul %50, %52, %cst_79 {dimension_numbers = #tpu.dot_dimension_numbers<[1], [0], [0], [1], [0, 0, 1, 1], [], []>} : vector<512x128xbf16>, vector<128x128xbf16>, vector<512x128xf32> -> vector<512x128xf32>
    %54 = arith.addf %48, %53 : vector<512x128xf32>
    %c0_80 = arith.constant 0 : index
    %c2_81 = arith.constant 2 : index
    %c0_82 = arith.constant 0 : index
    %c0_83 = arith.constant 0 : index
    %55 = vector.load %arg7[%c0_80, %c2_81, %c0_82, %c0_83] : memref<2x18x18x128xbf16, #tpu.memory_space<vmem>>, vector<2x16x16x128xbf16>
    %56 = vector.shape_cast %55 : vector<2x16x16x128xbf16> to vector<512x128xbf16>
    %c2_84 = arith.constant 2 : index
    %c0_85 = arith.constant 0 : index
    %c0_86 = arith.constant 0 : index
    %c0_87 = arith.constant 0 : index
    %57 = vector.load %arg4[%c2_84, %c0_85, %c0_86, %c0_87] : memref<3x3x128x128xbf16, #tpu.memory_space<vmem>>, vector<1x1x128x128xbf16>
    %58 = vector.shape_cast %57 : vector<1x1x128x128xbf16> to vector<128x128xbf16>
    %cst_88 = arith.constant dense<0.000000e+00> : vector<512x128xf32>
    %59 = tpu.matmul %56, %58, %cst_88 {dimension_numbers = #tpu.dot_dimension_numbers<[1], [0], [0], [1], [0, 0, 1, 1], [], []>} : vector<512x128xbf16>, vector<128x128xbf16>, vector<512x128xf32> -> vector<512x128xf32>
    %60 = arith.addf %54, %59 : vector<512x128xf32>
    %c0_89 = arith.constant 0 : index
    %c2_90 = arith.constant 2 : index
    %c1_91 = arith.constant 1 : index
    %c0_92 = arith.constant 0 : index
    %61 = vector.load %arg7[%c0_89, %c2_90, %c1_91, %c0_92] : memref<2x18x18x128xbf16, #tpu.memory_space<vmem>>, vector<2x16x16x128xbf16>
    %62 = vector.shape_cast %61 : vector<2x16x16x128xbf16> to vector<512x128xbf16>
    %c2_93 = arith.constant 2 : index
    %c1_94 = arith.constant 1 : index
    %c0_95 = arith.constant 0 : index
    %c0_96 = arith.constant 0 : index
    %63 = vector.load %arg4[%c2_93, %c1_94, %c0_95, %c0_96] : memref<3x3x128x128xbf16, #tpu.memory_space<vmem>>, vector<1x1x128x128xbf16>
    %64 = vector.shape_cast %63 : vector<1x1x128x128xbf16> to vector<128x128xbf16>
    %cst_97 = arith.constant dense<0.000000e+00> : vector<512x128xf32>
    %65 = tpu.matmul %62, %64, %cst_97 {dimension_numbers = #tpu.dot_dimension_numbers<[1], [0], [0], [1], [0, 0, 1, 1], [], []>} : vector<512x128xbf16>, vector<128x128xbf16>, vector<512x128xf32> -> vector<512x128xf32>
    %66 = arith.addf %60, %65 : vector<512x128xf32>
    %c0_98 = arith.constant 0 : index
    %c2_99 = arith.constant 2 : index
    %c2_100 = arith.constant 2 : index
    %c0_101 = arith.constant 0 : index
    %67 = vector.load %arg7[%c0_98, %c2_99, %c2_100, %c0_101] : memref<2x18x18x128xbf16, #tpu.memory_space<vmem>>, vector<2x16x16x128xbf16>
    %68 = vector.shape_cast %67 : vector<2x16x16x128xbf16> to vector<512x128xbf16>
    %c2_102 = arith.constant 2 : index
    %c2_103 = arith.constant 2 : index
    %c0_104 = arith.constant 0 : index
    %c0_105 = arith.constant 0 : index
    %69 = vector.load %arg4[%c2_102, %c2_103, %c0_104, %c0_105] : memref<3x3x128x128xbf16, #tpu.memory_space<vmem>>, vector<1x1x128x128xbf16>
    %70 = vector.shape_cast %69 : vector<1x1x128x128xbf16> to vector<128x128xbf16>
    %cst_106 = arith.constant dense<0.000000e+00> : vector<512x128xf32>
    %71 = tpu.matmul %68, %70, %cst_106 {dimension_numbers = #tpu.dot_dimension_numbers<[1], [0], [0], [1], [0, 0, 1, 1], [], []>} : vector<512x128xbf16>, vector<128x128xbf16>, vector<512x128xf32> -> vector<512x128xf32>
    %72 = arith.addf %66, %71 : vector<512x128xf32>
    %cst_107 = arith.constant dense<0.000000e+00> : vector<128xf32>
    %73 = vector.multi_reduction <add>, %72, %cst_107 [0] : vector<512x128xf32> to vector<128xf32>
    %74 = vector.shape_cast %73 : vector<128xf32> to vector<1x128xf32>
    %c0_108 = arith.constant 0 : index
    %c0_109 = arith.constant 0 : index
    %c0_110 = arith.constant 0 : index
    %75 = vector.load %arg6[%c0_108, %c0_109, %c0_110] : memref<1x2x128xf32, #tpu.memory_space<vmem>>, vector<1x1x128xf32>
    %76 = vector.shape_cast %75 : vector<1x1x128xf32> to vector<1x128xf32>
    %77 = vector.shape_cast %74 : vector<1x128xf32> to vector<1x1x128xf32>
    tpu.vector_store %arg6[%c0_108, %c0_109, %c0_110], %77 {strides = array<i32>} : memref<1x2x128xf32, #tpu.memory_space<vmem>>, vector<1x1x128xf32>,
    %78 = arith.mulf %72, %72 : vector<512x128xf32>
    %cst_111 = arith.constant dense<0.000000e+00> : vector<128xf32>
    %79 = vector.multi_reduction <add>, %78, %cst_111 [0] : vector<512x128xf32> to vector<128xf32>
    %80 = vector.shape_cast %79 : vector<128xf32> to vector<1x128xf32>
    %c0_112 = arith.constant 0 : index
    %c1_113 = arith.constant 1 : index
    %c0_114 = arith.constant 0 : index
    %81 = vector.load %arg6[%c0_112, %c1_113, %c0_114] : memref<1x2x128xf32, #tpu.memory_space<vmem>>, vector<1x1x128xf32>
    %82 = vector.shape_cast %81 : vector<1x1x128xf32> to vector<1x128xf32>
    %83 = vector.shape_cast %80 : vector<1x128xf32> to vector<1x1x128xf32>
    tpu.vector_store %arg6[%c0_112, %c1_113, %c0_114], %83 {strides = array<i32>} : memref<1x2x128xf32, #tpu.memory_space<vmem>>, vector<1x1x128xf32>,
    %84 = vector.shape_cast %72 : vector<512x128xf32> to vector<2x16x16x128xf32>
    %85 = arith.truncf %84 : vector<2x16x16x128xf32> to vector<2x16x16x128xbf16>
    %c0_115 = arith.constant 0 : index
    %c0_116 = arith.constant 0 : index
    %c0_117 = arith.constant 0 : index
    %c0_118 = arith.constant 0 : index
    %86 = vector.load %arg5[%c0_115, %c0_116, %c0_117, %c0_118] : memref<2x16x16x128xbf16, #tpu.memory_space<vmem>>, vector<2x16x16x128xbf16>
    tpu.vector_store %arg5[%c0_115, %c0_116, %c0_117, %c0_118], %85 {strides = array<i32>} : memref<2x16x16x128xbf16, #tpu.memory_space<vmem>>, vector<2x16x16x128xbf16>,
    return
  }
  func.func @transform_0(%arg0: i32) -> (i32, i32, i32, i32) {
    %c0_i32 = arith.constant 0 : i32
    %c0_i32_0 = arith.constant 0 : i32
    %c0_i32_1 = arith.constant 0 : i32
    %c0_i32_2 = arith.constant 0 : i32
    return %arg0, %c0_i32, %c0_i32_0, %c0_i32_1 : i32, i32, i32, i32
  }
  func.func @transform_1(%arg0: i32) -> (i32, i32) {
    %c0_i32 = arith.constant 0 : i32
    %c0_i32_0 = arith.constant 0 : i32
    %c0_i32_1 = arith.constant 0 : i32
    return %c0_i32, %c0_i32_0 : i32, i32
  }
  func.func @transform_2(%arg0: i32) -> (i32, i32) {
    %c0_i32 = arith.constant 0 : i32
    %c0_i32_0 = arith.constant 0 : i32
    %c0_i32_1 = arith.constant 0 : i32
    return %c0_i32, %c0_i32_0 : i32, i32
  }
  func.func @transform_3(%arg0: i32) -> (i32, i32, i32, i32) {
    %c0_i32 = arith.constant 0 : i32
    %c0_i32_0 = arith.constant 0 : i32
    %c0_i32_1 = arith.constant 0 : i32
    %c0_i32_2 = arith.constant 0 : i32
    %c0_i32_3 = arith.constant 0 : i32
    return %c0_i32, %c0_i32_0, %c0_i32_1, %c0_i32_2 : i32, i32, i32, i32
  }
  func.func @transform_4(%arg0: i32) -> (i32, i32, i32, i32) {
    %c0_i32 = arith.constant 0 : i32
    %c0_i32_0 = arith.constant 0 : i32
    %c0_i32_1 = arith.constant 0 : i32
    %c0_i32_2 = arith.constant 0 : i32
    return %arg0, %c0_i32, %c0_i32_0, %c0_i32_1 : i32, i32, i32, i32
  }
  func.func @transform_5(%arg0: i32) -> (i32, i32, i32) {
    %c0_i32 = arith.constant 0 : i32
    %c0_i32_0 = arith.constant 0 : i32
    %c0_i32_1 = arith.constant 0 : i32
    return %arg0, %c0_i32, %c0_i32_0 : i32, i32, i32
  }
}

module attributes {stable_mosaic.version = 11 : i64} {
  func.func @_bn_add_relu_kernel(%arg0: i32, %arg1: memref<512x128xbf16, #tpu.memory_space<vmem>>, %arg2: memref<512x128xbf16, #tpu.memory_space<vmem>>, %arg3: memref<1x128xf32, #tpu.memory_space<vmem>>, %arg4: memref<1x128xf32, #tpu.memory_space<vmem>>, %arg5: memref<512x128xf32, #tpu.memory_space<vmem>>) attributes {dimension_semantics = [#tpu.dimension_semantics<parallel>], iteration_bounds = array<i64: 1>, scalar_prefetch = 0 : i64, scratch_operands = 0 : i64, tpu.core_type = #tpu.core_type<tc>, window_params = [{transform_indices = @transform_0, window_bounds = array<i64: 512, 128>}, {transform_indices = @transform_1, window_bounds = array<i64: 512, 128>}, {pipeline_mode = #tpu.pipeline_mode<synchronous>, transform_indices = @transform_2, window_bounds = array<i64: 1, 128>}, {pipeline_mode = #tpu.pipeline_mode<synchronous>, transform_indices = @transform_3, window_bounds = array<i64: 1, 128>}, {transform_indices = @transform_4, window_bounds = array<i64: 512, 128>}]} {
    %c0 = arith.constant 0 : index
    %c0_0 = arith.constant 0 : index
    %0 = vector.load %arg1[%c0, %c0_0] : memref<512x128xbf16, #tpu.memory_space<vmem>>, vector<512x128xbf16>
    %1 = arith.extf %0 : vector<512x128xbf16> to vector<512x128xf32>
    %c0_1 = arith.constant 0 : index
    %c0_2 = arith.constant 0 : index
    %2 = vector.load %arg3[%c0_1, %c0_2] : memref<1x128xf32, #tpu.memory_space<vmem>>, vector<1x128xf32>
    %3 = vector.broadcast %2 : vector<1x128xf32> to vector<512x128xf32>
    %4 = arith.mulf %1, %3 : vector<512x128xf32>
    %c0_3 = arith.constant 0 : index
    %c0_4 = arith.constant 0 : index
    %5 = vector.load %arg4[%c0_3, %c0_4] : memref<1x128xf32, #tpu.memory_space<vmem>>, vector<1x128xf32>
    %6 = vector.broadcast %5 : vector<1x128xf32> to vector<512x128xf32>
    %7 = arith.addf %4, %6 : vector<512x128xf32>
    %c0_5 = arith.constant 0 : index
    %c0_6 = arith.constant 0 : index
    %8 = vector.load %arg2[%c0_5, %c0_6] : memref<512x128xbf16, #tpu.memory_space<vmem>>, vector<512x128xbf16>
    %9 = arith.extf %8 : vector<512x128xbf16> to vector<512x128xf32>
    %10 = arith.addf %7, %9 : vector<512x128xf32>
    %cst = arith.constant 0.000000e+00 : f32
    %11 = vector.broadcast %cst : f32 to vector<512x128xf32>
    %12 = arith.maximumf %10, %11 : vector<512x128xf32>
    %c0_7 = arith.constant 0 : index
    %c0_8 = arith.constant 0 : index
    %13 = vector.load %arg5[%c0_7, %c0_8] : memref<512x128xf32, #tpu.memory_space<vmem>>, vector<512x128xf32>
    tpu.vector_store %arg5[%c0_7, %c0_8], %12 {strides = array<i32>} : memref<512x128xf32, #tpu.memory_space<vmem>>, vector<512x128xf32>,
    return
  }
  func.func @transform_0(%arg0: i32) -> (i32, i32) {
    %c0_i32 = arith.constant 0 : i32
    %c0_i32_0 = arith.constant 0 : i32
    return %arg0, %c0_i32 : i32, i32
  }
  func.func @transform_1(%arg0: i32) -> (i32, i32) {
    %c0_i32 = arith.constant 0 : i32
    %c0_i32_0 = arith.constant 0 : i32
    return %arg0, %c0_i32 : i32, i32
  }
  func.func @transform_2(%arg0: i32) -> (i32, i32) {
    %c0_i32 = arith.constant 0 : i32
    %c0_i32_0 = arith.constant 0 : i32
    %c0_i32_1 = arith.constant 0 : i32
    return %c0_i32, %c0_i32_0 : i32, i32
  }
  func.func @transform_3(%arg0: i32) -> (i32, i32) {
    %c0_i32 = arith.constant 0 : i32
    %c0_i32_0 = arith.constant 0 : i32
    %c0_i32_1 = arith.constant 0 : i32
    return %c0_i32, %c0_i32_0 : i32, i32
  }
  func.func @transform_4(%arg0: i32) -> (i32, i32) {
    %c0_i32 = arith.constant 0 : i32
    %c0_i32_0 = arith.constant 0 : i32
    return %arg0, %c0_i32 : i32, i32
  }
}

</mosaic_0001>

<bundles_post_ra>
// kernel: bottleneck_forward_nhwc.4
= control target key start
LH: loop header
LB: loop body
LE: loop exit
PB: predicated region body
PF: predicated region fallthrough
CT: control target
= control target key end

     0   :  { %s2124_s1 = inlined_call_operand.vmem [shape: bf16[128,128], index: 1, kind: input, shape index: {}]   ;;  %s2125_s0 = inlined_call_operand.vmem [shape: bf16[512,128], index: 0, kind: input, shape index: {}]   ;;  %s2126_s2 = inlined_call_operand.vmem [shape: bf16[512,128], index: 2, kind: output, shape index: {0}]   ;;  %s2127_s3 = inlined_call_operand.vmem [shape: f32[1,2,128], index: 3, kind: output, shape index: {1}]  }
   0x1   :  { %v1650_v0 = vld [vmem:[%s2124_s1] sm:$0xff]   ;;  %v1651_v1 = vld [vmem:[%s2124_s1 + $0x8] sm:$0xff]   ;;  %v1652_v2 = vld [vmem:[%s2124_s1 + $0x10] sm:$0xff]  }
   0x2   :  { %1554 = vmatprep.subr.bf16.mxu0 %v1650_v0  ;;  %1634 = vmatprep.subr.bf16.mxu1 %v1650_v0  ;;  %v1653_v3 = vld [vmem:[%s2124_s1 + $0x18] sm:$0xff]   ;;  %v1658_v4 = vld [vmem:[%s2125_s0] sm:$0xff]   ;;  %v1655_v6 = vld [vmem:[%s2124_s1 + $0x28] sm:$0xff]  }
   0x3   :  { %1555 = vmatpush3.bf16.msra.mxu0 %v1650_v0  ;;  %1642 = vmatpush3.bf16.msra.mxu1 %v1650_v0  ;;  %v1654_v5 = vld [vmem:[%s2124_s1 + $0x20] sm:$0xff]   ;;  %v1656_v7 = vld [vmem:[%s2124_s1 + $0x30] sm:$0xff]   ;;  %v1657_v8 = vld [vmem:[%s2124_s1 + $0x38] sm:$0xff]  }
   0x4   :  { %1556 = vmatprep.subr.bf16.mxu0 %v1651_v1  ;;  %1635 = vmatprep.subr.bf16.mxu1 %v1651_v1  ;;  %v1674_v9 = vld [vmem:[%s2125_s0 + $0x80] sm:$0xff]   ;;  %v1659_v10 = vld [vmem:[%s2125_s0 + $0x8] sm:$0xff]   ;;  %v1660_v11 = vld [vmem:[%s2125_s0 + $0x10] sm:$0xff]  }
   0x5   :  { %1570 = vmatprep.mubr.bf16.mxu0 %v1658_v4  ;;  %1602 = vmatprep.mubr.bf16.mxu1 %v1674_v9  ;;  %v1675_v12 = vld [vmem:[%s2125_s0 + $0x88] sm:$0xff]   ;;  %v1676_v13 = vld [vmem:[%s2125_s0 + $0x90] sm:$0xff]   ;;  %v1661_v14 = vld [vmem:[%s2125_s0 + $0x18] sm:$0xff]  }
   0x6   :  { %v1662_v15 = vld [vmem:[%s2125_s0 + $0x20] sm:$0xff]   ;;  %v1677_v16 = vld [vmem:[%s2125_s0 + $0x98] sm:$0xff]   ;;  %v1663_v18 = vld [vmem:[%s2125_s0 + $0x28] sm:$0xff]  }
   0x7   :  { %1557 = vmatpush3.bf16.msra.mxu0 %v1651_v1  ;;  %1643 = vmatpush3.bf16.msra.mxu1 %v1651_v1  ;;  %v1678_v17 = vld [vmem:[%s2125_s0 + $0xa0] sm:$0xff]   ;;  %v1679_v19 = vld [vmem:[%s2125_s0 + $0xa8] sm:$0xff]   ;;  %v1664_v20 = vld [vmem:[%s2125_s0 + $0x30] sm:$0xff]  }
   0x8   :  { %1558 = vmatprep.subr.bf16.mxu0 %v1652_v2  ;;  %1636 = vmatprep.subr.bf16.mxu1 %v1652_v2  ;;  %v1680_v21 = vld [vmem:[%s2125_s0 + $0xb0] sm:$0xff]   ;;  %v1665_v22 = vld [vmem:[%s2125_s0 + $0x38] sm:$0xff]   ;;  %v1666_v24 = vld [vmem:[%s2125_s0 + $0x40] sm:$0xff]  }
   0x9   :  { %v1681_v23 = vld [vmem:[%s2125_s0 + $0xb8] sm:$0xff]   ;;  %v1682_v25 = vld [vmem:[%s2125_s0 + $0xc0] sm:$0xff]   ;;  %v1667_v26 = vld [vmem:[%s2125_s0 + $0x48] sm:$0xff]  }
   0xa   :  { %v1683_v27 = vld [vmem:[%s2125_s0 + $0xc8] sm:$0xff]   ;;  %v1668_v28 = vld [vmem:[%s2125_s0 + $0x50] sm:$0xff]   ;;  %v1669_v30 = vld [vmem:[%s2125_s0 + $0x58] sm:$0xff]  }
   0xb   :  { %1559 = vmatpush3.bf16.msra.mxu0 %v1652_v2  ;;  %1644 = vmatpush3.bf16.msra.mxu1 %v1652_v2  ;;  %v1684_v29 = vld [vmem:[%s2125_s0 + $0xd0] sm:$0xff]   ;;  %v1685_v31 = vld [vmem:[%s2125_s0 + $0xd8] sm:$0xff]   ;;  %v1670_v32 = vld [vmem:[%s2125_s0 + $0x60] sm:$0xff]  }
   0xc   :  { %1560 = vmatprep.subr.bf16.mxu0 %v1653_v3  ;;  %1637 = vmatprep.subr.bf16.mxu1 %v1653_v3  ;;  %v1686_v33 = vld [vmem:[%s2125_s0 + $0xe0] sm:$0xff]   ;;  %v1671_v34 = vld [vmem:[%s2125_s0 + $0x68] sm:$0xff]   ;;  %v1672_v36 = vld [vmem:[%s2125_s0 + $0x70] sm:$0xff]  }
   0xd   :  { %v1687_v35 = vld [vmem:[%s2125_s0 + $0xe8] sm:$0xff]   ;;  %v1688_v37 = vld [vmem:[%s2125_s0 + $0xf0] sm:$0xff]   ;;  %v1673_v38 = vld [vmem:[%s2125_s0 + $0x78] sm:$0xff]  }
   0xe   :  { %v1689_v39 = vld [vmem:[%s2125_s0 + $0xf8] sm:$0xff]  }
   0xf   :  { %1561 = vmatpush3.bf16.msra.mxu0 %v1653_v3  ;;  %1645 = vmatpush3.bf16.msra.mxu1 %v1653_v3 }
  0x10   :  { %1562 = vmatprep.subr.bf16.mxu0 %v1654_v5  ;;  %1638 = vmatprep.subr.bf16.mxu1 %v1654_v5 }
  0x13   :  { %1563 = vmatpush3.bf16.msra.mxu0 %v1654_v5  ;;  %1646 = vmatpush3.bf16.msra.mxu1 %v1654_v5 }
  0x14   :  { %1564 = vmatprep.subr.bf16.mxu0 %v1655_v6  ;;  %1639 = vmatprep.subr.bf16.mxu1 %v1655_v6 }
  0x17   :  { %1565 = vmatpush3.bf16.msra.mxu0 %v1655_v6  ;;  %1647 = vmatpush3.bf16.msra.mxu1 %v1655_v6 }
  0x18   :  { %1566 = vmatprep.subr.bf16.mxu0 %v1656_v7  ;;  %1640 = vmatprep.subr.bf16.mxu1 %v1656_v7 }
  0x1b   :  { %1567 = vmatpush3.bf16.msra.mxu0 %v1656_v7  ;;  %1648 = vmatpush3.bf16.msra.mxu1 %v1656_v7 }
  0x1c   :  { %1568 = vmatprep.subr.bf16.mxu0 %v1657_v8  ;;  %1641 = vmatprep.subr.bf16.mxu1 %v1657_v8 }
  0x1f   :  { %1569 = vmatpush3.bf16.msra.mxu0 %v1657_v8  ;;  %1649 = vmatpush3.bf16.msra.mxu1 %v1657_v8 }
  0x22   :  { %1571 = vmatmul.mubr.bf16.vlgmr.msra.gmra.mrb[0].mxu0 %v1659_v10  ;;  %1603 = vmatmul.mubr.bf16.vlgmr.msra.gmra.mrb[0].mxu1 %v1675_v12 }
  0x23   :  { %1574 = vmatprep.mubr.bf16.mxu0 %v1660_v11  ;;  %1606 = vmatprep.mubr.bf16.mxu1 %v1676_v13 }
  0x2a   :  { %1575 = vmatmul.mubr.bf16.gmra.mrb[4].mxu0 %v1661_v14  ;;  %1607 = vmatmul.mubr.bf16.gmra.mrb[4].mxu1 %v1677_v16 }
  0x2b   :  { %1578 = vmatprep.mubr.bf16.mxu0 %v1662_v15  ;;  %1610 = vmatprep.mubr.bf16.mxu1 %v1678_v17 }
  0x32   :  { %1579 = vmatmul.mubr.bf16.gmra.mrb[8].mxu0 %v1663_v18  ;;  %1611 = vmatmul.mubr.bf16.gmra.mrb[8].mxu1 %v1679_v19 }
  0x33   :  { %1582 = vmatprep.mubr.bf16.mxu0 %v1664_v20  ;;  %1614 = vmatprep.mubr.bf16.mxu1 %v1680_v21 }
  0x3a   :  { %1583 = vmatmul.mubr.bf16.gmra.mrb[12].mxu0 %v1665_v22  ;;  %1615 = vmatmul.mubr.bf16.gmra.mrb[12].mxu1 %v1681_v23 }
  0x3b   :  { %1586 = vmatprep.mubr.bf16.mxu0 %v1666_v24  ;;  %1618 = vmatprep.mubr.bf16.mxu1 %v1682_v25 }
  0x42   :  { %1587 = vmatmul.mubr.bf16.gmra.mrb[16].mxu0 %v1667_v26  ;;  %1619 = vmatmul.mubr.bf16.gmra.mrb[16].mxu1 %v1683_v27 }
  0x43   :  { %1590 = vmatprep.mubr.bf16.mxu0 %v1668_v28  ;;  %1622 = vmatprep.mubr.bf16.mxu1 %v1684_v29 }
  0x4a   :  { %1591 = vmatmul.mubr.bf16.gmra.mrb[20].mxu0 %v1669_v30  ;;  %1623 = vmatmul.mubr.bf16.gmra.mrb[20].mxu1 %v1685_v31 }
  0x4b   :  { %1594 = vmatprep.mubr.bf16.mxu0 %v1670_v32  ;;  %1626 = vmatprep.mubr.bf16.mxu1 %v1686_v33 }
  0x52   :  { %1595 = vmatmul.mubr.bf16.gmra.mrb[24].mxu0 %v1671_v34  ;;  %1627 = vmatmul.mubr.bf16.gmra.mrb[24].mxu1 %v1687_v35 }
  0x53   :  { %1598 = vmatprep.mubr.bf16.mxu0 %v1672_v36  ;;  %1630 = vmatprep.mubr.bf16.mxu1 %v1688_v37 }
  0x5a   :  { %1599 = vmatmul.mubr.bf16.gmra.mrb[28].mxu0 %v1673_v38  ;;  %1631 = vmatmul.mubr.bf16.gmra.mrb[28].mxu1 %v1689_v39 }
  0xf5   :  { %v1572_v40 = vpop.f32.mrb[0].mxu0  ;;  %v1830_v41 = vpop.f32.mrb[0].mxu1 }
  0xf6   :  { %v368_v42 = vpop.f32.mrb[1].mxu0  ;;  %v1832_v43 = vpop.f32.mrb[1].mxu1  ;;  %v695_v55 = vmul.f32 %v1572_v40, %v1572_v40 }
  0xf7   :  { %v1573_v44 = vpop.f32.mrb[2].mxu0  ;;  %v1834_v45 = vpop.f32.mrb[2].mxu1  ;;  %v693_v50 = vmul.f32 %v368_v42, %v368_v42 }
  0xf8   :  { %v1331_v46 = vpack.c.bf16 %v1573_v44, %v1572_v40  ;;  %v371_v47 = vpop.f32.mrb[3].mxu0  ;;  %v1411_v48 = vpack.c.bf16 %v1834_v45, %v1830_v41  ;;  %v1838_v49 = vpop.f32.mrb[3].mxu1  ;;  %v696_v58 = vmul.f32 %v1573_v44, %v1573_v44 }
  0xf9   :  { %v623_v51 = vadd.f32 %v371_v47, %v368_v42  ;;  %v694_v52 = vmul.f32 %v371_v47, %v371_v47  ;;  %v1326_v53 = vpack.c.bf16 %v371_v47, %v368_v42  ;;  %v1406_v54 = vpack.c.bf16 %v1838_v49, %v1832_v43 }
  0xfa   :  { %1483 = vst [vmem:[%s2126_s2 + $0x8] sm:$0xff] %v1331_v46   ;;  %1499 = vst [vmem:[%s2126_s2 + $0x88] sm:$0xff] %v1411_v48  }
  0xfb   :  { %v624_v56 = vadd.f32 %v1572_v40, %v623_v51  ;;  %v757_v57 = vadd.f32 %v694_v52, %v693_v50  ;;  %1327 = vst [vmem:[%s2126_s2] sm:$0xff] %v1326_v53   ;;  %1498 = vst [vmem:[%s2126_s2 + $0x80] sm:$0xff] %v1406_v54  }
  0xfd   :  { %v758_v59 = vadd.f32 %v757_v57, %v695_v55  ;;  %v1576_v60 = vpop.f32.mrb[4].mxu0  ;;  %v625_v61 = vadd.f32 %v1573_v44, %v624_v56  ;;  %v1854_v62 = vpop.f32.mrb[4].mxu1 }
  0xfe   :  { %v384_v63 = vpop.f32.mrb[5].mxu0  ;;  %v1856_v0 = vpop.f32.mrb[5].mxu1  ;;  %v699_v15 = vmul.f32 %v1576_v60, %v1576_v60 }
  0xff   :  { %v626_v1 = vadd.f32 %v625_v61, %v384_v63  ;;  %v697_v2 = vmul.f32 %v384_v63, %v384_v63  ;;  %v759_v3 = vadd.f32 %v758_v59, %v696_v58  ;;  %v1577_v4 = vpop.f32.mrb[6].mxu0  ;;  %v1858_v5 = vpop.f32.mrb[6].mxu1 }
 0x100   :  { %v1341_v6 = vpack.c.bf16 %v1577_v4, %v1576_v60  ;;  %v387_v7 = vpop.f32.mrb[7].mxu0  ;;  %v1421_v8 = vpack.c.bf16 %v1858_v5, %v1854_v62  ;;  %v1862_v9 = vpop.f32.mrb[7].mxu1  ;;  %v700_v18 = vmul.f32 %v1577_v4, %v1577_v4 }
 0x101   :  { %v760_v10 = vadd.f32 %v759_v3, %v697_v2  ;;  %v627_v11 = vadd.f32 %v626_v1, %v387_v7  ;;  %v698_v12 = vmul.f32 %v387_v7, %v387_v7  ;;  %v1336_v13 = vpack.c.bf16 %v387_v7, %v384_v63 }
 0x102   :  { %1485 = vst [vmem:[%s2126_s2 + $0x18] sm:$0xff] %v1341_v6   ;;  %1501 = vst [vmem:[%s2126_s2 + $0x98] sm:$0xff] %v1421_v8   ;;  %v1416_v14 = vpack.c.bf16 %v1862_v9, %v1856_v0 }
 0x103   :  { %v628_v16 = vadd.f32 %v1576_v60, %v627_v11  ;;  %v761_v17 = vadd.f32 %v760_v10, %v698_v12  ;;  %1484 = vst [vmem:[%s2126_s2 + $0x10] sm:$0xff] %v1336_v13  }
 0x104   :  { %1500 = vst [vmem:[%s2126_s2 + $0x90] sm:$0xff] %v1416_v14  }
 0x105   :  { %v762_v19 = vadd.f32 %v761_v17, %v699_v15  ;;  %v1580_v20 = vpop.f32.mrb[8].mxu0  ;;  %v629_v21 = vadd.f32 %v1577_v4, %v628_v16  ;;  %v1878_v22 = vpop.f32.mrb[8].mxu1 }
 0x106   :  { %v400_v23 = vpop.f32.mrb[9].mxu0  ;;  %v1880_v24 = vpop.f32.mrb[9].mxu1  ;;  %v703_v39 = vmul.f32 %v1580_v20, %v1580_v20 }
 0x107   :  { %v630_v25 = vadd.f32 %v629_v21, %v400_v23  ;;  %v701_v26 = vmul.f32 %v400_v23, %v400_v23  ;;  %v763_v27 = vadd.f32 %v762_v19, %v700_v18  ;;  %v1581_v28 = vpop.f32.mrb[10].mxu0  ;;  %v1882_v29 = vpop.f32.mrb[10].mxu1 }
 0x108   :  { %v1351_v30 = vpack.c.bf16 %v1581_v28, %v1580_v20  ;;  %v403_v31 = vpop.f32.mrb[11].mxu0  ;;  %v1431_v32 = vpack.c.bf16 %v1882_v29, %v1878_v22  ;;  %v1886_v33 = vpop.f32.mrb[11].mxu1  ;;  %v704_v44 = vmul.f32 %v1581_v28, %v1581_v28 }
 0x109   :  { %v764_v34 = vadd.f32 %v763_v27, %v701_v26  ;;  %v631_v35 = vadd.f32 %v630_v25, %v403_v31  ;;  %v702_v36 = vmul.f32 %v403_v31, %v403_v31  ;;  %v1346_v37 = vpack.c.bf16 %v403_v31, %v400_v23 }
 0x10a   :  { %1487 = vst [vmem:[%s2126_s2 + $0x28] sm:$0xff] %v1351_v30   ;;  %1503 = vst [vmem:[%s2126_s2 + $0xa8] sm:$0xff] %v1431_v32   ;;  %v1426_v38 = vpack.c.bf16 %v1886_v33, %v1880_v24 }
 0x10b   :  { %v632_v40 = vadd.f32 %v1580_v20, %v631_v35  ;;  %v765_v42 = vadd.f32 %v764_v34, %v702_v36  ;;  %1486 = vst [vmem:[%s2126_s2 + $0x20] sm:$0xff] %v1346_v37  }
 0x10c   :  { %1502 = vst [vmem:[%s2126_s2 + $0xa0] sm:$0xff] %v1426_v38  }
 0x10d   :  { %v766_v46 = vadd.f32 %v765_v42, %v703_v39  ;;  %v1584_v47 = vpop.f32.mrb[12].mxu0  ;;  %v633_v48 = vadd.f32 %v1581_v28, %v632_v40  ;;  %v1902_v50 = vpop.f32.mrb[12].mxu1 }
 0x10e   :  { %v416_v51 = vpop.f32.mrb[13].mxu0  ;;  %v1904_v52 = vpop.f32.mrb[13].mxu1  ;;  %v707_v6 = vmul.f32 %v1584_v47, %v1584_v47 }
 0x10f   :  { %v634_v53 = vadd.f32 %v633_v48, %v416_v51  ;;  %v705_v54 = vmul.f32 %v416_v51, %v416_v51  ;;  %v767_v55 = vadd.f32 %v766_v46, %v704_v44  ;;  %v1585_v56 = vpop.f32.mrb[14].mxu0  ;;  %v1906_v57 = vpop.f32.mrb[14].mxu1 }
 0x110   :  { %v1361_v58 = vpack.c.bf16 %v1585_v56, %v1584_v47  ;;  %v419_v59 = vpop.f32.mrb[15].mxu0  ;;  %v1441_v60 = vpack.c.bf16 %v1906_v57, %v1902_v50  ;;  %v1910_v61 = vpop.f32.mrb[15].mxu1  ;;  %v708_v10 = vmul.f32 %v1585_v56, %v1585_v56 }
 0x111   :  { %v768_v63 = vadd.f32 %v767_v55, %v705_v54  ;;  %v635_v1 = vadd.f32 %v634_v53, %v419_v59  ;;  %v706_v2 = vmul.f32 %v419_v59, %v419_v59  ;;  %v1356_v3 = vpack.c.bf16 %v419_v59, %v416_v51 }
 0x112   :  { %1489 = vst [vmem:[%s2126_s2 + $0x38] sm:$0xff] %v1361_v58   ;;  %1505 = vst [vmem:[%s2126_s2 + $0xb8] sm:$0xff] %v1441_v60   ;;  %v1436_v4 = vpack.c.bf16 %v1910_v61, %v1904_v52 }
 0x113   :  { %v636_v7 = vadd.f32 %v1584_v47, %v635_v1  ;;  %v769_v8 = vadd.f32 %v768_v63, %v706_v2  ;;  %1488 = vst [vmem:[%s2126_s2 + $0x30] sm:$0xff] %v1356_v3  }
 0x114   :  { %1504 = vst [vmem:[%s2126_s2 + $0xb0] sm:$0xff] %v1436_v4  }
 0x115   :  { %v770_v11 = vadd.f32 %v769_v8, %v707_v6  ;;  %v1588_v12 = vpop.f32.mrb[16].mxu0  ;;  %v637_v13 = vadd.f32 %v1585_v56, %v636_v7  ;;  %v1926_v14 = vpop.f32.mrb[16].mxu1 }
 0x116   :  { %v432_v15 = vpop.f32.mrb[17].mxu0  ;;  %v1928_v16 = vpop.f32.mrb[17].mxu1  ;;  %v711_v35 = vmul.f32 %v1588_v12, %v1588_v12 }
 0x117   :  { %v638_v17 = vadd.f32 %v637_v13, %v432_v15  ;;  %v709_v18 = vmul.f32 %v432_v15, %v432_v15  ;;  %v771_v19 = vadd.f32 %v770_v11, %v708_v10  ;;  %v1589_v20 = vpop.f32.mrb[18].mxu0  ;;  %v1930_v21 = vpop.f32.mrb[18].mxu1 }
 0x118   :  { %v1371_v23 = vpack.c.bf16 %v1589_v20, %v1588_v12  ;;  %v435_v25 = vpop.f32.mrb[19].mxu0  ;;  %v1451_v26 = vpack.c.bf16 %v1930_v21, %v1926_v14  ;;  %v1934_v27 = vpop.f32.mrb[19].mxu1  ;;  %v712_v38 = vmul.f32 %v1589_v20, %v1589_v20 }
 0x119   :  { %v772_v28 = vadd.f32 %v771_v19, %v709_v18  ;;  %v639_v30 = vadd.f32 %v638_v17, %v435_v25  ;;  %v710_v31 = vmul.f32 %v435_v25, %v435_v25  ;;  %v1366_v32 = vpack.c.bf16 %v435_v25, %v432_v15 }
 0x11a   :  { %1491 = vst [vmem:[%s2126_s2 + $0x48] sm:$0xff] %v1371_v23   ;;  %1507 = vst [vmem:[%s2126_s2 + $0xc8] sm:$0xff] %v1451_v26   ;;  %v1446_v34 = vpack.c.bf16 %v1934_v27, %v1928_v16 }
 0x11b   :  { %v640_v36 = vadd.f32 %v1588_v12, %v639_v30  ;;  %v773_v37 = vadd.f32 %v772_v28, %v710_v31  ;;  %1490 = vst [vmem:[%s2126_s2 + $0x40] sm:$0xff] %v1366_v32  }
 0x11c   :  { %1506 = vst [vmem:[%s2126_s2 + $0xc0] sm:$0xff] %v1446_v34  }
 0x11d   :  { %v774_v39 = vadd.f32 %v773_v37, %v711_v35  ;;  %v1592_v40 = vpop.f32.mrb[20].mxu0  ;;  %v641_v42 = vadd.f32 %v1589_v20, %v640_v36  ;;  %v1950_v44 = vpop.f32.mrb[20].mxu1 }
 0x11e   :  { %v448_v46 = vpop.f32.mrb[21].mxu0  ;;  %v1952_v47 = vpop.f32.mrb[21].mxu1  ;;  %v715_v6 = vmul.f32 %v1592_v40, %v1592_v40 }
 0x11f   :  { %v642_v48 = vadd.f32 %v641_v42, %v448_v46  ;;  %v713_v51 = vmul.f32 %v448_v46, %v448_v46  ;;  %v775_v53 = vadd.f32 %v774_v39, %v712_v38  ;;  %v1593_v54 = vpop.f32.mrb[22].mxu0  ;;  %v1954_v55 = vpop.f32.mrb[22].mxu1 }
 0x120   :  { %v1381_v56 = vpack.c.bf16 %v1593_v54, %v1592_v40  ;;  %v451_v58 = vpop.f32.mrb[23].mxu0  ;;  %v1461_v59 = vpack.c.bf16 %v1954_v55, %v1950_v44  ;;  %v1958_v60 = vpop.f32.mrb[23].mxu1  ;;  %v716_v10 = vmul.f32 %v1593_v54, %v1593_v54 }
 0x121   :  { %v776_v63 = vadd.f32 %v775_v53, %v713_v51  ;;  %v643_v1 = vadd.f32 %v642_v48, %v451_v58  ;;  %v714_v2 = vmul.f32 %v451_v58, %v451_v58  ;;  %v1376_v3 = vpack.c.bf16 %v451_v58, %v448_v46 }
 0x122   :  { %1493 = vst [vmem:[%s2126_s2 + $0x58] sm:$0xff] %v1381_v56   ;;  %1509 = vst [vmem:[%s2126_s2 + $0xd8] sm:$0xff] %v1461_v59   ;;  %v1456_v4 = vpack.c.bf16 %v1958_v60, %v1952_v47 }
 0x123   :  { %v644_v7 = vadd.f32 %v1592_v40, %v643_v1  ;;  %v777_v8 = vadd.f32 %v776_v63, %v714_v2  ;;  %1492 = vst [vmem:[%s2126_s2 + $0x50] sm:$0xff] %v1376_v3  }
 0x124   :  { %1508 = vst [vmem:[%s2126_s2 + $0xd0] sm:$0xff] %v1456_v4  }
 0x125   :  { %v778_v11 = vadd.f32 %v777_v8, %v715_v6  ;;  %v1596_v12 = vpop.f32.mrb[24].mxu0  ;;  %v645_v13 = vadd.f32 %v1593_v54, %v644_v7  ;;  %v1974_v15 = vpop.f32.mrb[24].mxu1 }
 0x126   :  { %v464_v17 = vpop.f32.mrb[25].mxu0  ;;  %v1976_v18 = vpop.f32.mrb[25].mxu1  ;;  %v719_v39 = vmul.f32 %v1596_v12, %v1596_v12 }
 0x127   :  { %v646_v19 = vadd.f32 %v645_v13, %v464_v17  ;;  %v717_v20 = vmul.f32 %v464_v17, %v464_v17  ;;  %v779_v23 = vadd.f32 %v778_v11, %v716_v10  ;;  %v1597_v25 = vpop.f32.mrb[26].mxu0  ;;  %v1978_v26 = vpop.f32.mrb[26].mxu1 }
 0x128   :  { %v1391_v28 = vpack.c.bf16 %v1597_v25, %v1596_v12  ;;  %v467_v30 = vpop.f32.mrb[27].mxu0  ;;  %v1471_v31 = vpack.c.bf16 %v1978_v26, %v1974_v15  ;;  %v1982_v32 = vpop.f32.mrb[27].mxu1  ;;  %v720_v46 = vmul.f32 %v1597_v25, %v1597_v25 }
 0x129   :  { %v780_v34 = vadd.f32 %v779_v23, %v717_v20  ;;  %v647_v35 = vadd.f32 %v646_v19, %v467_v30  ;;  %v718_v36 = vmul.f32 %v467_v30, %v467_v30  ;;  %v1386_v37 = vpack.c.bf16 %v467_v30, %v464_v17 }
 0x12a   :  { %1495 = vst [vmem:[%s2126_s2 + $0x68] sm:$0xff] %v1391_v28   ;;  %1511 = vst [vmem:[%s2126_s2 + $0xe8] sm:$0xff] %v1471_v31   ;;  %v1466_v38 = vpack.c.bf16 %v1982_v32, %v1976_v18  ;;  %v725_v31 = vmul.f32 %v1832_v43, %v1832_v43 }
 0x12b   :  { %v648_v40 = vadd.f32 %v1596_v12, %v647_v35  ;;  %v781_v42 = vadd.f32 %v780_v34, %v718_v36  ;;  %1494 = vst [vmem:[%s2126_s2 + $0x60] sm:$0xff] %v1386_v37  }
 0x12c   :  { %1510 = vst [vmem:[%s2126_s2 + $0xe0] sm:$0xff] %v1466_v38   ;;  %v726_v38 = vmul.f32 %v1838_v49, %v1838_v49 }
 0x12d   :  { %v782_v48 = vadd.f32 %v781_v42, %v719_v39  ;;  %v1600_v51 = vpop.f32.mrb[28].mxu0  ;;  %v649_v53 = vadd.f32 %v1597_v25, %v648_v40  ;;  %v1998_v54 = vpop.f32.mrb[28].mxu1  ;;  %v727_v39 = vmul.f32 %v1830_v41, %v1830_v41 }
 0x12e   :  { %v480_v56 = vpop.f32.mrb[29].mxu0  ;;  %v2000_v58 = vpop.f32.mrb[29].mxu1  ;;  %v723_v19 = vmul.f32 %v1600_v51, %v1600_v51 }
 0x12f   :  { %v650_v59 = vadd.f32 %v649_v53, %v480_v56  ;;  %v721_v63 = vmul.f32 %v480_v56, %v480_v56  ;;  %v783_v1 = vadd.f32 %v782_v48, %v720_v46  ;;  %v1601_v2 = vpop.f32.mrb[30].mxu0  ;;  %v2002_v3 = vpop.f32.mrb[30].mxu1  ;;  %v728_v46 = vmul.f32 %v1834_v45, %v1834_v45 }
 0x130   :  { %v1401_v4 = vpack.c.bf16 %v1601_v2, %v1600_v51  ;;  %v483_v6 = vpop.f32.mrb[31].mxu0  ;;  %v1481_v7 = vpack.c.bf16 %v2002_v3, %v1998_v54  ;;  %v2006_v8 = vpop.f32.mrb[31].mxu1  ;;  %v724_v25 = vmul.f32 %v1601_v2, %v1601_v2 }
 0x131   :  { %v784_v10 = vadd.f32 %v783_v1, %v721_v63  ;;  %v651_v11 = vadd.f32 %v650_v59, %v483_v6  ;;  %v722_v12 = vmul.f32 %v483_v6, %v483_v6  ;;  %v1396_v13 = vpack.c.bf16 %v483_v6, %v480_v56 }
 0x132   :  { %1497 = vst [vmem:[%s2126_s2 + $0x78] sm:$0xff] %v1401_v4   ;;  %1513 = vst [vmem:[%s2126_s2 + $0xf8] sm:$0xff] %v1481_v7   ;;  %v1476_v17 = vpack.c.bf16 %v2006_v8, %v2000_v58  ;;  %v730_v63 = vmul.f32 %v1862_v9, %v1862_v9 }
 0x133   :  { %v652_v20 = vadd.f32 %v1600_v51, %v651_v11  ;;  %v785_v23 = vadd.f32 %v784_v10, %v722_v12  ;;  %1496 = vst [vmem:[%s2126_s2 + $0x70] sm:$0xff] %v1396_v13   ;;  %v734_v12 = vmul.f32 %v1886_v33, %v1886_v33 }
 0x134   :  { %1512 = vst [vmem:[%s2126_s2 + $0xf0] sm:$0xff] %v1476_v17  }
 0x135   :  { %v786_v28 = vadd.f32 %v785_v23, %v723_v19  ;;  %v653_v30 = vadd.f32 %v1601_v2, %v652_v20 }
 0x137   :  { %v654_v34 = vadd.f32 %v653_v30, %v1832_v43  ;;  %v787_v35 = vadd.f32 %v786_v28, %v724_v25  ;;  %v729_v43 = vmul.f32 %v1856_v0, %v1856_v0  ;;  %v738_v30 = vmul.f32 %v1910_v61, %v1910_v61 }
 0x139   :  { %v788_v36 = vadd.f32 %v787_v35, %v725_v31  ;;  %v655_v37 = vadd.f32 %v654_v34, %v1838_v49 }
 0x13b   :  { %v656_v40 = vadd.f32 %v1830_v41, %v655_v37  ;;  %v789_v42 = vadd.f32 %v788_v36, %v726_v38  ;;  %v731_v41 = vmul.f32 %v1854_v62, %v1854_v62 }
 0x13d   :  { %v790_v48 = vadd.f32 %v789_v42, %v727_v39  ;;  %v657_v51 = vadd.f32 %v1834_v45, %v656_v40  ;;  %v732_v45 = vmul.f32 %v1858_v5, %v1858_v5  ;;  %v742_v40 = vmul.f32 %v1934_v27, %v1934_v27 }
 0x13f   :  { %v658_v53 = vadd.f32 %v657_v51, %v1856_v0  ;;  %v791_v56 = vadd.f32 %v790_v48, %v728_v46  ;;  %v733_v0 = vmul.f32 %v1880_v24, %v1880_v24 }
 0x141   :  { %v792_v59 = vadd.f32 %v791_v56, %v729_v43  ;;  %v659_v49 = vadd.f32 %v658_v53, %v1862_v9 }
 0x143   :  { %v660_v1 = vadd.f32 %v1854_v62, %v659_v49  ;;  %v793_v2 = vadd.f32 %v792_v59, %v730_v63  ;;  %v735_v62 = vmul.f32 %v1878_v22, %v1878_v22  ;;  %v746_v59 = vmul.f32 %v1958_v60, %v1958_v60 }
 0x145   :  { %v794_v4 = vadd.f32 %v793_v2, %v731_v41  ;;  %v661_v6 = vadd.f32 %v1858_v5, %v660_v1  ;;  %v736_v5 = vmul.f32 %v1882_v29, %v1882_v29 }
 0x147   :  { %v662_v7 = vadd.f32 %v661_v6, %v1880_v24  ;;  %v795_v10 = vadd.f32 %v794_v4, %v732_v45  ;;  %v737_v24 = vmul.f32 %v1904_v52, %v1904_v52  ;;  %v750_v6 = vmul.f32 %v1982_v32, %v1982_v32 }
 0x149   :  { %v796_v11 = vadd.f32 %v795_v10, %v733_v0  ;;  %v663_v9 = vadd.f32 %v662_v7, %v1886_v33 }
 0x14b   :  { %v664_v13 = vadd.f32 %v1878_v22, %v663_v9  ;;  %v797_v17 = vadd.f32 %v796_v11, %v734_v12  ;;  %v739_v22 = vmul.f32 %v1902_v50, %v1902_v50 }
 0x14d   :  { %v798_v19 = vadd.f32 %v797_v17, %v735_v62  ;;  %v665_v20 = vadd.f32 %v1882_v29, %v664_v13  ;;  %v740_v29 = vmul.f32 %v1906_v57, %v1906_v57  ;;  %v754_v13 = vmul.f32 %v2006_v8, %v2006_v8 }
 0x14f   :  { %v666_v23 = vadd.f32 %v665_v20, %v1904_v52  ;;  %v799_v25 = vadd.f32 %v798_v19, %v736_v5  ;;  %v741_v52 = vmul.f32 %v1928_v16, %v1928_v16 }
 0x151   :  { %v800_v28 = vadd.f32 %v799_v25, %v737_v24  ;;  %v667_v33 = vadd.f32 %v666_v23, %v1910_v61 }
 0x153   :  { %v668_v31 = vadd.f32 %v1902_v50, %v667_v33  ;;  %v801_v34 = vadd.f32 %v800_v28, %v738_v30  ;;  %v743_v50 = vmul.f32 %v1926_v14, %v1926_v14 }
 0x155   :  { %v802_v35 = vadd.f32 %v801_v34, %v739_v22  ;;  %v669_v36 = vadd.f32 %v1906_v57, %v668_v31  ;;  %v744_v57 = vmul.f32 %v1930_v21, %v1930_v21 }
 0x157   :  { %v670_v37 = vadd.f32 %v669_v36, %v1928_v16  ;;  %v803_v38 = vadd.f32 %v802_v35, %v740_v29  ;;  %v745_v16 = vmul.f32 %v1952_v47, %v1952_v47 }
 0x159   :  { %v804_v39 = vadd.f32 %v803_v38, %v741_v52  ;;  %v671_v61 = vadd.f32 %v670_v37, %v1934_v27 }
 0x15b   :  { %v672_v42 = vadd.f32 %v1926_v14, %v671_v61  ;;  %v805_v46 = vadd.f32 %v804_v39, %v742_v40  ;;  %v747_v14 = vmul.f32 %v1950_v44, %v1950_v44 }
 0x15d   :  { %v806_v48 = vadd.f32 %v805_v46, %v743_v50  ;;  %v673_v51 = vadd.f32 %v1930_v21, %v672_v42  ;;  %v748_v21 = vmul.f32 %v1954_v55, %v1954_v55 }
 0x15f   :  { %v674_v43 = vadd.f32 %v673_v51, %v1952_v47  ;;  %v807_v53 = vadd.f32 %v806_v48, %v744_v57  ;;  %v749_v47 = vmul.f32 %v1976_v18, %v1976_v18 }
 0x161   :  { %v808_v56 = vadd.f32 %v807_v53, %v745_v16  ;;  %v675_v27 = vadd.f32 %v674_v43, %v1958_v60 }
 0x163   :  { %v676_v49 = vadd.f32 %v1950_v44, %v675_v27  ;;  %v809_v63 = vadd.f32 %v808_v56, %v746_v59  ;;  %v751_v44 = vmul.f32 %v1974_v15, %v1974_v15 }
 0x165   :  { %v810_v41 = vadd.f32 %v809_v63, %v747_v14  ;;  %v677_v1 = vadd.f32 %v1954_v55, %v676_v49  ;;  %v752_v55 = vmul.f32 %v1978_v26, %v1978_v26 }
 0x167   :  { %v678_v2 = vadd.f32 %v677_v1, %v1976_v18  ;;  %v811_v45 = vadd.f32 %v810_v41, %v748_v21  ;;  %v753_v18 = vmul.f32 %v2000_v58, %v2000_v58 }
 0x169   :  { %v812_v4 = vadd.f32 %v811_v45, %v749_v47  ;;  %v679_v60 = vadd.f32 %v678_v2, %v1982_v32 }
 0x16b   :  { %v680_v0 = vadd.f32 %v1974_v15, %v679_v60  ;;  %v813_v7 = vadd.f32 %v812_v4, %v750_v6  ;;  %v755_v15 = vmul.f32 %v1998_v54, %v1998_v54 }
 0x16d   :  { %v814_v10 = vadd.f32 %v813_v7, %v751_v44  ;;  %v681_v11 = vadd.f32 %v1978_v26, %v680_v0  ;;  %v756_v26 = vmul.f32 %v2002_v3, %v2002_v3 }
 0x16f   :  { %v682_v9 = vadd.f32 %v681_v11, %v2000_v58  ;;  %v815_v12 = vadd.f32 %v814_v10, %v752_v55 }
 0x171   :  { %v816_v62 = vadd.f32 %v815_v12, %v753_v18  ;;  %v683_v32 = vadd.f32 %v682_v9, %v2006_v8 }
 0x173   :  { %v684_v17 = vadd.f32 %v1998_v54, %v683_v32  ;;  %v817_v5 = vadd.f32 %v816_v62, %v754_v13 }
 0x175   :  { %v685_v19 = vadd.f32 %v2002_v3, %v684_v17  ;;  %v818_v20 = vadd.f32 %v817_v5, %v755_v15 }
 0x177   :  { %v686_v58 = vrot.slane %v685_v19, 4  ;;  %v819_v24 = vadd.f32 %v818_v20, %v756_v26 }
 0x179   :  { %v687_v23 = vadd.f32 %v686_v58, %v685_v19  ;;  %v820_v25 = vrot.slane %v819_v24, 4 }
 0x17b   :  { %v688_v28 = vrot.slane %v687_v23, 2  ;;  %v821_v33 = vadd.f32 %v820_v25, %v819_v24 }
 0x17d   :  { %v689_v30 = vadd.f32 %v688_v28, %v687_v23  ;;  %v822_v8 = vrot.slane %v821_v33, 2 }
 0x17f   :  { %v690_v22 = vrot.slane %v689_v30, 1  ;;  %v823_v31 = vadd.f32 %v822_v8, %v821_v33 }
 0x181   :  { %v691_v34 = vadd.f32 %v690_v22, %v689_v30  ;;  %v824_v29 = vrot.slane %v823_v31, 1 }
 0x183   :  { %692 = vst [vmem:[%s2127_s3] sm:$0x1] %v691_v34  ;;  %v825_v54 = vadd.f32 %v824_v29, %v823_v31 }
 0x185   :  { %826 = vst [vmem:[%s2127_s3 + $0x1] sm:$0x1] %v825_v54 }

// kernel: bottleneck_forward_nhwc.6
= control target key start
LH: loop header
LB: loop body
LE: loop exit
PB: predicated region body
PF: predicated region fallthrough
CT: control target
= control target key end

     0   :  { %s2519_s3 = inlined_call_operand.vmem [shape: bf16[128,128], index: 3, kind: input, shape index: {}]   ;;  %s2520_s0 = inlined_call_operand.vmem [shape: bf16[512,128], index: 0, kind: input, shape index: {}]   ;;  %s2521_s1 = inlined_call_operand.vmem [shape: f32[1,128], index: 1, kind: input, shape index: {}]   ;;  %s2522_s2 = inlined_call_operand.vmem [shape: f32[1,128], index: 2, kind: input, shape index: {}]   ;;  %s2523_s4 = inlined_call_operand.vmem [shape: bf16[512,128], index: 4, kind: output, shape index: {0}]   ;;  %s2524_s5 = inlined_call_operand.vmem [shape: f32[1,2,128], index: 5, kind: output, shape index: {1}]  }
   0x1   :  { %v1895_v0 = vld [vmem:[%s2519_s3] sm:$0xff]   ;;  %v1896_v1 = vld [vmem:[%s2519_s3 + $0x8] sm:$0xff]   ;;  %v1897_v2 = vld [vmem:[%s2519_s3 + $0x10] sm:$0xff]  }
   0x2   :  { %1799 = vmatprep.subr.bf16.mxu0 %v1895_v0  ;;  %1879 = vmatprep.subr.bf16.mxu1 %v1895_v0  ;;  %v1898_v3 = vld [vmem:[%s2519_s3 + $0x18] sm:$0xff]   ;;  %v1410_v4 = vld [vmem:[%s2520_s0] sm:$0xff]   ;;  %v1697_v8 = vld [vmem:[%s2520_s0 + $0x8] sm:$0xff]  }
   0x3   :  { %1800 = vmatpush3.bf16.msra.mxu0 %v1895_v0  ;;  %1887 = vmatpush3.bf16.msra.mxu1 %v1895_v0  ;;  %v1951_v5 = vld [vmem:[%s2521_s1] ss:$0 sm:$0xff]  ;;  %v1411_v6 = vunpack.c.l.bf16 %v1410_v4  ;;  %v1412_v7 = vunpack.c.h.bf16 %v1410_v4  ;;  %v1698_v9 = vld [vmem:[%s2520_s0 + $0x10] sm:$0xff]   ;;  %v1415_v14 = vunpack.c.l.bf16 %v1697_v8  ;;  %v1416_v15 = vunpack.c.h.bf16 %v1697_v8  ;;  %v1900_v22 = vld [vmem:[%s2519_s3 + $0x28] sm:$0xff]  }
   0x4   :  { %1801 = vmatprep.subr.bf16.mxu0 %v1896_v1  ;;  %1880 = vmatprep.subr.bf16.mxu1 %v1896_v1  ;;  %v1962_v10 = vld [vmem:[%s2522_s2] ss:$0 sm:$0xff]  ;;  %v1419_v16 = vunpack.c.l.bf16 %v1698_v9  ;;  %v1420_v19 = vunpack.c.h.bf16 %v1698_v9  ;;  %v1699_v26 = vld [vmem:[%s2520_s0 + $0x18] sm:$0xff]   ;;  %v1901_v31 = vld [vmem:[%s2519_s3 + $0x30] sm:$0xff]  }
   0x5   :  { %v155_v11 = vmul.f32 %v1411_v6, %v1951_v5  ;;  %v156_v12 = vmul.f32 %v1412_v7, %v1951_v5  ;;  %v1899_v13 = vld [vmem:[%s2519_s3 + $0x20] sm:$0xff]   ;;  %v157_v23 = vmul.f32 %v1415_v14, %v1951_v5  ;;  %v158_v24 = vmul.f32 %v1416_v15, %v1951_v5  ;;  %v1701_v38 = vld [vmem:[%s2520_s0 + $0x28] sm:$0xff]   ;;  %v1702_v41 = vld [vmem:[%s2520_s0 + $0x30] sm:$0xff]  }
   0x6   :  { %v159_v25 = vmul.f32 %v1419_v16, %v1951_v5  ;;  %v160_v28 = vmul.f32 %v1420_v19, %v1951_v5  ;;  %v1700_v29 = vld [vmem:[%s2520_s0 + $0x20] sm:$0xff]   ;;  %v1423_v30 = vunpack.c.l.bf16 %v1699_v26  ;;  %v1424_v35 = vunpack.c.h.bf16 %v1699_v26  ;;  %v1703_v42 = vld [vmem:[%s2520_s0 + $0x38] sm:$0xff]   ;;  %v1705_v63 = vld [vmem:[%s2520_s0 + $0x48] sm:$0xff]  }
   0x7   :  { %1802 = vmatpush3.bf16.msra.mxu0 %v1896_v1  ;;  %1888 = vmatpush3.bf16.msra.mxu1 %v1896_v1  ;;  %v226_v17 = vadd.f32 %v1962_v10, %v155_v11  ;;  %v227_v18 = vadd.f32 %v1962_v10, %v156_v12  ;;  %v228_v32 = vadd.f32 %v1962_v10, %v157_v23  ;;  %v1427_v37 = vunpack.c.l.bf16 %v1700_v29  ;;  %v1902_v43 = vld [vmem:[%s2519_s3 + $0x38] sm:$0xff]   ;;  %v1704_v48 = vld [vmem:[%s2520_s0 + $0x40] sm:$0xff]   ;;  %v1706_v4 = vld [vmem:[%s2520_s0 + $0x50] sm:$0xff]  }
   0x8   :  { %1803 = vmatprep.subr.bf16.mxu0 %v1897_v2  ;;  %1881 = vmatprep.subr.bf16.mxu1 %v1897_v2  ;;  %v229_v33 = vadd.f32 %v1962_v10, %v158_v24  ;;  %v230_v34 = vadd.f32 %v1962_v10, %v159_v25  ;;  %v231_v36 = vadd.f32 %v1962_v10, %v160_v28  ;;  %v1428_v40 = vunpack.c.h.bf16 %v1700_v29  ;;  %v1707_v23 = vld [vmem:[%s2520_s0 + $0x58] sm:$0xff]  }
   0x9   :  { %v290_v20 = vmax.f32 %v226_v17, 0.0  ;;  %v291_v21 = vmax.f32 %v227_v18, 0.0  ;;  %v161_v39 = vmul.f32 %v1423_v30, %v1951_v5  ;;  %v292_v44 = vmax.f32 %v228_v32, 0.0 }
   0xa   :  { %v293_v45 = vmax.f32 %v229_v33, 0.0  ;;  %v294_v46 = vmax.f32 %v230_v34, 0.0  ;;  %v162_v47 = vmul.f32 %v1424_v35, %v1951_v5  ;;  %v295_v49 = vmax.f32 %v231_v36, 0.0 }
   0xb   :  { %1804 = vmatpush3.bf16.msra.mxu0 %v1897_v2  ;;  %1889 = vmatpush3.bf16.msra.mxu1 %v1897_v2  ;;  %v354_v27 = vpack.c.bf16 %v291_v21, %v290_v20  ;;  %v163_v50 = vmul.f32 %v1427_v37, %v1951_v5  ;;  %v1431_v51 = vunpack.c.l.bf16 %v1701_v38  ;;  %v1432_v52 = vunpack.c.h.bf16 %v1701_v38 }
   0xc   :  { %1805 = vmatprep.subr.bf16.mxu0 %v1898_v3  ;;  %1882 = vmatprep.subr.bf16.mxu1 %v1898_v3  ;;  %v1435_v53 = vunpack.c.l.bf16 %v1702_v41  ;;  %v1436_v54 = vunpack.c.h.bf16 %v1702_v41  ;;  %v1439_v55 = vunpack.c.l.bf16 %v1703_v42  ;;  %v1440_v56 = vunpack.c.h.bf16 %v1703_v42 }
   0xd   :  { %1815 = vmatprep.mubr.bf16.mxu0 %v354_v27  ;;  %v164_v57 = vmul.f32 %v1428_v40, %v1951_v5  ;;  %v1443_v58 = vunpack.c.l.bf16 %v1704_v48  ;;  %v1444_v59 = vunpack.c.h.bf16 %v1704_v48  ;;  %v355_v60 = vpack.c.bf16 %v293_v45, %v292_v44  ;;  %v1712_v44 = vld [vmem:[%s2520_s0 + $0x80] sm:$0xff]  }
   0xe   :  { %v232_v61 = vadd.f32 %v1962_v10, %v161_v39  ;;  %v233_v62 = vadd.f32 %v1962_v10, %v162_v47  ;;  %v356_v0 = vpack.c.bf16 %v295_v49, %v294_v46  ;;  %v234_v1 = vadd.f32 %v1962_v10, %v163_v50 }
   0xf   :  { %1806 = vmatpush3.bf16.msra.mxu0 %v1898_v3  ;;  %1890 = vmatpush3.bf16.msra.mxu1 %v1898_v3  ;;  %v165_v2 = vmul.f32 %v1431_v51, %v1951_v5  ;;  %v166_v3 = vmul.f32 %v1432_v52, %v1951_v5  ;;  %v167_v6 = vmul.f32 %v1435_v53, %v1951_v5  ;;  %v1447_v14 = vunpack.c.l.bf16 %v1705_v63  ;;  %v2055_v52 = vld [vmem:[%s2520_s0 + $0x60] sm:$0xff]  }
  0x10   :  { %1807 = vmatprep.subr.bf16.mxu0 %v1899_v13  ;;  %1883 = vmatprep.subr.bf16.mxu1 %v1899_v13  ;;  %v168_v7 = vmul.f32 %v1436_v54, %v1951_v5  ;;  %v169_v8 = vmul.f32 %v1439_v55, %v1951_v5  ;;  %v170_v9 = vmul.f32 %v1440_v56, %v1951_v5  ;;  %v296_v15 = vmax.f32 %v232_v61, 0.0 }
  0x11   :  { %v235_v11 = vadd.f32 %v1962_v10, %v164_v57  ;;  %v171_v12 = vmul.f32 %v1443_v58, %v1951_v5  ;;  %v297_v16 = vmax.f32 %v233_v62, 0.0  ;;  %v1448_v17 = vunpack.c.h.bf16 %v1705_v63 }
  0x12   :  { %v1451_v18 = vunpack.c.l.bf16 %v1706_v4  ;;  %v298_v19 = vmax.f32 %v234_v1, 0.0  ;;  %v236_v20 = vadd.f32 %v1962_v10, %v165_v2  ;;  %v237_v21 = vadd.f32 %v1962_v10, %v166_v3 }
  0x13   :  { %1808 = vmatpush3.bf16.msra.mxu0 %v1899_v13  ;;  %1891 = vmatpush3.bf16.msra.mxu1 %v1899_v13  ;;  %v172_v13 = vmul.f32 %v1444_v59, %v1951_v5  ;;  %v238_v24 = vadd.f32 %v1962_v10, %v167_v6  ;;  %v239_v25 = vadd.f32 %v1962_v10, %v168_v7  ;;  %v299_v28 = vmax.f32 %v235_v11, 0.0  ;;  %v1713_v59 = vld [vmem:[%s2520_s0 + $0x88] sm:$0xff]   ;;  %v1715_v11 = vld [vmem:[%s2520_s0 + $0x98] sm:$0xff]  }
  0x14   :  { %1809 = vmatprep.subr.bf16.mxu0 %v1900_v22  ;;  %1884 = vmatprep.subr.bf16.mxu1 %v1900_v22  ;;  %v240_v26 = vadd.f32 %v1962_v10, %v169_v8  ;;  %v241_v27 = vadd.f32 %v1962_v10, %v170_v9  ;;  %v242_v29 = vadd.f32 %v1962_v10, %v171_v12  ;;  %v1455_v35 = vunpack.c.l.bf16 %v1707_v23 }
  0x15   :  { %v243_v30 = vadd.f32 %v1962_v10, %v172_v13  ;;  %v357_v32 = vpack.c.bf16 %v297_v16, %v296_v15  ;;  %v174_v33 = vmul.f32 %v1448_v17, %v1951_v5  ;;  %v175_v34 = vmul.f32 %v1451_v18, %v1951_v5 }
  0x16   :  { %v300_v36 = vmax.f32 %v236_v20, 0.0  ;;  %v301_v37 = vmax.f32 %v237_v21, 0.0  ;;  %v1456_v39 = vunpack.c.h.bf16 %v1707_v23  ;;  %v302_v40 = vmax.f32 %v238_v24, 0.0  ;;  %v1716_v24 = vld [vmem:[%s2520_s0 + $0xa0] sm:$0xff]  }
  0x17   :  { %1810 = vmatpush3.bf16.msra.mxu0 %v1900_v22  ;;  %1892 = vmatpush3.bf16.msra.mxu1 %v1900_v22  ;;  %v1452_v22 = vunpack.c.h.bf16 %v1706_v4  ;;  %v303_v41 = vmax.f32 %v239_v25, 0.0  ;;  %v304_v42 = vmax.f32 %v240_v26, 0.0  ;;  %v358_v45 = vpack.c.bf16 %v299_v28, %v298_v19 }
  0x18   :  { %1811 = vmatprep.subr.bf16.mxu0 %v1901_v31  ;;  %1885 = vmatprep.subr.bf16.mxu1 %v1901_v31  ;;  %v306_v46 = vmax.f32 %v242_v29, 0.0  ;;  %v307_v47 = vmax.f32 %v243_v30, 0.0  ;;  %v245_v49 = vadd.f32 %v1962_v10, %v174_v33  ;;  %v2049_v50 = vadd.f32 %v1962_v10, %v175_v34  ;;  %v1717_v33 = vld [vmem:[%s2520_s0 + $0xa8] sm:$0xff]  }
  0x19   :  { %v176_v38 = vmul.f32 %v1452_v22, %v1951_v5  ;;  %v177_v51 = vmul.f32 %v1455_v35, %v1951_v5  ;;  %v178_v54 = vmul.f32 %v1456_v39, %v1951_v5  ;;  %v1475_v55 = vunpack.c.l.bf16 %v1712_v44 }
  0x1a   :  { %v359_v56 = vpack.c.bf16 %v301_v37, %v300_v36  ;;  %v360_v57 = vpack.c.bf16 %v303_v41, %v302_v40  ;;  %v1459_v62 = vunpack.c.l.bf16 %v2055_v52  ;;  %v1476_v63 = vunpack.c.h.bf16 %v1712_v44 }
  0x1b   :  { %1812 = vmatpush3.bf16.msra.mxu0 %v1901_v31  ;;  %1893 = vmatpush3.bf16.msra.mxu1 %v1901_v31  ;;  %v173_v31 = vmul.f32 %v1447_v14, %v1951_v5  ;;  %v2058_v53 = vadd.f32 %v1962_v10, %v176_v38  ;;  %v309_v1 = vmax.f32 %v245_v49, 0.0  ;;  %v310_v2 = vmax.f32 %v2049_v50, 0.0 }
  0x1c   :  { %1813 = vmatprep.subr.bf16.mxu0 %v1902_v43  ;;  %1886 = vmatprep.subr.bf16.mxu1 %v1902_v43  ;;  %v2074_v3 = vadd.f32 %v1962_v10, %v177_v51  ;;  %v187_v4 = vmul.f32 %v1475_v55, %v1951_v5  ;;  %v2079_v7 = vadd.f32 %v1962_v10, %v178_v54  ;;  %v1479_v9 = vunpack.c.l.bf16 %v1713_v59 }
  0x1d   :  { %v244_v48 = vadd.f32 %v1962_v10, %v173_v31  ;;  %v311_v6 = vmax.f32 %v2058_v53, 0.0  ;;  %v188_v8 = vmul.f32 %v1476_v63, %v1951_v5  ;;  %v1460_v12 = vunpack.c.h.bf16 %v2055_v52 }
  0x1e   :  { %v258_v13 = vadd.f32 %v1962_v10, %v187_v4  ;;  %v1480_v14 = vunpack.c.h.bf16 %v1713_v59  ;;  %v2088_v16 = vmul.f32 %v1459_v62, %v1951_v5  ;;  %v189_v18 = vmul.f32 %v1479_v9, %v1951_v5 }
  0x1f   :  { %1814 = vmatpush3.bf16.msra.mxu0 %v1902_v43  ;;  %1894 = vmatpush3.bf16.msra.mxu1 %v1902_v43  ;;  %v305_v43 = vmax.f32 %v241_v27, 0.0  ;;  %v308_v61 = vmax.f32 %v244_v48, 0.0  ;;  %v259_v17 = vadd.f32 %v1962_v10, %v188_v8  ;;  %v1487_v23 = vunpack.c.l.bf16 %v1715_v11 }
  0x20   :  { %v322_v20 = vmax.f32 %v258_v13, 0.0  ;;  %v190_v21 = vmul.f32 %v1480_v14, %v1951_v5  ;;  %v260_v27 = vadd.f32 %v1962_v10, %v189_v18  ;;  %v1488_v31 = vunpack.c.h.bf16 %v1715_v11  ;;  %v1720_v18 = vld [vmem:[%s2520_s0 + $0xc0] sm:$0xff]  }
  0x21   :  { %v2061_v58 = vpack.c.bf16 %v305_v43, %v304_v42  ;;  %v2097_v25 = vpack.c.bf16 %v309_v1, %v308_v61  ;;  %v323_v26 = vmax.f32 %v259_v17, 0.0  ;;  %v1491_v37 = vunpack.c.l.bf16 %v1716_v24  ;;  %v1719_v1 = vld [vmem:[%s2520_s0 + $0xb8] sm:$0xff]  }
  0x22   :  { %1816 = vmatmul.mubr.bf16.vlgmr.msra.gmra.mrb[0].mxu0 %v355_v60  ;;  %v2066_v60 = vpack.c.bf16 %v307_v47, %v306_v46  ;;  %v261_v29 = vadd.f32 %v1962_v10, %v190_v21  ;;  %v324_v35 = vmax.f32 %v260_v27, 0.0  ;;  %v194_v40 = vmul.f32 %v1488_v31, %v1951_v5  ;;  %v1718_v46 = vld [vmem:[%s2520_s0 + $0xb0] sm:$0xff]   ;;  %v1709_v47 = vld [vmem:[%s2520_s0 + $0x68] sm:$0xff]  }
  0x23   :  { %1819 = vmatprep.mubr.bf16.mxu0 %v356_v0  ;;  %v1714_v0 = vld [vmem:[%s2520_s0 + $0x90] sm:$0xff]   ;;  %v370_v34 = vpack.c.bf16 %v323_v26, %v322_v20  ;;  %v1492_v43 = vunpack.c.h.bf16 %v1716_v24  ;;  %v195_v44 = vmul.f32 %v1491_v37, %v1951_v5  ;;  %v1496_v54 = vunpack.c.h.bf16 %v1717_v33 }
  0x24   :  { %v1483_v15 = vunpack.c.l.bf16 %v1714_v0  ;;  %v1484_v19 = vunpack.c.h.bf16 %v1714_v0  ;;  %v325_v38 = vmax.f32 %v261_v29, 0.0  ;;  %v265_v49 = vadd.f32 %v1962_v10, %v194_v40  ;;  %v1722_v40 = vld [vmem:[%s2520_s0 + $0xd0] sm:$0xff]  }
  0x25   :  { %1847 = vmatprep.mubr.bf16.mxu1 %v370_v34  ;;  %v198_v62 = vmul.f32 %v1496_v54, %v1951_v5  ;;  %v1499_v63 = vunpack.c.l.bf16 %v1718_v46  ;;  %v1500_v0 = vunpack.c.h.bf16 %v1718_v46  ;;  %v312_v4 = vmax.f32 %v2074_v3, 0.0 }
  0x26   :  { %v191_v22 = vmul.f32 %v1483_v15, %v1951_v5  ;;  %v192_v28 = vmul.f32 %v1484_v19, %v1951_v5  ;;  %v371_v48 = vpack.c.bf16 %v325_v38, %v324_v35  ;;  %v329_v61 = vmax.f32 %v265_v49, 0.0 }
  0x27   :  { %v1463_v8 = vunpack.c.l.bf16 %v1709_v47  ;;  %v313_v13 = vmax.f32 %v2079_v7, 0.0  ;;  %v1464_v14 = vunpack.c.h.bf16 %v1709_v47  ;;  %v199_v15 = vmul.f32 %v1499_v63, %v1951_v5 }
  0x28   :  { %v262_v30 = vadd.f32 %v1962_v10, %v191_v22  ;;  %v263_v36 = vadd.f32 %v1962_v10, %v192_v28  ;;  %1848 = vmatmul.mubr.bf16.vlgmr.msra.gmra.mrb[0].mxu1 %v371_v48  ;;  %v200_v17 = vmul.f32 %v1500_v0, %v1951_v5  ;;  %v180_v3 = vmul.f32 %v1460_v12, %v1951_v5 }
  0x29   :  { %v1503_v19 = vunpack.c.l.bf16 %v1719_v1  ;;  %v1504_v20 = vunpack.c.h.bf16 %v1719_v1  ;;  %v270_v24 = vadd.f32 %v1962_v10, %v199_v15  ;;  %v1507_v27 = vunpack.c.l.bf16 %v1720_v18  ;;  %v1723_v15 = vld [vmem:[%s2520_s0 + $0xd8] sm:$0xff]  }
  0x2a   :  { %1820 = vmatmul.mubr.bf16.gmra.mrb[4].mxu0 %v357_v32  ;;  %v193_v32 = vmul.f32 %v1487_v23, %v1951_v5  ;;  %v326_v39 = vmax.f32 %v262_v30, 0.0  ;;  %v327_v42 = vmax.f32 %v263_v36, 0.0  ;;  %v269_v23 = vadd.f32 %v1962_v10, %v198_v62 }
  0x2b   :  { %1823 = vmatprep.mubr.bf16.mxu0 %v358_v45  ;;  %v1495_v45 = vunpack.c.l.bf16 %v1717_v33  ;;  %v1508_v52 = vunpack.c.h.bf16 %v1720_v18  ;;  %v364_v12 = vpack.c.bf16 %v311_v6, %v310_v2  ;;  %v250_v28 = vadd.f32 %v1962_v10, %v2088_v16  ;;  %v1711_v33 = vld [vmem:[%s2520_s0 + $0x78] sm:$0xff]   ;;  %v1721_v16 = vld [vmem:[%s2520_s0 + $0xc8] sm:$0xff]  }
  0x2c   :  { %v264_v41 = vadd.f32 %v1962_v10, %v193_v32  ;;  %v372_v55 = vpack.c.bf16 %v327_v42, %v326_v39  ;;  %v251_v31 = vadd.f32 %v1962_v10, %v180_v3  ;;  %v181_v32 = vmul.f32 %v1463_v8, %v1951_v5 }
  0x2d   :  { %v197_v59 = vmul.f32 %v1495_v45, %v1951_v5  ;;  %v201_v34 = vmul.f32 %v1503_v19, %v1951_v5  ;;  %v202_v50 = vmul.f32 %v1504_v20, %v1951_v5  ;;  %v365_v35 = vpack.c.bf16 %v313_v13, %v312_v4 }
  0x2e   :  { %v328_v51 = vmax.f32 %v264_v41, 0.0  ;;  %1851 = vmatprep.mubr.bf16.mxu1 %v372_v55  ;;  %v182_v53 = vmul.f32 %v1464_v14, %v1951_v5  ;;  %v333_v6 = vmax.f32 %v269_v23, 0.0  ;;  %v334_v36 = vmax.f32 %v270_v24, 0.0 }
  0x2f   :  { %v268_v22 = vadd.f32 %v1962_v10, %v197_v59  ;;  %v203_v38 = vmul.f32 %v1507_v27, %v1951_v5  ;;  %v204_v39 = vmul.f32 %v1508_v52, %v1951_v5  ;;  %v314_v41 = vmax.f32 %v250_v28, 0.0 }
  0x30   :  { %v373_v21 = vpack.c.bf16 %v329_v61, %v328_v51  ;;  %v315_v45 = vmax.f32 %v251_v31, 0.0  ;;  %v272_v46 = vadd.f32 %v1962_v10, %v201_v34  ;;  %v273_v47 = vadd.f32 %v1962_v10, %v202_v50 }
  0x31   :  { %v332_v2 = vmax.f32 %v268_v22, 0.0  ;;  %v1511_v48 = vunpack.c.l.bf16 %v1721_v16  ;;  %v1512_v51 = vunpack.c.h.bf16 %v1721_v16  ;;  %v1515_v54 = vunpack.c.l.bf16 %v1722_v40 }
  0x32   :  { %1824 = vmatmul.mubr.bf16.gmra.mrb[8].mxu0 %v359_v56  ;;  %v196_v56 = vmul.f32 %v1492_v43, %v1951_v5  ;;  %1852 = vmatmul.mubr.bf16.gmra.mrb[4].mxu1 %v373_v21  ;;  %v1516_v55 = vunpack.c.h.bf16 %v1722_v40  ;;  %v275_v59 = vadd.f32 %v1962_v10, %v204_v39  ;;  %v253_v61 = vadd.f32 %v1962_v10, %v182_v53  ;;  %v1724_v21 = vld [vmem:[%s2520_s0 + $0xe0] sm:$0xff]  }
  0x33   :  { %1827 = vmatprep.mubr.bf16.mxu0 %v360_v57  ;;  %v266_v57 = vadd.f32 %v1962_v10, %v195_v44  ;;  %v1471_v44 = vunpack.c.l.bf16 %v1711_v33  ;;  %v375_v49 = vpack.c.bf16 %v333_v6, %v332_v2  ;;  %v1472_v0 = vunpack.c.h.bf16 %v1711_v33 }
  0x34   :  { %v267_v9 = vadd.f32 %v1962_v10, %v196_v56  ;;  %v252_v56 = vadd.f32 %v1962_v10, %v181_v32  ;;  %v366_v1 = vpack.c.bf16 %v315_v45, %v314_v41  ;;  %v336_v4 = vmax.f32 %v272_v46, 0.0  ;;  %v1726_v41 = vld [vmem:[%s2520_s0 + $0xf0] sm:$0xff]  }
  0x35   :  { %v330_v11 = vmax.f32 %v266_v57, 0.0  ;;  %v274_v57 = vadd.f32 %v1962_v10, %v203_v38  ;;  %v337_v8 = vmax.f32 %v273_v47, 0.0  ;;  %v207_v13 = vmul.f32 %v1515_v54, %v1951_v5 }
  0x36   :  { %v331_v7 = vmax.f32 %v267_v9, 0.0  ;;  %v205_v9 = vmul.f32 %v1511_v48, %v1951_v5  ;;  %v208_v14 = vmul.f32 %v1516_v55, %v1951_v5  ;;  %v339_v3 = vmax.f32 %v275_v59, 0.0 }
  0x37   :  { %v338_v18 = vmax.f32 %v274_v57, 0.0  ;;  %v186_v20 = vmul.f32 %v1472_v0, %v1951_v5  ;;  %v377_v23 = vpack.c.bf16 %v337_v8, %v336_v4  ;;  %v278_v27 = vadd.f32 %v1962_v10, %v207_v13 }
  0x38   :  { %v374_v26 = vpack.c.bf16 %v331_v7, %v330_v11  ;;  %v206_v11 = vmul.f32 %v1512_v51, %v1951_v5  ;;  %v317_v7 = vmax.f32 %v253_v61, 0.0  ;;  %v276_v24 = vadd.f32 %v1962_v10, %v205_v9 }
  0x39   :  { %v279_v52 = vadd.f32 %v1962_v10, %v208_v14  ;;  %v378_v28 = vpack.c.bf16 %v339_v3, %v338_v18  ;;  %v257_v33 = vadd.f32 %v1962_v10, %v186_v20  ;;  %v342_v2 = vmax.f32 %v278_v27, 0.0 }
  0x3a   :  { %1828 = vmatmul.mubr.bf16.gmra.mrb[12].mxu0 %v2061_v58  ;;  %v1710_v58 = vld [vmem:[%s2520_s0 + $0x70] sm:$0xff]   ;;  %1855 = vmatprep.mubr.bf16.mxu1 %v374_v26  ;;  %v1519_v26 = vunpack.c.l.bf16 %v1723_v15  ;;  %v340_v50 = vmax.f32 %v276_v24, 0.0  ;;  %v1531_v51 = vunpack.c.l.bf16 %v1726_v41  ;;  %v1532_v54 = vunpack.c.h.bf16 %v1726_v41 }
  0x3b   :  { %1831 = vmatprep.mubr.bf16.mxu0 %v2066_v60  ;;  %v271_v60 = vadd.f32 %v1962_v10, %v200_v17  ;;  %v1467_v29 = vunpack.c.l.bf16 %v1710_v58  ;;  %v1468_v30 = vunpack.c.h.bf16 %v1710_v58  ;;  %1856 = vmatmul.mubr.bf16.gmra.mrb[8].mxu1 %v375_v49  ;;  %v185_v17 = vmul.f32 %v1471_v44, %v1951_v5 }
  0x3c   :  { %v316_v58 = vmax.f32 %v252_v56, 0.0  ;;  %v343_v6 = vmax.f32 %v279_v52, 0.0  ;;  %v321_v40 = vmax.f32 %v257_v33, 0.0  ;;  %v216_v0 = vmul.f32 %v1532_v54, %v1951_v5 }
  0x3d   :  { %v335_v37 = vmax.f32 %v271_v60, 0.0  ;;  %v183_v42 = vmul.f32 %v1467_v29, %v1951_v5  ;;  %v184_v43 = vmul.f32 %v1468_v30, %v1951_v5  ;;  %v277_v60 = vadd.f32 %v1962_v10, %v206_v11 }
  0x3e   :  { %v1523_v29 = vunpack.c.l.bf16 %v1724_v21  ;;  %v1524_v30 = vunpack.c.h.bf16 %v1724_v21  ;;  %v367_v31 = vpack.c.bf16 %v317_v7, %v316_v58  ;;  %v256_v32 = vadd.f32 %v1962_v10, %v185_v17 }
  0x3f   :  { %v254_v62 = vadd.f32 %v1962_v10, %v183_v42  ;;  %v255_v63 = vadd.f32 %v1962_v10, %v184_v43  ;;  %v341_v53 = vmax.f32 %v277_v60, 0.0  ;;  %v380_v45 = vpack.c.bf16 %v343_v6, %v342_v2 }
  0x40   :  { %v212_v38 = vmul.f32 %v1524_v30, %v1951_v5  ;;  %v320_v39 = vmax.f32 %v256_v32, 0.0  ;;  %v287_v17 = vadd.f32 %v1962_v10, %v216_v0 }
  0x41   :  { %v318_v19 = vmax.f32 %v254_v62, 0.0  ;;  %v319_v22 = vmax.f32 %v255_v63, 0.0  ;;  %v379_v44 = vpack.c.bf16 %v341_v53, %v340_v50  ;;  %v215_v63 = vmul.f32 %v1531_v51, %v1951_v5 }
  0x42   :  { %1832 = vmatmul.mubr.bf16.gmra.mrb[16].mxu0 %v2097_v25  ;;  %v376_v25 = vpack.c.bf16 %v335_v37, %v334_v36  ;;  %v1725_v36 = vld [vmem:[%s2520_s0 + $0xe8] sm:$0xff]   ;;  %v211_v37 = vmul.f32 %v1523_v29, %v1951_v5  ;;  %v283_v49 = vadd.f32 %v1962_v10, %v212_v38  ;;  %v369_v55 = vpack.c.bf16 %v321_v40, %v320_v39 }
  0x43   :  { %1835 = vmatprep.mubr.bf16.mxu0 %v364_v12  ;;  %v1520_v12 = vunpack.c.h.bf16 %v1723_v15  ;;  %v368_v34 = vpack.c.bf16 %v319_v22, %v318_v19  ;;  %v1527_v43 = vunpack.c.l.bf16 %v1725_v36  ;;  %v1528_v47 = vunpack.c.h.bf16 %v1725_v36 }
  0x44   :  { %1859 = vmatprep.mubr.bf16.mxu1 %v376_v25  ;;  %v282_v48 = vadd.f32 %v1962_v10, %v211_v37  ;;  %v347_v62 = vmax.f32 %v283_v49, 0.0  ;;  %v286_v15 = vadd.f32 %v1962_v10, %v215_v63  ;;  %v351_v20 = vmax.f32 %v287_v17, 0.0 }
  0x45   :  { %1860 = vmatmul.mubr.bf16.gmra.mrb[12].mxu1 %v377_v23  ;;  %v210_v16 = vmul.f32 %v1520_v12, %v1951_v5  ;;  %v213_v56 = vmul.f32 %v1527_v43, %v1951_v5  ;;  %v214_v59 = vmul.f32 %v1528_v47, %v1951_v5 }
  0x46   :  { %1863 = vmatprep.mubr.bf16.mxu1 %v378_v28  ;;  %v346_v61 = vmax.f32 %v282_v48, 0.0  ;;  %v350_v19 = vmax.f32 %v286_v15, 0.0 }
  0x47   :  { %v281_v46 = vadd.f32 %v1962_v10, %v210_v16  ;;  %v284_v4 = vadd.f32 %v1962_v10, %v213_v56  ;;  %v285_v9 = vadd.f32 %v1962_v10, %v214_v59 }
  0x48   :  { %v382_v14 = vpack.c.bf16 %v347_v62, %v346_v61  ;;  %v384_v24 = vpack.c.bf16 %v351_v20, %v350_v19 }
  0x49   :  { %v345_v57 = vmax.f32 %v281_v46, 0.0  ;;  %v348_v18 = vmax.f32 %v284_v4, 0.0  ;;  %v349_v3 = vmax.f32 %v285_v9, 0.0 }
  0x4a   :  { %1836 = vmatmul.mubr.bf16.gmra.mrb[20].mxu0 %v365_v35  ;;  %v209_v35 = vmul.f32 %v1519_v26, %v1951_v5 }
  0x4b   :  { %1839 = vmatprep.mubr.bf16.mxu0 %v366_v1  ;;  %v1727_v1 = vld [vmem:[%s2520_s0 + $0xf8] sm:$0xff]   ;;  %v383_v21 = vpack.c.bf16 %v349_v3, %v348_v18 }
  0x4c   :  { %v280_v42 = vadd.f32 %v1962_v10, %v209_v35  ;;  %v1535_v11 = vunpack.c.l.bf16 %v1727_v1  ;;  %v1536_v13 = vunpack.c.h.bf16 %v1727_v1 }
  0x4d   :  { %1864 = vmatmul.mubr.bf16.gmra.mrb[16].mxu1 %v379_v44 }
  0x4e   :  { %v344_v25 = vmax.f32 %v280_v42, 0.0  ;;  %1867 = vmatprep.mubr.bf16.mxu1 %v380_v45  ;;  %v217_v58 = vmul.f32 %v1535_v11, %v1951_v5  ;;  %v218_v7 = vmul.f32 %v1536_v13, %v1951_v5 }
  0x50   :  { %v381_v8 = vpack.c.bf16 %v345_v57, %v344_v25  ;;  %v288_v22 = vadd.f32 %v1962_v10, %v217_v58  ;;  %v289_v23 = vadd.f32 %v1962_v10, %v218_v7 }
  0x52   :  { %1840 = vmatmul.mubr.bf16.gmra.mrb[24].mxu0 %v367_v31  ;;  %v352_v26 = vmax.f32 %v288_v22, 0.0  ;;  %v353_v60 = vmax.f32 %v289_v23, 0.0 }
  0x53   :  { %1843 = vmatprep.mubr.bf16.mxu0 %v368_v34 }
  0x54   :  { %v385_v27 = vpack.c.bf16 %v353_v60, %v352_v26 }
  0x55   :  { %1868 = vmatmul.mubr.bf16.gmra.mrb[20].mxu1 %v381_v8 }
  0x56   :  { %1871 = vmatprep.mubr.bf16.mxu1 %v382_v14 }
  0x5a   :  { %1844 = vmatmul.mubr.bf16.gmra.mrb[28].mxu0 %v369_v55 }
  0x5d   :  { %1872 = vmatmul.mubr.bf16.gmra.mrb[24].mxu1 %v383_v21 }
  0x5e   :  { %1875 = vmatprep.mubr.bf16.mxu1 %v384_v24 }
  0x65   :  { %1876 = vmatmul.mubr.bf16.gmra.mrb[28].mxu1 %v385_v27 }
  0xf5   :  { %v1817_v52 = vpop.f32.mrb[0].mxu0 }
  0xf6   :  { %v484_v12 = vpop.f32.mrb[1].mxu0  ;;  %v811_v10 = vmul.f32 %v1817_v52, %v1817_v52 }
  0xf7   :  { %v1818_v28 = vpop.f32.mrb[2].mxu0  ;;  %v809_v30 = vmul.f32 %v484_v12, %v484_v12 }
  0xf8   :  { %v1545_v29 = vpack.c.bf16 %v1818_v28, %v1817_v52  ;;  %v487_v5 = vpop.f32.mrb[3].mxu0  ;;  %v812_v35 = vmul.f32 %v1818_v28, %v1818_v28 }
  0xf9   :  { %v739_v31 = vadd.f32 %v487_v5, %v484_v12  ;;  %v810_v32 = vmul.f32 %v487_v5, %v487_v5  ;;  %v1540_v33 = vpack.c.bf16 %v487_v5, %v484_v12 }
  0xfa   :  { %1728 = vst [vmem:[%s2523_s4 + $0x8] sm:$0xff] %v1545_v29  }
  0xfb   :  { %v740_v34 = vadd.f32 %v1817_v52, %v739_v31  ;;  %v873_v50 = vadd.f32 %v810_v32, %v809_v30  ;;  %1541 = vst [vmem:[%s2523_s4] sm:$0xff] %v1540_v33   ;;  %v2243_v14 = vpop.f32.mrb[0].mxu1 }
  0xfc   :  { %v2245_v15 = vpop.f32.mrb[1].mxu1 }
  0xfd   :  { %v874_v53 = vadd.f32 %v873_v50, %v811_v10  ;;  %v1821_v2 = vpop.f32.mrb[4].mxu0  ;;  %v741_v6 = vadd.f32 %v1818_v28, %v740_v34  ;;  %v2247_v7 = vpop.f32.mrb[2].mxu1 }
  0xfe   :  { %v500_v16 = vpop.f32.mrb[5].mxu0  ;;  %v815_v46 = vmul.f32 %v1821_v2, %v1821_v2  ;;  %v1625_v20 = vpack.c.bf16 %v2247_v7, %v2243_v14  ;;  %v2251_v21 = vpop.f32.mrb[3].mxu1 }
  0xff   :  { %v742_v36 = vadd.f32 %v741_v6, %v500_v16  ;;  %v813_v37 = vmul.f32 %v500_v16, %v500_v16  ;;  %v875_v38 = vadd.f32 %v874_v53, %v812_v35  ;;  %v1822_v39 = vpop.f32.mrb[6].mxu0  ;;  %v1620_v52 = vpack.c.bf16 %v2251_v21, %v2245_v15 }
 0x100   :  { %v1555_v40 = vpack.c.bf16 %v1822_v39, %v1821_v2  ;;  %v503_v41 = vpop.f32.mrb[7].mxu0  ;;  %v816_v49 = vmul.f32 %v1822_v39, %v1822_v39  ;;  %1744 = vst [vmem:[%s2523_s4 + $0x88] sm:$0xff] %v1625_v20  }
 0x101   :  { %v876_v42 = vadd.f32 %v875_v38, %v813_v37  ;;  %v743_v43 = vadd.f32 %v742_v36, %v503_v41  ;;  %v814_v44 = vmul.f32 %v503_v41, %v503_v41  ;;  %v1550_v45 = vpack.c.bf16 %v503_v41, %v500_v16  ;;  %1743 = vst [vmem:[%s2523_s4 + $0x80] sm:$0xff] %v1620_v52  }
 0x102   :  { %1730 = vst [vmem:[%s2523_s4 + $0x18] sm:$0xff] %v1555_v40  }
 0x103   :  { %v744_v47 = vadd.f32 %v1821_v2, %v743_v43  ;;  %v877_v48 = vadd.f32 %v876_v42, %v814_v44  ;;  %1729 = vst [vmem:[%s2523_s4 + $0x10] sm:$0xff] %v1550_v45  }
 0x105   :  { %v878_v51 = vadd.f32 %v877_v48, %v815_v46  ;;  %v1825_v54 = vpop.f32.mrb[8].mxu0  ;;  %v745_v55 = vadd.f32 %v1822_v39, %v744_v47  ;;  %v2267_v33 = vpop.f32.mrb[4].mxu1 }
 0x106   :  { %v516_v56 = vpop.f32.mrb[9].mxu0  ;;  %v819_v9 = vmul.f32 %v1825_v54, %v1825_v54  ;;  %v2269_v10 = vpop.f32.mrb[5].mxu1 }
 0x107   :  { %v746_v25 = vadd.f32 %v745_v55, %v516_v56  ;;  %v817_v57 = vmul.f32 %v516_v56, %v516_v56  ;;  %v879_v59 = vadd.f32 %v878_v51, %v816_v49  ;;  %v1826_v61 = vpop.f32.mrb[10].mxu0  ;;  %v2271_v2 = vpop.f32.mrb[6].mxu1 }
 0x108   :  { %v1565_v62 = vpack.c.bf16 %v1826_v61, %v1825_v54  ;;  %v519_v63 = vpop.f32.mrb[11].mxu0  ;;  %v820_v17 = vmul.f32 %v1826_v61, %v1826_v61  ;;  %v1635_v16 = vpack.c.bf16 %v2271_v2, %v2267_v33  ;;  %v2275_v36 = vpop.f32.mrb[7].mxu1 }
 0x109   :  { %v880_v0 = vadd.f32 %v879_v59, %v817_v57  ;;  %v747_v1 = vadd.f32 %v746_v25, %v519_v63  ;;  %v818_v4 = vmul.f32 %v519_v63, %v519_v63  ;;  %v1560_v8 = vpack.c.bf16 %v519_v63, %v516_v56 }
 0x10a   :  { %1732 = vst [vmem:[%s2523_s4 + $0x28] sm:$0xff] %v1565_v62   ;;  %1746 = vst [vmem:[%s2523_s4 + $0x98] sm:$0xff] %v1635_v16   ;;  %v1630_v43 = vpack.c.bf16 %v2275_v36, %v2269_v10 }
 0x10b   :  { %v748_v11 = vadd.f32 %v1825_v54, %v747_v1  ;;  %v881_v13 = vadd.f32 %v880_v0, %v818_v4  ;;  %1731 = vst [vmem:[%s2523_s4 + $0x20] sm:$0xff] %v1560_v8  }
 0x10c   :  { %1745 = vst [vmem:[%s2523_s4 + $0x90] sm:$0xff] %v1630_v43  }
 0x10d   :  { %v882_v18 = vadd.f32 %v881_v13, %v819_v9  ;;  %v1829_v3 = vpop.f32.mrb[12].mxu0  ;;  %v749_v58 = vadd.f32 %v1826_v61, %v748_v11 }
 0x10e   :  { %v532_v19 = vpop.f32.mrb[13].mxu0  ;;  %v823_v30 = vmul.f32 %v1829_v3, %v1829_v3  ;;  %v2291_v54 = vpop.f32.mrb[8].mxu1 }
 0x10f   :  { %v750_v22 = vadd.f32 %v749_v58, %v532_v19  ;;  %v821_v23 = vmul.f32 %v532_v19, %v532_v19  ;;  %v883_v24 = vadd.f32 %v882_v18, %v820_v17  ;;  %v1830_v26 = vpop.f32.mrb[14].mxu0  ;;  %v2293_v55 = vpop.f32.mrb[9].mxu1 }
 0x110   :  { %v1575_v60 = vpack.c.bf16 %v1830_v26, %v1829_v3  ;;  %v535_v27 = vpop.f32.mrb[15].mxu0  ;;  %v824_v34 = vmul.f32 %v1830_v26, %v1830_v26  ;;  %v2295_v61 = vpop.f32.mrb[10].mxu1 }
 0x111   :  { %v884_v12 = vadd.f32 %v883_v24, %v821_v23  ;;  %v751_v28 = vadd.f32 %v750_v22, %v535_v27  ;;  %v822_v29 = vmul.f32 %v535_v27, %v535_v27  ;;  %v1570_v5 = vpack.c.bf16 %v535_v27, %v532_v19  ;;  %v2299_v0 = vpop.f32.mrb[11].mxu1 }
 0x112   :  { %1734 = vst [vmem:[%s2523_s4 + $0x38] sm:$0xff] %v1575_v60   ;;  %v1645_v63 = vpack.c.bf16 %v2295_v61, %v2291_v54  ;;  %v1640_v17 = vpack.c.bf16 %v2299_v0, %v2293_v55 }
 0x113   :  { %v752_v31 = vadd.f32 %v1829_v3, %v751_v28  ;;  %v885_v32 = vadd.f32 %v884_v12, %v822_v29  ;;  %1733 = vst [vmem:[%s2523_s4 + $0x30] sm:$0xff] %v1570_v5  }
 0x114   :  { %1748 = vst [vmem:[%s2523_s4 + $0xa8] sm:$0xff] %v1645_v63   ;;  %1747 = vst [vmem:[%s2523_s4 + $0xa0] sm:$0xff] %v1640_v17  }
 0x115   :  { %v886_v50 = vadd.f32 %v885_v32, %v823_v30  ;;  %v1833_v35 = vpop.f32.mrb[16].mxu0  ;;  %v753_v53 = vadd.f32 %v1830_v26, %v752_v31 }
 0x116   :  { %v548_v6 = vpop.f32.mrb[17].mxu0  ;;  %v827_v48 = vmul.f32 %v1833_v35, %v1833_v35 }
 0x117   :  { %v754_v37 = vadd.f32 %v753_v53, %v548_v6  ;;  %v825_v38 = vmul.f32 %v548_v6, %v548_v6  ;;  %v887_v39 = vadd.f32 %v886_v50, %v824_v34  ;;  %v1834_v40 = vpop.f32.mrb[18].mxu0 }
 0x118   :  { %v1585_v41 = vpack.c.bf16 %v1834_v40, %v1833_v35  ;;  %v551_v42 = vpop.f32.mrb[19].mxu0  ;;  %v828_v56 = vmul.f32 %v1834_v40, %v1834_v40  ;;  %v2315_v24 = vpop.f32.mrb[12].mxu1 }
 0x119   :  { %v888_v44 = vadd.f32 %v887_v39, %v825_v38  ;;  %v755_v45 = vadd.f32 %v754_v37, %v551_v42  ;;  %v826_v46 = vmul.f32 %v551_v42, %v551_v42  ;;  %v1580_v47 = vpack.c.bf16 %v551_v42, %v548_v6  ;;  %v2317_v26 = vpop.f32.mrb[13].mxu1 }
 0x11a   :  { %1736 = vst [vmem:[%s2523_s4 + $0x48] sm:$0xff] %v1585_v41   ;;  %v2319_v28 = vpop.f32.mrb[14].mxu1 }
 0x11b   :  { %v756_v49 = vadd.f32 %v1833_v35, %v755_v45  ;;  %v889_v51 = vadd.f32 %v888_v44, %v826_v46  ;;  %1735 = vst [vmem:[%s2523_s4 + $0x40] sm:$0xff] %v1580_v47   ;;  %v1655_v5 = vpack.c.bf16 %v2319_v28, %v2315_v24  ;;  %v2323_v30 = vpop.f32.mrb[15].mxu1 }
 0x11c   :  { %v1650_v6 = vpack.c.bf16 %v2323_v30, %v2317_v26 }
 0x11d   :  { %v890_v25 = vadd.f32 %v889_v51, %v827_v48  ;;  %v1837_v57 = vpop.f32.mrb[20].mxu0  ;;  %v757_v59 = vadd.f32 %v1834_v40, %v756_v49  ;;  %1750 = vst [vmem:[%s2523_s4 + $0xb8] sm:$0xff] %v1655_v5  }
 0x11e   :  { %v564_v62 = vpop.f32.mrb[21].mxu0  ;;  %v831_v20 = vmul.f32 %v1837_v57, %v1837_v57  ;;  %1749 = vst [vmem:[%s2523_s4 + $0xb0] sm:$0xff] %v1650_v6  }
 0x11f   :  { %v758_v1 = vadd.f32 %v757_v59, %v564_v62  ;;  %v829_v4 = vmul.f32 %v564_v62, %v564_v62  ;;  %v891_v8 = vadd.f32 %v890_v25, %v828_v56  ;;  %v1838_v9 = vpop.f32.mrb[22].mxu0 }
 0x120   :  { %v1595_v11 = vpack.c.bf16 %v1838_v9, %v1837_v57  ;;  %v567_v13 = vpop.f32.mrb[23].mxu0  ;;  %v832_v60 = vmul.f32 %v1838_v9, %v1838_v9  ;;  %v2339_v43 = vpop.f32.mrb[16].mxu1 }
 0x121   :  { %v892_v18 = vadd.f32 %v891_v8, %v829_v4  ;;  %v759_v3 = vadd.f32 %v758_v1, %v567_v13  ;;  %v830_v58 = vmul.f32 %v567_v13, %v567_v13  ;;  %v1590_v19 = vpack.c.bf16 %v567_v13, %v564_v62  ;;  %v2341_v44 = vpop.f32.mrb[17].mxu1 }
 0x122   :  { %1738 = vst [vmem:[%s2523_s4 + $0x58] sm:$0xff] %v1595_v11   ;;  %v2343_v49 = vpop.f32.mrb[18].mxu1 }
 0x123   :  { %v760_v22 = vadd.f32 %v1837_v57, %v759_v3  ;;  %v893_v23 = vadd.f32 %v892_v18, %v830_v58  ;;  %1737 = vst [vmem:[%s2523_s4 + $0x50] sm:$0xff] %v1590_v19   ;;  %v1665_v56 = vpack.c.bf16 %v2343_v49, %v2339_v43  ;;  %v2347_v25 = vpop.f32.mrb[19].mxu1 }
 0x124   :  { %v1660_v8 = vpack.c.bf16 %v2347_v25, %v2341_v44 }
 0x125   :  { %v894_v27 = vadd.f32 %v893_v23, %v831_v20  ;;  %v1841_v52 = vpop.f32.mrb[24].mxu0  ;;  %v761_v12 = vadd.f32 %v1838_v9, %v760_v22  ;;  %1752 = vst [vmem:[%s2523_s4 + $0xc8] sm:$0xff] %v1665_v56  }
 0x126   :  { %v580_v29 = vpop.f32.mrb[25].mxu0  ;;  %v835_v40 = vmul.f32 %v1841_v52, %v1841_v52  ;;  %1751 = vst [vmem:[%s2523_s4 + $0xc0] sm:$0xff] %v1660_v8  }
 0x127   :  { %v762_v31 = vadd.f32 %v761_v12, %v580_v29  ;;  %v833_v32 = vmul.f32 %v580_v29, %v580_v29  ;;  %v895_v34 = vadd.f32 %v894_v27, %v832_v60  ;;  %v1842_v50 = vpop.f32.mrb[26].mxu0  ;;  %v841_v27 = vmul.f32 %v2245_v15, %v2245_v15 }
 0x128   :  { %v1605_v35 = vpack.c.bf16 %v1842_v50, %v1841_v52  ;;  %v583_v53 = vpop.f32.mrb[27].mxu0  ;;  %v836_v45 = vmul.f32 %v1842_v50, %v1842_v50  ;;  %v2363_v19 = vpop.f32.mrb[20].mxu1 }
 0x129   :  { %v896_v16 = vadd.f32 %v895_v34, %v833_v32  ;;  %v763_v37 = vadd.f32 %v762_v31, %v583_v53  ;;  %v834_v38 = vmul.f32 %v583_v53, %v583_v53  ;;  %v1600_v39 = vpack.c.bf16 %v583_v53, %v580_v29  ;;  %v2365_v20 = vpop.f32.mrb[21].mxu1 }
 0x12a   :  { %1740 = vst [vmem:[%s2523_s4 + $0x68] sm:$0xff] %v1605_v35   ;;  %v842_v35 = vmul.f32 %v2251_v21, %v2251_v21 }
 0x12b   :  { %v764_v41 = vadd.f32 %v1841_v52, %v763_v37  ;;  %v897_v42 = vadd.f32 %v896_v16, %v834_v38  ;;  %1739 = vst [vmem:[%s2523_s4 + $0x60] sm:$0xff] %v1600_v39   ;;  %v2369_v52 = vpop.f32.mrb[22].mxu1  ;;  %v844_v38 = vmul.f32 %v2247_v7, %v2247_v7 }
 0x12c   :  { %v1675_v12 = vpack.c.bf16 %v2369_v52, %v2363_v19  ;;  %v2373_v29 = vpop.f32.mrb[23].mxu1 }
 0x12d   :  { %v898_v46 = vadd.f32 %v897_v42, %v835_v40  ;;  %v1845_v47 = vpop.f32.mrb[28].mxu0  ;;  %v765_v48 = vadd.f32 %v1842_v50, %v764_v41  ;;  %v1670_v32 = vpack.c.bf16 %v2373_v29, %v2365_v20  ;;  %v845_v40 = vmul.f32 %v2269_v10, %v2269_v10 }
 0x12e   :  { %v596_v51 = vpop.f32.mrb[29].mxu0  ;;  %v839_v18 = vmul.f32 %v1845_v47, %v1845_v47  ;;  %1754 = vst [vmem:[%s2523_s4 + $0xd8] sm:$0xff] %v1675_v12   ;;  %v853_v12 = vmul.f32 %v2317_v26, %v2317_v26 }
 0x12f   :  { %v766_v57 = vadd.f32 %v765_v48, %v596_v51  ;;  %v837_v59 = vmul.f32 %v596_v51, %v596_v51  ;;  %v899_v62 = vadd.f32 %v898_v46, %v836_v45  ;;  %v1846_v63 = vpop.f32.mrb[30].mxu0  ;;  %1753 = vst [vmem:[%s2523_s4 + $0xd0] sm:$0xff] %v1670_v32  }
 0x130   :  { %v1615_v1 = vpack.c.bf16 %v1846_v63, %v1845_v47  ;;  %v599_v4 = vpop.f32.mrb[31].mxu0  ;;  %v840_v22 = vmul.f32 %v1846_v63, %v1846_v63  ;;  %v2390_v16 = vpop.f32.mrb[24].mxu1 }
 0x131   :  { %v900_v9 = vadd.f32 %v899_v62, %v837_v59  ;;  %v767_v11 = vadd.f32 %v766_v57, %v599_v4  ;;  %v838_v13 = vmul.f32 %v599_v4, %v599_v4  ;;  %v1610_v17 = vpack.c.bf16 %v599_v4, %v596_v51  ;;  %v2392_v37 = vpop.f32.mrb[25].mxu1 }
 0x132   :  { %1742 = vst [vmem:[%s2523_s4 + $0x78] sm:$0xff] %v1615_v1   ;;  %v2399_v41 = vpop.f32.mrb[26].mxu1  ;;  %v846_v51 = vmul.f32 %v2275_v36, %v2275_v36  ;;  %v849_v4 = vmul.f32 %v2293_v55, %v2293_v55 }
 0x133   :  { %v768_v3 = vadd.f32 %v1845_v47, %v767_v11  ;;  %v901_v58 = vadd.f32 %v900_v9, %v838_v13  ;;  %1741 = vst [vmem:[%s2523_s4 + $0x70] sm:$0xff] %v1610_v17   ;;  %v1685_v42 = vpack.c.bf16 %v2399_v41, %v2390_v16 }
 0x135   :  { %v902_v23 = vadd.f32 %v901_v58, %v839_v18  ;;  %v769_v60 = vadd.f32 %v1846_v63, %v768_v3  ;;  %1756 = vst [vmem:[%s2523_s4 + $0xe8] sm:$0xff] %v1685_v42   ;;  %v848_v63 = vmul.f32 %v2271_v2, %v2271_v2  ;;  %v850_v3 = vmul.f32 %v2299_v0, %v2299_v0 }
 0x137   :  { %v770_v5 = vadd.f32 %v769_v60, %v2245_v15  ;;  %v903_v31 = vadd.f32 %v902_v23, %v840_v22  ;;  %v843_v15 = vmul.f32 %v2243_v14, %v2243_v14  ;;  %v852_v23 = vmul.f32 %v2295_v61, %v2295_v61 }
 0x139   :  { %v904_v34 = vadd.f32 %v903_v31, %v841_v27  ;;  %v771_v50 = vadd.f32 %v770_v5, %v2251_v21 }
 0x13b   :  { %v772_v53 = vadd.f32 %v2243_v14, %v771_v50  ;;  %v905_v6 = vadd.f32 %v904_v34, %v842_v35  ;;  %v2403_v14 = vpop.f32.mrb[27].mxu1  ;;  %v854_v34 = vmul.f32 %v2323_v30, %v2323_v30 }
 0x13c   :  { %v1680_v47 = vpack.c.bf16 %v2403_v14, %v2392_v37  ;;  %v2420_v59 = vpop.f32.mrb[28].mxu1 }
 0x13d   :  { %v906_v39 = vadd.f32 %v905_v6, %v843_v15  ;;  %v773_v21 = vadd.f32 %v2247_v7, %v772_v53  ;;  %v2422_v62 = vpop.f32.mrb[29].mxu1 }
 0x13e   :  { %1755 = vst [vmem:[%s2523_s4 + $0xe0] sm:$0xff] %v1680_v47   ;;  %v2429_v8 = vpop.f32.mrb[30].mxu1 }
 0x13f   :  { %v774_v45 = vadd.f32 %v773_v21, %v2269_v10  ;;  %v907_v46 = vadd.f32 %v906_v39, %v844_v38  ;;  %v847_v10 = vmul.f32 %v2267_v33, %v2267_v33  ;;  %v1695_v9 = vpack.c.bf16 %v2429_v8, %v2420_v59 }
 0x140   :  { %v858_v21 = vmul.f32 %v2347_v25, %v2347_v25 }
 0x141   :  { %v908_v7 = vadd.f32 %v907_v46, %v845_v40  ;;  %v775_v48 = vadd.f32 %v774_v45, %v2275_v36  ;;  %1758 = vst [vmem:[%s2523_s4 + $0xf8] sm:$0xff] %v1695_v9   ;;  %v866_v9 = vmul.f32 %v2403_v14, %v2403_v14 }
 0x143   :  { %v776_v56 = vadd.f32 %v2267_v33, %v775_v48  ;;  %v909_v57 = vadd.f32 %v908_v7, %v846_v51  ;;  %v2433_v33 = vpop.f32.mrb[31].mxu1  ;;  %v862_v51 = vmul.f32 %v2373_v29, %v2373_v29 }
 0x144   :  { %v1690_v17 = vpack.c.bf16 %v2433_v33, %v2422_v62 }
 0x145   :  { %v910_v1 = vadd.f32 %v909_v57, %v847_v10  ;;  %v777_v36 = vadd.f32 %v2271_v2, %v776_v56 }
 0x146   :  { %1757 = vst [vmem:[%s2523_s4 + $0xf0] sm:$0xff] %v1690_v17  }
 0x147   :  { %v778_v11 = vadd.f32 %v777_v36, %v2293_v55  ;;  %v911_v13 = vadd.f32 %v910_v1, %v848_v63  ;;  %v851_v55 = vmul.f32 %v2291_v54, %v2291_v54 }
 0x149   :  { %v912_v2 = vadd.f32 %v911_v13, %v849_v4  ;;  %v779_v18 = vadd.f32 %v778_v11, %v2299_v0 }
 0x14b   :  { %v780_v58 = vadd.f32 %v2291_v54, %v779_v18  ;;  %v913_v22 = vadd.f32 %v912_v2, %v850_v3  ;;  %v855_v54 = vmul.f32 %v2315_v24, %v2315_v24 }
 0x14d   :  { %v914_v60 = vadd.f32 %v913_v22, %v851_v55  ;;  %v781_v27 = vadd.f32 %v2295_v61, %v780_v58  ;;  %v856_v61 = vmul.f32 %v2319_v28, %v2319_v28  ;;  %v870_v58 = vmul.f32 %v2433_v33, %v2433_v33 }
 0x14f   :  { %v782_v0 = vadd.f32 %v781_v27, %v2317_v26  ;;  %v915_v5 = vadd.f32 %v914_v60, %v852_v23  ;;  %v857_v26 = vmul.f32 %v2341_v44, %v2341_v44 }
 0x151   :  { %v916_v31 = vadd.f32 %v915_v5, %v853_v12  ;;  %v783_v32 = vadd.f32 %v782_v0, %v2323_v30 }
 0x153   :  { %v784_v50 = vadd.f32 %v2315_v24, %v783_v32  ;;  %v917_v35 = vadd.f32 %v916_v31, %v854_v34  ;;  %v859_v24 = vmul.f32 %v2339_v43, %v2339_v43 }
 0x155   :  { %v918_v15 = vadd.f32 %v917_v35, %v855_v54  ;;  %v785_v53 = vadd.f32 %v2319_v28, %v784_v50  ;;  %v860_v28 = vmul.f32 %v2343_v49, %v2343_v49 }
 0x157   :  { %v786_v6 = vadd.f32 %v785_v53, %v2341_v44  ;;  %v919_v38 = vadd.f32 %v918_v15, %v856_v61  ;;  %v861_v44 = vmul.f32 %v2365_v20, %v2365_v20 }
 0x159   :  { %v920_v39 = vadd.f32 %v919_v38, %v857_v26  ;;  %v787_v30 = vadd.f32 %v786_v6, %v2347_v25 }
 0x15b   :  { %v788_v40 = vadd.f32 %v2339_v43, %v787_v30  ;;  %v921_v42 = vadd.f32 %v920_v39, %v858_v21  ;;  %v863_v43 = vmul.f32 %v2363_v19, %v2363_v19 }
 0x15d   :  { %v922_v45 = vadd.f32 %v921_v42, %v859_v24  ;;  %v789_v46 = vadd.f32 %v2343_v49, %v788_v40  ;;  %v864_v49 = vmul.f32 %v2369_v52, %v2369_v52 }
 0x15f   :  { %v790_v47 = vadd.f32 %v789_v46, %v2365_v20  ;;  %v923_v7 = vadd.f32 %v922_v45, %v860_v28  ;;  %v865_v20 = vmul.f32 %v2392_v37, %v2392_v37 }
 0x161   :  { %v924_v48 = vadd.f32 %v923_v7, %v861_v44  ;;  %v791_v25 = vadd.f32 %v790_v47, %v2373_v29 }
 0x163   :  { %v792_v10 = vadd.f32 %v2363_v19, %v791_v25  ;;  %v925_v56 = vadd.f32 %v924_v48, %v862_v51  ;;  %v867_v19 = vmul.f32 %v2390_v16, %v2390_v16 }
 0x165   :  { %v926_v57 = vadd.f32 %v925_v56, %v863_v43  ;;  %v793_v63 = vadd.f32 %v2369_v52, %v792_v10  ;;  %v868_v52 = vmul.f32 %v2399_v41, %v2399_v41 }
 0x167   :  { %v794_v1 = vadd.f32 %v793_v63, %v2392_v37  ;;  %v927_v36 = vadd.f32 %v926_v57, %v864_v49  ;;  %v869_v37 = vmul.f32 %v2422_v62, %v2422_v62 }
 0x169   :  { %v928_v4 = vadd.f32 %v927_v36, %v865_v20  ;;  %v795_v29 = vadd.f32 %v794_v1, %v2403_v14 }
 0x16b   :  { %v796_v11 = vadd.f32 %v2390_v16, %v795_v29  ;;  %v929_v13 = vadd.f32 %v928_v4, %v866_v9  ;;  %v871_v16 = vmul.f32 %v2420_v59, %v2420_v59 }
 0x16d   :  { %v930_v17 = vadd.f32 %v929_v13, %v867_v19  ;;  %v797_v2 = vadd.f32 %v2399_v41, %v796_v11  ;;  %v872_v41 = vmul.f32 %v2429_v8, %v2429_v8 }
 0x16f   :  { %v798_v18 = vadd.f32 %v797_v2, %v2422_v62  ;;  %v931_v3 = vadd.f32 %v930_v17, %v868_v52 }
 0x171   :  { %v932_v55 = vadd.f32 %v931_v3, %v869_v37  ;;  %v799_v14 = vadd.f32 %v798_v18, %v2433_v33 }
 0x173   :  { %v800_v22 = vadd.f32 %v2420_v59, %v799_v14  ;;  %v933_v23 = vadd.f32 %v932_v55, %v870_v58 }
 0x175   :  { %v801_v60 = vadd.f32 %v2429_v8, %v800_v22  ;;  %v934_v27 = vadd.f32 %v933_v23, %v871_v16 }
 0x177   :  { %v802_v62 = vrot.slane %v801_v60, 4  ;;  %v935_v12 = vadd.f32 %v934_v27, %v872_v41 }
 0x179   :  { %v803_v0 = vadd.f32 %v802_v62, %v801_v60  ;;  %v936_v5 = vrot.slane %v935_v12, 4 }
 0x17b   :  { %v804_v31 = vrot.slane %v803_v0, 2  ;;  %v937_v32 = vadd.f32 %v936_v5, %v935_v12 }
 0x17d   :  { %v805_v34 = vadd.f32 %v804_v31, %v803_v0  ;;  %v938_v33 = vrot.slane %v937_v32, 2 }
 0x17f   :  { %v806_v54 = vrot.slane %v805_v34, 1  ;;  %v939_v50 = vadd.f32 %v938_v33, %v937_v32 }
 0x181   :  { %v807_v35 = vadd.f32 %v806_v54, %v805_v34  ;;  %v940_v61 = vrot.slane %v939_v50, 1 }
 0x183   :  { %808 = vst [vmem:[%s2524_s5] sm:$0x1] %v807_v35  ;;  %v941_v59 = vadd.f32 %v940_v61, %v939_v50 }
 0x185   :  { %942 = vst [vmem:[%s2524_s5 + $0x1] sm:$0x1] %v941_v59 }

// kernel: bottleneck_forward_nhwc.7
= control target key start
LH: loop header
LB: loop body
LE: loop exit
PB: predicated region body
PF: predicated region fallthrough
CT: control target
= control target key end

     0   :  { %s1341_s0 = inlined_call_operand.vmem [shape: bf16[512,128], index: 0, kind: input, shape index: {}]   ;;  %s1342_s1 = inlined_call_operand.vmem [shape: bf16[512,128], index: 1, kind: input, shape index: {}]   ;;  %s1343_s2 = inlined_call_operand.vmem [shape: f32[1,128], index: 2, kind: input, shape index: {}]   ;;  %s1344_s3 = inlined_call_operand.vmem [shape: f32[1,128], index: 3, kind: input, shape index: {}]   ;;  %s1345_s4 = inlined_call_operand.hbm [shape: f32[512,128], index: 4, kind: output, shape index: {}]  }
   0x1   :  { %v627_v0 = vld [vmem:[%s1341_s0] sm:$0xff]   ;;  %v882_v5 = vld [vmem:[%s1341_s0 + $0x8] sm:$0xff]   ;;  %v883_v12 = vld [vmem:[%s1341_s0 + $0x10] sm:$0xff]  }
   0x2   :  { %v1005_v1 = vld [vmem:[%s1343_s2] ss:$0 sm:$0xff]  ;;  %v628_v2 = vunpack.c.l.bf16 %v627_v0  ;;  %v629_v4 = vunpack.c.h.bf16 %v627_v0  ;;  %v913_v6 = vld [vmem:[%s1342_s1 + $0x8] sm:$0xff]   ;;  %v632_v10 = vunpack.c.l.bf16 %v882_v5  ;;  %v914_v13 = vld [vmem:[%s1342_s1 + $0x10] sm:$0xff]   ;;  %v633_v16 = vunpack.c.h.bf16 %v882_v5 }
   0x3   :  { %v755_v3 = vld [vmem:[%s1342_s1] sm:$0xff]   ;;  %v760_v11 = vunpack.c.l.bf16 %v913_v6  ;;  %v761_v17 = vunpack.c.h.bf16 %v913_v6  ;;  %v884_v18 = vld [vmem:[%s1341_s0 + $0x18] sm:$0xff]   ;;  %v636_v20 = vunpack.c.l.bf16 %v883_v12  ;;  %v764_v21 = vunpack.c.l.bf16 %v914_v13  ;;  %v886_v54 = vld [vmem:[%s1341_s0 + $0x28] sm:$0xff]  }
   0x4   :  { %v1019_v7 = vld [vmem:[%s1344_s3] ss:$0 sm:$0xff]  ;;  %v756_v8 = vunpack.c.l.bf16 %v755_v3  ;;  %v757_v9 = vunpack.c.h.bf16 %v755_v3  ;;  %v153_v14 = vmul.f32 %v628_v2, %v1005_v1  ;;  %v154_v15 = vmul.f32 %v629_v4, %v1005_v1  ;;  %v915_v23 = vld [vmem:[%s1342_s1 + $0x18] sm:$0xff]   ;;  %v917_v55 = vld [vmem:[%s1342_s1 + $0x28] sm:$0xff]  }
   0x5   :  { %v155_v19 = vmul.f32 %v632_v10, %v1005_v1  ;;  %v637_v22 = vunpack.c.h.bf16 %v883_v12  ;;  %v156_v26 = vmul.f32 %v633_v16, %v1005_v1  ;;  %v765_v27 = vunpack.c.h.bf16 %v914_v13  ;;  %v885_v40 = vld [vmem:[%s1341_s0 + $0x20] sm:$0xff]   ;;  %v887_v0 = vld [vmem:[%s1341_s0 + $0x30] sm:$0xff]   ;;  %v888_v16 = vld [vmem:[%s1341_s0 + $0x38] sm:$0xff]  }
   0x6   :  { %v224_v24 = vadd.f32 %v1019_v7, %v153_v14  ;;  %v225_v25 = vadd.f32 %v1019_v7, %v154_v15  ;;  %v157_v29 = vmul.f32 %v636_v20, %v1005_v1  ;;  %v640_v31 = vunpack.c.l.bf16 %v884_v18  ;;  %v916_v45 = vld [vmem:[%s1342_s1 + $0x20] sm:$0xff]   ;;  %v918_v2 = vld [vmem:[%s1342_s1 + $0x30] sm:$0xff]  }
   0x7   :  { %v226_v28 = vadd.f32 %v1019_v7, %v155_v19  ;;  %v158_v30 = vmul.f32 %v637_v22, %v1005_v1  ;;  %v227_v34 = vadd.f32 %v1019_v7, %v156_v26  ;;  %v768_v35 = vunpack.c.l.bf16 %v915_v23 }
   0x8   :  { %v416_v32 = vadd.f32 %v756_v8, %v224_v24  ;;  %v417_v33 = vadd.f32 %v757_v9, %v225_v25  ;;  %v228_v37 = vadd.f32 %v1019_v7, %v157_v29  ;;  %v159_v39 = vmul.f32 %v640_v31, %v1005_v1 }
   0x9   :  { %v418_v36 = vadd.f32 %v760_v11, %v226_v28  ;;  %v229_v38 = vadd.f32 %v1019_v7, %v158_v30  ;;  %v419_v43 = vadd.f32 %v761_v17, %v227_v34  ;;  %v641_v44 = vunpack.c.h.bf16 %v884_v18  ;;  %v889_v34 = vld [vmem:[%s1341_s0 + $0x40] sm:$0xff]  }
   0xa   :  { %v480_v41 = vmax.f32 %v416_v32, 0.0  ;;  %v481_v42 = vmax.f32 %v417_v33, 0.0  ;;  %v420_v47 = vadd.f32 %v764_v21, %v228_v37  ;;  %v230_v49 = vadd.f32 %v1019_v7, %v159_v39  ;;  %v919_v21 = vld [vmem:[%s1342_s1 + $0x38] sm:$0xff]   ;;  %v920_v39 = vld [vmem:[%s1342_s1 + $0x40] sm:$0xff]  }
   0xb   :  { %v482_v46 = vmax.f32 %v418_v36, 0.0  ;;  %v421_v48 = vadd.f32 %v765_v27, %v229_v38  ;;  %v483_v50 = vmax.f32 %v419_v43, 0.0  ;;  %v160_v51 = vmul.f32 %v641_v44, %v1005_v1 }
   0xc   :  { %544 = vst [vmem:[#allocation2] sm:$0xff] %v480_v41  ;;  %545 = vst [vmem:[#allocation2 + $0x8] sm:$0xff] %v481_v42  ;;  %v769_v52 = vunpack.c.h.bf16 %v915_v23  ;;  %v644_v53 = vunpack.c.l.bf16 %v885_v40  ;;  %v484_v56 = vmax.f32 %v420_v47, 0.0  ;;  %v422_v58 = vadd.f32 %v768_v35, %v230_v49 }
   0xd   :  { %546 = vst [vmem:[#allocation2 + $0x10] sm:$0xff] %v482_v46  ;;  %v485_v57 = vmax.f32 %v421_v48, 0.0  ;;  %v772_v59 = vunpack.c.l.bf16 %v916_v45  ;;  %547 = vst [vmem:[#allocation2 + $0x18] sm:$0xff] %v483_v50  ;;  %v231_v60 = vadd.f32 %v1019_v7, %v160_v51  ;;  %v645_v62 = vunpack.c.h.bf16 %v885_v40 }
   0xe   :  { %v161_v61 = vmul.f32 %v644_v53, %v1005_v1  ;;  %v773_v63 = vunpack.c.h.bf16 %v916_v45  ;;  %548 = vst [vmem:[#allocation2 + $0x20] sm:$0xff] %v484_v56  ;;  %v486_v3 = vmax.f32 %v422_v58, 0.0  ;;  %v648_v4 = vunpack.c.l.bf16 %v886_v54 }
   0xf   :  { %549 = vst [vmem:[#allocation2 + $0x28] sm:$0xff] %v485_v57  ;;  %v776_v5 = vunpack.c.l.bf16 %v917_v55  ;;  %v649_v6 = vunpack.c.h.bf16 %v886_v54  ;;  %v423_v8 = vadd.f32 %v769_v52, %v231_v60  ;;  %v162_v10 = vmul.f32 %v645_v62, %v1005_v1 }
  0x10   :  { %v232_v9 = vadd.f32 %v1019_v7, %v161_v61  ;;  %v777_v11 = vunpack.c.h.bf16 %v917_v55  ;;  %550 = vst [vmem:[#allocation2 + $0x30] sm:$0xff] %v486_v3  ;;  %v163_v12 = vmul.f32 %v648_v4, %v1005_v1  ;;  %v652_v14 = vunpack.c.l.bf16 %v887_v0 }
  0x11   :  { %v164_v13 = vmul.f32 %v649_v6, %v1005_v1  ;;  %v780_v15 = vunpack.c.l.bf16 %v918_v2  ;;  %v487_v17 = vmax.f32 %v423_v8, 0.0  ;;  %v233_v19 = vadd.f32 %v1019_v7, %v162_v10 }
  0x12   :  { %v424_v18 = vadd.f32 %v772_v59, %v232_v9  ;;  %v653_v20 = vunpack.c.h.bf16 %v887_v0  ;;  %v234_v22 = vadd.f32 %v1019_v7, %v163_v12  ;;  %v165_v24 = vmul.f32 %v652_v14, %v1005_v1 }
  0x13   :  { %v235_v23 = vadd.f32 %v1019_v7, %v164_v13  ;;  %v781_v25 = vunpack.c.h.bf16 %v918_v2  ;;  %551 = vst [vmem:[#allocation2 + $0x38] sm:$0xff] %v487_v17  ;;  %v425_v27 = vadd.f32 %v773_v63, %v233_v19  ;;  %v656_v29 = vunpack.c.l.bf16 %v888_v16 }
  0x14   :  { %v488_v26 = vmax.f32 %v424_v18, 0.0  ;;  %v166_v28 = vmul.f32 %v653_v20, %v1005_v1  ;;  %v426_v30 = vadd.f32 %v776_v5, %v234_v22  ;;  %v236_v32 = vadd.f32 %v1019_v7, %v165_v24 }
  0x15   :  { %v427_v31 = vadd.f32 %v777_v11, %v235_v23  ;;  %v784_v33 = vunpack.c.l.bf16 %v919_v21  ;;  %v489_v35 = vmax.f32 %v425_v27, 0.0  ;;  %v167_v37 = vmul.f32 %v656_v29, %v1005_v1 }
  0x16   :  { %552 = vst [vmem:[#allocation2 + $0x40] sm:$0xff] %v488_v26  ;;  %v237_v36 = vadd.f32 %v1019_v7, %v166_v28  ;;  %v657_v38 = vunpack.c.h.bf16 %v888_v16  ;;  %v490_v40 = vmax.f32 %v426_v30, 0.0  ;;  %v428_v42 = vadd.f32 %v780_v15, %v236_v32 }
  0x17   :  { %v491_v41 = vmax.f32 %v427_v31, 0.0  ;;  %v785_v43 = vunpack.c.h.bf16 %v919_v21 }
  0x18   :  { %9 = vsyncpa [#allocation3], 0  ;;  %553 = vst [vmem:[#allocation2 + $0x48] sm:$0xff] %v489_v35  ;;  %v429_v44 = vadd.f32 %v781_v25, %v237_v36  ;;  %v238_v45 = vadd.f32 %v1019_v7, %v167_v37  ;;  %v168_v46 = vmul.f32 %v657_v38, %v1005_v1  ;;  %v660_v47 = vunpack.c.l.bf16 %v889_v34  ;;  %v890_v48 = vld [vmem:[%s1341_s0 + $0x48] sm:$0xff]   ;;  %v891_v58 = vld [vmem:[%s1341_s0 + $0x50] sm:$0xff]  }
  0x19   :  { %v921_v49 = vld [vmem:[%s1342_s1 + $0x48] sm:$0xff]   ;;  %554 = vst [vmem:[#allocation2 + $0x50] sm:$0xff] %v490_v40  ;;  %555 = vst [vmem:[#allocation2 + $0x58] sm:$0xff] %v491_v41  ;;  %v492_v50 = vmax.f32 %v428_v42, 0.0  ;;  %v788_v51 = vunpack.c.l.bf16 %v920_v39  ;;  %v661_v52 = vunpack.c.h.bf16 %v889_v34  ;;  %v789_v53 = vunpack.c.h.bf16 %v920_v39  ;;  %v922_v63 = vld [vmem:[%s1342_s1 + $0x50] sm:$0xff]  }
  0x1a   :  { %v493_v54 = vmax.f32 %v429_v44, 0.0  ;;  %v430_v55 = vadd.f32 %v784_v33, %v238_v45  ;;  %v239_v56 = vadd.f32 %v1019_v7, %v168_v46  ;;  %v169_v57 = vmul.f32 %v660_v47, %v1005_v1  ;;  %v892_v10 = vld [vmem:[%s1341_s0 + $0x58] sm:$0xff]   ;;  %v893_v28 = vld [vmem:[%s1341_s0 + $0x60] sm:$0xff]   ;;  %v894_v42 = vld [vmem:[%s1341_s0 + $0x68] sm:$0xff]  }
  0x1b   :  { %556 = vst [vmem:[#allocation2 + $0x60] sm:$0xff] %v492_v50  ;;  %v170_v59 = vmul.f32 %v661_v52, %v1005_v1  ;;  %v664_v60 = vunpack.c.l.bf16 %v890_v48  ;;  %v792_v61 = vunpack.c.l.bf16 %v921_v49  ;;  %v665_v62 = vunpack.c.h.bf16 %v890_v48  ;;  %v923_v19 = vld [vmem:[%s1342_s1 + $0x58] sm:$0xff]   ;;  %v924_v33 = vld [vmem:[%s1342_s1 + $0x60] sm:$0xff]   ;;  %v895_v52 = vld [vmem:[%s1341_s0 + $0x70] sm:$0xff]  }
  0x1c   :  { %557 = vst [vmem:[#allocation2 + $0x68] sm:$0xff] %v493_v54  ;;  %v494_v0 = vmax.f32 %v430_v55, 0.0  ;;  %v431_v2 = vadd.f32 %v785_v43, %v239_v56  ;;  %v240_v3 = vadd.f32 %v1019_v7, %v169_v57  ;;  %v793_v4 = vunpack.c.h.bf16 %v921_v49  ;;  %v925_v43 = vld [vmem:[%s1342_s1 + $0x68] sm:$0xff]   ;;  %v926_v57 = vld [vmem:[%s1342_s1 + $0x70] sm:$0xff]  }
  0x1d   :  { %v241_v5 = vadd.f32 %v1019_v7, %v170_v59  ;;  %v171_v6 = vmul.f32 %v664_v60, %v1005_v1  ;;  %v172_v8 = vmul.f32 %v665_v62, %v1005_v1  ;;  %v668_v9 = vunpack.c.l.bf16 %v891_v58 }
  0x1e   :  { %558 = vst [vmem:[#allocation2 + $0x70] sm:$0xff] %v494_v0  ;;  %v495_v11 = vmax.f32 %v431_v2, 0.0  ;;  %v432_v12 = vadd.f32 %v788_v51, %v240_v3  ;;  %v796_v13 = vunpack.c.l.bf16 %v922_v63  ;;  %v669_v14 = vunpack.c.h.bf16 %v891_v58  ;;  %v896_v3 = vld [vmem:[%s1341_s0 + $0x78] sm:$0xff]  }
  0x1f   :  { %v433_v15 = vadd.f32 %v789_v53, %v241_v5  ;;  %v242_v16 = vadd.f32 %v1019_v7, %v171_v6  ;;  %v243_v17 = vadd.f32 %v1019_v7, %v172_v8  ;;  %v173_v18 = vmul.f32 %v668_v9, %v1005_v1 }
  0x20   :  { %559 = vst [vmem:[#allocation2 + $0x78] sm:$0xff] %v495_v11  ;;  %v496_v20 = vmax.f32 %v432_v12, 0.0  ;;  %v174_v21 = vmul.f32 %v669_v14, %v1005_v1  ;;  %v797_v22 = vunpack.c.h.bf16 %v922_v63  ;;  %v672_v23 = vunpack.c.l.bf16 %v892_v10 }
  0x21   :  { %v497_v24 = vmax.f32 %v433_v15, 0.0  ;;  %v434_v25 = vadd.f32 %v792_v61, %v242_v16  ;;  %v435_v26 = vadd.f32 %v793_v4, %v243_v17  ;;  %v244_v27 = vadd.f32 %v1019_v7, %v173_v18 }
  0x22   :  { %560 = vst [vmem:[#allocation2 + $0x80] sm:$0xff] %v496_v20  ;;  %v245_v29 = vadd.f32 %v1019_v7, %v174_v21  ;;  %v175_v30 = vmul.f32 %v672_v23, %v1005_v1  ;;  %v800_v31 = vunpack.c.l.bf16 %v923_v19  ;;  %v673_v32 = vunpack.c.h.bf16 %v892_v10 }
  0x23   :  { %561 = vst [vmem:[#allocation2 + $0x88] sm:$0xff] %v497_v24  ;;  %v498_v34 = vmax.f32 %v434_v25, 0.0  ;;  %v499_v35 = vmax.f32 %v435_v26, 0.0  ;;  %v436_v36 = vadd.f32 %v796_v13, %v244_v27  ;;  %v801_v37 = vunpack.c.h.bf16 %v923_v19  ;;  %v927_v13 = vld [vmem:[%s1342_s1 + $0x78] sm:$0xff]   ;;  %v928_v27 = vld [vmem:[%s1342_s1 + $0x80] sm:$0xff]  }
  0x24   :  { %v437_v38 = vadd.f32 %v797_v22, %v245_v29  ;;  %v246_v39 = vadd.f32 %v1019_v7, %v175_v30  ;;  %v176_v40 = vmul.f32 %v673_v32, %v1005_v1  ;;  %v676_v41 = vunpack.c.l.bf16 %v893_v28  ;;  %v897_v22 = vld [vmem:[%s1341_s0 + $0x80] sm:$0xff]  }
  0x25   :  { %562 = vst [vmem:[#allocation2 + $0x90] sm:$0xff] %v498_v34  ;;  %563 = vst [vmem:[#allocation2 + $0x98] sm:$0xff] %v499_v35  ;;  %v500_v44 = vmax.f32 %v436_v36, 0.0  ;;  %v804_v45 = vunpack.c.l.bf16 %v924_v33  ;;  %v677_v46 = vunpack.c.h.bf16 %v893_v28  ;;  %v805_v47 = vunpack.c.h.bf16 %v924_v33  ;;  %v898_v36 = vld [vmem:[%s1341_s0 + $0x88] sm:$0xff]  }
  0x26   :  { %v501_v48 = vmax.f32 %v437_v38, 0.0  ;;  %v438_v49 = vadd.f32 %v800_v31, %v246_v39  ;;  %v247_v50 = vadd.f32 %v1019_v7, %v176_v40  ;;  %v177_v51 = vmul.f32 %v676_v41, %v1005_v1 }
  0x27   :  { %564 = vst [vmem:[#allocation2 + $0xa0] sm:$0xff] %v500_v44  ;;  %v178_v53 = vmul.f32 %v677_v46, %v1005_v1  ;;  %v680_v54 = vunpack.c.l.bf16 %v894_v42  ;;  %v808_v55 = vunpack.c.l.bf16 %v925_v43  ;;  %v681_v56 = vunpack.c.h.bf16 %v894_v42  ;;  %v899_v46 = vld [vmem:[%s1341_s0 + $0x90] sm:$0xff]  }
  0x28   :  { %565 = vst [vmem:[#allocation2 + $0xa8] sm:$0xff] %v501_v48  ;;  %v502_v58 = vmax.f32 %v438_v49, 0.0  ;;  %v439_v59 = vadd.f32 %v801_v37, %v247_v50  ;;  %v248_v60 = vadd.f32 %v1019_v7, %v177_v51  ;;  %v809_v61 = vunpack.c.h.bf16 %v925_v43  ;;  %v929_v37 = vld [vmem:[%s1342_s1 + $0x88] sm:$0xff]   ;;  %v930_v51 = vld [vmem:[%s1342_s1 + $0x90] sm:$0xff]  }
  0x29   :  { %v249_v62 = vadd.f32 %v1019_v7, %v178_v53  ;;  %v179_v63 = vmul.f32 %v680_v54, %v1005_v1  ;;  %v180_v0 = vmul.f32 %v681_v56, %v1005_v1  ;;  %v684_v2 = vunpack.c.l.bf16 %v895_v52 }
  0x2a   :  { %566 = vst [vmem:[#allocation2 + $0xb0] sm:$0xff] %v502_v58  ;;  %v503_v4 = vmax.f32 %v439_v59, 0.0  ;;  %v440_v5 = vadd.f32 %v804_v45, %v248_v60  ;;  %v812_v6 = vunpack.c.l.bf16 %v926_v57  ;;  %v685_v8 = vunpack.c.h.bf16 %v895_v52  ;;  %v900_v60 = vld [vmem:[%s1341_s0 + $0x98] sm:$0xff]  }
  0x2b   :  { %v441_v9 = vadd.f32 %v805_v47, %v249_v62  ;;  %v250_v10 = vadd.f32 %v1019_v7, %v179_v63  ;;  %v251_v11 = vadd.f32 %v1019_v7, %v180_v0  ;;  %v181_v12 = vmul.f32 %v684_v2, %v1005_v1 }
  0x2c   :  { %567 = vst [vmem:[#allocation2 + $0xb8] sm:$0xff] %v503_v4  ;;  %v504_v14 = vmax.f32 %v440_v5, 0.0  ;;  %v182_v15 = vmul.f32 %v685_v8, %v1005_v1  ;;  %v813_v16 = vunpack.c.h.bf16 %v926_v57  ;;  %v688_v17 = vunpack.c.l.bf16 %v896_v3 }
  0x2d   :  { %v505_v18 = vmax.f32 %v441_v9, 0.0  ;;  %v442_v19 = vadd.f32 %v808_v55, %v250_v10  ;;  %v443_v20 = vadd.f32 %v809_v61, %v251_v11  ;;  %v252_v21 = vadd.f32 %v1019_v7, %v181_v12 }
  0x2e   :  { %568 = vst [vmem:[#allocation2 + $0xc0] sm:$0xff] %v504_v14  ;;  %v253_v23 = vadd.f32 %v1019_v7, %v182_v15  ;;  %v183_v24 = vmul.f32 %v688_v17, %v1005_v1  ;;  %v816_v25 = vunpack.c.l.bf16 %v927_v13  ;;  %v689_v26 = vunpack.c.h.bf16 %v896_v3 }
  0x2f   :  { %569 = vst [vmem:[#allocation2 + $0xc8] sm:$0xff] %v505_v18  ;;  %v506_v28 = vmax.f32 %v442_v19, 0.0  ;;  %v507_v29 = vmax.f32 %v443_v20, 0.0  ;;  %v444_v30 = vadd.f32 %v812_v6, %v252_v21  ;;  %v817_v31 = vunpack.c.h.bf16 %v927_v13  ;;  %v931_v6 = vld [vmem:[%s1342_s1 + $0x98] sm:$0xff]   ;;  %v932_v21 = vld [vmem:[%s1342_s1 + $0xa0] sm:$0xff]  }
  0x30   :  { %v445_v32 = vadd.f32 %v813_v16, %v253_v23  ;;  %v254_v33 = vadd.f32 %v1019_v7, %v183_v24  ;;  %v184_v34 = vmul.f32 %v689_v26, %v1005_v1  ;;  %v692_v35 = vunpack.c.l.bf16 %v897_v22  ;;  %v901_v16 = vld [vmem:[%s1341_s0 + $0xa0] sm:$0xff]  }
  0x31   :  { %570 = vst [vmem:[#allocation2 + $0xd0] sm:$0xff] %v506_v28  ;;  %571 = vst [vmem:[#allocation2 + $0xd8] sm:$0xff] %v507_v29  ;;  %v508_v38 = vmax.f32 %v444_v30, 0.0  ;;  %v820_v39 = vunpack.c.l.bf16 %v928_v27  ;;  %v693_v40 = vunpack.c.h.bf16 %v897_v22  ;;  %v821_v41 = vunpack.c.h.bf16 %v928_v27  ;;  %v902_v30 = vld [vmem:[%s1341_s0 + $0xa8] sm:$0xff]  }
  0x32   :  { %v509_v42 = vmax.f32 %v445_v32, 0.0  ;;  %v446_v43 = vadd.f32 %v816_v25, %v254_v33  ;;  %v255_v44 = vadd.f32 %v1019_v7, %v184_v34  ;;  %v185_v45 = vmul.f32 %v692_v35, %v1005_v1 }
  0x33   :  { %572 = vst [vmem:[#allocation2 + $0xe0] sm:$0xff] %v508_v38  ;;  %v186_v47 = vmul.f32 %v693_v40, %v1005_v1  ;;  %v696_v48 = vunpack.c.l.bf16 %v898_v36  ;;  %v824_v49 = vunpack.c.l.bf16 %v929_v37  ;;  %v697_v50 = vunpack.c.h.bf16 %v898_v36  ;;  %v903_v40 = vld [vmem:[%s1341_s0 + $0xb0] sm:$0xff]  }
  0x34   :  { %573 = vst [vmem:[#allocation2 + $0xe8] sm:$0xff] %v509_v42  ;;  %v510_v52 = vmax.f32 %v446_v43, 0.0  ;;  %v447_v53 = vadd.f32 %v817_v31, %v255_v44  ;;  %v256_v54 = vadd.f32 %v1019_v7, %v185_v45  ;;  %v825_v55 = vunpack.c.h.bf16 %v929_v37  ;;  %v933_v31 = vld [vmem:[%s1342_s1 + $0xa8] sm:$0xff]   ;;  %v934_v45 = vld [vmem:[%s1342_s1 + $0xb0] sm:$0xff]  }
  0x35   :  { %v257_v56 = vadd.f32 %v1019_v7, %v186_v47  ;;  %v187_v57 = vmul.f32 %v696_v48, %v1005_v1  ;;  %v188_v58 = vmul.f32 %v697_v50, %v1005_v1  ;;  %v700_v59 = vunpack.c.l.bf16 %v899_v46 }
  0x36   :  { %574 = vst [vmem:[#allocation2 + $0xf0] sm:$0xff] %v510_v52  ;;  %v511_v61 = vmax.f32 %v447_v53, 0.0  ;;  %v448_v62 = vadd.f32 %v820_v39, %v256_v54  ;;  %v828_v63 = vunpack.c.l.bf16 %v930_v51  ;;  %v701_v0 = vunpack.c.h.bf16 %v899_v46  ;;  %v904_v54 = vld [vmem:[%s1341_s0 + $0xb8] sm:$0xff]  }
  0x37   :  { %v449_v2 = vadd.f32 %v821_v41, %v257_v56  ;;  %v258_v3 = vadd.f32 %v1019_v7, %v187_v57  ;;  %v259_v4 = vadd.f32 %v1019_v7, %v188_v58  ;;  %v189_v5 = vmul.f32 %v700_v59, %v1005_v1 }
  0x38   :  { %575 = vst [vmem:[#allocation2 + $0xf8] sm:$0xff] %v511_v61  ;;  %v512_v8 = vmax.f32 %v448_v62, 0.0  ;;  %v190_v9 = vmul.f32 %v701_v0, %v1005_v1  ;;  %v829_v10 = vunpack.c.h.bf16 %v930_v51  ;;  %v704_v11 = vunpack.c.l.bf16 %v900_v60 }
  0x39   :  { %v513_v12 = vmax.f32 %v449_v2, 0.0  ;;  %v450_v13 = vadd.f32 %v824_v49, %v258_v3  ;;  %v451_v14 = vadd.f32 %v825_v55, %v259_v4  ;;  %v260_v15 = vadd.f32 %v1019_v7, %v189_v5 }
  0x3a   :  { %576 = vst [vmem:[#allocation2 + $0x100] sm:$0xff] %v512_v8  ;;  %v261_v17 = vadd.f32 %v1019_v7, %v190_v9  ;;  %v191_v18 = vmul.f32 %v704_v11, %v1005_v1  ;;  %v832_v19 = vunpack.c.l.bf16 %v931_v6  ;;  %v705_v20 = vunpack.c.h.bf16 %v900_v60 }
  0x3b   :  { %577 = vst [vmem:[#allocation2 + $0x108] sm:$0xff] %v513_v12  ;;  %v514_v22 = vmax.f32 %v450_v13, 0.0  ;;  %v515_v23 = vmax.f32 %v451_v14, 0.0  ;;  %v452_v24 = vadd.f32 %v828_v63, %v260_v15  ;;  %v833_v25 = vunpack.c.h.bf16 %v931_v6  ;;  %v935_v63 = vld [vmem:[%s1342_s1 + $0xb8] sm:$0xff]   ;;  %v936_v15 = vld [vmem:[%s1342_s1 + $0xc0] sm:$0xff]  }
  0x3c   :  { %v453_v26 = vadd.f32 %v829_v10, %v261_v17  ;;  %v262_v27 = vadd.f32 %v1019_v7, %v191_v18  ;;  %v192_v28 = vmul.f32 %v705_v20, %v1005_v1  ;;  %v708_v29 = vunpack.c.l.bf16 %v901_v16  ;;  %v905_v10 = vld [vmem:[%s1341_s0 + $0xc0] sm:$0xff]  }
  0x3d   :  { %578 = vst [vmem:[#allocation2 + $0x110] sm:$0xff] %v514_v22  ;;  %579 = vst [vmem:[#allocation2 + $0x118] sm:$0xff] %v515_v23  ;;  %v516_v32 = vmax.f32 %v452_v24, 0.0  ;;  %v836_v33 = vunpack.c.l.bf16 %v932_v21  ;;  %v709_v34 = vunpack.c.h.bf16 %v901_v16  ;;  %v837_v35 = vunpack.c.h.bf16 %v932_v21  ;;  %v906_v24 = vld [vmem:[%s1341_s0 + $0xc8] sm:$0xff]  }
  0x3e   :  { %v517_v36 = vmax.f32 %v453_v26, 0.0  ;;  %v454_v37 = vadd.f32 %v832_v19, %v262_v27  ;;  %v263_v38 = vadd.f32 %v1019_v7, %v192_v28  ;;  %v193_v39 = vmul.f32 %v708_v29, %v1005_v1 }
  0x3f   :  { %580 = vst [vmem:[#allocation2 + $0x120] sm:$0xff] %v516_v32  ;;  %v194_v41 = vmul.f32 %v709_v34, %v1005_v1  ;;  %v712_v42 = vunpack.c.l.bf16 %v902_v30  ;;  %v840_v43 = vunpack.c.l.bf16 %v933_v31  ;;  %v713_v44 = vunpack.c.h.bf16 %v902_v30  ;;  %v907_v34 = vld [vmem:[%s1341_s0 + $0xd0] sm:$0xff]  }
  0x40   :  { %581 = vst [vmem:[#allocation2 + $0x128] sm:$0xff] %v517_v36  ;;  %v518_v46 = vmax.f32 %v454_v37, 0.0  ;;  %v455_v47 = vadd.f32 %v833_v25, %v263_v38  ;;  %v264_v48 = vadd.f32 %v1019_v7, %v193_v39  ;;  %v841_v49 = vunpack.c.h.bf16 %v933_v31  ;;  %v937_v25 = vld [vmem:[%s1342_s1 + $0xc8] sm:$0xff]   ;;  %v938_v39 = vld [vmem:[%s1342_s1 + $0xd0] sm:$0xff]  }
  0x41   :  { %v265_v50 = vadd.f32 %v1019_v7, %v194_v41  ;;  %v195_v51 = vmul.f32 %v712_v42, %v1005_v1  ;;  %v196_v52 = vmul.f32 %v713_v44, %v1005_v1  ;;  %v716_v53 = vunpack.c.l.bf16 %v903_v40 }
  0x42   :  { %582 = vst [vmem:[#allocation2 + $0x130] sm:$0xff] %v518_v46  ;;  %v519_v55 = vmax.f32 %v455_v47, 0.0  ;;  %v456_v56 = vadd.f32 %v836_v33, %v264_v48  ;;  %v844_v57 = vunpack.c.l.bf16 %v934_v45  ;;  %v717_v58 = vunpack.c.h.bf16 %v903_v40  ;;  %v908_v48 = vld [vmem:[%s1341_s0 + $0xd8] sm:$0xff]  }
  0x43   :  { %v457_v59 = vadd.f32 %v837_v35, %v265_v50  ;;  %v266_v60 = vadd.f32 %v1019_v7, %v195_v51  ;;  %v267_v61 = vadd.f32 %v1019_v7, %v196_v52  ;;  %v197_v62 = vmul.f32 %v716_v53, %v1005_v1 }
  0x44   :  { %583 = vst [vmem:[#allocation2 + $0x138] sm:$0xff] %v519_v55  ;;  %v520_v0 = vmax.f32 %v456_v56, 0.0  ;;  %v198_v2 = vmul.f32 %v717_v58, %v1005_v1  ;;  %v845_v3 = vunpack.c.h.bf16 %v934_v45  ;;  %v720_v4 = vunpack.c.l.bf16 %v904_v54 }
  0x45   :  { %v521_v5 = vmax.f32 %v457_v59, 0.0  ;;  %v458_v6 = vadd.f32 %v840_v43, %v266_v60  ;;  %v459_v8 = vadd.f32 %v841_v49, %v267_v61  ;;  %v268_v9 = vadd.f32 %v1019_v7, %v197_v62 }
  0x46   :  { %584 = vst [vmem:[#allocation2 + $0x140] sm:$0xff] %v520_v0  ;;  %v269_v11 = vadd.f32 %v1019_v7, %v198_v2  ;;  %v199_v12 = vmul.f32 %v720_v4, %v1005_v1  ;;  %v848_v13 = vunpack.c.l.bf16 %v935_v63  ;;  %v721_v14 = vunpack.c.h.bf16 %v904_v54 }
  0x47   :  { %585 = vst [vmem:[#allocation2 + $0x148] sm:$0xff] %v521_v5  ;;  %v522_v16 = vmax.f32 %v458_v6, 0.0  ;;  %v523_v17 = vmax.f32 %v459_v8, 0.0  ;;  %v460_v18 = vadd.f32 %v844_v57, %v268_v9  ;;  %v849_v19 = vunpack.c.h.bf16 %v935_v63  ;;  %v939_v57 = vld [vmem:[%s1342_s1 + $0xd8] sm:$0xff]   ;;  %v940_v9 = vld [vmem:[%s1342_s1 + $0xe0] sm:$0xff]  }
  0x48   :  { %v461_v20 = vadd.f32 %v845_v3, %v269_v11  ;;  %v270_v21 = vadd.f32 %v1019_v7, %v199_v12  ;;  %v200_v22 = vmul.f32 %v721_v14, %v1005_v1  ;;  %v724_v23 = vunpack.c.l.bf16 %v905_v10  ;;  %v909_v3 = vld [vmem:[%s1341_s0 + $0xe0] sm:$0xff]  }
  0x49   :  { %586 = vst [vmem:[#allocation2 + $0x150] sm:$0xff] %v522_v16  ;;  %587 = vst [vmem:[#allocation2 + $0x158] sm:$0xff] %v523_v17  ;;  %v524_v26 = vmax.f32 %v460_v18, 0.0  ;;  %v852_v27 = vunpack.c.l.bf16 %v936_v15  ;;  %v725_v28 = vunpack.c.h.bf16 %v905_v10  ;;  %v853_v29 = vunpack.c.h.bf16 %v936_v15  ;;  %v910_v18 = vld [vmem:[%s1341_s0 + $0xe8] sm:$0xff]  }
  0x4a   :  { %v525_v30 = vmax.f32 %v461_v20, 0.0  ;;  %v462_v31 = vadd.f32 %v848_v13, %v270_v21  ;;  %v271_v32 = vadd.f32 %v1019_v7, %v200_v22  ;;  %v201_v33 = vmul.f32 %v724_v23, %v1005_v1 }
  0x4b   :  { %588 = vst [vmem:[#allocation2 + $0x160] sm:$0xff] %v524_v26  ;;  %v202_v35 = vmul.f32 %v725_v28, %v1005_v1  ;;  %v728_v36 = vunpack.c.l.bf16 %v906_v24  ;;  %v856_v37 = vunpack.c.l.bf16 %v937_v25  ;;  %v729_v38 = vunpack.c.h.bf16 %v906_v24  ;;  %v911_v28 = vld [vmem:[%s1341_s0 + $0xf0] sm:$0xff]  }
  0x4c   :  { %589 = vst [vmem:[#allocation2 + $0x168] sm:$0xff] %v525_v30  ;;  %v526_v40 = vmax.f32 %v462_v31, 0.0  ;;  %v463_v41 = vadd.f32 %v849_v19, %v271_v32  ;;  %v272_v42 = vadd.f32 %v1019_v7, %v201_v33  ;;  %v857_v43 = vunpack.c.h.bf16 %v937_v25  ;;  %v941_v19 = vld [vmem:[%s1342_s1 + $0xe8] sm:$0xff]   ;;  %v942_v33 = vld [vmem:[%s1342_s1 + $0xf0] sm:$0xff]  }
  0x4d   :  { %v273_v44 = vadd.f32 %v1019_v7, %v202_v35  ;;  %v203_v45 = vmul.f32 %v728_v36, %v1005_v1  ;;  %v204_v46 = vmul.f32 %v729_v38, %v1005_v1  ;;  %v732_v47 = vunpack.c.l.bf16 %v907_v34 }
  0x4e   :  { %590 = vst [vmem:[#allocation2 + $0x170] sm:$0xff] %v526_v40  ;;  %v527_v49 = vmax.f32 %v463_v41, 0.0  ;;  %v464_v50 = vadd.f32 %v852_v27, %v272_v42  ;;  %v860_v51 = vunpack.c.l.bf16 %v938_v39  ;;  %v733_v52 = vunpack.c.h.bf16 %v907_v34  ;;  %v912_v42 = vld [vmem:[%s1341_s0 + $0xf8] sm:$0xff]   ;;  %s971_s0 = smov [#allocation2]  }
  0x4f   :  { %v465_v53 = vadd.f32 %v853_v29, %v273_v44  ;;  %v274_v54 = vadd.f32 %v1019_v7, %v203_v45  ;;  %v275_v55 = vadd.f32 %v1019_v7, %v204_v46  ;;  %v205_v56 = vmul.f32 %v732_v47, %v1005_v1 }
  0x50   :  { %591 = vst [vmem:[#allocation2 + $0x178] sm:$0xff] %v527_v49  ;;  %v528_v58 = vmax.f32 %v464_v50, 0.0  ;;  %v206_v59 = vmul.f32 %v733_v52, %v1005_v1  ;;  %v861_v60 = vunpack.c.h.bf16 %v938_v39  ;;  %v736_v61 = vunpack.c.l.bf16 %v908_v48 }
  0x51   :  { %v529_v62 = vmax.f32 %v465_v53, 0.0  ;;  %v466_v63 = vadd.f32 %v856_v37, %v274_v54  ;;  %v467_v0 = vadd.f32 %v857_v43, %v275_v55  ;;  %v276_v2 = vadd.f32 %v1019_v7, %v205_v56 }
  0x52   :  { %592 = vst [vmem:[#allocation2 + $0x180] sm:$0xff] %v528_v58  ;;  %v277_v4 = vadd.f32 %v1019_v7, %v206_v59  ;;  %v207_v5 = vmul.f32 %v736_v61, %v1005_v1  ;;  %v864_v6 = vunpack.c.l.bf16 %v939_v57  ;;  %v737_v8 = vunpack.c.h.bf16 %v908_v48 }
  0x53   :  { %593 = vst [vmem:[#allocation2 + $0x188] sm:$0xff] %v529_v62  ;;  %v530_v10 = vmax.f32 %v466_v63, 0.0  ;;  %v531_v11 = vmax.f32 %v467_v0, 0.0  ;;  %v468_v12 = vadd.f32 %v860_v51, %v276_v2  ;;  %v865_v13 = vunpack.c.h.bf16 %v939_v57  ;;  %v943_v51 = vld [vmem:[%s1342_s1 + $0xf8] sm:$0xff]   ;;  %s613_s1 = sshll.u32 %s971_s0, 4  ;;  %s614_s1 = int_to_ptr.vmem [resolvable:$true] %s613_s1 }
  0x54   :  { %v469_v14 = vadd.f32 %v861_v60, %v277_v4  ;;  %v278_v15 = vadd.f32 %v1019_v7, %v207_v5  ;;  %v208_v16 = vmul.f32 %v737_v8, %v1005_v1  ;;  %v740_v17 = vunpack.c.l.bf16 %v909_v3  ;;  %s947_s7 = scalar_lea.vmem %s614_s1, 8192  ;;  %p952_p1 = scmp.lt.s32.totalorder %s614_s1, %s614_s1 }
  0x55   :  { %594 = vst [vmem:[#allocation2 + $0x190] sm:$0xff] %v530_v10  ;;  %595 = vst [vmem:[#allocation2 + $0x198] sm:$0xff] %v531_v11  ;;  %v532_v20 = vmax.f32 %v468_v12, 0.0  ;;  %v868_v21 = vunpack.c.l.bf16 %v940_v9  ;;  %v741_v22 = vunpack.c.h.bf16 %v909_v3  ;;  %v869_v23 = vunpack.c.h.bf16 %v940_v9  ;;  %p948_p0 = scmp.ne.s32.totalorder %s614_s1, %s947_s7  ;;  %p953_p2 = scmp.lt.s32.totalorder %s947_s7, %s947_s7 }
  0x56   :  { %v533_v24 = vmax.f32 %v469_v14, 0.0  ;;  %v470_v25 = vadd.f32 %v864_v6, %v278_v15  ;;  %v279_v26 = vadd.f32 %v1019_v7, %v208_v16  ;;  %v209_v27 = vmul.f32 %v740_v17, %v1005_v1 }
  0x57   :  { %596 = vst [vmem:[#allocation2 + $0x1a0] sm:$0xff] %v532_v20  ;;  %v210_v29 = vmul.f32 %v741_v22, %v1005_v1  ;;  %v744_v30 = vunpack.c.l.bf16 %v910_v18  ;;  %v872_v31 = vunpack.c.l.bf16 %v941_v19  ;;  %v745_v32 = vunpack.c.h.bf16 %v910_v18  ;;  %p954_p3 = por %p953_p2, %p952_p1 }
  0x58   :  { %597 = vst [vmem:[#allocation2 + $0x1a8] sm:$0xff] %v533_v24  ;;  %v534_v34 = vmax.f32 %v470_v25, 0.0  ;;  %v471_v35 = vadd.f32 %v865_v13, %v279_v26  ;;  %v280_v36 = vadd.f32 %v1019_v7, %v209_v27  ;;  %v873_v37 = vunpack.c.h.bf16 %v941_v19 }
  0x59   :  { %v281_v38 = vadd.f32 %v1019_v7, %v210_v29  ;;  %v211_v39 = vmul.f32 %v744_v30, %v1005_v1  ;;  %v212_v40 = vmul.f32 %v745_v32, %v1005_v1  ;;  %v748_v41 = vunpack.c.l.bf16 %v911_v28  ;;  %p955_p4 = pnand %p954_p3, %p948_p0 }
  0x5a   :  { %598 = vst [vmem:[#allocation2 + $0x1b0] sm:$0xff] %v534_v34  ;;  %v535_v43 = vmax.f32 %v471_v35, 0.0  ;;  %v472_v44 = vadd.f32 %v868_v21, %v280_v36  ;;  %v876_v45 = vunpack.c.l.bf16 %v942_v33  ;;  %v749_v46 = vunpack.c.h.bf16 %v911_v28 }
  0x5b   :  { %v473_v47 = vadd.f32 %v869_v23, %v281_v38  ;;  %v282_v48 = vadd.f32 %v1019_v7, %v211_v39  ;;  %v283_v49 = vadd.f32 %v1019_v7, %v212_v40  ;;  %v213_v50 = vmul.f32 %v748_v41, %v1005_v1 }
  0x5c   :  { %599 = vst [vmem:[#allocation2 + $0x1b8] sm:$0xff] %v535_v43  ;;  %v536_v52 = vmax.f32 %v472_v44, 0.0  ;;  %v214_v53 = vmul.f32 %v749_v46, %v1005_v1  ;;  %v877_v54 = vunpack.c.h.bf16 %v942_v33  ;;  %v752_v55 = vunpack.c.l.bf16 %v912_v42 }
  0x5d   :  { %v537_v56 = vmax.f32 %v473_v47, 0.0  ;;  %v474_v57 = vadd.f32 %v872_v31, %v282_v48  ;;  %v475_v58 = vadd.f32 %v873_v37, %v283_v49  ;;  %v284_v59 = vadd.f32 %v1019_v7, %v213_v50 }
  0x5e   :  { %600 = vst [vmem:[#allocation2 + $0x1c0] sm:$0xff] %v536_v52  ;;  %v285_v60 = vadd.f32 %v1019_v7, %v214_v53  ;;  %v215_v61 = vmul.f32 %v752_v55, %v1005_v1  ;;  %v880_v62 = vunpack.c.l.bf16 %v943_v51  ;;  %v753_v63 = vunpack.c.h.bf16 %v912_v42 }
  0x5f   :  { %601 = vst [vmem:[#allocation2 + $0x1c8] sm:$0xff] %v537_v56  ;;  %v538_v0 = vmax.f32 %v474_v57, 0.0  ;;  %v539_v2 = vmax.f32 %v475_v58, 0.0  ;;  %v476_v3 = vadd.f32 %v876_v45, %v284_v59  ;;  %v881_v8 = vunpack.c.h.bf16 %v943_v51 }
  0x60   :  { %v477_v4 = vadd.f32 %v877_v54, %v285_v60  ;;  %v286_v5 = vadd.f32 %v1019_v7, %v215_v61  ;;  %v216_v6 = vmul.f32 %v753_v63, %v1005_v1 }
  0x61   :  { %602 = vst [vmem:[#allocation2 + $0x1d0] sm:$0xff] %v538_v0  ;;  %603 = vst [vmem:[#allocation2 + $0x1d8] sm:$0xff] %v539_v2  ;;  %v540_v9 = vmax.f32 %v476_v3, 0.0 }
  0x62   :  { %v541_v10 = vmax.f32 %v477_v4, 0.0  ;;  %v478_v11 = vadd.f32 %v880_v62, %v286_v5  ;;  %v287_v12 = vadd.f32 %v1019_v7, %v216_v6 }
  0x63   :  { %604 = vst [vmem:[#allocation2 + $0x1e0] sm:$0xff] %v540_v9 }
  0x64   :  { %605 = vst [vmem:[#allocation2 + $0x1e8] sm:$0xff] %v541_v10  ;;  %v542_v13 = vmax.f32 %v478_v11, 0.0  ;;  %v479_v14 = vadd.f32 %v881_v8, %v287_v12 }
  0x66   :  { %606 = vst [vmem:[#allocation2 + $0x1f0] sm:$0xff] %v542_v13  ;;  %v543_v15 = vmax.f32 %v479_v14, 0.0 }
  0x68   :  { %607 = vst [vmem:[#allocation2 + $0x1f8] sm:$0xff] %v543_v15 }
  0x69   :  { %958 = shalt.err (!%p955_p4)
}
  0x6a   :  { %s959_s10 = scalar_lea.hbm %s1345_s4, 8192 }
  0x6b   :  { %p960_p5 = scmp.ne.s32.totalorder %s1345_s4, %s959_s10  ;;  %p963_p6 = scmp.lt.u32.totalorder %s959_s10, %s1345_s4 }
  0x6d   :  { %p965_p7 = pnand %p963_p6, %p960_p5 }
  0x6f   :  { %968 = shalt.err (!%p965_p7)
}
  0x70   :  { %s972_s15 = smov 128   ;;  %s973_s16 = smov 8  }
  0x71   :  { %619 = dma.vmem_to_hbm [thread:$0]  %s614_s1, 8192, %s1345_s4, [#allocation3], %s972_s15, %s972_s15, %s973_s16  }
  0x72   :  { %969 = dma.done.wait [#allocation3], 8192  }
  0x73   :  { %970 = vsyncadd [#allocation3], 4294959104 }
  0x74   :  { %623 = vsyncpa [#allocation3], 1 }

// kernel: bottleneck_forward_nhwc.5
= control target key start
LH: loop header
LB: loop body
LE: loop exit
PB: predicated region body
PF: predicated region fallthrough
CT: control target
= control target key end

     0   :  { %v14118_v1 = vmov 0   ;;  %vm400_vm0 = vsmask.f32 256  ;;  %vm510_vm1 = vsmask.f32 7938  ;;  %vm399_vm2 = vcmask 1040384   ;;  %s17261_s3 = inlined_call_operand.vmem [shape: bf16[3,3,128,128], index: 3, kind: input, shape index: {}]   ;;  %s17262_s0 = inlined_call_operand.vmem [shape: bf16[2,16,16,128], index: 0, kind: input, shape index: {}]   ;;  %s17263_s1 = inlined_call_operand.vmem [shape: f32[1,128], index: 1, kind: input, shape index: {}]   ;;  %s17264_s2 = inlined_call_operand.vmem [shape: f32[1,128], index: 2, kind: input, shape index: {}]   ;;  %s17265_s4 = inlined_call_operand.vmem [shape: bf16[2,16,16,128], index: 4, kind: output, shape index: {0}]   ;;  %s17266_s5 = inlined_call_operand.vmem [shape: f32[1,2,128], index: 5, kind: output, shape index: {1}]  }
   0x1   :  { %v13710_v0 = vld [vmem:[%s17261_s3 + $0x40] sm:$0xff]   ;;  %386 = vst [vmem:[#allocation2] sm:$0xf] %v14118_v1  ;;  %387 = vst [vmem:[#allocation2 + $0x4] sm:$0xf] %v14118_v1  ;;  %v13712_v3 = vld [vmem:[%s17261_s3 + $0x48] sm:$0xff]  }
   0x2   :  { %388 = vst [vmem:[#allocation2 + $0x8] sm:$0x1] %v14118_v1  ;;  %389 = vst [vmem:[#allocation2 + $0xd8] sm:$0xf] %v14118_v1  ;;  %v13711_v2 = vld [vmem:[%s17261_s3 + $0x100] sm:$0xff]   ;;  %12461 = vmatprep.subr.bf16.mxu1 %v13710_v0  ;;  %v13713_v4 = vld [vmem:[%s17261_s3 + $0x108] sm:$0xff]  }
   0x3   :  { %390 = vst [vmem:[#allocation2 + $0xdc] sm:$0xf] %v14118_v1  ;;  %391 = vst [vmem:[#allocation2 + $0xe0] sm:$0x1] %v14118_v1  ;;  %12781 = vmatprep.subr.bf16.mxu0 %v13711_v2  ;;  %12462 = vmatpush3.bf16.msra.mxu1 %v13710_v0  ;;  %v13714_v5 = vld [vmem:[%s17261_s3 + $0x50] sm:$0xff]   ;;  %v13716_v7 = vld [vmem:[%s17261_s3 + $0x58] sm:$0xff]  }
   0x4   :  { %393 = vst [vmem:[#allocation2 + $0xcc] sm:$0xf] %v14118_v1  ;;  %394 = vst [vmem:[#allocation2 + $0xd0] sm:$0xf] %v14118_v1  ;;  %12782 = vmatpush3.bf16.msra.mxu0 %v13711_v2  ;;  %12463 = vmatprep.subr.bf16.mxu1 %v13712_v3  ;;  %v13715_v6 = vld [vmem:[%s17261_s3 + $0x110] sm:$0xff]   ;;  %v13717_v8 = vld [vmem:[%s17261_s3 + $0x118] sm:$0xff]  }
   0x5   :  { %395 = vst [vmem:[#allocation2 + $0xd4] sm:$0x1] %v14118_v1  ;;  %396 = vst [vmem:[#allocation2 + $0x1a4] sm:$0xf] %v14118_v1  ;;  %12783 = vmatprep.subr.bf16.mxu0 %v13713_v4  ;;  %v13718_v9 = vld [vmem:[%s17261_s3 + $0x60] sm:$0xff]   ;;  %v13720_v11 = vld [vmem:[%s17261_s3 + $0x68] sm:$0xff]  }
   0x6   :  { %397 = vst [vmem:[#allocation2 + $0x1a8] sm:$0xf] %v14118_v1  ;;  %398 = vst [vmem:[#allocation2 + $0x1ac] sm:$0x1] %v14118_v1  ;;  %v13719_v10 = vld [vmem:[%s17261_s3 + $0x120] sm:$0xff]   ;;  %v13721_v12 = vld [vmem:[%s17261_s3 + $0x128] sm:$0xff]  }
   0x7   :  { %12464 = vmatpush3.bf16.msra.mxu1 %v13712_v3  ;;  %vm14186_vm3 = vmand %vm399_vm2, %vm400_vm0  ;;  %v17293_v17 = vmov 0  ;;  %v11752_v19 = vld [vmem:[%s17262_s0] sm:$0xff]   ;;  %v13722_v20 = vld [vmem:[%s17261_s3 + $0x70] sm:$0xff]   ;;  %vm1423_vm5 = vcmask 1043456   ;;  %vm1761_vm6 = vsmask.f32 3328 }
   0x8   :  { %12784 = vmatpush3.bf16.msra.mxu0 %v13713_v4  ;;  %12465 = vmatprep.subr.bf16.mxu1 %v13714_v5  ;;  %v402_v14 = vld [vmem:[#allocation2] sm:$0x1]  ;;  %vm14193_vm4 = vmand %vm399_vm2, %vm510_vm1  ;;  %v1650_v18 = vld [vmem:[#allocation2 + $0x4] sm:$0xf]  ;;  %v11753_v25 = vunpack.c.l.bf16 %v11752_v19  ;;  %v11754_v27 = vunpack.c.h.bf16 %v11752_v19  ;;  %vm1762_vm7 = vsmask.f32 7440 }
   0x9   :  { %12785 = vmatprep.subr.bf16.mxu0 %v13715_v6  ;;  %v512_v15 = vld [vmem:[#allocation2 + $0x8] sm:$0x1]  ;;  %v403_v16 = vsel %vm14186_vm3, 0, %v402_v14  ;;  %v17294_v17 = vsel %vm14193_vm4, 4294967295, %v17293_v17  ;;  %v1774_v22 = vshll.u32 %v1650_v18, 16  ;;  %v1778_v23 = vshrl.u32 %v1650_v18, 16  ;;  %vm14254_vm9 = vmor %vm1761_vm6, %vm1762_vm7 }
   0xa   :  { %17295 = vst [vmem:[#allocation3_spill] sm:$0xff] %v17294_v17  ;;  %404 = vst [vmem:[#allocation2] sm:$0x1] %v403_v16  ;;  %v513_v21 = vsel %vm14193_vm4, 0, %v512_v15  ;;  %v14208_v24 = vld [vmem:[%s17263_s1] ss:$0 sm:$0xff] }
   0xb   :  { %12466 = vmatpush3.bf16.msra.mxu1 %v13714_v5  ;;  %514 = vst [vmem:[#allocation2 + $0x8] sm:$0x1] %v513_v21  ;;  %v14213_v26 = vld [vmem:[%s17264_s2] ss:$0 sm:$0xff]  ;;  %v405_v28 = vld [vmem:[#allocation2 + $0xc] sm:$0x1]  ;;  %v156_v33 = vmul.f32 %v11753_v25, %v14208_v24  ;;  %v157_v35 = vmul.f32 %v11754_v27, %v14208_v24  ;;  %vm14273_vm10 = vmand %vm1423_vm5, %vm510_vm1 }
   0xc   :  { %12786 = vmatpush3.bf16.msra.mxu0 %v13715_v6  ;;  %12467 = vmatprep.subr.bf16.mxu1 %v13716_v7  ;;  %v515_v29 = vld [vmem:[#allocation2 + $0x14] sm:$0x1]  ;;  %v14218_v31 = vrot.slane %v1774_v22, 5  ;;  %v1780_v32 = vrot.slane %v1778_v23, 4  ;;  %v406_v34 = vsel %vm14186_vm3, 0, %v405_v28  ;;  %v12039_v37 = vld [vmem:[%s17262_s0 + $0x8] sm:$0xff]  }
   0xd   :  { %12787 = vmatprep.subr.bf16.mxu0 %v13717_v8  ;;  %v13723_v30 = vld [vmem:[%s17261_s3 + $0x130] sm:$0xff]   ;;  %407 = vst [vmem:[#allocation2 + $0xc] sm:$0x1] %v406_v34  ;;  %v516_v36 = vsel %vm14193_vm4, 0, %v515_v29  ;;  %v226_v39 = vadd.f32 %v14213_v26, %v156_v33  ;;  %v11757_v40 = vunpack.c.l.bf16 %v12039_v37  ;;  %v11758_v41 = vunpack.c.h.bf16 %v12039_v37  ;;  %v408_v43 = vld [vmem:[#allocation2 + $0x18] sm:$0x1] }
   0xe   :  { %v1781_v38 = vor.u32 %v1780_v32, %v14218_v31  ;;  %517 = vst [vmem:[#allocation2 + $0x14] sm:$0x1] %v516_v36  ;;  %v227_v42 = vadd.f32 %v14213_v26, %v157_v35  ;;  %v518_v44 = vld [vmem:[#allocation2 + $0x20] sm:$0x1]  ;;  %v13724_v45 = vld [vmem:[%s17261_s3 + $0x78] sm:$0xff]   ;;  %v14243_v50 = vld [vmem:[%s17262_s0 + $0x10] sm:$0xff]  }
   0xf   :  { %12468 = vmatpush3.bf16.msra.mxu1 %v13716_v7  ;;  %v13725_v46 = vld [vmem:[%s17261_s3 + $0x138] sm:$0xff]   ;;  %v290_v47 = vmax.f32 %v226_v39, 0.0  ;;  %vm780_vm8 = vsmask.f32 4368  ;;  %v158_v48 = vmul.f32 %v11757_v40, %v14208_v24  ;;  %v159_v49 = vmul.f32 %v11758_v41, %v14208_v24  ;;  %v14261_v6 = vld [vmem:[%s17261_s3] sm:$0xff]   ;;  %v13794_v13 = vld [vmem:[%s17261_s3 + $0x1d0] sm:$0xff]  }
  0x10   :  { %12788 = vmatpush3.bf16.msra.mxu0 %v13717_v8  ;;  %12469 = vmatprep.subr.bf16.mxu1 %v13718_v9  ;;  %v1782_v52 = vrot.slane %v1781_v38, 4  ;;  %v291_v53 = vmax.f32 %v227_v42, 0.0  ;;  %v409_v54 = vsel %vm14186_vm3, 0, %v408_v43  ;;  %v519_v55 = vsel %vm14193_vm4, 0, %v518_v44  ;;  %v411_v27 = vld [vmem:[#allocation2 + $0x24] sm:$0x1]  ;;  %vm14280_vm11 = vmor %vm400_vm0, %vm780_vm8 }
  0x11   :  { %12789 = vmatprep.subr.bf16.mxu0 %v13719_v10  ;;  %v1649_v51 = vld [vmem:[#allocation2] sm:$0xf]  ;;  %v11623_v59 = vpack.c.bf16 %v290_v47, %v290_v47  ;;  %v228_v60 = vadd.f32 %v14213_v26, %v158_v48  ;;  %410 = vst [vmem:[#allocation2 + $0x18] sm:$0x1] %v409_v54  ;;  %520 = vst [vmem:[#allocation2 + $0x20] sm:$0x1] %v519_v55  ;;  %v229_v63 = vadd.f32 %v14213_v26, %v159_v49 }
  0x12   :  { %v1729_v56 = vld [vmem:[#allocation2 + $0x8] sm:$0x1]  ;;  %v1765_v57 = vshrl.u32 %v1649_v51, 16  ;;  %v1768_v58 = vshll.u32 %v1649_v51, 16  ;;  %v11624_v62 = vpack.c.bf16 %v291_v53, %v291_v53  ;;  %v11761_v0 = vunpack.c.l.bf16 %v14243_v50  ;;  %v521_v38 = vld [vmem:[#allocation2 + $0x2c] sm:$0x1] }
  0x13   :  { %12470 = vmatpush3.bf16.msra.mxu1 %v13718_v9  ;;  %v1784_v61 = vshll.u32 %v1729_v56, 16  ;;  %v17296_v1 = vmov 0  ;;  %v783_v4 = vshrl.u32 %v11623_v59, 16  ;;  %v786_v5 = vshll.u32 %v11623_v59, 16  ;;  %v12041_v43 = vld [vmem:[%s17262_s0 + $0x18] sm:$0xff]   ;;  %v14305_v53 = vld [vmem:[%s17262_s0 + $0x20] sm:$0xff]  }
  0x14   :  { %12790 = vmatpush3.bf16.msra.mxu0 %v13719_v10  ;;  %12471 = vmatprep.subr.bf16.mxu1 %v13720_v11  ;;  %v17297_v1 = vsel %vm14254_vm9, 4294967295, %v17296_v1  ;;  %v1767_v2 = vrot.slane %v1765_v57, 4  ;;  %v1770_v3 = vrot.slane %v1768_v58, 5  ;;  %v791_v8 = vshrl.u32 %v11624_v62, 16  ;;  %v14266_v10 = vld [vmem:[%s17261_s3 + $0x140] sm:$0xff]  }
  0x15   :  { %12791 = vmatprep.subr.bf16.mxu0 %v13721_v12  ;;  %17298 = vst [vmem:[#allocation4_spill] sm:$0xff] %v17297_v1  ;;  %v1786_v7 = vrot.slane %v1784_v61, 5  ;;  %v794_v9 = vshll.u32 %v11624_v62, 16  ;;  %v785_v14 = vrot.slane %v783_v4, 7  ;;  %v293_v15 = vmax.f32 %v229_v63, 0.0 }
  0x16   :  { %v11762_v16 = vunpack.c.h.bf16 %v14243_v50  ;;  %v793_v19 = vrot.slane %v791_v8, 7  ;;  %v1425_v21 = vld [vmem:[#allocation2 + $0xc] sm:$0xf]  ;;  %v1429_v22 = vld [vmem:[#allocation2 + $0x14] sm:$0x1]  ;;  %v160_v25 = vmul.f32 %v11761_v0, %v14208_v24  ;;  %v412_v51 = vsel %vm14186_vm3, 0, %v411_v27 }
  0x17   :  { %12472 = vmatpush3.bf16.msra.mxu1 %v13720_v11  ;;  %v292_v11 = vmax.f32 %v228_v60, 0.0  ;;  %v1787_v18 = vsel %vm14254_vm9, %v1782_v52, %v1786_v7  ;;  %v789_v32 = vrot.slane %v785_v14, 4  ;;  %v11626_v33 = vpack.c.bf16 %v293_v15, %v293_v15  ;;  %v414_v52 = vld [vmem:[#allocation2 + $0x30] sm:$0x1]  ;;  %413 = vst [vmem:[#allocation2 + $0x24] sm:$0x1] %v412_v51 }
  0x18   :  { %12792 = vmatpush3.bf16.msra.mxu0 %v13721_v12  ;;  %12473 = vmatprep.subr.bf16.mxu1 %v13722_v20  ;;  %v1771_v12 = vor.u32 %v1770_v3, %v1767_v2  ;;  %v796_v34 = vor.u32 %v794_v9, %v793_v19  ;;  %v798_v35 = vrot.slane %v793_v19, 4  ;;  %v1432_v48 = vld [vmem:[#allocation2 + $0x18] sm:$0xf]  ;;  %v161_v49 = vmul.f32 %v11762_v16, %v14208_v24  ;;  %v1436_v56 = vld [vmem:[#allocation2 + $0x20] sm:$0x1] }
  0x19   :  { %12793 = vmatprep.subr.bf16.mxu0 %v13723_v30  ;;  %v11625_v23 = vpack.c.bf16 %v292_v11, %v292_v11  ;;  %v808_v41 = vshrl.u32 %v11626_v33, 16  ;;  %v811_v42 = vshll.u32 %v11626_v33, 16  ;;  %v230_v50 = vadd.f32 %v14213_v26, %v160_v25  ;;  %v524_v59 = vld [vmem:[#allocation2 + $0x38] sm:$0x1] }
  0x1a   :  { %v1772_v28 = vrot.slane %v1771_v12, 4  ;;  %v522_v57 = vsel %vm14193_vm4, 0, %v521_v38  ;;  %v11765_v58 = vunpack.c.l.bf16 %v12041_v43  ;;  %v231_v62 = vadd.f32 %v14213_v26, %v161_v49 }
  0x1b   :  { %12474 = vmatpush3.bf16.msra.mxu1 %v13722_v20  ;;  %v800_v36 = vshrl.u32 %v11625_v23, 16  ;;  %v803_v37 = vshll.u32 %v11625_v23, 16  ;;  %v294_v63 = vmax.f32 %v230_v50, 0.0  ;;  %523 = vst [vmem:[#allocation2 + $0x2c] sm:$0x1] %v522_v57  ;;  %v11766_v2 = vunpack.c.h.bf16 %v12041_v43 }
  0x1c   :  { %12794 = vmatpush3.bf16.msra.mxu0 %v13723_v30  ;;  %12475 = vmatprep.subr.bf16.mxu1 %v13724_v45  ;;  %v788_v30 = vor.u32 %v786_v5, %v785_v14  ;;  %v1777_v39 = vsel %vm14254_vm9, %v1772_v28, %v14218_v31  ;;  %v810_v31 = vrot.slane %v808_v41, 7  ;;  %v162_v3 = vmul.f32 %v11765_v58, %v14208_v24 }
  0x1d   :  { %12795 = vmatprep.subr.bf16.mxu0 %v13725_v46  ;;  %v10991_v44 = vcombine.low %v1777_v39, %v1787_v18  ;;  %v802_v47 = vrot.slane %v800_v36, 7  ;;  %v415_v4 = vsel %vm14186_vm3, 0, %v414_v52  ;;  %v295_v8 = vmax.f32 %v231_v62, 0.0 }
  0x1e   :  { %v1426_v40 = vsel %vm14273_vm10, %v788_v30, %v1425_v21  ;;  %v813_v60 = vor.u32 %v811_v42, %v810_v31  ;;  %v815_v61 = vrot.slane %v810_v31, 4  ;;  %v14319_v9 = vpack.c.bf16 %v294_v63, %v294_v63  ;;  %416 = vst [vmem:[#allocation2 + $0x30] sm:$0x1] %v415_v4 }
  0x1f   :  { %12476 = vmatpush3.bf16.msra.mxu1 %v13724_v45  ;;  %v797_v45 = vsel %vm14280_vm11, %v789_v32, %v796_v34  ;;  %1427 = vst [vmem:[#allocation2 + $0xc] sm:$0xf] %v1426_v40  ;;  %12477 = vmatprep.mubr.bf16.mxu1 %v10991_v44  ;;  %v805_v54 = vor.u32 %v803_v37, %v802_v47  ;;  %v806_v55 = vrot.slane %v802_v47, 4  ;;  %v525_v12 = vsel %vm14193_vm4, 0, %v524_v59 }
  0x20   :  { %12796 = vmatpush3.bf16.msra.mxu0 %v13725_v46  ;;  %12541 = vmatprep.subr.bf16.mxu1 %v14261_v6  ;;  %v1430_v46 = vsel %vm14186_vm3, %v798_v35, %v1429_v22  ;;  %1428 = vst [vmem:[#allocation2 + $0x10] sm:$0xf] %v797_v45  ;;  %v1437_v7 = vsel %vm14186_vm3, %v815_v61, %v1436_v56  ;;  %v11769_v14 = vunpack.c.l.bf16 %v14305_v53  ;;  %v817_v19 = vshrl.u32 %v14319_v9, 16 }
  0x21   :  { %12861 = vmatprep.subr.bf16.mxu0 %v14266_v10  ;;  %1431 = vst [vmem:[#allocation2 + $0x14] sm:$0x1] %v1430_v46  ;;  %v1433_v0 = vsel %vm14273_vm10, %v805_v54, %v1432_v48  ;;  %v814_v5 = vsel %vm14280_vm11, %v806_v55, %v813_v60  ;;  %1438 = vst [vmem:[#allocation2 + $0x20] sm:$0x1] %v1437_v7  ;;  %v163_v11 = vmul.f32 %v11766_v2, %v14208_v24  ;;  %vm3639_vm12 = vcmask 1042432  }
  0x22   :  { %1434 = vst [vmem:[#allocation2 + $0x18] sm:$0xf] %v1433_v0  ;;  %1435 = vst [vmem:[#allocation2 + $0x1c] sm:$0xf] %v814_v5  ;;  %v14325_v18 = vpack.c.bf16 %v295_v8, %v295_v8  ;;  %v820_v21 = vshll.u32 %v14319_v9, 16  ;;  %v14330_v22 = vadd.f32 %v14213_v26, %v162_v3  ;;  %v11770_v32 = vunpack.c.h.bf16 %v14305_v53 }
  0x23   :  { %526 = vst [vmem:[#allocation2 + $0x38] sm:$0x1] %v525_v12  ;;  %v14333_v30 = vadd.f32 %v14213_v26, %v163_v11  ;;  %v14337_v37 = vmul.f32 %v11769_v14, %v14208_v24  ;;  %vm3640_vm13 = vcmask 1046532  }
  0x24   :  { %vm14956_vm14 = vmor %vm3639_vm12, %vm3640_vm13 }
  0x26   :  { %v1651_v15 = vld [vmem:[#allocation2 + $0xc] sm:$0xf] }
  0x27   :  { %v5086_v16 = vld [vmem:[#allocation2 + $0xc] sm:$0xf]  ;;  %v1652_v23 = vld [vmem:[#allocation2 + $0x10] sm:$0xf]  ;;  %v1789_v27 = vshrl.u32 %v1651_v15, 16  ;;  %v1792_v28 = vshll.u32 %v1651_v15, 16 }
  0x28   :  { %v1730_v25 = vld [vmem:[#allocation2 + $0x14] sm:$0x1]  ;;  %v1798_v33 = vshll.u32 %v1652_v23, 16  ;;  %v1802_v34 = vshrl.u32 %v1652_v23, 16  ;;  %v5087_v36 = vld [vmem:[#allocation2 + $0x10] sm:$0xf] }
  0x29   :  { %v1808_v35 = vshll.u32 %v1730_v25, 16  ;;  %v1791_v38 = vrot.slane %v1789_v27, 4  ;;  %v1794_v39 = vrot.slane %v1792_v28, 5  ;;  %v14339_v40 = vld [vmem:[#allocation2 + $0x14] sm:$0x1]  ;;  %v5183_v41 = vshrl.u32 %v5086_v16, 16 }
  0x2a   :  { %v5186_v42 = vshll.u32 %v5086_v16, 16  ;;  %v1800_v43 = vrot.slane %v1798_v33, 5  ;;  %v1804_v44 = vrot.slane %v1802_v34, 4  ;;  %v5192_v46 = vshll.u32 %v5087_v36, 16  ;;  %v5089_v50 = vld [vmem:[#allocation2 + $0x18] sm:$0xf] }
  0x2b   :  { %v1810_v45 = vrot.slane %v1808_v35, 5  ;;  %v1795_v47 = vor.u32 %v1794_v39, %v1791_v38  ;;  %v5185_v31 = vrot.slane %v5183_v41, 4  ;;  %v5196_v49 = vshrl.u32 %v5087_v36, 16  ;;  %v14343_v56 = vld [vmem:[#allocation2 + $0x1c] sm:$0xf]  ;;  %v13729_v16 = vld [vmem:[%s17261_s3 + $0x8] sm:$0xff]  }
  0x2c   :  { %v5188_v48 = vrot.slane %v5186_v42, 5  ;;  %v1805_v51 = vor.u32 %v1804_v44, %v1800_v43  ;;  %v5194_v52 = vrot.slane %v5192_v46, 5  ;;  %v5202_v54 = vshll.u32 %v14339_v40, 16  ;;  %v14345_v63 = vld [vmem:[#allocation2 + $0x20] sm:$0x1] }
  0x2d   :  { %v6629_v55 = vrot.slane %v14339_v40, 5  ;;  %v1796_v57 = vrot.slane %v1795_v47, 4  ;;  %v5198_v59 = vrot.slane %v5196_v49, 4  ;;  %v5207_v60 = vshrl.u32 %v5089_v50, 16  ;;  %v1653_v15 = vld [vmem:[#allocation2 + $0x18] sm:$0xf] }
  0x2e   :  { %v5189_v58 = vor.u32 %v5188_v48, %v5185_v31  ;;  %v1806_v61 = vrot.slane %v1805_v51, 4  ;;  %v5204_v62 = vrot.slane %v5202_v54, 5  ;;  %v5210_v0 = vshll.u32 %v5089_v50, 16  ;;  %v1654_v33 = vld [vmem:[#allocation2 + $0x1c] sm:$0xf] }
  0x2f   :  { %v5216_v2 = vshll.u32 %v14343_v56, 16  ;;  %v1801_v3 = vsel %vm14254_vm9, %v1796_v57, %v1800_v43  ;;  %v5199_v5 = vor.u32 %v5198_v59, %v5194_v52  ;;  %v5209_v7 = vrot.slane %v5207_v60, 4  ;;  %v1731_v34 = vld [vmem:[#allocation2 + $0x20] sm:$0x1]  ;;  %v1439_v59 = vld [vmem:[#allocation2 + $0x24] sm:$0xf] }
  0x30   :  { %v5190_v4 = vrot.slane %v5189_v58, 4  ;;  %v1811_v8 = vsel %vm14254_vm9, %v1806_v61, %v1810_v45  ;;  %v5212_v11 = vrot.slane %v5210_v0, 5  ;;  %v5220_v14 = vshrl.u32 %v14343_v56, 16 }
  0x31   :  { %v5218_v12 = vrot.slane %v5216_v2, 5  ;;  %v10992_v23 = vcombine.low %v1801_v3, %v1811_v8  ;;  %v5200_v27 = vrot.slane %v5199_v5, 4  ;;  %v5226_v28 = vshll.u32 %v14345_v63, 16  ;;  %v13728_v2 = vld [vmem:[%s17261_s3 + $0x148] sm:$0xff]   ;;  %v417_v8 = vld [vmem:[#allocation2 + $0x3c] sm:$0x1] }
  0x32   :  { %v5195_v25 = vsel %vm14254_vm9, %v5190_v4, %v5194_v52  ;;  %v5213_v35 = vor.u32 %v5212_v11, %v5209_v7  ;;  %v5222_v36 = vrot.slane %v5220_v14, 4  ;;  %v6633_v38 = vrot.slane %v14343_v56, 5  ;;  %v13732_v52 = vld [vmem:[%s17261_s3 + $0x10] sm:$0xff]  }
  0x33   :  { %v6636_v39 = vrot.slane %v14345_v63, 5  ;;  %12478 = vmatmul.mubr.bf16.vlgmr.msra.gmra.mrb[0].mxu1 %v10992_v23  ;;  %v5205_v41 = vsel %vm14254_vm9, %v5200_v27, %v5204_v62  ;;  %v5228_v42 = vrot.slane %v5226_v28, 5  ;;  %v1813_v43 = vshrl.u32 %v1653_v15, 16 }
  0x34   :  { %v1816_v44 = vshll.u32 %v1653_v15, 16  ;;  %v11231_v45 = vcombine.low %v5195_v25, %v5205_v41  ;;  %12542 = vmatpush3.bf16.msra.mxu1 %v14261_v6  ;;  %v5214_v46 = vrot.slane %v5213_v35, 4  ;;  %v5223_v47 = vor.u32 %v5222_v36, %v5218_v12  ;;  %v1443_v15 = vld [vmem:[#allocation2 + $0x2c] sm:$0x1] }
  0x35   :  { %v14366_v31 = vrot.slane %v6633_v38, 4  ;;  %v1815_v48 = vrot.slane %v1813_v43, 4  ;;  %v1822_v50 = vshll.u32 %v1654_v33, 16  ;;  %v1826_v51 = vshrl.u32 %v1654_v33, 16  ;;  %12543 = vmatprep.subr.bf16.mxu1 %v13729_v16 }
  0x36   :  { %v1818_v49 = vrot.slane %v1816_v44, 5  ;;  %12797 = vmatprep.mubr.bf16.mxu0 %v11231_v45  ;;  %v5219_v54 = vsel %vm14254_vm9, %v5214_v46, %v5218_v12  ;;  %v5224_v6 = vrot.slane %v5223_v47, 4  ;;  %v1832_v57 = vshll.u32 %v1731_v34, 16  ;;  %v527_v34 = vld [vmem:[#allocation2 + $0x44] sm:$0x1] }
  0x37   :  { %v819_v58 = vrot.slane %v817_v19, 7  ;;  %v1824_v61 = vrot.slane %v1822_v50, 5  ;;  %v1828_v62 = vrot.slane %v1826_v51, 4  ;;  %v825_v0 = vshrl.u32 %v14325_v18, 16  ;;  %v420_v46 = vld [vmem:[#allocation2 + $0x48] sm:$0x1] }
  0x38   :  { %v1819_v60 = vor.u32 %v1818_v49, %v1815_v48  ;;  %v5229_v3 = vsel %vm14254_vm9, %v5224_v6, %v5228_v42  ;;  %v1834_v4 = vrot.slane %v1832_v57, 5  ;;  %12544 = vmatpush3.bf16.msra.mxu1 %v13729_v16  ;;  %v828_v23 = vshll.u32 %v14325_v18, 16  ;;  %v13730_v18 = vld [vmem:[%s17261_s3 + $0x150] sm:$0xff]  }
  0x39   :  { %v822_v5 = vor.u32 %v820_v21, %v819_v58  ;;  %v823_v7 = vrot.slane %v819_v58, 4  ;;  %v11232_v19 = vcombine.low %v5219_v54, %v5229_v3  ;;  %v1829_v12 = vor.u32 %v1828_v62, %v1824_v61  ;;  %12545 = vmatprep.subr.bf16.mxu1 %v13732_v52  ;;  %v1446_v49 = vld [vmem:[#allocation2 + $0x30] sm:$0xf]  ;;  %v13731_v54 = vld [vmem:[%s17261_s3 + $0x158] sm:$0xff]  }
  0x3a   :  { %v1820_v11 = vrot.slane %v1819_v60, 4  ;;  %v827_v14 = vrot.slane %v825_v0, 7  ;;  %v296_v27 = vmax.f32 %v14330_v22, 0.0  ;;  %v297_v28 = vmax.f32 %v14333_v30, 0.0 }
  0x3b   :  { %v1440_v25 = vsel %vm14273_vm10, %v822_v5, %v1439_v59  ;;  %12798 = vmatmul.mubr.bf16.vlgmr.msra.gmra.mrb[0].mxu0 %v11232_v19  ;;  %v1830_v21 = vrot.slane %v1829_v12, 4  ;;  %v165_v33 = vmul.f32 %v11770_v32, %v14208_v24  ;;  %v234_v36 = vadd.f32 %v14213_v26, %v14337_v37 }
  0x3c   :  { %v1825_v9 = vsel %vm14254_vm9, %v1820_v11, %v1824_v61  ;;  %v832_v16 = vrot.slane %v827_v14, 4  ;;  %1441 = vst [vmem:[#allocation2 + $0x24] sm:$0xf] %v1440_v25  ;;  %12862 = vmatpush3.bf16.msra.mxu0 %v14266_v10  ;;  %v830_v22 = vor.u32 %v828_v23, %v827_v14  ;;  %v11629_v30 = vpack.c.bf16 %v296_v27, %v296_v27  ;;  %v12043_v10 = vld [vmem:[%s17262_s0 + $0x28] sm:$0xff]   ;;  %v1450_v14 = vld [vmem:[#allocation2 + $0x38] sm:$0x1] }
  0x3d   :  { %v11630_v35 = vpack.c.bf16 %v297_v28, %v297_v28  ;;  %v1835_v41 = vsel %vm14254_vm9, %v1830_v21, %v1834_v4  ;;  %12863 = vmatprep.subr.bf16.mxu0 %v13728_v2  ;;  %v235_v32 = vadd.f32 %v14213_v26, %v165_v33  ;;  %v418_v42 = vsel %vm14186_vm3, 0, %v417_v8  ;;  %12546 = vmatpush3.bf16.msra.mxu1 %v13732_v52  ;;  %v13733_v28 = vld [vmem:[%s17261_s3 + $0x160] sm:$0xff]  }
  0x3e   :  { %v1444_v53 = vsel %vm14186_vm3, %v832_v16, %v1443_v15  ;;  %v10993_v43 = vcombine.low %v1825_v9, %v1835_v41  ;;  %v831_v37 = vsel %vm14280_vm11, %v823_v7, %v830_v22  ;;  %v834_v44 = vshrl.u32 %v11629_v30, 16  ;;  %419 = vst [vmem:[#allocation2 + $0x3c] sm:$0x1] %v418_v42 }
  0x3f   :  { %1445 = vst [vmem:[#allocation2 + $0x2c] sm:$0x1] %v1444_v53  ;;  %v837_v45 = vshll.u32 %v11629_v30, 16  ;;  %1442 = vst [vmem:[#allocation2 + $0x28] sm:$0xf] %v831_v37  ;;  %v842_v47 = vshrl.u32 %v11630_v35, 16  ;;  %v11773_v57 = vunpack.c.l.bf16 %v12043_v10  ;;  %v11774_v58 = vunpack.c.h.bf16 %v12043_v10 }
  0x40   :  { %v845_v48 = vshll.u32 %v11630_v35, 16  ;;  %v298_v50 = vmax.f32 %v234_v36, 0.0  ;;  %v299_v51 = vmax.f32 %v235_v32, 0.0  ;;  %12481 = vmatprep.mubr.bf16.mxu1 %v10993_v43  ;;  %v836_v52 = vrot.slane %v834_v44, 7  ;;  %12864 = vmatpush3.bf16.msra.mxu0 %v13728_v2 }
  0x41   :  { %v528_v6 = vsel %vm14193_vm4, 0, %v527_v34  ;;  %v844_v59 = vrot.slane %v842_v47, 7  ;;  %12865 = vmatprep.subr.bf16.mxu0 %v13730_v18  ;;  %v421_v62 = vsel %vm14186_vm3, 0, %v420_v46  ;;  %v166_v2 = vmul.f32 %v11773_v57, %v14208_v24 }
  0x42   :  { %529 = vst [vmem:[#allocation2 + $0x44] sm:$0x1] %v528_v6  ;;  %v14416_v60 = vpack.c.bf16 %v298_v50, %v298_v50  ;;  %v14418_v61 = vpack.c.bf16 %v299_v51, %v299_v51  ;;  %v839_v4 = vor.u32 %v837_v45, %v836_v52  ;;  %v840_v5 = vrot.slane %v836_v52, 4  ;;  %422 = vst [vmem:[#allocation2 + $0x48] sm:$0x1] %v421_v62  ;;  %v14443_v51 = vld [vmem:[%s17262_s0 + $0x30] sm:$0xff]  }
  0x43   :  { %v1655_v0 = vld [vmem:[#allocation2 + $0x24] sm:$0xf]  ;;  %v167_v7 = vmul.f32 %v11774_v58, %v14208_v24  ;;  %v847_v15 = vor.u32 %v845_v48, %v844_v59  ;;  %v849_v23 = vrot.slane %v844_v59, 4  ;;  %v14431_v34 = vadd.f32 %v14213_v26, %v166_v2  ;;  %v13734_v52 = vld [vmem:[%s17261_s3 + $0x168] sm:$0xff]  }
  0x44   :  { %v5092_v3 = vld [vmem:[#allocation2 + $0x24] sm:$0xf]  ;;  %v1837_v8 = vshrl.u32 %v1655_v0, 16  ;;  %v1840_v19 = vshll.u32 %v1655_v0, 16  ;;  %v1447_v25 = vsel %vm14273_vm10, %v839_v4, %v1446_v49  ;;  %v851_v27 = vshrl.u32 %v14416_v60, 16  ;;  %12866 = vmatpush3.bf16.msra.mxu0 %v13730_v18 }
  0x45   :  { %v5231_v11 = vshrl.u32 %v5092_v3, 16  ;;  %v5234_v12 = vshll.u32 %v5092_v3, 16  ;;  %1448 = vst [vmem:[#allocation2 + $0x30] sm:$0xf] %v1447_v25  ;;  %v14434_v22 = vadd.f32 %v14213_v26, %v167_v7  ;;  %12867 = vmatprep.subr.bf16.mxu0 %v13731_v54  ;;  %v848_v41 = vsel %vm14280_vm11, %v840_v5, %v847_v15 }
  0x46   :  { %v1732_v9 = vld [vmem:[#allocation2 + $0x2c] sm:$0x1]  ;;  %v1839_v21 = vrot.slane %v1837_v8, 4  ;;  %v1842_v16 = vrot.slane %v1840_v19, 5  ;;  %v1656_v30 = vld [vmem:[#allocation2 + $0x28] sm:$0xf]  ;;  %v1451_v53 = vsel %vm14186_vm3, %v849_v23, %v1450_v14  ;;  %v11777_v19 = vunpack.c.l.bf16 %v14443_v51 }
  0x47   :  { %v5094_v33 = vld [vmem:[#allocation2 + $0x2c] sm:$0x1]  ;;  %v1856_v35 = vshll.u32 %v1732_v9, 16  ;;  %v5093_v36 = vld [vmem:[#allocation2 + $0x28] sm:$0xf]  ;;  %v5233_v18 = vrot.slane %v5231_v11, 4 }
  0x48   :  { %v1843_v32 = vor.u32 %v1842_v16, %v1839_v21  ;;  %v1846_v42 = vshll.u32 %v1656_v30, 16  ;;  %v1850_v10 = vshrl.u32 %v1656_v30, 16  ;;  %v5236_v43 = vrot.slane %v5234_v12, 5  ;;  %1449 = vst [vmem:[#allocation2 + $0x34] sm:$0xf] %v848_v41  ;;  %12868 = vmatpush3.bf16.msra.mxu0 %v13731_v54 }
  0x49   :  { %1452 = vst [vmem:[#allocation2 + $0x38] sm:$0x1] %v1451_v53  ;;  %v1858_v37 = vrot.slane %v1856_v35, 5  ;;  %v5240_v44 = vshll.u32 %v5093_v36, 16  ;;  %v5244_v45 = vshrl.u32 %v5093_v36, 16  ;;  %v5250_v46 = vshll.u32 %v5094_v33, 16  ;;  %12869 = vmatprep.subr.bf16.mxu0 %v13733_v28 }
  0x4a   :  { %v1844_v47 = vrot.slane %v1843_v32, 4  ;;  %v1848_v48 = vrot.slane %v1846_v42, 5  ;;  %v1852_v49 = vrot.slane %v1850_v10, 4  ;;  %v5237_v50 = vor.u32 %v5236_v43, %v5233_v18 }
  0x4b   :  { %v5242_v6 = vrot.slane %v5240_v44, 5  ;;  %v5246_v57 = vrot.slane %v5244_v45, 4  ;;  %v5252_v58 = vrot.slane %v5250_v46, 5  ;;  %v14448_v59 = vrot.slane %v851_v27, 7  ;;  %v1453_v45 = vld [vmem:[#allocation2 + $0x3c] sm:$0xf] }
  0x4c   :  { %v1849_v54 = vsel %vm14254_vm9, %v1844_v47, %v1848_v48  ;;  %v1853_v62 = vor.u32 %v1852_v49, %v1848_v48  ;;  %v5238_v0 = vrot.slane %v5237_v50, 4  ;;  %v854_v3 = vshll.u32 %v14416_v60, 16  ;;  %v5095_v5 = vld [vmem:[#allocation2 + $0x30] sm:$0xf]  ;;  %12870 = vmatpush3.bf16.msra.mxu0 %v13733_v28  ;;  %v1457_v49 = vld [vmem:[#allocation2 + $0x44] sm:$0x1] }
  0x4d   :  { %v5247_v4 = vor.u32 %v5246_v57, %v5242_v6  ;;  %v1657_v2 = vld [vmem:[#allocation2 + $0x30] sm:$0xf]  ;;  %v857_v7 = vrot.slane %v14448_v59, 4  ;;  %v859_v8 = vshrl.u32 %v14418_v61, 16  ;;  %v5255_v14 = vshrl.u32 %v5095_v5, 16  ;;  %12871 = vmatprep.subr.bf16.mxu0 %v13734_v52 }
  0x4e   :  { %v1854_v11 = vrot.slane %v1853_v62, 4  ;;  %v5243_v12 = vsel %vm14254_vm9, %v5238_v0, %v5242_v6  ;;  %v5258_v15 = vshll.u32 %v5095_v5, 16  ;;  %v1861_v27 = vshrl.u32 %v1657_v2, 16 }
  0x4f   :  { %v5248_v23 = vrot.slane %v5247_v4, 4  ;;  %v5096_v25 = vld [vmem:[#allocation2 + $0x34] sm:$0xf]  ;;  %v856_v9 = vor.u32 %v854_v3, %v14448_v59  ;;  %v11778_v21 = vunpack.c.h.bf16 %v14443_v51  ;;  %v5257_v33 = vrot.slane %v5255_v14, 4 }
  0x50   :  { %v5097_v60 = vld [vmem:[#allocation2 + $0x38] sm:$0x1]  ;;  %v1859_v16 = vsel %vm14254_vm9, %v1854_v11, %v1858_v37  ;;  %v5260_v28 = vrot.slane %v5258_v15, 5  ;;  %v5264_v30 = vshll.u32 %v5096_v25, 16  ;;  %v1658_v35 = vld [vmem:[#allocation2 + $0x34] sm:$0xf]  ;;  %12872 = vmatpush3.bf16.msra.mxu0 %v13734_v52  ;;  %v168_v59 = vmul.f32 %v11777_v19, %v14208_v24 }
  0x51   :  { %v10994_v36 = vcombine.low %v1849_v54, %v1859_v16  ;;  %v5253_v18 = vsel %vm14254_vm9, %v5248_v23, %v5252_v58  ;;  %v5268_v41 = vshrl.u32 %v5096_v25, 16  ;;  %v5274_v53 = vshll.u32 %v5097_v60, 16  ;;  %v1733_v32 = vld [vmem:[#allocation2 + $0x38] sm:$0x1]  ;;  %v530_v54 = vld [vmem:[#allocation2 + $0x50] sm:$0x1] }
  0x52   :  { %v11233_v42 = vcombine.low %v5243_v12, %v5253_v18  ;;  %v5261_v10 = vor.u32 %v5260_v28, %v5257_v33  ;;  %v5266_v43 = vrot.slane %v5264_v30, 5  ;;  %v1863_v44 = vrot.slane %v1861_v27, 4  ;;  %v533_v30 = vld [vmem:[#allocation2 + $0x5c] sm:$0x1] }
  0x53   :  { %12482 = vmatmul.mubr.bf16.gmra.mrb[4].mxu1 %v10994_v36  ;;  %v5270_v46 = vrot.slane %v5268_v41, 4  ;;  %v5276_v37 = vrot.slane %v5274_v53, 5  ;;  %v1864_v47 = vshll.u32 %v1657_v2, 16  ;;  %v1870_v48 = vshll.u32 %v1658_v35, 16  ;;  %v423_v2 = vld [vmem:[#allocation2 + $0x54] sm:$0x1] }
  0x54   :  { %12801 = vmatprep.mubr.bf16.mxu0 %v11233_v42  ;;  %v5262_v50 = vrot.slane %v5261_v10, 4  ;;  %v1874_v6 = vshrl.u32 %v1658_v35, 16  ;;  %v1880_v57 = vshll.u32 %v1733_v32, 16  ;;  %v861_v58 = vrot.slane %v859_v8, 7  ;;  %v14492_v53 = vld [vmem:[%s17262_s0 + $0x38] sm:$0xff]  }
  0x55   :  { %v5271_v62 = vor.u32 %v5270_v46, %v5266_v43  ;;  %v1866_v0 = vrot.slane %v1864_v47, 5  ;;  %v1872_v52 = vrot.slane %v1870_v48, 5  ;;  %v862_v3 = vshll.u32 %v14418_v61, 16 }
  0x56   :  { %v5267_v4 = vsel %vm14254_vm9, %v5262_v50, %v5266_v43  ;;  %v1876_v5 = vrot.slane %v1874_v6, 4  ;;  %v1882_v11 = vrot.slane %v1880_v57, 5  ;;  %v866_v12 = vrot.slane %v861_v58, 4 }
  0x57   :  { %v5272_v14 = vrot.slane %v5271_v62, 4  ;;  %v1867_v15 = vor.u32 %v1866_v0, %v1863_v44  ;;  %v864_v23 = vor.u32 %v862_v3, %v861_v58  ;;  %v1454_v25 = vsel %vm14273_vm10, %v856_v9, %v1453_v45 }
  0x58   :  { %v1877_v8 = vor.u32 %v1876_v5, %v1872_v52  ;;  %1455 = vst [vmem:[#allocation2 + $0x3c] sm:$0xf] %v1454_v25  ;;  %v1458_v60 = vsel %vm14186_vm3, %v866_v12, %v1457_v49  ;;  %v300_v61 = vmax.f32 %v14431_v34, 0.0  ;;  %v301_v27 = vmax.f32 %v14434_v22, 0.0 }
  0x59   :  { %v5277_v16 = vsel %vm14254_vm9, %v5272_v14, %v5276_v37  ;;  %v1868_v33 = vrot.slane %v1867_v15, 4  ;;  %v865_v28 = vsel %vm14280_vm11, %v857_v7, %v864_v23  ;;  %1459 = vst [vmem:[#allocation2 + $0x44] sm:$0x1] %v1458_v60  ;;  %v531_v9 = vsel %vm14193_vm4, 0, %v530_v54 }
  0x5a   :  { %v11234_v35 = vcombine.low %v5267_v4, %v5277_v16  ;;  %v1878_v36 = vrot.slane %v1877_v8, 4  ;;  %1456 = vst [vmem:[#allocation2 + $0x40] sm:$0xf] %v865_v28  ;;  %532 = vst [vmem:[#allocation2 + $0x50] sm:$0x1] %v531_v9  ;;  %v11633_v34 = vpack.c.bf16 %v300_v61, %v300_v61  ;;  %v11634_v22 = vpack.c.bf16 %v301_v27, %v301_v27 }
  0x5b   :  { %v1873_v18 = vsel %vm14254_vm9, %v1868_v33, %v1872_v52  ;;  %v169_v7 = vmul.f32 %v11778_v21, %v14208_v24  ;;  %v424_v41 = vsel %vm14186_vm3, 0, %v423_v2  ;;  %v14499_v24 = vld [vmem:[%s17262_s0 + $0x40] sm:$0xff]   ;;  %v238_v21 = vadd.f32 %v14213_v26, %v168_v59  ;;  %v1460_v33 = vld [vmem:[#allocation2 + $0x48] sm:$0xf] }
  0x5c   :  { %12802 = vmatmul.mubr.bf16.gmra.mrb[4].mxu0 %v11234_v35  ;;  %v1883_v32 = vsel %vm14254_vm9, %v1878_v36, %v1882_v11  ;;  %v868_v42 = vshrl.u32 %v11633_v34, 16  ;;  %v871_v10 = vshll.u32 %v11633_v34, 16  ;;  %v876_v43 = vshrl.u32 %v11634_v22, 16  ;;  %425 = vst [vmem:[#allocation2 + $0x54] sm:$0x1] %v424_v41  ;;  %v13735_v36 = vld [vmem:[%s17261_s3 + $0x18] sm:$0xff]  }
  0x5d   :  { %v10995_v51 = vcombine.low %v1873_v18, %v1883_v32  ;;  %v879_v19 = vshll.u32 %v11634_v22, 16  ;;  %v239_v44 = vadd.f32 %v14213_v26, %v169_v7  ;;  %v534_v37 = vsel %vm14193_vm4, 0, %v533_v30  ;;  %v13736_v34 = vld [vmem:[%s17261_s3 + $0x170] sm:$0xff]   ;;  %12547 = vmatprep.subr.bf16.mxu1 %v13735_v36 }
  0x5e   :  { %v870_v45 = vrot.slane %v868_v42, 7  ;;  %v14503_v46 = vrot.slane %v876_v43, 7  ;;  %v11781_v47 = vunpack.c.l.bf16 %v14492_v53  ;;  %v302_v50 = vmax.f32 %v238_v21, 0.0  ;;  %535 = vst [vmem:[#allocation2 + $0x5c] sm:$0x1] %v534_v37  ;;  %12873 = vmatprep.subr.bf16.mxu0 %v13736_v34  ;;  %12548 = vmatpush3.bf16.msra.mxu1 %v13735_v36 }
  0x5f   :  { %12485 = vmatprep.mubr.bf16.mxu1 %v10995_v51  ;;  %v1659_v48 = vld [vmem:[#allocation2 + $0x3c] sm:$0xf]  ;;  %v303_v6 = vmax.f32 %v239_v44, 0.0  ;;  %v11782_v57 = vunpack.c.h.bf16 %v14492_v53  ;;  %v11785_v58 = vunpack.c.l.bf16 %v14499_v24  ;;  %v426_v37 = vld [vmem:[#allocation2 + $0x60] sm:$0x1]  ;;  %12874 = vmatpush3.bf16.msra.mxu0 %v13736_v34 }
  0x60   :  { %v5098_v49 = vld [vmem:[#allocation2 + $0x3c] sm:$0xf]  ;;  %v1734_v54 = vld [vmem:[#allocation2 + $0x44] sm:$0x1]  ;;  %v1885_v26 = vshrl.u32 %v1659_v48, 16  ;;  %v1888_v62 = vshll.u32 %v1659_v48, 16  ;;  %v873_v0 = vor.u32 %v871_v10, %v870_v45  ;;  %v881_v52 = vor.u32 %v879_v19, %v14503_v46 }
  0x61   :  { %v1660_v3 = vld [vmem:[#allocation2 + $0x40] sm:$0xf]  ;;  %v1904_v4 = vshll.u32 %v1734_v54, 16  ;;  %v5279_v11 = vshrl.u32 %v5098_v49, 16  ;;  %v14511_v12 = vpack.c.bf16 %v302_v50, %v302_v50  ;;  %v14513_v2 = vpack.c.bf16 %v303_v6, %v303_v6  ;;  %v5100_v8 = vld [vmem:[#allocation2 + $0x44] sm:$0x1] }
  0x62   :  { %v5099_v5 = vld [vmem:[#allocation2 + $0x40] sm:$0xf]  ;;  %v1887_v14 = vrot.slane %v1885_v26, 4  ;;  %v1890_v15 = vrot.slane %v1888_v62, 5  ;;  %v1894_v23 = vshll.u32 %v1660_v3, 16  ;;  %v1898_v25 = vshrl.u32 %v1660_v3, 16 }
  0x63   :  { %v1906_v60 = vrot.slane %v1904_v4, 5  ;;  %v5281_v61 = vrot.slane %v5279_v11, 4  ;;  %v5282_v27 = vshll.u32 %v5098_v49, 16  ;;  %v5288_v16 = vshll.u32 %v5099_v5, 16  ;;  %v1464_v41 = vld [vmem:[#allocation2 + $0x50] sm:$0x1] }
  0x64   :  { %v1891_v28 = vor.u32 %v1890_v15, %v1887_v14  ;;  %v1896_v9 = vrot.slane %v1894_v23, 5  ;;  %v1900_v30 = vrot.slane %v1898_v25, 4  ;;  %v5292_v35 = vshrl.u32 %v5099_v5, 16  ;;  %v536_v62 = vld [vmem:[#allocation2 + $0x68] sm:$0x1] }
  0x65   :  { %v5284_v22 = vrot.slane %v5282_v27, 5  ;;  %v5290_v18 = vrot.slane %v5288_v16, 5  ;;  %v5298_v59 = vshll.u32 %v5100_v8, 16  ;;  %v874_v7 = vrot.slane %v870_v45, 4  ;;  %v1467_v4 = vld [vmem:[#allocation2 + $0x54] sm:$0xf] }
  0x66   :  { %v1892_v32 = vrot.slane %v1891_v28, 4  ;;  %v1901_v42 = vor.u32 %v1900_v30, %v1896_v9  ;;  %v5294_v10 = vrot.slane %v5292_v35, 4  ;;  %v883_v43 = vrot.slane %v14503_v46, 4  ;;  %v14539_v5 = vld [vmem:[%s17263_s1] ss:$0 sm:$0xff] }
  0x67   :  { %v5285_v51 = vor.u32 %v5284_v22, %v5281_v61  ;;  %v5300_v19 = vrot.slane %v5298_v59, 5  ;;  %v882_v21 = vsel %vm14280_vm11, %v874_v7, %v881_v52  ;;  %v1461_v44 = vsel %vm14273_vm10, %v873_v0, %v1460_v33  ;;  %v14554_v8 = vld [vmem:[%s17264_s2] ss:$0 sm:$0xff]  ;;  %v1471_v28 = vld [vmem:[#allocation2 + $0x5c] sm:$0x1] }
  0x68   :  { %v1897_v45 = vsel %vm14254_vm9, %v1892_v32, %v1896_v9  ;;  %v1902_v48 = vrot.slane %v1901_v42, 4  ;;  %v5295_v49 = vor.u32 %v5294_v10, %v5290_v18  ;;  %1462 = vst [vmem:[#allocation2 + $0x48] sm:$0xf] %v1461_v44  ;;  %1463 = vst [vmem:[#allocation2 + $0x4c] sm:$0xf] %v882_v21  ;;  %v1465_v46 = vsel %vm14186_vm3, %v883_v43, %v1464_v41 }
  0x69   :  { %v5286_v50 = vrot.slane %v5285_v51, 4  ;;  %1466 = vst [vmem:[#allocation2 + $0x50] sm:$0x1] %v1465_v46  ;;  %v885_v6 = vshrl.u32 %v14511_v12, 16  ;;  %v888_v54 = vshll.u32 %v14511_v12, 16  ;;  %v893_v26 = vshrl.u32 %v14513_v2, 16 }
  0x6a   :  { %v1907_v0 = vsel %vm14254_vm9, %v1902_v48, %v1906_v60  ;;  %v5296_v52 = vrot.slane %v5295_v49, 4  ;;  %v896_v3 = vshll.u32 %v14513_v2, 16  ;;  %v170_v11 = vmul.f32 %v14539_v5, %v11781_v47 }
  0x6b   :  { %v10996_v12 = vcombine.low %v1897_v45, %v1907_v0  ;;  %v5291_v14 = vsel %vm14254_vm9, %v5286_v50, %v5290_v18  ;;  %v887_v15 = vrot.slane %v885_v6, 7  ;;  %v895_v23 = vrot.slane %v893_v26, 7 }
  0x6c   :  { %v5301_v25 = vsel %vm14254_vm9, %v5296_v52, %v5300_v19  ;;  %v171_v2 = vmul.f32 %v14539_v5, %v11782_v57  ;;  %v240_v47 = vadd.f32 %v14554_v8, %v170_v11  ;;  %v427_v60 = vsel %vm14186_vm3, 0, %v426_v37 }
  0x6d   :  { %12486 = vmatmul.mubr.bf16.gmra.mrb[8].mxu1 %v10996_v12  ;;  %v11235_v61 = vcombine.low %v5291_v14, %v5301_v25  ;;  %v890_v27 = vor.u32 %v888_v54, %v887_v15  ;;  %v891_v16 = vrot.slane %v887_v15, 4  ;;  %v898_v33 = vor.u32 %v896_v3, %v895_v23  ;;  %428 = vst [vmem:[#allocation2 + $0x60] sm:$0x1] %v427_v60 }
  0x6e   :  { %v900_v53 = vrot.slane %v895_v23, 4  ;;  %v241_v57 = vadd.f32 %v14554_v8, %v171_v2  ;;  %v304_v9 = vmax.f32 %v240_v47, 0.0  ;;  %v537_v30 = vsel %vm14193_vm4, 0, %v536_v62 }
  0x6f   :  { %12805 = vmatprep.mubr.bf16.mxu0 %v11235_v61  ;;  %v5101_v35 = vld [vmem:[#allocation2 + $0x48] sm:$0xf]  ;;  %v5102_v36 = vld [vmem:[#allocation2 + $0x4c] sm:$0xf]  ;;  %v899_v22 = vsel %vm14280_vm11, %v891_v16, %v898_v33  ;;  %v1468_v18 = vsel %vm14273_vm10, %v890_v27, %v1467_v4  ;;  %538 = vst [vmem:[#allocation2 + $0x68] sm:$0x1] %v537_v30  ;;  %v11786_v59 = vunpack.c.h.bf16 %v14499_v24  ;;  %v172_v7 = vmul.f32 %v14539_v5, %v11785_v58 }
  0x70   :  { %v1661_v34 = vld [vmem:[#allocation2 + $0x48] sm:$0xf]  ;;  %v5103_v41 = vld [vmem:[#allocation2 + $0x50] sm:$0x1]  ;;  %v5303_v32 = vshrl.u32 %v5101_v35, 16  ;;  %v5306_v42 = vshll.u32 %v5101_v35, 16  ;;  %v1472_v37 = vsel %vm14186_vm3, %v900_v53, %v1471_v28  ;;  %v14572_v45 = vpack.c.bf16 %v304_v9, %v304_v9 }
  0x71   :  { %v5312_v10 = vshll.u32 %v5102_v36, 16  ;;  %v5316_v43 = vshrl.u32 %v5102_v36, 16  ;;  %1469 = vst [vmem:[#allocation2 + $0x54] sm:$0xf] %v1468_v18  ;;  %1470 = vst [vmem:[#allocation2 + $0x58] sm:$0xf] %v899_v22  ;;  %v173_v16 = vmul.f32 %v14539_v5, %v11786_v59  ;;  %v14579_v33 = vadd.f32 %v14554_v8, %v172_v7 }
  0x72   :  { %v5322_v51 = vshll.u32 %v5103_v41, 16  ;;  %v1662_v19 = vld [vmem:[#allocation2 + $0x4c] sm:$0xf]  ;;  %v1735_v21 = vld [vmem:[#allocation2 + $0x50] sm:$0x1]  ;;  %v1909_v44 = vshrl.u32 %v1661_v34, 16 }
  0x73   :  { %v5305_v48 = vrot.slane %v5303_v32, 4  ;;  %v5308_v24 = vrot.slane %v5306_v42, 5  ;;  %v5314_v49 = vrot.slane %v5312_v10, 5  ;;  %v5318_v58 = vrot.slane %v5316_v43, 4  ;;  %1473 = vst [vmem:[#allocation2 + $0x5c] sm:$0x1] %v1472_v37 }
  0x74   :  { %v5324_v46 = vrot.slane %v5322_v51, 5  ;;  %v1911_v50 = vrot.slane %v1909_v44, 4  ;;  %v1912_v6 = vshll.u32 %v1661_v34, 16  ;;  %v1918_v54 = vshll.u32 %v1662_v19, 16 }
  0x75   :  { %v5309_v26 = vor.u32 %v5308_v24, %v5305_v48  ;;  %v5319_v62 = vor.u32 %v5318_v58, %v5314_v49  ;;  %v1922_v0 = vshrl.u32 %v1662_v19, 16  ;;  %v1928_v52 = vshll.u32 %v1735_v21, 16 }
  0x76   :  { %v1914_v3 = vrot.slane %v1912_v6, 5  ;;  %v1920_v4 = vrot.slane %v1918_v54, 5  ;;  %v305_v11 = vmax.f32 %v241_v57, 0.0  ;;  %v902_v12 = vshrl.u32 %v14572_v45, 16 }
  0x77   :  { %v5310_v14 = vrot.slane %v5309_v26, 4  ;;  %v5320_v15 = vrot.slane %v5319_v62, 4  ;;  %v1924_v23 = vrot.slane %v1922_v0, 4  ;;  %v1930_v25 = vrot.slane %v1928_v52, 5  ;;  %v1474_v62 = vld [vmem:[#allocation2 + $0x60] sm:$0xf] }
  0x78   :  { %v1915_v2 = vor.u32 %v1914_v3, %v1911_v50  ;;  %v1663_v47 = vld [vmem:[#allocation2 + $0x54] sm:$0xf]  ;;  %v1664_v60 = vld [vmem:[#allocation2 + $0x58] sm:$0xf]  ;;  %v14575_v27 = vpack.c.bf16 %v305_v11, %v305_v11  ;;  %v904_v3 = vrot.slane %v902_v12, 7 }
  0x79   :  { %v5104_v61 = vld [vmem:[#allocation2 + $0x54] sm:$0xf]  ;;  %v5315_v28 = vsel %vm14254_vm9, %v5310_v14, %v5314_v49  ;;  %v5325_v53 = vsel %vm14254_vm9, %v5320_v15, %v5324_v46  ;;  %v1925_v57 = vor.u32 %v1924_v23, %v1920_v4  ;;  %v1933_v9 = vshrl.u32 %v1663_v47, 16  ;;  %v5105_v30 = vld [vmem:[#allocation2 + $0x58] sm:$0xf] }
  0x7a   :  { %v11236_v35 = vcombine.low %v5315_v28, %v5325_v53  ;;  %v1916_v36 = vrot.slane %v1915_v2, 4  ;;  %v1736_v34 = vld [vmem:[#allocation2 + $0x5c] sm:$0x1]  ;;  %v1936_v22 = vshll.u32 %v1663_v47, 16  ;;  %v1942_v18 = vshll.u32 %v1664_v60, 16 }
  0x7b   :  { %v1926_v41 = vrot.slane %v1925_v57, 4  ;;  %v1935_v32 = vrot.slane %v1933_v9, 4  ;;  %v1946_v59 = vshrl.u32 %v1664_v60, 16  ;;  %v1952_v42 = vshll.u32 %v1736_v34, 16  ;;  %v5106_v7 = vld [vmem:[#allocation2 + $0x5c] sm:$0x1] }
  0x7c   :  { %12806 = vmatmul.mubr.bf16.gmra.mrb[8].mxu0 %v11236_v35  ;;  %v1921_v10 = vsel %vm14254_vm9, %v1916_v36, %v1920_v4  ;;  %v1938_v43 = vrot.slane %v1936_v22, 5  ;;  %v1944_v51 = vrot.slane %v1942_v18, 5  ;;  %v5327_v19 = vshrl.u32 %v5104_v61, 16  ;;  %v429_v11 = vld [vmem:[#allocation2 + $0x6c] sm:$0x1]  ;;  %v13737_v53 = vld [vmem:[%s17261_s3 + $0x178] sm:$0xff]  }
  0x7d   :  { %v1931_v21 = vsel %vm14254_vm9, %v1926_v41, %v1930_v25  ;;  %v1948_v44 = vrot.slane %v1946_v59, 4  ;;  %v1954_v37 = vrot.slane %v1952_v42, 5  ;;  %v5330_v48 = vshll.u32 %v5104_v61, 16  ;;  %v539_v28 = vld [vmem:[#allocation2 + $0x74] sm:$0x1]  ;;  %v12047_v18 = vld [vmem:[%s17262_s0 + $0x48] sm:$0xff]   ;;  %12875 = vmatprep.subr.bf16.mxu0 %v13737_v53 }
  0x7e   :  { %v10997_v24 = vcombine.low %v1921_v10, %v1931_v21  ;;  %v1939_v49 = vor.u32 %v1938_v43, %v1935_v32  ;;  %v5329_v58 = vrot.slane %v5327_v19, 4  ;;  %v5336_v46 = vshll.u32 %v5105_v30, 16  ;;  %v1478_v34 = vld [vmem:[#allocation2 + $0x68] sm:$0x1]  ;;  %v432_v42 = vld [vmem:[#allocation2 + $0x78] sm:$0x1]  ;;  %12876 = vmatpush3.bf16.msra.mxu0 %v13737_v53 }
  0x7f   :  { %v1949_v50 = vor.u32 %v1948_v44, %v1944_v51  ;;  %v5332_v6 = vrot.slane %v5330_v48, 5  ;;  %v5340_v54 = vshrl.u32 %v5105_v30, 16  ;;  %v5346_v26 = vshll.u32 %v5106_v7, 16  ;;  %v14615_v19 = vld [vmem:[%s17262_s0 + $0x50] sm:$0xff]   ;;  %v14622_v48 = vld [vmem:[%s17262_s0 + $0x58] sm:$0xff]  }
  0x80   :  { %12489 = vmatprep.mubr.bf16.mxu1 %v10997_v24  ;;  %v1940_v0 = vrot.slane %v1939_v49, 4  ;;  %v5338_v52 = vrot.slane %v5336_v46, 5  ;;  %v905_v4 = vshll.u32 %v14572_v45, 16  ;;  %v908_v60 = vrot.slane %v904_v3, 4 }
  0x81   :  { %v1950_v14 = vrot.slane %v1949_v50, 4  ;;  %v5333_v15 = vor.u32 %v5332_v6, %v5329_v58  ;;  %v5342_v23 = vrot.slane %v5340_v54, 4  ;;  %v5348_v25 = vrot.slane %v5346_v26, 5  ;;  %v435_v50 = vld [vmem:[#allocation2 + $0x84] sm:$0x1] }
  0x82   :  { %v1945_v2 = vsel %vm14254_vm9, %v1940_v0, %v1944_v51  ;;  %v907_v47 = vor.u32 %v905_v4, %v904_v3  ;;  %v910_v61 = vshrl.u32 %v14575_v27, 16  ;;  %v913_v9 = vshll.u32 %v14575_v27, 16  ;;  %v542_v51 = vld [vmem:[#allocation2 + $0x80] sm:$0x1] }
  0x83   :  { %v1955_v45 = vsel %vm14254_vm9, %v1950_v14, %v1954_v37  ;;  %v5334_v12 = vrot.slane %v5333_v15, 4  ;;  %v5343_v57 = vor.u32 %v5342_v23, %v5338_v52  ;;  %v243_v22 = vadd.f32 %v14554_v8, %v173_v16 }
  0x84   :  { %v10998_v30 = vcombine.low %v1945_v2, %v1955_v45  ;;  %v912_v35 = vrot.slane %v910_v61, 7  ;;  %v1475_v36 = vsel %vm14273_vm10, %v907_v47, %v1474_v62  ;;  %v306_v27 = vmax.f32 %v14579_v33, 0.0 }
  0x85   :  { %v5339_v41 = vsel %vm14254_vm9, %v5334_v12, %v5338_v52  ;;  %v5344_v32 = vrot.slane %v5343_v57, 4  ;;  %1476 = vst [vmem:[#allocation2 + $0x60] sm:$0xf] %v1475_v36  ;;  %v430_v59 = vsel %vm14186_vm3, 0, %v429_v11  ;;  %v307_v10 = vmax.f32 %v243_v22, 0.0 }
  0x86   :  { %12490 = vmatmul.mubr.bf16.gmra.mrb[12].mxu1 %v10998_v30  ;;  %v915_v7 = vor.u32 %v913_v9, %v912_v35  ;;  %v917_v16 = vrot.slane %v912_v35, 4  ;;  %431 = vst [vmem:[#allocation2 + $0x6c] sm:$0x1] %v430_v59  ;;  %v540_v43 = vsel %vm14193_vm4, 0, %v539_v28  ;;  %v11639_v21 = vpack.c.bf16 %v306_v27, %v306_v27 }
  0x87   :  { %v5349_v33 = vsel %vm14254_vm9, %v5344_v32, %v5348_v25  ;;  %541 = vst [vmem:[#allocation2 + $0x74] sm:$0x1] %v540_v43  ;;  %v11789_v44 = vunpack.c.l.bf16 %v12047_v18  ;;  %v11790_v37 = vunpack.c.h.bf16 %v12047_v18  ;;  %v11640_v46 = vpack.c.bf16 %v307_v10, %v307_v10 }
  0x88   :  { %v11237_v24 = vcombine.low %v5339_v41, %v5349_v33  ;;  %v916_v49 = vsel %vm14280_vm11, %v908_v60, %v915_v7  ;;  %v1479_v58 = vsel %vm14186_vm3, %v917_v16, %v1478_v34  ;;  %v919_v6 = vshrl.u32 %v11639_v21, 16 }
  0x89   :  { %1477 = vst [vmem:[#allocation2 + $0x64] sm:$0xf] %v916_v49  ;;  %1480 = vst [vmem:[#allocation2 + $0x68] sm:$0x1] %v1479_v58  ;;  %v922_v54 = vshll.u32 %v11639_v21, 16  ;;  %v174_v26 = vmul.f32 %v14539_v5, %v11789_v44  ;;  %v175_v62 = vmul.f32 %v14539_v5, %v11790_v37  ;;  %v927_v0 = vshrl.u32 %v11640_v46, 16 }
  0x8a   :  { %12809 = vmatprep.mubr.bf16.mxu0 %v11237_v24  ;;  %v930_v52 = vshll.u32 %v11640_v46, 16  ;;  %v433_v3 = vsel %vm14186_vm3, 0, %v432_v42  ;;  %v543_v4 = vsel %vm14193_vm4, 0, %v542_v51  ;;  %v921_v11 = vrot.slane %v919_v6, 7 }
  0x8b   :  { %v14635_v14 = vadd.f32 %v14554_v8, %v174_v26  ;;  %v14638_v15 = vadd.f32 %v14554_v8, %v175_v62  ;;  %434 = vst [vmem:[#allocation2 + $0x78] sm:$0x1] %v433_v3  ;;  %544 = vst [vmem:[#allocation2 + $0x80] sm:$0x1] %v543_v4  ;;  %v11793_v23 = vunpack.c.l.bf16 %v14615_v19  ;;  %v929_v47 = vrot.slane %v927_v0, 7 }
  0x8c   :  { %v5107_v25 = vld [vmem:[#allocation2 + $0x60] sm:$0xf]  ;;  %v11794_v60 = vunpack.c.h.bf16 %v14615_v19  ;;  %v436_v61 = vsel %vm14186_vm3, 0, %v435_v50  ;;  %v11797_v28 = vunpack.c.l.bf16 %v14622_v48  ;;  %v924_v30 = vor.u32 %v922_v54, %v921_v11  ;;  %v545_v4 = vld [vmem:[#allocation2 + $0x8c] sm:$0x1] }
  0x8d   :  { %v1665_v2 = vld [vmem:[#allocation2 + $0x60] sm:$0xf]  ;;  %v5351_v53 = vshrl.u32 %v5107_v25, 16  ;;  %v5354_v45 = vshll.u32 %v5107_v25, 16  ;;  %v1481_v9 = vld [vmem:[#allocation2 + $0x6c] sm:$0xf]  ;;  %v932_v36 = vor.u32 %v930_v52, %v929_v47  ;;  %v176_v51 = vmul.f32 %v14539_v5, %v11793_v23 }
  0x8e   :  { %v1957_v12 = vshrl.u32 %v1665_v2, 16  ;;  %v1960_v57 = vshll.u32 %v1665_v2, 16  ;;  %437 = vst [vmem:[#allocation2 + $0x84] sm:$0x1] %v436_v61  ;;  %v925_v35 = vrot.slane %v921_v11, 4  ;;  %v934_v34 = vrot.slane %v929_v47, 4 }
  0x8f   :  { %v1485_v22 = vld [vmem:[#allocation2 + $0x74] sm:$0x1]  ;;  %v5353_v18 = vrot.slane %v5351_v53, 4  ;;  %v5356_v41 = vrot.slane %v5354_v45, 5  ;;  %v1482_v10 = vsel %vm14273_vm10, %v924_v30, %v1481_v9  ;;  %v308_v25 = vmax.f32 %v14635_v14, 0.0 }
  0x90   :  { %v1959_v32 = vrot.slane %v1957_v12, 4  ;;  %v1962_v27 = vrot.slane %v1960_v57, 5  ;;  %v5108_v59 = vld [vmem:[#allocation2 + $0x64] sm:$0xf]  ;;  %v5109_v42 = vld [vmem:[#allocation2 + $0x68] sm:$0x1]  ;;  %v933_v16 = vsel %vm14280_vm11, %v925_v35, %v932_v36  ;;  %v1486_v43 = vsel %vm14186_vm3, %v934_v34, %v1485_v22 }
  0x91   :  { %v1666_v7 = vld [vmem:[#allocation2 + $0x64] sm:$0xf]  ;;  %v5357_v19 = vor.u32 %v5356_v41, %v5353_v18  ;;  %v5360_v33 = vshll.u32 %v5108_v59, 16  ;;  %v5364_v21 = vshrl.u32 %v5108_v59, 16  ;;  %v5370_v44 = vshll.u32 %v5109_v42, 16 }
  0x92   :  { %v1737_v37 = vld [vmem:[#allocation2 + $0x68] sm:$0x1]  ;;  %1483 = vst [vmem:[#allocation2 + $0x6c] sm:$0xf] %v1482_v10  ;;  %1484 = vst [vmem:[#allocation2 + $0x70] sm:$0xf] %v933_v16  ;;  %v1963_v24 = vor.u32 %v1962_v27, %v1959_v32  ;;  %v177_v53 = vmul.f32 %v14539_v5, %v11794_v60  ;;  %v14660_v45 = vadd.f32 %v14554_v8, %v176_v51  ;;  %v11798_v60 = vunpack.c.h.bf16 %v14622_v48 }
  0x93   :  { %1487 = vst [vmem:[#allocation2 + $0x74] sm:$0x1] %v1486_v43  ;;  %v1966_v49 = vshll.u32 %v1666_v7, 16  ;;  %v1970_v58 = vshrl.u32 %v1666_v7, 16  ;;  %v1976_v46 = vshll.u32 %v1737_v37, 16  ;;  %v5358_v50 = vrot.slane %v5357_v19, 4 }
  0x94   :  { %v5362_v6 = vrot.slane %v5360_v33, 5  ;;  %v5366_v54 = vrot.slane %v5364_v21, 4  ;;  %v5372_v26 = vrot.slane %v5370_v44, 5  ;;  %v1964_v62 = vrot.slane %v1963_v24, 4 }
  0x95   :  { %v1968_v0 = vrot.slane %v1966_v49, 5  ;;  %v1972_v52 = vrot.slane %v1970_v58, 4  ;;  %v1978_v3 = vrot.slane %v1976_v46, 5  ;;  %v309_v2 = vmax.f32 %v14638_v15, 0.0 }
  0x96   :  { %v5363_v11 = vsel %vm14254_vm9, %v5358_v50, %v5362_v6  ;;  %v5367_v23 = vor.u32 %v5366_v54, %v5362_v6  ;;  %v11641_v57 = vpack.c.bf16 %v308_v25, %v308_v25  ;;  %v546_v30 = vsel %vm14193_vm4, 0, %v545_v4  ;;  %v1488_v25 = vld [vmem:[#allocation2 + $0x78] sm:$0xf] }
  0x97   :  { %v1969_v47 = vsel %vm14254_vm9, %v1964_v62, %v1968_v0  ;;  %v1973_v61 = vor.u32 %v1972_v52, %v1968_v0  ;;  %v14662_v9 = vpack.c.bf16 %v309_v2, %v309_v2  ;;  %v14667_v15 = vadd.f32 %v14554_v8, %v177_v53  ;;  %547 = vst [vmem:[#allocation2 + $0x8c] sm:$0x1] %v546_v30  ;;  %v13739_v30 = vld [vmem:[%s17261_s3 + $0x180] sm:$0xff]  }
  0x98   :  { %v5368_v12 = vrot.slane %v5367_v23, 4  ;;  %v310_v34 = vmax.f32 %v14660_v45, 0.0  ;;  %v936_v52 = vshrl.u32 %v11641_v57, 16  ;;  %v939_v53 = vshll.u32 %v11641_v57, 16  ;;  %12941 = vmatprep.subr.bf16.mxu0 %v13739_v30 }
  0x99   :  { %v1974_v35 = vrot.slane %v1973_v61, 4  ;;  %v1667_v14 = vld [vmem:[#allocation2 + $0x6c] sm:$0xf]  ;;  %v1668_v36 = vld [vmem:[#allocation2 + $0x70] sm:$0xf] }
  0x9a   :  { %v5373_v22 = vsel %vm14254_vm9, %v5368_v12, %v5372_v26  ;;  %v1738_v18 = vld [vmem:[#allocation2 + $0x74] sm:$0x1]  ;;  %v1981_v41 = vshrl.u32 %v1667_v14, 16  ;;  %v1984_v32 = vshll.u32 %v1667_v14, 16  ;;  %v1990_v27 = vshll.u32 %v1668_v36, 16  ;;  %v13738_v12 = vld [vmem:[%s17261_s3 + $0x20] sm:$0xff]  }
  0x9b   :  { %v11238_v59 = vcombine.low %v5363_v11, %v5373_v22  ;;  %v1979_v42 = vsel %vm14254_vm9, %v1974_v35, %v1978_v3  ;;  %v1994_v7 = vshrl.u32 %v1668_v36, 16  ;;  %v2000_v16 = vshll.u32 %v1738_v18, 16  ;;  %v5110_v10 = vld [vmem:[#allocation2 + $0x6c] sm:$0xf]  ;;  %v5111_v43 = vld [vmem:[#allocation2 + $0x70] sm:$0xf]  ;;  %12549 = vmatprep.subr.bf16.mxu1 %v13738_v12 }
  0x9c   :  { %v10999_v51 = vcombine.low %v1969_v47, %v1979_v42  ;;  %v1983_v19 = vrot.slane %v1981_v41, 4  ;;  %v1986_v33 = vrot.slane %v1984_v32, 5  ;;  %v1992_v21 = vrot.slane %v1990_v27, 5  ;;  %v5112_v44 = vld [vmem:[#allocation2 + $0x74] sm:$0x1]  ;;  %12550 = vmatpush3.bf16.msra.mxu1 %v13738_v12 }
  0x9d   :  { %12810 = vmatmul.mubr.bf16.gmra.mrb[12].mxu0 %v11238_v59  ;;  %v1996_v37 = vrot.slane %v1994_v7, 4  ;;  %v2002_v24 = vrot.slane %v2000_v16, 5  ;;  %v5375_v49 = vshrl.u32 %v5110_v10, 16  ;;  %v5378_v58 = vshll.u32 %v5110_v10, 16  ;;  %v438_v16 = vld [vmem:[#allocation2 + $0x90] sm:$0x1] }
  0x9e   :  { %12493 = vmatprep.mubr.bf16.mxu1 %v10999_v51  ;;  %v1987_v46 = vor.u32 %v1986_v33, %v1983_v19  ;;  %v5384_v50 = vshll.u32 %v5111_v43, 16  ;;  %v5388_v6 = vshrl.u32 %v5111_v43, 16  ;;  %v5394_v54 = vshll.u32 %v5112_v44, 16  ;;  %v1492_v43 = vld [vmem:[#allocation2 + $0x80] sm:$0x1] }
  0x9f   :  { %v1997_v26 = vor.u32 %v1996_v37, %v1992_v21  ;;  %v5377_v62 = vrot.slane %v5375_v49, 4  ;;  %v5380_v0 = vrot.slane %v5378_v58, 5  ;;  %v938_v61 = vrot.slane %v936_v52, 7  ;;  %v548_v33 = vld [vmem:[#allocation2 + $0x98] sm:$0x1] }
  0xa0   :  { %v1988_v3 = vrot.slane %v1987_v46, 4  ;;  %v5386_v4 = vrot.slane %v5384_v50, 5  ;;  %v5390_v11 = vrot.slane %v5388_v6, 4  ;;  %v5396_v23 = vrot.slane %v5394_v54, 5  ;;  %v1495_v54 = vld [vmem:[#allocation2 + $0x84] sm:$0xf] }
  0xa1   :  { %v1998_v2 = vrot.slane %v1997_v26, 4  ;;  %v5381_v47 = vor.u32 %v5380_v0, %v5377_v62  ;;  %v944_v36 = vshrl.u32 %v14662_v9, 16  ;;  %v947_v22 = vshll.u32 %v14662_v9, 16  ;;  %v441_v26 = vld [vmem:[#allocation2 + $0x9c] sm:$0x1] }
  0xa2   :  { %v1993_v35 = vsel %vm14254_vm9, %v1988_v3, %v1992_v21  ;;  %v5391_v14 = vor.u32 %v5390_v11, %v5386_v4  ;;  %v941_v41 = vor.u32 %v939_v53, %v938_v61  ;;  %v942_v32 = vrot.slane %v938_v61, 4  ;;  %v1499_v12 = vld [vmem:[#allocation2 + $0x8c] sm:$0x1] }
  0xa3   :  { %v2003_v18 = vsel %vm14254_vm9, %v1998_v2, %v2002_v24  ;;  %v5382_v57 = vrot.slane %v5381_v47, 4  ;;  %v946_v42 = vrot.slane %v944_v36, 7  ;;  %v311_v7 = vmax.f32 %v14667_v15, 0.0  ;;  %v12050_v24 = vld [vmem:[%s17262_s0 + $0x60] sm:$0xff]  }
  0xa4   :  { %v11000_v27 = vcombine.low %v1993_v35, %v2003_v18  ;;  %v5392_v59 = vrot.slane %v5391_v14, 4  ;;  %v1489_v9 = vsel %vm14273_vm10, %v941_v41, %v1488_v25  ;;  %v11643_v51 = vpack.c.bf16 %v310_v34, %v310_v34 }
  0xa5   :  { %v5387_v10 = vsel %vm14254_vm9, %v5382_v57, %v5386_v4  ;;  %v178_v19 = vmul.f32 %v14539_v5, %v11797_v28  ;;  %v949_v21 = vor.u32 %v947_v22, %v946_v42  ;;  %v951_v44 = vrot.slane %v946_v42, 4  ;;  %1490 = vst [vmem:[#allocation2 + $0x78] sm:$0xf] %v1489_v9 }
  0xa6   :  { %12494 = vmatmul.mubr.bf16.gmra.mrb[16].mxu1 %v11000_v27  ;;  %v5397_v15 = vsel %vm14254_vm9, %v5392_v59, %v5396_v23  ;;  %v11644_v37 = vpack.c.bf16 %v311_v7, %v311_v7  ;;  %v953_v49 = vshrl.u32 %v11643_v51, 16  ;;  %v956_v34 = vshll.u32 %v11643_v51, 16 }
  0xa7   :  { %v11239_v45 = vcombine.low %v5387_v10, %v5397_v15  ;;  %v179_v28 = vmul.f32 %v14539_v5, %v11798_v60  ;;  %v950_v58 = vsel %vm14280_vm11, %v942_v32, %v949_v21  ;;  %v1493_v46 = vsel %vm14186_vm3, %v951_v44, %v1492_v43 }
  0xa8   :  { %v961_v50 = vshrl.u32 %v11644_v37, 16  ;;  %v964_v6 = vshll.u32 %v11644_v37, 16  ;;  %1491 = vst [vmem:[#allocation2 + $0x7c] sm:$0xf] %v950_v58  ;;  %1494 = vst [vmem:[#allocation2 + $0x80] sm:$0x1] %v1493_v46  ;;  %v248_v0 = vadd.f32 %v14554_v8, %v178_v19  ;;  %v11801_v4 = vunpack.c.l.bf16 %v12050_v24 }
  0xa9   :  { %12813 = vmatprep.mubr.bf16.mxu0 %v11239_v45  ;;  %v955_v62 = vrot.slane %v953_v49, 7  ;;  %v249_v48 = vadd.f32 %v14554_v8, %v179_v28  ;;  %v439_v60 = vsel %vm14186_vm3, 0, %v438_v16  ;;  %v549_v3 = vsel %vm14193_vm4, 0, %v548_v33 }
  0xaa   :  { %v963_v52 = vrot.slane %v961_v50, 7  ;;  %440 = vst [vmem:[#allocation2 + $0x90] sm:$0x1] %v439_v60  ;;  %v11802_v11 = vunpack.c.h.bf16 %v12050_v24  ;;  %v312_v2 = vmax.f32 %v248_v0, 0.0  ;;  %550 = vst [vmem:[#allocation2 + $0x98] sm:$0x1] %v549_v3  ;;  %v180_v30 = vmul.f32 %v14539_v5, %v11801_v4 }
  0xab   :  { %v958_v23 = vor.u32 %v956_v34, %v955_v62  ;;  %v959_v25 = vrot.slane %v955_v62, 4  ;;  %v313_v47 = vmax.f32 %v249_v48, 0.0  ;;  %v442_v41 = vsel %vm14186_vm3, 0, %v441_v26  ;;  %v14737_v50 = vld [vmem:[%s17262_s0 + $0x68] sm:$0xff]  }
  0xac   :  { %v966_v61 = vor.u32 %v964_v6, %v963_v52  ;;  %v968_v53 = vrot.slane %v963_v52, 4  ;;  %v181_v35 = vmul.f32 %v14539_v5, %v11802_v11  ;;  %v5113_v14 = vld [vmem:[#allocation2 + $0x78] sm:$0xf]  ;;  %v11645_v18 = vpack.c.bf16 %v312_v2, %v312_v2  ;;  %443 = vst [vmem:[#allocation2 + $0x9c] sm:$0x1] %v442_v41 }
  0xad   :  { %v1669_v36 = vld [vmem:[#allocation2 + $0x78] sm:$0xf]  ;;  %v1496_v22 = vsel %vm14273_vm10, %v958_v23, %v1495_v54  ;;  %v14720_v57 = vpack.c.bf16 %v313_v47, %v313_v47  ;;  %v5399_v32 = vshrl.u32 %v5113_v14, 16  ;;  %v5402_v27 = vshll.u32 %v5113_v14, 16 }
  0xae   :  { %v2005_v59 = vshrl.u32 %v1669_v36, 16  ;;  %v2008_v42 = vshll.u32 %v1669_v36, 16  ;;  %1497 = vst [vmem:[#allocation2 + $0x84] sm:$0xf] %v1496_v22  ;;  %v967_v5 = vsel %vm14280_vm11, %v959_v25, %v966_v61  ;;  %v1500_v7 = vsel %vm14186_vm3, %v968_v53, %v1499_v12  ;;  %v13937_v20 = vld [vmem:[#allocation2 + $0x78] sm:$0xf] }
  0xaf   :  { %v970_v16 = vshrl.u32 %v11645_v18, 16  ;;  %v973_v10 = vshll.u32 %v11645_v18, 16  ;;  %v5114_v9 = vld [vmem:[#allocation2 + $0x7c] sm:$0xf]  ;;  %v5115_v43 = vld [vmem:[#allocation2 + $0x80] sm:$0x1]  ;;  %v14729_v33 = vadd.f32 %v14554_v8, %v180_v30  ;;  %v14732_v15 = vadd.f32 %v14554_v8, %v181_v35 }
  0xb0   :  { %v5401_v51 = vrot.slane %v5399_v32, 4  ;;  %v5404_v19 = vrot.slane %v5402_v27, 5  ;;  %1498 = vst [vmem:[#allocation2 + $0x88] sm:$0xf] %v967_v5  ;;  %1501 = vst [vmem:[#allocation2 + $0x8c] sm:$0x1] %v1500_v7  ;;  %v11805_v23 = vunpack.c.l.bf16 %v14737_v50  ;;  %v11806_v22 = vunpack.c.h.bf16 %v14737_v50 }
  0xb1   :  { %v5408_v21 = vshll.u32 %v5114_v9, 16  ;;  %v5412_v44 = vshrl.u32 %v5114_v9, 16  ;;  %v5418_v37 = vshll.u32 %v5115_v43, 16  ;;  %v1670_v24 = vld [vmem:[#allocation2 + $0x7c] sm:$0xf]  ;;  %v2007_v45 = vrot.slane %v2005_v59, 4 }
  0xb2   :  { %v5405_v49 = vor.u32 %v5404_v19, %v5401_v51  ;;  %v1739_v34 = vld [vmem:[#allocation2 + $0x80] sm:$0x1]  ;;  %v2010_v28 = vrot.slane %v2008_v42, 5  ;;  %v2014_v58 = vshll.u32 %v1670_v24, 16  ;;  %v2018_v46 = vshrl.u32 %v1670_v24, 16 }
  0xb3   :  { %v5410_v6 = vrot.slane %v5408_v21, 5  ;;  %v5414_v54 = vrot.slane %v5412_v44, 4  ;;  %v5420_v26 = vrot.slane %v5418_v37, 5  ;;  %v2024_v8 = vshll.u32 %v1739_v34, 16  ;;  %v3553_v1 = vld [vmem:[#allocation2 + $0x78] sm:$0xe] }
  0xb4   :  { %v5406_v62 = vrot.slane %v5405_v49, 4  ;;  %v2011_v0 = vor.u32 %v2010_v28, %v2007_v45  ;;  %v2016_v48 = vrot.slane %v2014_v58, 5  ;;  %v2020_v60 = vrot.slane %v2018_v46, 4  ;;  %v1502_v45 = vld [vmem:[#allocation2 + $0x90] sm:$0xf] }
  0xb5   :  { %v5415_v52 = vor.u32 %v5414_v54, %v5410_v6  ;;  %v2026_v3 = vrot.slane %v2024_v8, 5  ;;  %v1671_v4 = vld [vmem:[#allocation2 + $0x84] sm:$0xf]  ;;  %v14739_v11 = vrot.slane %v970_v16, 7 }
  0xb6   :  { %v5411_v25 = vsel %vm14254_vm9, %v5406_v62, %v5410_v6  ;;  %v2012_v2 = vrot.slane %v2011_v0, 4  ;;  %v2021_v47 = vor.u32 %v2020_v60, %v2016_v48  ;;  %v2029_v61 = vshrl.u32 %v1671_v4, 16  ;;  %v5116_v53 = vld [vmem:[#allocation2 + $0x84] sm:$0xf] }
  0xb7   :  { %v5416_v12 = vrot.slane %v5415_v52, 4  ;;  %v1672_v30 = vld [vmem:[#allocation2 + $0x88] sm:$0xf]  ;;  %v1740_v35 = vld [vmem:[#allocation2 + $0x8c] sm:$0x1]  ;;  %v2032_v14 = vshll.u32 %v1671_v4, 16  ;;  %v975_v36 = vor.u32 %v973_v10, %v14739_v11 }
  0xb8   :  { %v2017_v18 = vsel %vm14254_vm9, %v2012_v2, %v2016_v48  ;;  %v2022_v41 = vrot.slane %v2021_v47, 4  ;;  %v2031_v32 = vrot.slane %v2029_v61, 4  ;;  %v2038_v27 = vshll.u32 %v1672_v30, 16  ;;  %v5117_v16 = vld [vmem:[#allocation2 + $0x88] sm:$0xf] }
  0xb9   :  { %v5421_v59 = vsel %vm14254_vm9, %v5416_v12, %v5420_v26  ;;  %v2034_v42 = vrot.slane %v2032_v14, 5  ;;  %v2042_v5 = vshrl.u32 %v1672_v30, 16  ;;  %v2048_v7 = vshll.u32 %v1740_v35, 16  ;;  %v5118_v51 = vld [vmem:[#allocation2 + $0x8c] sm:$0x1] }
  0xba   :  { %v11240_v9 = vcombine.low %v5411_v25, %v5421_v59  ;;  %v2027_v43 = vsel %vm14254_vm9, %v2022_v41, %v2026_v3  ;;  %v2040_v10 = vrot.slane %v2038_v27, 5  ;;  %v5423_v19 = vshrl.u32 %v5116_v53, 16  ;;  %v551_v46 = vld [vmem:[#allocation2 + $0xa4] sm:$0x1]  ;;  %v1506_v12 = vld [vmem:[#allocation2 + $0x98] sm:$0x1] }
  0xbb   :  { %v11001_v21 = vcombine.low %v2017_v18, %v2027_v43  ;;  %v2035_v44 = vor.u32 %v2034_v42, %v2031_v32  ;;  %v2044_v37 = vrot.slane %v2042_v5, 4  ;;  %v2050_v24 = vrot.slane %v2048_v7, 5  ;;  %v444_v27 = vld [vmem:[#allocation2 + $0xa8] sm:$0x1]  ;;  %v554_v59 = vld [vmem:[#allocation2 + $0xb0] sm:$0x1] }
  0xbc   :  { %12814 = vmatmul.mubr.bf16.gmra.mrb[16].mxu0 %v11240_v9  ;;  %v5425_v49 = vrot.slane %v5423_v19, 4  ;;  %v5426_v34 = vshll.u32 %v5116_v53, 16  ;;  %v5432_v28 = vshll.u32 %v5117_v16, 16  ;;  %v5436_v58 = vshrl.u32 %v5117_v16, 16  ;;  %v14768_v7 = vld [vmem:[%s17263_s1] ss:$0 sm:$0xff] }
  0xbd   :  { %12497 = vmatprep.mubr.bf16.mxu1 %v11001_v21  ;;  %v2036_v6 = vrot.slane %v2035_v44, 4  ;;  %v2045_v54 = vor.u32 %v2044_v37, %v2040_v10  ;;  %v5442_v26 = vshll.u32 %v5118_v51, 16  ;;  %v976_v8 = vrot.slane %v14739_v11, 4  ;;  %v14781_v16 = vld [vmem:[%s17262_s0 + $0x78] sm:$0xff]  }
  0xbe   :  { %v5428_v62 = vrot.slane %v5426_v34, 5  ;;  %v5434_v0 = vrot.slane %v5432_v28, 5  ;;  %v5438_v48 = vrot.slane %v5436_v58, 4  ;;  %v978_v60 = vshrl.u32 %v14720_v57, 16  ;;  %v1509_v34 = vld [vmem:[#allocation2 + $0x9c] sm:$0xf] }
  0xbf   :  { %v2041_v52 = vsel %vm14254_vm9, %v2036_v6, %v2040_v10  ;;  %v2046_v3 = vrot.slane %v2045_v54, 4  ;;  %v5444_v4 = vrot.slane %v5442_v26, 5  ;;  %v981_v25 = vshll.u32 %v14720_v57, 16 }
  0xc0   :  { %v5429_v2 = vor.u32 %v5428_v62, %v5425_v49  ;;  %v5439_v47 = vor.u32 %v5438_v48, %v5434_v0  ;;  %v980_v61 = vrot.slane %v978_v60, 7  ;;  %v1503_v53 = vsel %vm14273_vm10, %v975_v36, %v1502_v45  ;;  %v14797_v45 = vld [vmem:[%s17264_s2] ss:$0 sm:$0xff] }
  0xc1   :  { %v2051_v11 = vsel %vm14254_vm9, %v2046_v3, %v2050_v24  ;;  %1504 = vst [vmem:[#allocation2 + $0x90] sm:$0xf] %v1503_v53  ;;  %v314_v30 = vmax.f32 %v14729_v33, 0.0  ;;  %v315_v35 = vmax.f32 %v14732_v15, 0.0  ;;  %v552_v14 = vsel %vm14193_vm4, 0, %v551_v46  ;;  %v14776_v15 = vld [vmem:[%s17262_s0 + $0x70] sm:$0xff]  }
  0xc2   :  { %v11002_v18 = vcombine.low %v2041_v52, %v2051_v11  ;;  %v5430_v57 = vrot.slane %v5429_v2, 4  ;;  %v5440_v41 = vrot.slane %v5439_v47, 4  ;;  %v983_v32 = vor.u32 %v981_v25, %v980_v61  ;;  %553 = vst [vmem:[#allocation2 + $0xa4] sm:$0x1] %v552_v14 }
  0xc3   :  { %v985_v36 = vrot.slane %v980_v61, 4  ;;  %v11647_v42 = vpack.c.bf16 %v314_v30, %v314_v30  ;;  %v11648_v5 = vpack.c.bf16 %v315_v35, %v315_v35  ;;  %v182_v33 = vmul.f32 %v14768_v7, %v11805_v23 }
  0xc4   :  { %12498 = vmatmul.mubr.bf16.gmra.mrb[20].mxu1 %v11002_v18  ;;  %v5435_v9 = vsel %vm14254_vm9, %v5430_v57, %v5434_v0  ;;  %v5445_v43 = vsel %vm14254_vm9, %v5440_v41, %v5444_v4  ;;  %v984_v23 = vsel %vm14280_vm11, %v976_v8, %v983_v32  ;;  %v183_v10 = vmul.f32 %v14768_v7, %v11806_v22 }
  0xc5   :  { %v11241_v51 = vcombine.low %v5435_v9, %v5445_v43  ;;  %1505 = vst [vmem:[#allocation2 + $0x94] sm:$0xf] %v984_v23  ;;  %v1507_v19 = vsel %vm14186_vm3, %v985_v36, %v1506_v12  ;;  %v987_v21 = vshrl.u32 %v11647_v42, 16  ;;  %v990_v44 = vshll.u32 %v11647_v42, 16 }
  0xc6   :  { %1508 = vst [vmem:[#allocation2 + $0x98] sm:$0x1] %v1507_v19  ;;  %v995_v37 = vshrl.u32 %v11648_v5, 16  ;;  %v998_v24 = vshll.u32 %v11648_v5, 16  ;;  %v252_v49 = vadd.f32 %v14797_v45, %v182_v33  ;;  %v253_v50 = vadd.f32 %v14797_v45, %v183_v10 }
  0xc7   :  { %12817 = vmatprep.mubr.bf16.mxu0 %v11241_v51  ;;  %v989_v22 = vrot.slane %v987_v21, 7  ;;  %v445_v28 = vsel %vm14186_vm3, 0, %v444_v27  ;;  %v555_v58 = vsel %vm14193_vm4, 0, %v554_v59  ;;  %v11809_v46 = vunpack.c.l.bf16 %v14776_v15 }
  0xc8   :  { %v5119_v6 = vld [vmem:[#allocation2 + $0x90] sm:$0xf]  ;;  %v997_v26 = vrot.slane %v995_v37, 7  ;;  %v316_v8 = vmax.f32 %v252_v49, 0.0  ;;  %446 = vst [vmem:[#allocation2 + $0xa8] sm:$0x1] %v445_v28  ;;  %v11810_v62 = vunpack.c.h.bf16 %v14776_v15  ;;  %v11813_v0 = vunpack.c.l.bf16 %v14781_v16 }
  0xc9   :  { %v1673_v54 = vld [vmem:[#allocation2 + $0x90] sm:$0xf]  ;;  %556 = vst [vmem:[#allocation2 + $0xb0] sm:$0x1] %v555_v58  ;;  %v5447_v48 = vshrl.u32 %v5119_v6, 16  ;;  %v5450_v60 = vshll.u32 %v5119_v6, 16  ;;  %v992_v25 = vor.u32 %v990_v44, %v989_v22 }
  0xca   :  { %v2053_v52 = vshrl.u32 %v1673_v54, 16  ;;  %v2056_v3 = vshll.u32 %v1673_v54, 16  ;;  %v1513_v4 = vld [vmem:[#allocation2 + $0xa4] sm:$0x1]  ;;  %v993_v2 = vrot.slane %v989_v22, 4  ;;  %v1000_v47 = vor.u32 %v998_v24, %v997_v26  ;;  %v13740_v58 = vld [vmem:[%s17261_s3 + $0x28] sm:$0xff]  }
  0xcb   :  { %v1002_v61 = vrot.slane %v997_v26, 4  ;;  %v5449_v53 = vrot.slane %v5447_v48, 4  ;;  %v5452_v12 = vrot.slane %v5450_v60, 5  ;;  %v1510_v57 = vsel %vm14273_vm10, %v992_v25, %v1509_v34  ;;  %12551 = vmatprep.subr.bf16.mxu1 %v13740_v58 }
  0xcc   :  { %v2055_v11 = vrot.slane %v2053_v52, 4  ;;  %v2058_v30 = vrot.slane %v2056_v3, 5  ;;  %v5120_v35 = vld [vmem:[#allocation2 + $0x94] sm:$0xf]  ;;  %v1001_v18 = vsel %vm14280_vm11, %v993_v2, %v1000_v47  ;;  %v317_v32 = vmax.f32 %v253_v50, 0.0  ;;  %12552 = vmatpush3.bf16.msra.mxu1 %v13740_v58 }
  0xcd   :  { %v1674_v14 = vld [vmem:[#allocation2 + $0x94] sm:$0xf]  ;;  %v1514_v41 = vsel %vm14186_vm3, %v1002_v61, %v1513_v4  ;;  %v5121_v27 = vld [vmem:[#allocation2 + $0x98] sm:$0x1]  ;;  %v5453_v59 = vor.u32 %v5452_v12, %v5449_v53  ;;  %v5456_v36 = vshll.u32 %v5120_v35, 16  ;;  %v5460_v42 = vshrl.u32 %v5120_v35, 16 }
  0xce   :  { %v1741_v5 = vld [vmem:[#allocation2 + $0x98] sm:$0x1]  ;;  %v2059_v33 = vor.u32 %v2058_v30, %v2055_v11  ;;  %1511 = vst [vmem:[#allocation2 + $0x9c] sm:$0xf] %v1510_v57  ;;  %1512 = vst [vmem:[#allocation2 + $0xa0] sm:$0xf] %v1001_v18  ;;  %v11649_v34 = vpack.c.bf16 %v316_v8, %v316_v8  ;;  %v14816_v28 = vpack.c.bf16 %v317_v32, %v317_v32 }
  0xcf   :  { %1515 = vst [vmem:[#allocation2 + $0xa4] sm:$0x1] %v1514_v41  ;;  %v5466_v15 = vshll.u32 %v5121_v27, 16  ;;  %v2062_v9 = vshll.u32 %v1674_v14, 16  ;;  %v2066_v43 = vshrl.u32 %v1674_v14, 16  ;;  %v2072_v23 = vshll.u32 %v1741_v5, 16 }
  0xd0   :  { %v5454_v10 = vrot.slane %v5453_v59, 4  ;;  %v5458_v51 = vrot.slane %v5456_v36, 5  ;;  %v5462_v19 = vrot.slane %v5460_v42, 4  ;;  %v2060_v21 = vrot.slane %v2059_v33, 4  ;;  %v447_v58 = vld [vmem:[#allocation2 + $0xb4] sm:$0x1] }
  0xd1   :  { %v5468_v44 = vrot.slane %v5466_v15, 5  ;;  %v2064_v37 = vrot.slane %v2062_v9, 5  ;;  %v2068_v24 = vrot.slane %v2066_v43, 4  ;;  %v2074_v49 = vrot.slane %v2072_v23, 5 }
  0xd2   :  { %v5459_v50 = vsel %vm14254_vm9, %v5454_v10, %v5458_v51  ;;  %v5463_v22 = vor.u32 %v5462_v19, %v5458_v51  ;;  %v184_v26 = vmul.f32 %v14768_v7, %v11809_v46  ;;  %v185_v48 = vmul.f32 %v14768_v7, %v11810_v62 }
  0xd3   :  { %v2065_v6 = vsel %vm14254_vm9, %v2060_v21, %v2064_v37  ;;  %v2069_v54 = vor.u32 %v2068_v24, %v2064_v37  ;;  %v1004_v52 = vshrl.u32 %v11649_v34, 16  ;;  %v1007_v3 = vshll.u32 %v11649_v34, 16 }
  0xd4   :  { %v5464_v60 = vrot.slane %v5463_v22, 4  ;;  %v1012_v4 = vshrl.u32 %v14816_v28, 16  ;;  %v1015_v47 = vshll.u32 %v14816_v28, 16  ;;  %v14828_v61 = vadd.f32 %v14797_v45, %v184_v26 }
  0xd5   :  { %v2070_v8 = vrot.slane %v2069_v54, 4  ;;  %v1675_v25 = vld [vmem:[#allocation2 + $0x9c] sm:$0xf]  ;;  %v1676_v2 = vld [vmem:[#allocation2 + $0xa0] sm:$0xf]  ;;  %v14831_v53 = vadd.f32 %v14797_v45, %v185_v48  ;;  %v1006_v24 = vrot.slane %v1004_v52, 7 }
  0xd6   :  { %v5469_v46 = vsel %vm14254_vm9, %v5464_v60, %v5468_v44  ;;  %v1742_v62 = vld [vmem:[#allocation2 + $0xa4] sm:$0x1]  ;;  %v2077_v12 = vshrl.u32 %v1675_v25, 16  ;;  %v2080_v11 = vshll.u32 %v1675_v25, 16  ;;  %v2086_v30 = vshll.u32 %v1676_v2, 16 }
  0xd7   :  { %v11242_v35 = vcombine.low %v5459_v50, %v5469_v46  ;;  %v2075_v14 = vsel %vm14254_vm9, %v2070_v8, %v2074_v49  ;;  %v2090_v18 = vshrl.u32 %v1676_v2, 16  ;;  %v2096_v57 = vshll.u32 %v1742_v62, 16  ;;  %v5122_v41 = vld [vmem:[#allocation2 + $0x9c] sm:$0xf]  ;;  %v5123_v32 = vld [vmem:[#allocation2 + $0xa0] sm:$0xf] }
  0xd8   :  { %v11003_v27 = vcombine.low %v2065_v6, %v2075_v14  ;;  %v2079_v59 = vrot.slane %v2077_v12, 4  ;;  %v2082_v36 = vrot.slane %v2080_v11, 5  ;;  %v2088_v42 = vrot.slane %v2086_v30, 5  ;;  %v5124_v5 = vld [vmem:[#allocation2 + $0xa4] sm:$0x1] }
  0xd9   :  { %12818 = vmatmul.mubr.bf16.gmra.mrb[20].mxu0 %v11242_v35  ;;  %v2092_v33 = vrot.slane %v2090_v18, 4  ;;  %v2098_v15 = vrot.slane %v2096_v57, 5  ;;  %v5471_v9 = vshrl.u32 %v5122_v41, 16  ;;  %v5474_v43 = vshll.u32 %v5122_v41, 16  ;;  %v1516_v49 = vld [vmem:[#allocation2 + $0xa8] sm:$0xf] }
  0xda   :  { %12501 = vmatprep.mubr.bf16.mxu1 %v11003_v27  ;;  %v2083_v23 = vor.u32 %v2082_v36, %v2079_v59  ;;  %v5480_v10 = vshll.u32 %v5123_v32, 16  ;;  %v5484_v51 = vshrl.u32 %v5123_v32, 16  ;;  %v5490_v19 = vshll.u32 %v5124_v5, 16  ;;  %v557_v6 = vld [vmem:[#allocation2 + $0xbc] sm:$0x1] }
  0xdb   :  { %v2093_v21 = vor.u32 %v2092_v33, %v2088_v42  ;;  %v5473_v44 = vrot.slane %v5471_v9, 4  ;;  %v5476_v37 = vrot.slane %v5474_v43, 5  ;;  %v1009_v48 = vor.u32 %v1007_v3, %v1006_v24  ;;  %v1520_v11 = vld [vmem:[#allocation2 + $0xb0] sm:$0x1]  ;;  %v450_v35 = vld [vmem:[#allocation2 + $0xc0] sm:$0x1] }
  0xdc   :  { %v2084_v50 = vrot.slane %v2083_v23, 4  ;;  %v5482_v22 = vrot.slane %v5480_v10, 5  ;;  %v5486_v34 = vrot.slane %v5484_v51, 4  ;;  %v5492_v28 = vrot.slane %v5490_v19, 5  ;;  %v560_v41 = vld [vmem:[#allocation2 + $0xc8] sm:$0x1] }
  0xdd   :  { %v2094_v54 = vrot.slane %v2093_v21, 4  ;;  %v5477_v26 = vor.u32 %v5476_v37, %v5473_v44  ;;  %v1010_v60 = vrot.slane %v1006_v24, 4  ;;  %v1014_v2 = vrot.slane %v1012_v4, 7  ;;  %v456_v4 = vld [vmem:[#allocation2 + $0xd8] sm:$0x1] }
  0xde   :  { %v2089_v8 = vsel %vm14254_vm9, %v2084_v50, %v2088_v42  ;;  %v5487_v25 = vor.u32 %v5486_v34, %v5482_v22  ;;  %v318_v46 = vmax.f32 %v14828_v61, 0.0  ;;  %v1517_v12 = vsel %vm14273_vm10, %v1009_v48, %v1516_v49  ;;  %v566_v36 = vld [vmem:[#allocation2 + $0xe0] sm:$0x1] }
  0xdf   :  { %v2099_v52 = vsel %vm14254_vm9, %v2094_v54, %v2098_v15  ;;  %v5478_v62 = vrot.slane %v5477_v26, 4  ;;  %v319_v30 = vmax.f32 %v14831_v53, 0.0  ;;  %v1017_v18 = vor.u32 %v1015_v47, %v1014_v2  ;;  %1518 = vst [vmem:[#allocation2 + $0xa8] sm:$0xf] %v1517_v12  ;;  %v14851_v53 = vld [vmem:[#allocation2 + $0xdc] sm:$0xf] }
  0xe0   :  { %v11004_v3 = vcombine.low %v2089_v8, %v2099_v52  ;;  %v5488_v14 = vrot.slane %v5487_v25, 4  ;;  %v1019_v57 = vrot.slane %v1014_v2, 4  ;;  %v448_v32 = vsel %vm14186_vm3, 0, %v447_v58  ;;  %v14877_v34 = vld [vmem:[%s17262_s0 + $0x80] sm:$0xff]  }
  0xe1   :  { %v5483_v61 = vsel %vm14254_vm9, %v5478_v62, %v5482_v22  ;;  %v558_v27 = vsel %vm14193_vm4, 0, %v557_v6  ;;  %v11651_v59 = vpack.c.bf16 %v318_v46, %v318_v46  ;;  %v1018_v42 = vsel %vm14280_vm11, %v1010_v60, %v1017_v18  ;;  %449 = vst [vmem:[#allocation2 + $0xb4] sm:$0x1] %v448_v32 }
  0xe2   :  { %12502 = vmatmul.mubr.bf16.gmra.mrb[24].mxu1 %v11004_v3  ;;  %v5493_v47 = vsel %vm14254_vm9, %v5488_v14, %v5492_v28  ;;  %v1521_v5 = vsel %vm14186_vm3, %v1019_v57, %v1520_v11  ;;  %559 = vst [vmem:[#allocation2 + $0xbc] sm:$0x1] %v558_v27  ;;  %v11652_v33 = vpack.c.bf16 %v319_v30, %v319_v30  ;;  %1519 = vst [vmem:[#allocation2 + $0xac] sm:$0xf] %v1018_v42 }
  0xe3   :  { %v11243_v15 = vcombine.low %v5483_v61, %v5493_v47  ;;  %1522 = vst [vmem:[#allocation2 + $0xb0] sm:$0x1] %v1521_v5  ;;  %v1021_v9 = vshrl.u32 %v11651_v59, 16  ;;  %v1024_v43 = vshll.u32 %v11651_v59, 16  ;;  %v11814_v23 = vunpack.c.h.bf16 %v14781_v16 }
  0xe4   :  { %v1029_v10 = vshrl.u32 %v11652_v33, 16  ;;  %v1032_v51 = vshll.u32 %v11652_v33, 16  ;;  %v186_v19 = vmul.f32 %v14768_v7, %v11813_v0  ;;  %v451_v21 = vsel %vm14186_vm3, 0, %v450_v35 }
  0xe5   :  { %12821 = vmatprep.mubr.bf16.mxu0 %v11243_v15  ;;  %v1023_v44 = vrot.slane %v1021_v9, 7  ;;  %v187_v37 = vmul.f32 %v14768_v7, %v11814_v23  ;;  %452 = vst [vmem:[#allocation2 + $0xc0] sm:$0x1] %v451_v21  ;;  %v561_v24 = vsel %vm14193_vm4, 0, %v560_v41  ;;  %v457_v49 = vsel %vm14186_vm3, 0, %v456_v4 }
  0xe6   :  { %v1031_v50 = vrot.slane %v1029_v10, 7  ;;  %v256_v22 = vadd.f32 %v14797_v45, %v186_v19  ;;  %562 = vst [vmem:[#allocation2 + $0xc8] sm:$0x1] %v561_v24  ;;  %458 = vst [vmem:[#allocation2 + $0xd8] sm:$0x1] %v457_v49  ;;  %v567_v16 = vsel %vm14193_vm4, 0, %v566_v36  ;;  %v11817_v11 = vunpack.c.l.bf16 %v14877_v34 }
  0xe7   :  { %v2158_v0 = vshll.u32 %v14851_v53, 16  ;;  %v5125_v28 = vld [vmem:[#allocation2 + $0xa8] sm:$0xf]  ;;  %v1026_v6 = vor.u32 %v1024_v43, %v1023_v44  ;;  %v1027_v54 = vrot.slane %v1023_v44, 4  ;;  %v257_v26 = vadd.f32 %v14797_v45, %v187_v37  ;;  %568 = vst [vmem:[#allocation2 + $0xe0] sm:$0x1] %v567_v16 }
  0xe8   :  { %v1677_v58 = vld [vmem:[#allocation2 + $0xa8] sm:$0xf]  ;;  %v2162_v48 = vshrl.u32 %v14851_v53, 16  ;;  %v5495_v60 = vshrl.u32 %v5125_v28, 16  ;;  %v5498_v8 = vshll.u32 %v5125_v28, 16  ;;  %v1034_v46 = vor.u32 %v1032_v51, %v1031_v50 }
  0xe9   :  { %v2101_v25 = vshrl.u32 %v1677_v58, 16  ;;  %v2104_v2 = vshll.u32 %v1677_v58, 16  ;;  %v1036_v52 = vrot.slane %v1031_v50, 4  ;;  %v1523_v62 = vld [vmem:[#allocation2 + $0xb4] sm:$0xf]  ;;  %v320_v12 = vmax.f32 %v256_v22, 0.0 }
  0xea   :  { %v5126_v30 = vld [vmem:[#allocation2 + $0xac] sm:$0xf]  ;;  %v5127_v35 = vld [vmem:[#allocation2 + $0xb0] sm:$0x1]  ;;  %v5497_v3 = vrot.slane %v5495_v60, 4  ;;  %v5500_v14 = vrot.slane %v5498_v8, 5  ;;  %v1524_v18 = vsel %vm14273_vm10, %v1026_v6, %v1523_v62  ;;  %v11818_v41 = vunpack.c.h.bf16 %v14877_v34 }
  0xeb   :  { %v1527_v57 = vld [vmem:[#allocation2 + $0xbc] sm:$0x1]  ;;  %v5504_v4 = vshll.u32 %v5126_v30, 16  ;;  %v5508_v61 = vshrl.u32 %v5126_v30, 16  ;;  %v5514_v32 = vshll.u32 %v5127_v35, 16  ;;  %v2103_v59 = vrot.slane %v2101_v25, 4 }
  0xec   :  { %v1678_v27 = vld [vmem:[#allocation2 + $0xac] sm:$0xf]  ;;  %1525 = vst [vmem:[#allocation2 + $0xb4] sm:$0xf] %v1524_v18  ;;  %v5501_v36 = vor.u32 %v5500_v14, %v5497_v3  ;;  %v1743_v47 = vld [vmem:[#allocation2 + $0xb0] sm:$0x1]  ;;  %v1035_v24 = vsel %vm14280_vm11, %v1027_v54, %v1034_v46  ;;  %v1528_v49 = vsel %vm14186_vm3, %v1036_v52, %v1527_v57  ;;  %v11653_v60 = vpack.c.bf16 %v320_v12, %v320_v12 }
  0xed   :  { %v2106_v42 = vrot.slane %v2104_v2, 5  ;;  %v2110_v5 = vshll.u32 %v1678_v27, 16  ;;  %v2114_v33 = vshrl.u32 %v1678_v27, 16  ;;  %v5506_v15 = vrot.slane %v5504_v4, 5  ;;  %v14889_v50 = vld [vmem:[#allocation2 + $0xd8] sm:$0xf] }
  0xee   :  { %v5510_v9 = vrot.slane %v5508_v61, 4  ;;  %v5516_v43 = vrot.slane %v5514_v32, 5  ;;  %v2120_v23 = vshll.u32 %v1743_v47, 16  ;;  %v5502_v10 = vrot.slane %v5501_v36, 4  ;;  %1526 = vst [vmem:[#allocation2 + $0xb8] sm:$0xf] %v1035_v24 }
  0xef   :  { %v2107_v51 = vor.u32 %v2106_v42, %v2103_v59  ;;  %v2112_v19 = vrot.slane %v2110_v5, 5  ;;  %v2116_v21 = vrot.slane %v2114_v33, 4  ;;  %1529 = vst [vmem:[#allocation2 + $0xbc] sm:$0x1] %v1528_v49  ;;  %v321_v58 = vmax.f32 %v257_v26, 0.0  ;;  %v14908_v14 = vld [vmem:[%s17262_s0 + $0x88] sm:$0xff]  }
  0xf0   :  { %v5511_v44 = vor.u32 %v5510_v9, %v5506_v15  ;;  %v2122_v37 = vrot.slane %v2120_v23, 5  ;;  %v5507_v22 = vsel %vm14254_vm9, %v5502_v10, %v5506_v15  ;;  %v2149_v8 = vshrl.u32 %v14889_v50, 16  ;;  %v1530_v49 = vld [vmem:[#allocation2 + $0xc0] sm:$0xf] }
  0xf1   :  { %v2108_v16 = vrot.slane %v2107_v51, 4  ;;  %v2117_v28 = vor.u32 %v2116_v21, %v2112_v19  ;;  %v2152_v25 = vshll.u32 %v14889_v50, 16  ;;  %v14897_v62 = vpack.c.bf16 %v321_v58, %v321_v58 }
  0xf2   :  { %v5512_v6 = vrot.slane %v5511_v44, 4  ;;  %v14901_v30 = vrot.slane %v2158_v0, 5  ;;  %v1038_v61 = vshrl.u32 %v11653_v60, 16  ;;  %v1041_v42 = vshll.u32 %v11653_v60, 16 }
  0xf3   :  { %v2113_v54 = vsel %vm14254_vm9, %v2108_v16, %v2112_v19  ;;  %v2118_v2 = vrot.slane %v2117_v28, 4  ;;  %v1679_v46 = vld [vmem:[#allocation2 + $0xb4] sm:$0xf]  ;;  %v1046_v5 = vshrl.u32 %v14897_v62, 16  ;;  %v188_v23 = vmul.f32 %v14768_v7, %v11817_v11 }
  0xf4   :  { %v5128_v52 = vld [vmem:[#allocation2 + $0xb4] sm:$0xf]  ;;  %v5517_v26 = vsel %vm14254_vm9, %v5512_v6, %v5516_v43  ;;  %v2125_v12 = vshrl.u32 %v1679_v46, 16  ;;  %v2128_v35 = vshll.u32 %v1679_v46, 16  ;;  %v1040_v47 = vrot.slane %v1038_v61, 7 }
  0xf5   :  { %v5519_v3 = vshrl.u32 %v5128_v52, 16  ;;  %v11244_v18 = vcombine.low %v5507_v22, %v5517_v26  ;;  %v2123_v57 = vsel %vm14254_vm9, %v2118_v2, %v2122_v37  ;;  %v5522_v4 = vshll.u32 %v5128_v52, 16  ;;  %v1680_v33 = vld [vmem:[#allocation2 + $0xb8] sm:$0xf]  ;;  %v1745_v2 = vld [vmem:[#allocation2 + $0xe0] sm:$0x1] }
  0xf6   :  { %v11005_v32 = vcombine.low %v2113_v54, %v2123_v57  ;;  %v2127_v0 = vrot.slane %v2125_v12, 4  ;;  %v2130_v27 = vrot.slane %v2128_v35, 5  ;;  %v1744_v15 = vld [vmem:[#allocation2 + $0xbc] sm:$0x1]  ;;  %v5129_v43 = vld [vmem:[#allocation2 + $0xb8] sm:$0xf]  ;;  %v189_v10 = vmul.f32 %v14768_v7, %v11818_v41 }
  0xf7   :  { %v5521_v59 = vrot.slane %v5519_v3, 4  ;;  %12822 = vmatmul.mubr.bf16.gmra.mrb[24].mxu0 %v11244_v18  ;;  %v5524_v36 = vrot.slane %v5522_v4, 5  ;;  %v11821_v51 = vunpack.c.l.bf16 %v14908_v14  ;;  %v2134_v19 = vshll.u32 %v1680_v33, 16  ;;  %v5130_v37 = vld [vmem:[#allocation2 + $0xbc] sm:$0x1] }
  0xf8   :  { %12505 = vmatprep.mubr.bf16.mxu1 %v11005_v32  ;;  %v2131_v9 = vor.u32 %v2130_v27, %v2127_v0  ;;  %v2138_v21 = vshrl.u32 %v1680_v33, 16  ;;  %v2144_v44 = vshll.u32 %v1744_v15, 16  ;;  %v5528_v16 = vshll.u32 %v5129_v43, 16  ;;  %v1534_v32 = vld [vmem:[#allocation2 + $0xc8] sm:$0x1] }
  0xf9   :  { %v5525_v24 = vor.u32 %v5524_v36, %v5521_v59  ;;  %v5532_v28 = vshrl.u32 %v5129_v43, 16  ;;  %v5538_v58 = vshll.u32 %v5130_v37, 16  ;;  %v2136_v6 = vrot.slane %v2134_v19, 5  ;;  %v569_v15 = vld [vmem:[#allocation2 + $0xec] sm:$0x1] }
  0xfa   :  { %v2132_v22 = vrot.slane %v2131_v9, 4  ;;  %v2140_v60 = vrot.slane %v2138_v21, 4  ;;  %v2146_v54 = vrot.slane %v2144_v44, 5  ;;  %v5530_v34 = vrot.slane %v5528_v16, 5 }
  0xfb   :  { %v5526_v11 = vrot.slane %v5525_v24, 4  ;;  %v5534_v46 = vrot.slane %v5532_v28, 4  ;;  %v5540_v41 = vrot.slane %v5538_v58, 5  ;;  %v1043_v52 = vor.u32 %v1041_v42, %v1040_v47  ;;  %v13742_v58 = vld [vmem:[%s17261_s3 + $0x30] sm:$0xff]  }
  0xfc   :  { %v2137_v26 = vsel %vm14254_vm9, %v2132_v22, %v2136_v6  ;;  %v2141_v12 = vor.u32 %v2140_v60, %v2136_v6  ;;  %v1044_v35 = vrot.slane %v1040_v47, 4  ;;  %v1048_v3 = vrot.slane %v1046_v5, 7  ;;  %v459_v47 = vld [vmem:[#allocation2 + $0xe4] sm:$0x1]  ;;  %12553 = vmatprep.subr.bf16.mxu1 %v13742_v58 }
  0xfd   :  { %v5531_v18 = vsel %vm14254_vm9, %v5526_v11, %v5530_v34  ;;  %v5535_v57 = vor.u32 %v5534_v46, %v5530_v34  ;;  %v1049_v4 = vshll.u32 %v14897_v62, 16  ;;  %v1531_v61 = vsel %vm14273_vm10, %v1043_v52, %v1530_v49  ;;  %v6496_v49 = vld [vmem:[#allocation2 + $0xc] sm:$0xe]  ;;  %v13882_v46 = vld [vmem:[#allocation2 + $0x10] sm:$0xf]  ;;  %12554 = vmatpush3.bf16.msra.mxu1 %v13742_v58 }
  0xfe   :  { %v2142_v0 = vrot.slane %v2141_v12, 4  ;;  %v1053_v27 = vrot.slane %v1048_v3, 4  ;;  %1532 = vst [vmem:[#allocation2 + $0xc0] sm:$0xf] %v1531_v61  ;;  %v2151_v59 = vrot.slane %v2149_v8, 4  ;;  %v2154_v36 = vrot.slane %v2152_v25, 5 }
  0xff   :  { %v5536_v42 = vrot.slane %v5535_v57, 4  ;;  %v1051_v5 = vor.u32 %v1049_v4, %v1048_v3  ;;  %v2164_v33 = vrot.slane %v2162_v48, 4  ;;  %v2168_v62 = vshll.u32 %v1745_v2, 16 }
 0x100   :  { %v2147_v9 = vsel %vm14254_vm9, %v2142_v0, %v2146_v54  ;;  %v1535_v43 = vsel %vm14186_vm3, %v1053_v27, %v1534_v32  ;;  %v2155_v19 = vor.u32 %v2154_v36, %v2151_v59  ;;  %v258_v8 = vadd.f32 %v14797_v45, %v188_v23 }
 0x101   :  { %v11006_v21 = vcombine.low %v2137_v26, %v2147_v9  ;;  %v5541_v50 = vsel %vm14254_vm9, %v5536_v42, %v5540_v41  ;;  %v1052_v25 = vsel %vm14280_vm11, %v1044_v35, %v1051_v5  ;;  %1536 = vst [vmem:[#allocation2 + $0xc8] sm:$0x1] %v1535_v43  ;;  %v2165_v53 = vor.u32 %v2164_v33, %v14901_v30  ;;  %v6497_v35 = vld [vmem:[#allocation2 + $0x18] sm:$0xe] }
 0x102   :  { %v11245_v48 = vcombine.low %v5531_v18, %v5541_v50  ;;  %1533 = vst [vmem:[#allocation2 + $0xc4] sm:$0xf] %v1052_v25  ;;  %v2156_v44 = vrot.slane %v2155_v19, 4  ;;  %v2170_v37 = vrot.slane %v2168_v62, 5  ;;  %v259_v24 = vadd.f32 %v14797_v45, %v189_v10 }
 0x103   :  { %12506 = vmatmul.mubr.bf16.gmra.mrb[28].mxu1 %v11006_v21  ;;  %v2166_v22 = vrot.slane %v2165_v53, 4  ;;  %v322_v23 = vmax.f32 %v258_v8, 0.0  ;;  %v460_v16 = vsel %vm14186_vm3, 0, %v459_v47  ;;  %v570_v28 = vsel %vm14193_vm4, 0, %v569_v15  ;;  %v462_v53 = vld [vmem:[#allocation2 + $0xf0] sm:$0x1] }
 0x104   :  { %12825 = vmatprep.mubr.bf16.mxu0 %v11245_v48  ;;  %v2161_v6 = vsel %vm14254_vm9, %v2156_v44, %v14901_v30  ;;  %v323_v10 = vmax.f32 %v259_v24, 0.0  ;;  %461 = vst [vmem:[#allocation2 + $0xe4] sm:$0x1] %v460_v16  ;;  %571 = vst [vmem:[#allocation2 + $0xec] sm:$0x1] %v570_v28  ;;  %v11271_v34 = vrot.slane %v6496_v49, 9 }
 0x105   :  { %v5131_v60 = vld [vmem:[#allocation2 + $0xc0] sm:$0xf]  ;;  %v2171_v54 = vsel %vm14254_vm9, %v2166_v22, %v2170_v37  ;;  %v11655_v11 = vpack.c.bf16 %v322_v23, %v322_v23  ;;  %v6626_v41 = vrot.slane %v13882_v46, 5  ;;  %v11272_v33 = vrot.slane %v6497_v35, 9  ;;  %v572_v16 = vld [vmem:[#allocation2 + $0xf8] sm:$0x1] }
 0x106   :  { %v5543_v52 = vshrl.u32 %v5131_v60, 16  ;;  %v5546_v30 = vshll.u32 %v5131_v60, 16  ;;  %v11007_v26 = vcombine.low %v2161_v6, %v2171_v54  ;;  %v11656_v12 = vpack.c.bf16 %v323_v10, %v323_v10  ;;  %v12056_v28 = vld [vmem:[%s17262_s0 + $0x90] sm:$0xff]   ;;  %v465_v6 = vld [vmem:[#allocation2 + $0xfc] sm:$0x1] }
 0x107   :  { %v1055_v3 = vshrl.u32 %v11655_v11, 16  ;;  %v1058_v18 = vshll.u32 %v11655_v11, 16  ;;  %v14962_v57 = vsel %vm14956_vm14, %v11271_v34, %v6626_v41  ;;  %v6628_v4 = vrot.slane %v6626_v41, 4  ;;  %v575_v10 = vld [vmem:[#allocation2 + $0x104] sm:$0x1] }
 0x108   :  { %v5133_v61 = vld [vmem:[#allocation2 + $0xc8] sm:$0x1]  ;;  %v5545_v32 = vrot.slane %v5543_v52, 4  ;;  %v5548_v0 = vrot.slane %v5546_v30, 5  ;;  %12509 = vmatprep.mubr.bf16.mxu1 %v11007_v26  ;;  %v1063_v27 = vshrl.u32 %v11656_v12, 16  ;;  %v1066_v59 = vshll.u32 %v11656_v12, 16 }
 0x109   :  { %v5132_v36 = vld [vmem:[#allocation2 + $0xc4] sm:$0xf]  ;;  %v5562_v47 = vshll.u32 %v5133_v61, 16  ;;  %v1057_v42 = vrot.slane %v1055_v3, 7  ;;  %v14968_v5 = vsel %vm14956_vm14, %v6628_v4, %v6629_v55  ;;  %v14978_v22 = vsel %vm14956_vm14, %v11272_v33, %v6633_v38  ;;  %v15012_v12 = vld [vmem:[#allocation2 + $0x30] sm:$0xe] }
 0x10a   :  { %v5549_v62 = vor.u32 %v5548_v0, %v5545_v32  ;;  %v5552_v15 = vshll.u32 %v5132_v36, 16  ;;  %v5556_v9 = vshrl.u32 %v5132_v36, 16  ;;  %v1065_v43 = vrot.slane %v1063_v27, 7  ;;  %v6498_v11 = vld [vmem:[#allocation2 + $0x24] sm:$0xe] }
 0x10b   :  { %v5564_v19 = vrot.slane %v5562_v47, 5  ;;  %v1060_v8 = vor.u32 %v1058_v18, %v1057_v42  ;;  %v1061_v21 = vrot.slane %v1057_v42, 4  ;;  %v1537_v50 = vld [vmem:[#allocation2 + $0xe4] sm:$0xf]  ;;  %v11319_v25 = vcombine.low %v14962_v57, %v14968_v5  ;;  %v1541_v24 = vld [vmem:[#allocation2 + $0xec] sm:$0x1] }
 0x10c   :  { %v5550_v48 = vrot.slane %v5549_v62, 4  ;;  %v5554_v44 = vrot.slane %v5552_v15, 5  ;;  %v5558_v40 = vrot.slane %v5556_v9, 4  ;;  %v1068_v37 = vor.u32 %v1066_v59, %v1065_v43  ;;  %v13883_v0 = vld [vmem:[#allocation2 + $0x28] sm:$0xf] }
 0x10d   :  { %v1070_v55 = vrot.slane %v1065_v43, 4  ;;  %v1538_v49 = vsel %vm14273_vm10, %v1060_v8, %v1537_v50  ;;  %v14985_v23 = vsel %vm14956_vm14, %v14366_v31, %v6636_v39  ;;  %v11822_v31 = vunpack.c.h.bf16 %v14908_v14  ;;  %v13884_v47 = vld [vmem:[#allocation2 + $0x2c] sm:$0x1] }
 0x10e   :  { %v5555_v58 = vsel %vm14254_vm9, %v5550_v48, %v5554_v44  ;;  %v5559_v56 = vor.u32 %v5558_v40, %v5554_v44  ;;  %v1069_v38 = vsel %vm14280_vm11, %v1061_v21, %v1068_v37  ;;  %1539 = vst [vmem:[#allocation2 + $0xe4] sm:$0xf] %v1538_v49  ;;  %v11320_v63 = vcombine.low %v14978_v22, %v14985_v23  ;;  %v12057_v22 = vld [vmem:[%s17262_s0 + $0x98] sm:$0xff]  }
 0x10f   :  { %1540 = vst [vmem:[#allocation2 + $0xe8] sm:$0xf] %v1069_v38  ;;  %v1542_v39 = vsel %vm14186_vm3, %v1070_v55, %v1541_v24  ;;  %v190_v60 = vmul.f32 %v14768_v7, %v11821_v51  ;;  %v463_v54 = vsel %vm14186_vm3, 0, %v462_v53  ;;  %v573_v46 = vsel %vm14193_vm4, 0, %v572_v16 }
 0x110   :  { %v5560_v34 = vrot.slane %v5559_v56, 4  ;;  %1543 = vst [vmem:[#allocation2 + $0xec] sm:$0x1] %v1542_v39  ;;  %464 = vst [vmem:[#allocation2 + $0xf0] sm:$0x1] %v463_v54  ;;  %v11825_v41 = vunpack.c.l.bf16 %v12056_v28  ;;  %v11826_v52 = vunpack.c.h.bf16 %v12056_v28  ;;  %v191_v30 = vmul.f32 %v14768_v7, %v11822_v31 }
 0x111   :  { %v260_v26 = vadd.f32 %v14797_v45, %v190_v60  ;;  %574 = vst [vmem:[#allocation2 + $0xf8] sm:$0x1] %v573_v46  ;;  %v466_v14 = vsel %vm14186_vm3, 0, %v465_v6  ;;  %v576_v51 = vsel %vm14193_vm4, 0, %v575_v10  ;;  %v11273_v57 = vrot.slane %v6498_v11, 9 }
 0x112   :  { %v5565_v35 = vsel %vm14254_vm9, %v5560_v34, %v5564_v19  ;;  %v192_v3 = vmul.f32 %v14768_v7, %v11825_v41  ;;  %v193_v18 = vmul.f32 %v14768_v7, %v11826_v52  ;;  %467 = vst [vmem:[#allocation2 + $0xfc] sm:$0x1] %v466_v14  ;;  %577 = vst [vmem:[#allocation2 + $0x104] sm:$0x1] %v576_v51  ;;  %v6640_v27 = vrot.slane %v13883_v0, 5  ;;  %v13741_v34 = vld [vmem:[%s17261_s3 + $0x188] sm:$0xff]  }
 0x113   :  { %v11246_v4 = vcombine.low %v5555_v58, %v5565_v35  ;;  %v261_v61 = vadd.f32 %v14797_v45, %v191_v30  ;;  %v324_v32 = vmax.f32 %v260_v26, 0.0  ;;  %v6643_v42 = vrot.slane %v13884_v47, 5 }
 0x114   :  { %v262_v59 = vadd.f32 %v14797_v45, %v192_v3  ;;  %v263_v36 = vadd.f32 %v14797_v45, %v193_v18  ;;  %v11274_v5 = vrot.slane %v15012_v12, 9  ;;  %v15024_v15 = vsel %vm14956_vm14, %v11273_v57, %v6640_v27  ;;  %v13885_v57 = vld [vmem:[%s17261_s3 + $0x180] sm:$0xff]  }
 0x115   :  { %12826 = vmatmul.mubr.bf16.gmra.mrb[28].mxu0 %v11246_v4  ;;  %v1683_v33 = vld [vmem:[#allocation2 + $0xe4] sm:$0xf]  ;;  %v325_v7 = vmax.f32 %v261_v61, 0.0  ;;  %v11657_v62 = vpack.c.bf16 %v324_v32, %v324_v32  ;;  %v6642_v9 = vrot.slane %v6640_v27, 4 }
 0x116   :  { %v1684_v43 = vld [vmem:[#allocation2 + $0xe8] sm:$0xf]  ;;  %v2173_v19 = vshrl.u32 %v1683_v33, 16  ;;  %v2176_v8 = vshll.u32 %v1683_v33, 16  ;;  %12877 = vmatprep.mubr.bf16.mxu0 %v11319_v25  ;;  %v326_v21 = vmax.f32 %v262_v59, 0.0  ;;  %v327_v50 = vmax.f32 %v263_v36, 0.0 }
 0x117   :  { %v1746_v45 = vld [vmem:[#allocation2 + $0xec] sm:$0x1]  ;;  %v2182_v53 = vshll.u32 %v1684_v43, 16  ;;  %v2186_v48 = vshrl.u32 %v1684_v43, 16  ;;  %v11658_v44 = vpack.c.bf16 %v325_v7, %v325_v7  ;;  %v1072_v40 = vshrl.u32 %v11657_v62, 16  ;;  %v13743_v36 = vld [vmem:[%s17261_s3 + $0x190] sm:$0xff]  }
 0x118   :  { %v2175_v37 = vrot.slane %v2173_v19, 4  ;;  %v2178_v24 = vrot.slane %v2176_v8, 5  ;;  %v2192_v55 = vshll.u32 %v1746_v45, 16  ;;  %v1075_v49 = vshll.u32 %v11657_v62, 16  ;;  %v1544_v39 = vld [vmem:[#allocation2 + $0xf0] sm:$0xf] }
 0x119   :  { %v2184_v16 = vrot.slane %v2182_v53, 5  ;;  %v2188_v28 = vrot.slane %v2186_v48, 4  ;;  %v1074_v58 = vrot.slane %v1072_v40, 7  ;;  %v1080_v56 = vshrl.u32 %v11658_v44, 16  ;;  %v1548_v41 = vld [vmem:[#allocation2 + $0xf8] sm:$0x1] }
 0x11a   :  { %v2179_v38 = vor.u32 %v2178_v24, %v2175_v37  ;;  %v2194_v6 = vrot.slane %v2192_v55, 5  ;;  %v1083_v10 = vshll.u32 %v11658_v44, 16  ;;  %v11659_v25 = vpack.c.bf16 %v326_v21, %v326_v21  ;;  %v1551_v27 = vld [vmem:[#allocation2 + $0xfc] sm:$0xf]  ;;  %v468_v43 = vld [vmem:[#allocation2 + $0x108] sm:$0x1] }
 0x11b   :  { %v2189_v31 = vor.u32 %v2188_v28, %v2184_v16  ;;  %v1077_v60 = vor.u32 %v1075_v49, %v1074_v58  ;;  %v1078_v54 = vrot.slane %v1074_v58, 4  ;;  %v1082_v11 = vrot.slane %v1080_v56, 7  ;;  %v1555_v19 = vld [vmem:[#allocation2 + $0x104] sm:$0x1]  ;;  %v13886_v21 = vld [vmem:[#allocation2 + $0x34] sm:$0xf] }
 0x11c   :  { %v2180_v46 = vrot.slane %v2179_v38, 4  ;;  %v11660_v52 = vpack.c.bf16 %v327_v50, %v327_v50  ;;  %v1089_v30 = vshrl.u32 %v11659_v25, 16  ;;  %v1092_v26 = vshll.u32 %v11659_v25, 16  ;;  %v13887_v45 = vld [vmem:[#allocation2 + $0x38] sm:$0x1]  ;;  %v12058_v24 = vld [vmem:[%s17262_s0 + $0xa0] sm:$0xff]  }
 0x11d   :  { %v2190_v14 = vrot.slane %v2189_v31, 4  ;;  %12878 = vmatmul.mubr.bf16.vlgmr.msra.gmra.mrb[0].mxu0 %v11320_v63  ;;  %v1085_v51 = vor.u32 %v1083_v10, %v1082_v11  ;;  %v1087_v35 = vrot.slane %v1082_v11, 4  ;;  %v1545_v3 = vsel %vm14273_vm10, %v1077_v60, %v1544_v39  ;;  %v15066_v49 = vld [vmem:[%s17263_s1] ss:$0 sm:$0xff]  ;;  %v471_v38 = vld [vmem:[#allocation2 + $0x114] sm:$0x1] }
 0x11e   :  { %v2185_v18 = vsel %vm14254_vm9, %v2180_v46, %v2184_v16  ;;  %12942 = vmatpush3.bf16.msra.mxu0 %v13885_v57  ;;  %1546 = vst [vmem:[#allocation2 + $0xf0] sm:$0xf] %v1545_v3  ;;  %v1091_v4 = vrot.slane %v1089_v30, 7  ;;  %v1097_v61 = vshrl.u32 %v11660_v52, 16  ;;  %v1100_v32 = vshll.u32 %v11660_v52, 16 }
 0x11f   :  { %v2195_v23 = vsel %vm14254_vm9, %v2190_v14, %v2194_v6  ;;  %v1086_v63 = vsel %vm14280_vm11, %v1078_v54, %v1085_v51  ;;  %v1549_v0 = vsel %vm14186_vm3, %v1087_v35, %v1548_v41  ;;  %v6644_v59 = vsel %vm14956_vm14, %v6642_v9, %v6643_v42  ;;  %12943 = vmatprep.subr.bf16.mxu0 %v13741_v34  ;;  %v578_v9 = vld [vmem:[#allocation2 + $0x110] sm:$0x1]  ;;  %v15083_v39 = vld [vmem:[%s17264_s2] ss:$0 sm:$0xff] }
 0x120   :  { %v11008_v47 = vcombine.low %v2185_v18, %v2195_v23  ;;  %1547 = vst [vmem:[#allocation2 + $0xf4] sm:$0xf] %v1086_v63  ;;  %1550 = vst [vmem:[#allocation2 + $0xf8] sm:$0x1] %v1549_v0  ;;  %v1094_v33 = vor.u32 %v1092_v26, %v1091_v4  ;;  %v1095_v7 = vrot.slane %v1091_v4, 4  ;;  %v1099_v62 = vrot.slane %v1097_v61, 7 }
 0x121   :  { %v11321_v8 = vcombine.low %v15024_v15, %v6644_v59  ;;  %v6647_v50 = vrot.slane %v13886_v21, 5  ;;  %v6650_v53 = vrot.slane %v13887_v45, 5  ;;  %v11829_v42 = vunpack.c.l.bf16 %v12057_v22  ;;  %v15094_v4 = vld [vmem:[%s17262_s0 + $0xa8] sm:$0xff]  }
 0x122   :  { %12510 = vmatmul.mubr.bf16.gmra.mrb[32].mxu1 %v11008_v47  ;;  %v1102_v48 = vor.u32 %v1100_v32, %v1099_v62  ;;  %v1104_v44 = vrot.slane %v1099_v62, 4  ;;  %v1552_v40 = vsel %vm14273_vm10, %v1094_v33, %v1551_v27  ;;  %v11830_v37 = vunpack.c.h.bf16 %v12057_v22  ;;  %12944 = vmatpush3.bf16.msra.mxu0 %v13741_v34 }
 0x123   :  { %1553 = vst [vmem:[#allocation2 + $0xfc] sm:$0xf] %v1552_v40  ;;  %12881 = vmatprep.mubr.bf16.mxu0 %v11321_v8  ;;  %v6648_v15 = vsel %vm14956_vm14, %v11274_v5, %v6647_v50  ;;  %v6649_v55 = vrot.slane %v6647_v50, 4  ;;  %v194_v16 = vmul.f32 %v15066_v49, %v11829_v42  ;;  %v469_v28 = vsel %vm14186_vm3, 0, %v468_v43  ;;  %12945 = vmatprep.subr.bf16.mxu0 %v13743_v36 }
 0x124   :  { %v1103_v58 = vsel %vm14280_vm11, %v1095_v7, %v1102_v48  ;;  %v1556_v12 = vsel %vm14186_vm3, %v1104_v44, %v1555_v19  ;;  %v195_v5 = vmul.f32 %v15066_v49, %v11830_v37  ;;  %470 = vst [vmem:[#allocation2 + $0x108] sm:$0x1] %v469_v28  ;;  %v579_v56 = vsel %vm14193_vm4, 0, %v578_v9 }
 0x125   :  { %v1685_v6 = vld [vmem:[#allocation2 + $0xf0] sm:$0xf]  ;;  %1554 = vst [vmem:[#allocation2 + $0x100] sm:$0xf] %v1103_v58  ;;  %1557 = vst [vmem:[#allocation2 + $0x104] sm:$0x1] %v1556_v12  ;;  %v6651_v10 = vsel %vm14956_vm14, %v6649_v55, %v6650_v53  ;;  %v264_v25 = vadd.f32 %v15083_v39, %v194_v16  ;;  %v11833_v31 = vunpack.c.l.bf16 %v12058_v24  ;;  %v11834_v60 = vunpack.c.h.bf16 %v12058_v24 }
 0x126   :  { %580 = vst [vmem:[#allocation2 + $0x110] sm:$0x1] %v579_v56  ;;  %v2197_v54 = vshrl.u32 %v1685_v6, 16  ;;  %v2200_v11 = vshll.u32 %v1685_v6, 16  ;;  %v11322_v34 = vcombine.low %v6648_v15, %v6651_v10  ;;  %v265_v46 = vadd.f32 %v15083_v39, %v195_v5  ;;  %12946 = vmatpush3.bf16.msra.mxu0 %v13743_v36  ;;  %v581_v58 = vld [vmem:[#allocation2 + $0x11c] sm:$0x1] }
 0x127   :  { %v1686_v41 = vld [vmem:[#allocation2 + $0xf4] sm:$0xf]  ;;  %v1747_v52 = vld [vmem:[#allocation2 + $0xf8] sm:$0x1]  ;;  %v328_v30 = vmax.f32 %v264_v25, 0.0  ;;  %v196_v26 = vmul.f32 %v15066_v49, %v11833_v31  ;;  %v197_v14 = vmul.f32 %v15066_v49, %v11834_v60  ;;  %v472_v51 = vsel %vm14186_vm3, 0, %v471_v38 }
 0x128   :  { %v2199_v35 = vrot.slane %v2197_v54, 4  ;;  %v2202_v3 = vrot.slane %v2200_v11, 5  ;;  %v2206_v18 = vshll.u32 %v1686_v41, 16  ;;  %v2210_v57 = vshrl.u32 %v1686_v41, 16  ;;  %12882 = vmatmul.mubr.bf16.gmra.mrb[4].mxu0 %v11322_v34  ;;  %473 = vst [vmem:[#allocation2 + $0x114] sm:$0x1] %v472_v51 }
 0x129   :  { %v2216_v61 = vshll.u32 %v1747_v52, 16  ;;  %v329_v32 = vmax.f32 %v265_v46, 0.0  ;;  %v11661_v22 = vpack.c.bf16 %v328_v30, %v328_v30  ;;  %v266_v23 = vadd.f32 %v15083_v39, %v196_v26  ;;  %v6500_v54 = vld [vmem:[#allocation2 + $0x3c] sm:$0xe] }
 0x12a   :  { %v2203_v63 = vor.u32 %v2202_v3, %v2199_v35  ;;  %v2208_v0 = vrot.slane %v2206_v18, 5  ;;  %v2212_v27 = vrot.slane %v2210_v57, 4  ;;  %v1687_v59 = vld [vmem:[#allocation2 + $0xfc] sm:$0xf]  ;;  %v267_v36 = vadd.f32 %v15083_v39, %v197_v14 }
 0x12b   :  { %v2218_v47 = vrot.slane %v2216_v61, 5  ;;  %v2221_v33 = vshrl.u32 %v1687_v59, 16  ;;  %v2224_v7 = vshll.u32 %v1687_v59, 16  ;;  %v11662_v62 = vpack.c.bf16 %v329_v32, %v329_v32  ;;  %v1558_v6 = vld [vmem:[#allocation2 + $0x108] sm:$0xf]  ;;  %v13744_v52 = vld [vmem:[%s17261_s3 + $0x38] sm:$0xff]  }
 0x12c   :  { %v2204_v43 = vrot.slane %v2203_v63, 4  ;;  %v2213_v19 = vor.u32 %v2212_v27, %v2208_v0  ;;  %v1688_v8 = vld [vmem:[#allocation2 + $0x100] sm:$0xf]  ;;  %v1748_v21 = vld [vmem:[#allocation2 + $0x104] sm:$0x1]  ;;  %v1106_v50 = vshrl.u32 %v11661_v22, 16  ;;  %v11837_v45 = vunpack.c.l.bf16 %v15094_v4  ;;  %12555 = vmatprep.subr.bf16.mxu1 %v13744_v52 }
 0x12d   :  { %v2223_v53 = vrot.slane %v2221_v33, 4  ;;  %v2226_v42 = vrot.slane %v2224_v7, 5  ;;  %v2230_v9 = vshll.u32 %v1688_v8, 16  ;;  %v2234_v48 = vshrl.u32 %v1688_v8, 16  ;;  %v13745_v30 = vld [vmem:[%s17261_s3 + $0x198] sm:$0xff]   ;;  %12556 = vmatpush3.bf16.msra.mxu1 %v13744_v52 }
 0x12e   :  { %v2209_v44 = vsel %vm14254_vm9, %v2204_v43, %v2208_v0  ;;  %v2214_v40 = vrot.slane %v2213_v19, 4  ;;  %v2240_v37 = vshll.u32 %v1748_v21, 16  ;;  %v1108_v24 = vrot.slane %v1106_v50, 7  ;;  %v1562_v35 = vld [vmem:[#allocation2 + $0x110] sm:$0x1]  ;;  %12947 = vmatprep.subr.bf16.mxu0 %v13745_v30 }
 0x12f   :  { %v2227_v15 = vor.u32 %v2226_v42, %v2223_v53  ;;  %v2232_v55 = vrot.slane %v2230_v9, 5  ;;  %v2236_v16 = vrot.slane %v2234_v48, 4  ;;  %v1109_v28 = vshll.u32 %v11661_v22, 16  ;;  %v13890_v63 = vld [vmem:[#allocation2 + $0x40] sm:$0xf]  ;;  %12948 = vmatpush3.bf16.msra.mxu0 %v13745_v30  ;;  %v12060_v30 = vld [vmem:[%s17262_s0 + $0xb0] sm:$0xff]  }
 0x130   :  { %v2219_v12 = vsel %vm14254_vm9, %v2214_v40, %v2218_v47  ;;  %v2242_v5 = vrot.slane %v2240_v37, 5  ;;  %v1112_v56 = vrot.slane %v1108_v24, 4  ;;  %v1114_v38 = vshrl.u32 %v11662_v62, 16  ;;  %v13891_v27 = vld [vmem:[#allocation2 + $0x44] sm:$0x1] }
 0x131   :  { %v11009_v10 = vcombine.low %v2209_v44, %v2219_v12  ;;  %v2228_v25 = vrot.slane %v2227_v15, 4  ;;  %v2237_v31 = vor.u32 %v2236_v16, %v2232_v55  ;;  %v1111_v60 = vor.u32 %v1109_v28, %v1108_v24  ;;  %v13892_v9 = vld [vmem:[#allocation2 + $0x4c] sm:$0xf]  ;;  %v1565_v40 = vld [vmem:[#allocation2 + $0x114] sm:$0xf] }
 0x132   :  { %v1116_v11 = vrot.slane %v1114_v38, 7  ;;  %v1117_v34 = vshll.u32 %v11662_v62, 16  ;;  %v330_v46 = vmax.f32 %v266_v23, 0.0  ;;  %v331_v41 = vmax.f32 %v267_v36, 0.0  ;;  %v6501_v36 = vld [vmem:[#allocation2 + $0x48] sm:$0xe] }
 0x133   :  { %12513 = vmatprep.mubr.bf16.mxu1 %v11009_v10  ;;  %v2233_v26 = vsel %vm14254_vm9, %v2228_v25, %v2232_v55  ;;  %v2238_v14 = vrot.slane %v2237_v31, 4  ;;  %v1559_v51 = vsel %vm14273_vm10, %v1111_v60, %v1558_v6  ;;  %v582_v3 = vsel %vm14193_vm4, 0, %v581_v58  ;;  %v13893_v37 = vld [vmem:[#allocation2 + $0x50] sm:$0x1]  ;;  %v584_v52 = vld [vmem:[#allocation2 + $0x128] sm:$0x1] }
 0x134   :  { %v1119_v18 = vor.u32 %v1117_v34, %v1116_v11  ;;  %v1121_v57 = vrot.slane %v1116_v11, 4  ;;  %1560 = vst [vmem:[#allocation2 + $0x108] sm:$0xf] %v1559_v51  ;;  %583 = vst [vmem:[#allocation2 + $0x11c] sm:$0x1] %v582_v3  ;;  %v11663_v61 = vpack.c.bf16 %v330_v46, %v330_v46  ;;  %v11664_v32 = vpack.c.bf16 %v331_v41, %v331_v41 }
 0x135   :  { %v2243_v22 = vsel %vm14254_vm9, %v2238_v14, %v2242_v5  ;;  %v11275_v23 = vrot.slane %v6500_v54, 9  ;;  %v6654_v0 = vrot.slane %v13890_v63, 5  ;;  %v6657_v59 = vrot.slane %v13891_v27, 5  ;;  %v474_v41 = vld [vmem:[#allocation2 + $0x120] sm:$0x1] }
 0x136   :  { %v11010_v47 = vcombine.low %v2233_v26, %v2243_v22  ;;  %v1120_v33 = vsel %vm14280_vm11, %v1112_v56, %v1119_v18  ;;  %v1563_v7 = vsel %vm14186_vm3, %v1121_v57, %v1562_v35  ;;  %v1123_v62 = vshrl.u32 %v11663_v61, 16  ;;  %v477_v57 = vld [vmem:[#allocation2 + $0x12c] sm:$0x1] }
 0x137   :  { %1561 = vst [vmem:[#allocation2 + $0x10c] sm:$0xf] %v1120_v33  ;;  %1564 = vst [vmem:[#allocation2 + $0x110] sm:$0x1] %v1563_v7  ;;  %v1126_v43 = vshll.u32 %v11663_v61, 16  ;;  %v1131_v19 = vshrl.u32 %v11664_v32, 16  ;;  %v6655_v21 = vsel %vm14956_vm14, %v11275_v23, %v6654_v0  ;;  %v11838_v15 = vunpack.c.h.bf16 %v15094_v4 }
 0x138   :  { %v1134_v8 = vshll.u32 %v11664_v32, 16  ;;  %12514 = vmatmul.mubr.bf16.gmra.mrb[36].mxu1 %v11010_v47  ;;  %v1125_v50 = vrot.slane %v1123_v62, 7  ;;  %v6656_v53 = vrot.slane %v6654_v0, 4  ;;  %v11276_v42 = vrot.slane %v6501_v36, 9 }
 0x139   :  { %v6661_v48 = vrot.slane %v13892_v9, 5  ;;  %v1133_v44 = vrot.slane %v1131_v19, 7  ;;  %v6664_v24 = vrot.slane %v13893_v37, 5  ;;  %v198_v55 = vmul.f32 %v15066_v49, %v11837_v45 }
 0x13a   :  { %v1128_v16 = vor.u32 %v1126_v43, %v1125_v50  ;;  %v1129_v28 = vrot.slane %v1125_v50, 4  ;;  %v6658_v58 = vsel %vm14956_vm14, %v6656_v53, %v6657_v59  ;;  %v199_v45 = vmul.f32 %v15066_v49, %v11838_v15 }
 0x13b   :  { %v6662_v12 = vsel %vm14956_vm14, %v11276_v42, %v6661_v48  ;;  %v1689_v5 = vld [vmem:[#allocation2 + $0x108] sm:$0xf]  ;;  %v1136_v56 = vor.u32 %v1134_v8, %v1133_v44  ;;  %v1138_v38 = vrot.slane %v1133_v44, 4  ;;  %v1569_v6 = vld [vmem:[#allocation2 + $0x11c] sm:$0x1]  ;;  %v11323_v10 = vcombine.low %v6655_v21, %v6658_v58 }
 0x13c   :  { %v6663_v25 = vrot.slane %v6661_v48, 4  ;;  %v2245_v31 = vshrl.u32 %v1689_v5, 16  ;;  %v2248_v60 = vshll.u32 %v1689_v5, 16  ;;  %v1566_v4 = vsel %vm14273_vm10, %v1128_v16, %v1565_v40  ;;  %v15152_v21 = vld [vmem:[%s17262_s0 + $0xb8] sm:$0xff]  }
 0x13d   :  { %v1137_v54 = vsel %vm14280_vm11, %v1129_v28, %v1136_v56  ;;  %1567 = vst [vmem:[#allocation2 + $0x114] sm:$0xf] %v1566_v4  ;;  %v1570_v11 = vsel %vm14186_vm3, %v1138_v38, %v1569_v6  ;;  %12885 = vmatprep.mubr.bf16.mxu0 %v11323_v10  ;;  %v268_v46 = vadd.f32 %v15083_v39, %v198_v55  ;;  %v475_v27 = vsel %vm14186_vm3, 0, %v474_v41  ;;  %v587_v4 = vld [vmem:[#allocation2 + $0x134] sm:$0x1] }
 0x13e   :  { %v6665_v34 = vsel %vm14956_vm14, %v6663_v25, %v6664_v24  ;;  %v1690_v26 = vld [vmem:[#allocation2 + $0x10c] sm:$0xf]  ;;  %v1749_v14 = vld [vmem:[#allocation2 + $0x110] sm:$0x1]  ;;  %v2247_v51 = vrot.slane %v2245_v31, 4  ;;  %v2250_v35 = vrot.slane %v2248_v60, 5  ;;  %v269_v18 = vadd.f32 %v15083_v39, %v199_v45 }
 0x13f   :  { %1568 = vst [vmem:[#allocation2 + $0x118] sm:$0xf] %v1137_v54  ;;  %1571 = vst [vmem:[#allocation2 + $0x11c] sm:$0x1] %v1570_v11  ;;  %v11324_v3 = vcombine.low %v6662_v12, %v6665_v34  ;;  %v2254_v61 = vshll.u32 %v1690_v26, 16  ;;  %v2258_v32 = vshrl.u32 %v1690_v26, 16  ;;  %v11841_v19 = vunpack.c.l.bf16 %v12060_v30 }
 0x140   :  { %v2264_v22 = vshll.u32 %v1749_v14, 16  ;;  %v332_v23 = vmax.f32 %v268_v46, 0.0  ;;  %v2251_v63 = vor.u32 %v2250_v35, %v2247_v51  ;;  %v333_v0 = vmax.f32 %v269_v18, 0.0  ;;  %476 = vst [vmem:[#allocation2 + $0x120] sm:$0x1] %v475_v27 }
 0x141   :  { %12886 = vmatmul.mubr.bf16.gmra.mrb[8].mxu0 %v11324_v3  ;;  %v585_v59 = vsel %vm14193_vm4, 0, %v584_v52  ;;  %v2256_v36 = vrot.slane %v2254_v61, 5  ;;  %v2260_v47 = vrot.slane %v2258_v32, 4  ;;  %v11842_v8 = vunpack.c.h.bf16 %v12060_v30  ;;  %v6502_v41 = vld [vmem:[#allocation2 + $0x54] sm:$0xe] }
 0x142   :  { %v2266_v33 = vrot.slane %v2264_v22, 5  ;;  %586 = vst [vmem:[#allocation2 + $0x128] sm:$0x1] %v585_v59  ;;  %v11665_v7 = vpack.c.bf16 %v332_v23, %v332_v23  ;;  %v2252_v62 = vrot.slane %v2251_v63, 4  ;;  %v11666_v43 = vpack.c.bf16 %v333_v0, %v333_v0  ;;  %v6503_v63 = vld [vmem:[#allocation2 + $0x60] sm:$0xe] }
 0x143   :  { %v2261_v50 = vor.u32 %v2260_v47, %v2256_v36  ;;  %v478_v9 = vsel %vm14186_vm3, 0, %v477_v57  ;;  %v200_v24 = vmul.f32 %v15066_v49, %v11841_v19  ;;  %v201_v58 = vmul.f32 %v15066_v49, %v11842_v8 }
 0x144   :  { %v1140_v53 = vshrl.u32 %v11665_v7, 16  ;;  %v1143_v42 = vshll.u32 %v11665_v7, 16  ;;  %v2257_v48 = vsel %vm14254_vm9, %v2252_v62, %v2256_v36  ;;  %v1691_v44 = vld [vmem:[#allocation2 + $0x114] sm:$0xf]  ;;  %v1148_v40 = vshrl.u32 %v11666_v43, 16 }
 0x145   :  { %v1151_v37 = vshll.u32 %v11666_v43, 16  ;;  %479 = vst [vmem:[#allocation2 + $0x12c] sm:$0x1] %v478_v9  ;;  %v2262_v15 = vrot.slane %v2261_v50, 4  ;;  %v2269_v28 = vshrl.u32 %v1691_v44, 16  ;;  %v11845_v12 = vunpack.c.l.bf16 %v15152_v21 }
 0x146   :  { %v1692_v55 = vld [vmem:[#allocation2 + $0x118] sm:$0xf]  ;;  %v1750_v16 = vld [vmem:[#allocation2 + $0x11c] sm:$0x1]  ;;  %v2272_v5 = vshll.u32 %v1691_v44, 16  ;;  %v1142_v31 = vrot.slane %v1140_v53, 7  ;;  %v270_v57 = vadd.f32 %v15083_v39, %v200_v24  ;;  %v271_v22 = vadd.f32 %v15083_v39, %v201_v58 }
 0x147   :  { %v2278_v56 = vshll.u32 %v1692_v55, 16  ;;  %v2282_v38 = vshrl.u32 %v1692_v55, 16  ;;  %v2288_v6 = vshll.u32 %v1750_v16, 16  ;;  %v2267_v10 = vsel %vm14254_vm9, %v2262_v15, %v2266_v33  ;;  %v1572_v46 = vld [vmem:[#allocation2 + $0x120] sm:$0xf] }
 0x148   :  { %v2271_v25 = vrot.slane %v2269_v28, 4  ;;  %v1150_v60 = vrot.slane %v1148_v40, 7  ;;  %v11011_v45 = vcombine.low %v2257_v48, %v2267_v10  ;;  %v2274_v54 = vrot.slane %v2272_v5, 5  ;;  %v13894_v7 = vld [vmem:[#allocation2 + $0x58] sm:$0xf] }
 0x149   :  { %v2280_v11 = vrot.slane %v2278_v56, 5  ;;  %v2284_v34 = vrot.slane %v2282_v38, 4  ;;  %v2290_v52 = vrot.slane %v2288_v6, 5  ;;  %v1145_v30 = vor.u32 %v1143_v42, %v1142_v31  ;;  %v1576_v51 = vld [vmem:[#allocation2 + $0x128] sm:$0x1] }
 0x14a   :  { %v1146_v26 = vrot.slane %v1142_v31, 4  ;;  %v1153_v14 = vor.u32 %v1151_v37, %v1150_v60  ;;  %12517 = vmatprep.mubr.bf16.mxu1 %v11011_v45  ;;  %v2275_v35 = vor.u32 %v2274_v54, %v2271_v25  ;;  %v1155_v18 = vrot.slane %v1150_v60, 4  ;;  %v13895_v43 = vld [vmem:[#allocation2 + $0x5c] sm:$0x1]  ;;  %v13896_v15 = vld [vmem:[#allocation2 + $0x64] sm:$0xf] }
 0x14b   :  { %v2285_v3 = vor.u32 %v2284_v34, %v2280_v11  ;;  %v1573_v32 = vsel %vm14273_vm10, %v1145_v30, %v1572_v46  ;;  %v588_v23 = vsel %vm14193_vm4, 0, %v587_v4  ;;  %v334_v36 = vmax.f32 %v270_v57, 0.0  ;;  %v13897_v16 = vld [vmem:[#allocation2 + $0x68] sm:$0x1]  ;;  %v480_v58 = vld [vmem:[#allocation2 + $0x138] sm:$0x1] }
 0x14c   :  { %v1154_v61 = vsel %vm14280_vm11, %v1146_v26, %v1153_v14  ;;  %v2276_v0 = vrot.slane %v2275_v35, 4  ;;  %1574 = vst [vmem:[#allocation2 + $0x120] sm:$0xf] %v1573_v32  ;;  %v1577_v59 = vsel %vm14186_vm3, %v1155_v18, %v1576_v51  ;;  %589 = vst [vmem:[#allocation2 + $0x134] sm:$0x1] %v588_v23  ;;  %v335_v47 = vmax.f32 %v271_v22, 0.0 }
 0x14d   :  { %v2286_v27 = vrot.slane %v2285_v3, 4  ;;  %1575 = vst [vmem:[#allocation2 + $0x124] sm:$0xf] %v1154_v61  ;;  %1578 = vst [vmem:[#allocation2 + $0x128] sm:$0x1] %v1577_v59  ;;  %v11277_v33 = vrot.slane %v6502_v41, 9  ;;  %v11667_v53 = vpack.c.bf16 %v334_v36, %v334_v36  ;;  %v11846_v6 = vunpack.c.h.bf16 %v15152_v21 }
 0x14e   :  { %v6668_v62 = vrot.slane %v13894_v7, 5  ;;  %v6671_v19 = vrot.slane %v13895_v43, 5  ;;  %v2281_v8 = vsel %vm14254_vm9, %v2276_v0, %v2280_v11  ;;  %v11278_v42 = vrot.slane %v6503_v63, 9  ;;  %v1579_v25 = vld [vmem:[#allocation2 + $0x12c] sm:$0xf]  ;;  %v13748_v21 = vld [vmem:[%s17261_s3 + $0x80] sm:$0xff]  }
 0x14f   :  { %v2291_v50 = vsel %vm14254_vm9, %v2286_v27, %v2290_v52  ;;  %v11668_v48 = vpack.c.bf16 %v335_v47, %v335_v47  ;;  %v1157_v37 = vshrl.u32 %v11667_v53, 16  ;;  %v1160_v24 = vshll.u32 %v11667_v53, 16  ;;  %v590_v61 = vld [vmem:[#allocation2 + $0x140] sm:$0x1]  ;;  %12621 = vmatprep.subr.bf16.mxu1 %v13748_v21  ;;  %v6504_v53 = vld [vmem:[#allocation2 + $0x6c] sm:$0xe] }
 0x150   :  { %v11012_v9 = vcombine.low %v2281_v8, %v2291_v50  ;;  %v6669_v44 = vsel %vm14956_vm14, %v11277_v33, %v6668_v62  ;;  %v6670_v40 = vrot.slane %v6668_v62, 4  ;;  %v6675_v55 = vrot.slane %v13896_v15, 5  ;;  %v12062_v33 = vld [vmem:[%s17262_s0 + $0xc0] sm:$0xff]   ;;  %v593_v50 = vld [vmem:[#allocation2 + $0x14c] sm:$0x1] }
 0x151   :  { %v6678_v28 = vrot.slane %v13897_v16, 5  ;;  %v1165_v5 = vshrl.u32 %v11668_v48, 16  ;;  %v1168_v56 = vshll.u32 %v11668_v48, 16  ;;  %v1159_v10 = vrot.slane %v1157_v37, 7  ;;  %v483_v8 = vld [vmem:[#allocation2 + $0x144] sm:$0x1] }
 0x152   :  { %12518 = vmatmul.mubr.bf16.gmra.mrb[40].mxu1 %v11012_v9  ;;  %v6672_v38 = vsel %vm14956_vm14, %v6670_v40, %v6671_v19  ;;  %v6676_v60 = vsel %vm14956_vm14, %v11278_v42, %v6675_v55  ;;  %v6677_v4 = vrot.slane %v6675_v55, 4  ;;  %v202_v34 = vmul.f32 %v15066_v49, %v11845_v12  ;;  %v13749_v12 = vld [vmem:[%s17261_s3 + $0x1a0] sm:$0xff]  }
 0x153   :  { %v11325_v31 = vcombine.low %v6669_v44, %v6672_v38  ;;  %v1693_v45 = vld [vmem:[#allocation2 + $0x120] sm:$0xf]  ;;  %v1167_v11 = vrot.slane %v1165_v5, 7  ;;  %v203_v46 = vmul.f32 %v15066_v49, %v11846_v6  ;;  %v481_v41 = vsel %vm14186_vm3, 0, %v480_v58  ;;  %v1583_v0 = vld [vmem:[#allocation2 + $0x134] sm:$0x1]  ;;  %12949 = vmatprep.subr.bf16.mxu0 %v13749_v12 }
 0x154   :  { %v1694_v54 = vld [vmem:[#allocation2 + $0x124] sm:$0xf]  ;;  %v1751_v52 = vld [vmem:[#allocation2 + $0x128] sm:$0x1]  ;;  %v2293_v30 = vshrl.u32 %v1693_v45, 16  ;;  %v2296_v26 = vshll.u32 %v1693_v45, 16  ;;  %v1162_v3 = vor.u32 %v1160_v24, %v1159_v10  ;;  %v6679_v43 = vsel %vm14956_vm14, %v6677_v4, %v6678_v28  ;;  %12950 = vmatpush3.bf16.msra.mxu0 %v13749_v12 }
 0x155   :  { %v2302_v14 = vshll.u32 %v1694_v54, 16  ;;  %v2306_v51 = vshrl.u32 %v1694_v54, 16  ;;  %12889 = vmatprep.mubr.bf16.mxu0 %v11325_v31  ;;  %482 = vst [vmem:[#allocation2 + $0x138] sm:$0x1] %v481_v41  ;;  %v2312_v35 = vshll.u32 %v1751_v52, 16  ;;  %v1163_v18 = vrot.slane %v1159_v10, 4 }
 0x156   :  { %v1170_v57 = vor.u32 %v1168_v56, %v1167_v11  ;;  %v2295_v32 = vrot.slane %v2293_v30, 4  ;;  %v2298_v22 = vrot.slane %v2296_v26, 5  ;;  %v1172_v36 = vrot.slane %v1167_v11, 4  ;;  %v15223_v10 = vld [vmem:[%s17262_s0 + $0xc8] sm:$0xff]  }
 0x157   :  { %v2304_v23 = vrot.slane %v2302_v14, 5  ;;  %v2308_v63 = vrot.slane %v2306_v51, 4  ;;  %v2314_v27 = vrot.slane %v2312_v35, 5  ;;  %v1580_v47 = vsel %vm14273_vm10, %v1162_v3, %v1579_v25 }
 0x158   :  { %v1171_v59 = vsel %vm14280_vm11, %v1163_v18, %v1170_v57  ;;  %v2299_v7 = vor.u32 %v2298_v22, %v2295_v32  ;;  %1581 = vst [vmem:[#allocation2 + $0x12c] sm:$0xf] %v1580_v47  ;;  %v272_v19 = vadd.f32 %v15083_v39, %v202_v34  ;;  %v1584_v42 = vsel %vm14186_vm3, %v1172_v36, %v1583_v0  ;;  %v13898_v34 = vld [vmem:[#allocation2 + $0x70] sm:$0xf] }
 0x159   :  { %v2309_v62 = vor.u32 %v2308_v63, %v2304_v23  ;;  %1582 = vst [vmem:[#allocation2 + $0x130] sm:$0xf] %v1171_v59  ;;  %v11326_v9 = vcombine.low %v6676_v60, %v6679_v43  ;;  %v273_v48 = vadd.f32 %v15083_v39, %v203_v46  ;;  %v591_v44 = vsel %vm14193_vm4, 0, %v590_v61  ;;  %1585 = vst [vmem:[#allocation2 + $0x134] sm:$0x1] %v1584_v42  ;;  %v13755_v42 = vld [vmem:[%s17261_s3 + $0x1a8] sm:$0xff]  }
 0x15a   :  { %v2300_v40 = vrot.slane %v2299_v7, 4  ;;  %v336_v24 = vmax.f32 %v272_v19, 0.0  ;;  %592 = vst [vmem:[#allocation2 + $0x140] sm:$0x1] %v591_v44  ;;  %v11849_v15 = vunpack.c.l.bf16 %v12062_v33  ;;  %v11850_v16 = vunpack.c.h.bf16 %v12062_v33  ;;  %12951 = vmatprep.subr.bf16.mxu0 %v13755_v42 }
 0x15b   :  { %v2310_v37 = vrot.slane %v2309_v62, 4  ;;  %12890 = vmatmul.mubr.bf16.gmra.mrb[12].mxu0 %v11326_v9  ;;  %v337_v55 = vmax.f32 %v273_v48, 0.0  ;;  %v484_v28 = vsel %vm14186_vm3, 0, %v483_v8  ;;  %v594_v58 = vsel %vm14193_vm4, 0, %v593_v50 }
 0x15c   :  { %v2305_v5 = vsel %vm14254_vm9, %v2300_v40, %v2304_v23  ;;  %v11669_v38 = vpack.c.bf16 %v336_v24, %v336_v24  ;;  %v204_v6 = vmul.f32 %v15066_v49, %v11849_v15  ;;  %485 = vst [vmem:[#allocation2 + $0x144] sm:$0x1] %v484_v28  ;;  %595 = vst [vmem:[#allocation2 + $0x14c] sm:$0x1] %v594_v58  ;;  %v11279_v4 = vrot.slane %v6504_v53, 9 }
 0x15d   :  { %v2315_v56 = vsel %vm14254_vm9, %v2310_v37, %v2314_v27  ;;  %v11670_v31 = vpack.c.bf16 %v337_v55, %v337_v55  ;;  %v205_v60 = vmul.f32 %v15066_v49, %v11850_v16  ;;  %v6682_v46 = vrot.slane %v13898_v34, 5  ;;  %v1586_v59 = vld [vmem:[#allocation2 + $0x138] sm:$0xf]  ;;  %v486_v16 = vld [vmem:[#allocation2 + $0x150] sm:$0x1]  ;;  %12952 = vmatpush3.bf16.msra.mxu0 %v13755_v42 }
 0x15e   :  { %v11013_v25 = vcombine.low %v2305_v5, %v2315_v56  ;;  %v1174_v45 = vshrl.u32 %v11669_v38, 16  ;;  %v1177_v54 = vshll.u32 %v11669_v38, 16  ;;  %v274_v11 = vadd.f32 %v15083_v39, %v204_v6  ;;  %v6505_v53 = vld [vmem:[#allocation2 + $0x78] sm:$0xe]  ;;  %v13899_v5 = vld [vmem:[#allocation2 + $0x74] sm:$0x1] }
 0x15f   :  { %v1695_v41 = vld [vmem:[#allocation2 + $0x12c] sm:$0xf]  ;;  %v1182_v30 = vshrl.u32 %v11670_v31, 16  ;;  %v1185_v26 = vshll.u32 %v11670_v31, 16  ;;  %v275_v14 = vadd.f32 %v15083_v39, %v205_v60  ;;  %v11853_v51 = vunpack.c.l.bf16 %v15223_v10  ;;  %v489_v42 = vld [vmem:[#allocation2 + $0x15c] sm:$0x1] }
 0x160   :  { %12521 = vmatprep.mubr.bf16.mxu1 %v11013_v25  ;;  %v1696_v52 = vld [vmem:[#allocation2 + $0x130] sm:$0xf]  ;;  %v2317_v35 = vshrl.u32 %v1695_v41, 16  ;;  %v2320_v3 = vshll.u32 %v1695_v41, 16  ;;  %v1752_v61 = vld [vmem:[#allocation2 + $0x134] sm:$0x1]  ;;  %v6683_v32 = vsel %vm14956_vm14, %v11279_v4, %v6682_v46  ;;  %v11854_v22 = vunpack.c.h.bf16 %v15223_v10 }
 0x161   :  { %v2326_v18 = vshll.u32 %v1696_v52, 16  ;;  %v2330_v57 = vshrl.u32 %v1696_v52, 16  ;;  %v1176_v21 = vrot.slane %v1174_v45, 7  ;;  %v1184_v12 = vrot.slane %v1182_v30, 7  ;;  %v1590_v62 = vld [vmem:[#allocation2 + $0x140] sm:$0x1] }
 0x162   :  { %v2319_v23 = vrot.slane %v2317_v35, 4  ;;  %v2322_v63 = vrot.slane %v2320_v3, 5  ;;  %v2336_v36 = vshll.u32 %v1752_v61, 16  ;;  %v338_v50 = vmax.f32 %v274_v11, 0.0  ;;  %v13901_v52 = vld [vmem:[#allocation2 + $0x80] sm:$0x1] }
 0x163   :  { %v2328_v0 = vrot.slane %v2326_v18, 5  ;;  %v2332_v27 = vrot.slane %v2330_v57, 4  ;;  %v1179_v47 = vor.u32 %v1177_v54, %v1176_v21  ;;  %v1180_v33 = vrot.slane %v1176_v21, 4  ;;  %v1593_v61 = vld [vmem:[#allocation2 + $0x144] sm:$0xf] }
 0x164   :  { %v1187_v7 = vor.u32 %v1185_v26, %v1184_v12  ;;  %v2323_v43 = vor.u32 %v2322_v63, %v2319_v23  ;;  %v1189_v8 = vrot.slane %v1184_v12, 4  ;;  %v2338_v9 = vrot.slane %v2336_v36, 5  ;;  %v1597_v21 = vld [vmem:[#allocation2 + $0x14c] sm:$0x1] }
 0x165   :  { %v2333_v19 = vor.u32 %v2332_v27, %v2328_v0  ;;  %v1587_v44 = vsel %vm14273_vm10, %v1179_v47, %v1586_v59  ;;  %v339_v40 = vmax.f32 %v275_v14, 0.0  ;;  %v11671_v55 = vpack.c.bf16 %v338_v50, %v338_v50  ;;  %v596_v50 = vld [vmem:[#allocation2 + $0x158] sm:$0x1] }
 0x166   :  { %v1188_v48 = vsel %vm14280_vm11, %v1180_v33, %v1187_v7  ;;  %v2324_v37 = vrot.slane %v2323_v43, 4  ;;  %1588 = vst [vmem:[#allocation2 + $0x138] sm:$0xf] %v1587_v44  ;;  %v1591_v15 = vsel %vm14186_vm3, %v1189_v8, %v1590_v62  ;;  %v6684_v58 = vrot.slane %v6682_v46, 4  ;;  %v13900_v46 = vld [vmem:[#allocation2 + $0x7c] sm:$0xf] }
 0x167   :  { %v2334_v24 = vrot.slane %v2333_v19, 4  ;;  %1589 = vst [vmem:[#allocation2 + $0x13c] sm:$0xf] %v1188_v48  ;;  %1592 = vst [vmem:[#allocation2 + $0x140] sm:$0x1] %v1591_v15  ;;  %v11672_v28 = vpack.c.bf16 %v339_v40, %v339_v40  ;;  %v6685_v56 = vrot.slane %v13899_v5, 5  ;;  %v206_v14 = vmul.f32 %v15066_v49, %v11853_v51 }
 0x168   :  { %v11280_v38 = vrot.slane %v6505_v53, 9  ;;  %v2329_v6 = vsel %vm14254_vm9, %v2324_v37, %v2328_v0  ;;  %v1191_v25 = vshrl.u32 %v11671_v55, 16  ;;  %v1194_v31 = vshll.u32 %v11671_v55, 16  ;;  %v12064_v53 = vld [vmem:[%s17262_s0 + $0xd0] sm:$0xff]   ;;  %v599_v37 = vld [vmem:[#allocation2 + $0x164] sm:$0x1] }
 0x169   :  { %v2339_v10 = vsel %vm14254_vm9, %v2334_v24, %v2338_v9  ;;  %v1199_v4 = vshrl.u32 %v11672_v28, 16  ;;  %v1202_v45 = vshll.u32 %v11672_v28, 16  ;;  %v6686_v54 = vsel %vm14956_vm14, %v6684_v58, %v6685_v56 }
 0x16a   :  { %v11014_v60 = vcombine.low %v2329_v6, %v2339_v10  ;;  %v1193_v11 = vrot.slane %v1191_v25, 7  ;;  %v11327_v34 = vcombine.low %v6683_v32, %v6686_v54  ;;  %v6689_v41 = vrot.slane %v13900_v46, 5 }
 0x16b   :  { %v6692_v30 = vrot.slane %v13901_v52, 5  ;;  %v1201_v26 = vrot.slane %v1199_v4, 7  ;;  %v207_v35 = vmul.f32 %v15066_v49, %v11854_v22  ;;  %v487_v3 = vsel %vm14186_vm3, 0, %v486_v16 }
 0x16c   :  { %12522 = vmatmul.mubr.bf16.gmra.mrb[44].mxu1 %v11014_v60  ;;  %v1196_v18 = vor.u32 %v1194_v31, %v1193_v11  ;;  %v1197_v57 = vrot.slane %v1193_v11, 4  ;;  %12893 = vmatprep.mubr.bf16.mxu0 %v11327_v34  ;;  %v6690_v12 = vsel %vm14956_vm14, %v11280_v38, %v6689_v41  ;;  %v6691_v32 = vrot.slane %v6689_v41, 4  ;;  %488 = vst [vmem:[#allocation2 + $0x150] sm:$0x1] %v487_v3  ;;  %v15271_v31 = vld [vmem:[%s17262_s0 + $0xd8] sm:$0xff]   ;;  %v15280_v11 = vld [vmem:[%s17262_s0 + $0xe0] sm:$0xff]  }
 0x16d   :  { %v1697_v23 = vld [vmem:[#allocation2 + $0x138] sm:$0xf]  ;;  %v1204_v0 = vor.u32 %v1202_v45, %v1201_v26  ;;  %v1206_v27 = vrot.slane %v1201_v26, 4  ;;  %v276_v51 = vadd.f32 %v15083_v39, %v206_v14  ;;  %v277_v22 = vadd.f32 %v15083_v39, %v207_v35  ;;  %v13761_v34 = vld [vmem:[%s17261_s3 + $0x1b0] sm:$0xff]  }
 0x16e   :  { %v1698_v63 = vld [vmem:[#allocation2 + $0x13c] sm:$0xf]  ;;  %v1753_v59 = vld [vmem:[#allocation2 + $0x140] sm:$0x1]  ;;  %v2341_v36 = vshrl.u32 %v1697_v23, 16  ;;  %v2344_v47 = vshll.u32 %v1697_v23, 16  ;;  %v1594_v19 = vsel %vm14273_vm10, %v1196_v18, %v1593_v61  ;;  %v6693_v15 = vsel %vm14956_vm14, %v6691_v32, %v6692_v30  ;;  %12953 = vmatprep.subr.bf16.mxu0 %v13761_v34 }
 0x16f   :  { %v2350_v33 = vshll.u32 %v1698_v63, 16  ;;  %v2354_v7 = vshrl.u32 %v1698_v63, 16  ;;  %v2360_v62 = vshll.u32 %v1753_v59, 16  ;;  %v1205_v43 = vsel %vm14280_vm11, %v1197_v57, %v1204_v0  ;;  %1595 = vst [vmem:[#allocation2 + $0x144] sm:$0xf] %v1594_v19  ;;  %12954 = vmatpush3.bf16.msra.mxu0 %v13761_v34 }
 0x170   :  { %v1598_v8 = vsel %vm14186_vm3, %v1206_v27, %v1597_v21  ;;  %v2343_v9 = vrot.slane %v2341_v36, 4  ;;  %v2346_v48 = vrot.slane %v2344_v47, 5  ;;  %1596 = vst [vmem:[#allocation2 + $0x148] sm:$0xf] %v1205_v43  ;;  %v340_v55 = vmax.f32 %v276_v51, 0.0 }
 0x171   :  { %v2352_v44 = vrot.slane %v2350_v33, 5  ;;  %v2356_v40 = vrot.slane %v2354_v7, 4  ;;  %1599 = vst [vmem:[#allocation2 + $0x14c] sm:$0x1] %v1598_v8  ;;  %v2362_v24 = vrot.slane %v2360_v62, 5  ;;  %v341_v16 = vmax.f32 %v277_v22, 0.0 }
 0x172   :  { %v2347_v28 = vor.u32 %v2346_v48, %v2343_v9  ;;  %v11328_v5 = vcombine.low %v6690_v12, %v6693_v15  ;;  %v597_v56 = vsel %vm14193_vm4, 0, %v596_v50  ;;  %v11673_v38 = vpack.c.bf16 %v340_v55, %v340_v55  ;;  %v6506_v47 = vld [vmem:[#allocation2 + $0x84] sm:$0xe] }
 0x173   :  { %v2357_v58 = vor.u32 %v2356_v40, %v2352_v44  ;;  %598 = vst [vmem:[#allocation2 + $0x158] sm:$0x1] %v597_v56  ;;  %v11674_v6 = vpack.c.bf16 %v341_v16, %v341_v16  ;;  %v11857_v10 = vunpack.c.l.bf16 %v12064_v53  ;;  %v11858_v25 = vunpack.c.h.bf16 %v12064_v53  ;;  %v1600_v19 = vld [vmem:[#allocation2 + $0x150] sm:$0xf] }
 0x174   :  { %v2348_v60 = vrot.slane %v2347_v28, 4  ;;  %12894 = vmatmul.mubr.bf16.gmra.mrb[16].mxu0 %v11328_v5  ;;  %v490_v45 = vsel %vm14186_vm3, 0, %v489_v42  ;;  %v600_v54 = vsel %vm14193_vm4, 0, %v599_v37  ;;  %v1208_v46 = vshrl.u32 %v11673_v38, 16 }
 0x175   :  { %v2358_v4 = vrot.slane %v2357_v58, 4  ;;  %v1211_v41 = vshll.u32 %v11673_v38, 16  ;;  %v1216_v52 = vshrl.u32 %v11674_v6, 16  ;;  %v1219_v30 = vshll.u32 %v11674_v6, 16  ;;  %491 = vst [vmem:[#allocation2 + $0x15c] sm:$0x1] %v490_v45 }
 0x176   :  { %601 = vst [vmem:[#allocation2 + $0x164] sm:$0x1] %v600_v54  ;;  %v2353_v26 = vsel %vm14254_vm9, %v2348_v60, %v2352_v44  ;;  %v208_v35 = vmul.f32 %v15066_v49, %v11857_v10  ;;  %v209_v3 = vmul.f32 %v15066_v49, %v11858_v25  ;;  %v1699_v57 = vld [vmem:[#allocation2 + $0x144] sm:$0xf]  ;;  %v11861_v12 = vunpack.c.l.bf16 %v15271_v31  ;;  %v13903_v25 = vld [vmem:[#allocation2 + $0x8c] sm:$0x1] }
 0x177   :  { %v2363_v14 = vsel %vm14254_vm9, %v2358_v4, %v2362_v24  ;;  %v1700_v61 = vld [vmem:[#allocation2 + $0x148] sm:$0xf]  ;;  %v11862_v32 = vunpack.c.h.bf16 %v15271_v31  ;;  %v11865_v23 = vunpack.c.l.bf16 %v15280_v11  ;;  %v2365_v63 = vshrl.u32 %v1699_v57, 16  ;;  %v6507_v24 = vld [vmem:[#allocation2 + $0x90] sm:$0xe] }
 0x178   :  { %v11015_v18 = vcombine.low %v2353_v26, %v2363_v14  ;;  %v1754_v21 = vld [vmem:[#allocation2 + $0x14c] sm:$0x1]  ;;  %v2368_v0 = vshll.u32 %v1699_v57, 16  ;;  %v2374_v27 = vshll.u32 %v1700_v61, 16  ;;  %v2378_v51 = vshrl.u32 %v1700_v61, 16 }
 0x179   :  { %v2384_v22 = vshll.u32 %v1754_v21, 16  ;;  %v1210_v59 = vrot.slane %v1208_v46, 7  ;;  %v1218_v49 = vrot.slane %v1216_v52, 7  ;;  %v278_v36 = vadd.f32 %v15083_v39, %v208_v35  ;;  %v13904_v46 = vld [vmem:[#allocation2 + $0x94] sm:$0xf] }
 0x17a   :  { %12525 = vmatprep.mubr.bf16.mxu1 %v11015_v18  ;;  %v2367_v33 = vrot.slane %v2365_v63, 4  ;;  %v2370_v7 = vrot.slane %v2368_v0, 5  ;;  %v2376_v62 = vrot.slane %v2374_v27, 5  ;;  %v2380_v43 = vrot.slane %v2378_v51, 4  ;;  %v1604_v9 = vld [vmem:[#allocation2 + $0x158] sm:$0x1] }
 0x17b   :  { %v2386_v8 = vrot.slane %v2384_v22, 5  ;;  %v1213_v50 = vor.u32 %v1211_v41, %v1210_v59  ;;  %v1214_v53 = vrot.slane %v1210_v59, 4  ;;  %v1221_v42 = vor.u32 %v1219_v30, %v1218_v49  ;;  %v492_v35 = vld [vmem:[#allocation2 + $0x168] sm:$0x1]  ;;  %v13905_v27 = vld [vmem:[#allocation2 + $0x98] sm:$0x1] }
 0x17c   :  { %v2371_v48 = vor.u32 %v2370_v7, %v2367_v33  ;;  %v2381_v44 = vor.u32 %v2380_v43, %v2376_v62  ;;  %v1223_v40 = vrot.slane %v1218_v49, 4  ;;  %v279_v37 = vadd.f32 %v15083_v39, %v209_v3  ;;  %v13902_v39 = vld [vmem:[#allocation2 + $0x88] sm:$0xf]  ;;  %v1607_v63 = vld [vmem:[#allocation2 + $0x15c] sm:$0xf] }
 0x17d   :  { %v1222_v15 = vsel %vm14280_vm11, %v1214_v53, %v1221_v42  ;;  %v1601_v55 = vsel %vm14273_vm10, %v1213_v50, %v1600_v19  ;;  %v342_v16 = vmax.f32 %v278_v36, 0.0  ;;  %v11281_v28 = vrot.slane %v6506_v47, 9  ;;  %v15313_v22 = vld [vmem:[%s17263_s1] ss:$0 sm:$0xff]  ;;  %v1611_v36 = vld [vmem:[#allocation2 + $0x164] sm:$0x1] }
 0x17e   :  { %v2372_v58 = vrot.slane %v2371_v48, 4  ;;  %v2382_v5 = vrot.slane %v2381_v44, 4  ;;  %1602 = vst [vmem:[#allocation2 + $0x150] sm:$0xf] %v1601_v55  ;;  %1603 = vst [vmem:[#allocation2 + $0x154] sm:$0xf] %v1222_v15  ;;  %v1605_v56 = vsel %vm14186_vm3, %v1223_v40, %v1604_v9  ;;  %v210_v59 = vmul.f32 %v15313_v22, %v11861_v12 }
 0x17f   :  { %v343_v38 = vmax.f32 %v279_v37, 0.0  ;;  %1606 = vst [vmem:[#allocation2 + $0x158] sm:$0x1] %v1605_v56  ;;  %v11675_v6 = vpack.c.bf16 %v342_v16, %v342_v16  ;;  %v6696_v10 = vrot.slane %v13902_v39, 5  ;;  %v6699_v60 = vrot.slane %v13903_v25, 5 }
 0x180   :  { %v11282_v4 = vrot.slane %v6507_v24, 9  ;;  %v2377_v45 = vsel %vm14254_vm9, %v2372_v58, %v2376_v62  ;;  %v2387_v54 = vsel %vm14254_vm9, %v2382_v5, %v2386_v8  ;;  %v6703_v41 = vrot.slane %v13904_v46, 5  ;;  %v13767_v62 = vld [vmem:[%s17261_s3 + $0x1b8] sm:$0xff]   ;;  %v602_v15 = vld [vmem:[#allocation2 + $0x170] sm:$0x1] }
 0x181   :  { %v11676_v34 = vpack.c.bf16 %v343_v38, %v343_v38  ;;  %v11016_v52 = vcombine.low %v2377_v45, %v2387_v54  ;;  %v1225_v30 = vshrl.u32 %v11675_v6, 16  ;;  %v1228_v26 = vshll.u32 %v11675_v6, 16  ;;  %12955 = vmatprep.subr.bf16.mxu0 %v13767_v62  ;;  %v495_v55 = vld [vmem:[#allocation2 + $0x174] sm:$0x1]  ;;  %v605_v56 = vld [vmem:[#allocation2 + $0x17c] sm:$0x1] }
 0x182   :  { %v6697_v14 = vsel %vm14956_vm14, %v11281_v28, %v6696_v10  ;;  %v6698_v57 = vrot.slane %v6696_v10, 4  ;;  %v6704_v61 = vsel %vm14956_vm14, %v11282_v4, %v6703_v41  ;;  %v6705_v0 = vrot.slane %v6703_v41, 4  ;;  %12956 = vmatpush3.bf16.msra.mxu0 %v13767_v62  ;;  %v15339_v4 = vld [vmem:[%s17264_s2] ss:$0 sm:$0xff] }
 0x183   :  { %v1233_v3 = vshrl.u32 %v11676_v34, 16  ;;  %v1236_v18 = vshll.u32 %v11676_v34, 16  ;;  %12526 = vmatmul.mubr.bf16.gmra.mrb[48].mxu1 %v11016_v52  ;;  %v1227_v21 = vrot.slane %v1225_v30, 7  ;;  %v6706_v51 = vrot.slane %v13905_v27, 5  ;;  %v6508_v34 = vld [vmem:[#allocation2 + $0x9c] sm:$0xe] }
 0x184   :  { %v6700_v47 = vsel %vm14956_vm14, %v6698_v57, %v6699_v60  ;;  %v211_v33 = vmul.f32 %v15313_v22, %v11862_v32  ;;  %v493_v7 = vsel %vm14186_vm3, 0, %v492_v35  ;;  %v280_v45 = vadd.f32 %v15339_v4, %v210_v59 }
 0x185   :  { %v1235_v49 = vrot.slane %v1233_v3, 7  ;;  %v1701_v43 = vld [vmem:[#allocation2 + $0x150] sm:$0xf]  ;;  %v1702_v19 = vld [vmem:[#allocation2 + $0x154] sm:$0xf]  ;;  %v1230_v8 = vor.u32 %v1228_v26, %v1227_v21  ;;  %v1231_v12 = vrot.slane %v1227_v21, 4  ;;  %v11329_v50 = vcombine.low %v6697_v14, %v6700_v47 }
 0x186   :  { %v6707_v53 = vsel %vm14956_vm14, %v6705_v0, %v6706_v51  ;;  %494 = vst [vmem:[#allocation2 + $0x168] sm:$0x1] %v493_v7  ;;  %v1755_v42 = vld [vmem:[#allocation2 + $0x158] sm:$0x1]  ;;  %v2389_v31 = vshrl.u32 %v1701_v43, 16  ;;  %v2392_v9 = vshll.u32 %v1701_v43, 16  ;;  %v281_v54 = vadd.f32 %v15339_v4, %v211_v33 }
 0x187   :  { %v2398_v32 = vshll.u32 %v1702_v19, 16  ;;  %v2402_v48 = vshrl.u32 %v1702_v19, 16  ;;  %v2408_v44 = vshll.u32 %v1755_v42, 16  ;;  %v1238_v40 = vor.u32 %v1236_v18, %v1235_v49  ;;  %12897 = vmatprep.mubr.bf16.mxu0 %v11329_v50 }
 0x188   :  { %v1240_v37 = vrot.slane %v1235_v49, 4  ;;  %v1608_v24 = vsel %vm14273_vm10, %v1230_v8, %v1607_v63  ;;  %v2391_v16 = vrot.slane %v2389_v31, 4  ;;  %v2394_v28 = vrot.slane %v2392_v9, 5 }
 0x189   :  { %v2400_v58 = vrot.slane %v2398_v32, 5  ;;  %v2404_v5 = vrot.slane %v2402_v48, 4  ;;  %1609 = vst [vmem:[#allocation2 + $0x15c] sm:$0xf] %v1608_v24  ;;  %v2410_v38 = vrot.slane %v2408_v44, 5  ;;  %v1239_v6 = vsel %vm14280_vm11, %v1231_v12, %v1238_v40 }
 0x18a   :  { %v1612_v39 = vsel %vm14186_vm3, %v1240_v37, %v1611_v36  ;;  %v11330_v10 = vcombine.low %v6704_v61, %v6707_v53  ;;  %v2395_v25 = vor.u32 %v2394_v28, %v2391_v16  ;;  %1610 = vst [vmem:[#allocation2 + $0x160] sm:$0xf] %v1239_v6  ;;  %v603_v46 = vsel %vm14193_vm4, 0, %v602_v15  ;;  %v13908_v36 = vld [vmem:[#allocation2 + $0xa0] sm:$0xf] }
 0x18b   :  { %v2405_v60 = vor.u32 %v2404_v5, %v2400_v58  ;;  %1613 = vst [vmem:[#allocation2 + $0x164] sm:$0x1] %v1612_v39  ;;  %v11866_v41 = vunpack.c.h.bf16 %v15280_v11  ;;  %v212_v52 = vmul.f32 %v15313_v22, %v11865_v23  ;;  %v496_v30 = vsel %vm14186_vm3, 0, %v495_v55  ;;  %604 = vst [vmem:[#allocation2 + $0x170] sm:$0x1] %v603_v46 }
 0x18c   :  { %12898 = vmatmul.mubr.bf16.gmra.mrb[20].mxu0 %v11330_v10  ;;  %v2396_v26 = vrot.slane %v2395_v25, 4  ;;  %v344_v35 = vmax.f32 %v280_v45, 0.0  ;;  %v345_v3 = vmax.f32 %v281_v54, 0.0  ;;  %497 = vst [vmem:[#allocation2 + $0x174] sm:$0x1] %v496_v30  ;;  %v606_v61 = vsel %vm14193_vm4, 0, %v605_v56 }
 0x18d   :  { %v2406_v14 = vrot.slane %v2405_v60, 4  ;;  %v213_v18 = vmul.f32 %v15313_v22, %v11866_v41  ;;  %v282_v57 = vadd.f32 %v15339_v4, %v212_v52  ;;  %v11283_v21 = vrot.slane %v6508_v34, 9  ;;  %607 = vst [vmem:[#allocation2 + $0x17c] sm:$0x1] %v606_v61  ;;  %v1614_v28 = vld [vmem:[#allocation2 + $0x168] sm:$0xf] }
 0x18e   :  { %v2401_v11 = vsel %vm14254_vm9, %v2396_v26, %v2400_v58  ;;  %v11677_v63 = vpack.c.bf16 %v344_v35, %v344_v35  ;;  %v11678_v0 = vpack.c.bf16 %v345_v3, %v345_v3  ;;  %v6710_v47 = vrot.slane %v13908_v36, 5  ;;  %v6509_v54 = vld [vmem:[#allocation2 + $0xa8] sm:$0xe]  ;;  %v13774_v34 = vld [vmem:[%s17261_s3 + $0x1c0] sm:$0xff]  }
 0x18f   :  { %v2411_v23 = vsel %vm14254_vm9, %v2406_v14, %v2410_v38  ;;  %v283_v59 = vadd.f32 %v15339_v4, %v213_v18  ;;  %v346_v49 = vmax.f32 %v282_v57, 0.0  ;;  %13021 = vmatprep.subr.bf16.mxu0 %v13774_v34 }
 0x190   :  { %v11017_v27 = vcombine.low %v2401_v11, %v2411_v23  ;;  %v1703_v51 = vld [vmem:[#allocation2 + $0x15c] sm:$0xf]  ;;  %v1242_v62 = vshrl.u32 %v11677_v63, 16  ;;  %v1245_v43 = vshll.u32 %v11677_v63, 16  ;;  %v1250_v12 = vshrl.u32 %v11678_v0, 16  ;;  %v12067_v23 = vld [vmem:[%s17262_s0 + $0xe8] sm:$0xff]  }
 0x191   :  { %v2413_v33 = vshrl.u32 %v1703_v51, 16  ;;  %v2416_v7 = vshll.u32 %v1703_v51, 16  ;;  %v1704_v19 = vld [vmem:[#allocation2 + $0x160] sm:$0xf]  ;;  %v1253_v50 = vshll.u32 %v11678_v0, 16  ;;  %v11679_v53 = vpack.c.bf16 %v346_v49, %v346_v49 }
 0x192   :  { %12529 = vmatprep.mubr.bf16.mxu1 %v11017_v27  ;;  %v1756_v8 = vld [vmem:[#allocation2 + $0x164] sm:$0x1]  ;;  %v15362_v42 = vsel %vm14956_vm14, %v11283_v21, %v6710_v47  ;;  %v2422_v32 = vshll.u32 %v1704_v19, 16  ;;  %v2426_v48 = vshrl.u32 %v1704_v19, 16  ;;  %v1244_v40 = vrot.slane %v1242_v62, 7 }
 0x193   :  { %v2415_v31 = vrot.slane %v2413_v33, 4  ;;  %v2418_v9 = vrot.slane %v2416_v7, 5  ;;  %v2432_v44 = vshll.u32 %v1756_v8, 16  ;;  %v1252_v37 = vrot.slane %v1250_v12, 7  ;;  %v1618_v39 = vld [vmem:[#allocation2 + $0x170] sm:$0x1] }
 0x194   :  { %v347_v24 = vmax.f32 %v283_v59, 0.0  ;;  %v2424_v55 = vrot.slane %v2422_v32, 5  ;;  %v2428_v16 = vrot.slane %v2426_v48, 4  ;;  %v1259_v58 = vshrl.u32 %v11679_v53, 16  ;;  %v1621_v18 = vld [vmem:[#allocation2 + $0x174] sm:$0xf] }
 0x195   :  { %v2419_v15 = vor.u32 %v2418_v9, %v2415_v31  ;;  %v2434_v5 = vrot.slane %v2432_v44, 5  ;;  %v1247_v56 = vor.u32 %v1245_v43, %v1244_v40  ;;  %v1248_v38 = vrot.slane %v1244_v40, 4  ;;  %v13909_v27 = vld [vmem:[#allocation2 + $0xa4] sm:$0x1]  ;;  %v1625_v33 = vld [vmem:[#allocation2 + $0x17c] sm:$0x1] }
 0x196   :  { %v1255_v6 = vor.u32 %v1253_v50, %v1252_v37  ;;  %v2429_v25 = vor.u32 %v2428_v16, %v2424_v55  ;;  %v1257_v60 = vrot.slane %v1252_v37, 4  ;;  %v11680_v45 = vpack.c.bf16 %v347_v24, %v347_v24  ;;  %v13910_v7 = vld [vmem:[#allocation2 + $0xac] sm:$0xf]  ;;  %v13911_v43 = vld [vmem:[#allocation2 + $0xb0] sm:$0x1] }
 0x197   :  { %v2420_v10 = vrot.slane %v2419_v15, 4  ;;  %v1615_v41 = vsel %vm14273_vm10, %v1247_v56, %v1614_v28  ;;  %v1261_v52 = vrot.slane %v1259_v58, 7  ;;  %v1262_v30 = vshll.u32 %v11679_v53, 16  ;;  %v498_v19 = vld [vmem:[#allocation2 + $0x180] sm:$0x1]  ;;  %v12068_v9 = vld [vmem:[%s17262_s0 + $0xf0] sm:$0xff]  }
 0x198   :  { %v1256_v46 = vsel %vm14280_vm11, %v1248_v38, %v1255_v6  ;;  %v2430_v14 = vrot.slane %v2429_v25, 4  ;;  %1616 = vst [vmem:[#allocation2 + $0x168] sm:$0xf] %v1615_v41  ;;  %v1619_v35 = vsel %vm14186_vm3, %v1257_v60, %v1618_v39  ;;  %v1267_v3 = vshrl.u32 %v11680_v45, 16  ;;  %v608_v31 = vld [vmem:[#allocation2 + $0x188] sm:$0x1] }
 0x199   :  { %v2425_v26 = vsel %vm14254_vm9, %v2420_v10, %v2424_v55  ;;  %1617 = vst [vmem:[#allocation2 + $0x16c] sm:$0xf] %v1256_v46  ;;  %1620 = vst [vmem:[#allocation2 + $0x170] sm:$0x1] %v1619_v35  ;;  %v1264_v57 = vor.u32 %v1262_v30, %v1261_v52  ;;  %v1265_v61 = vrot.slane %v1261_v52, 4  ;;  %v1270_v21 = vshll.u32 %v11680_v45, 16 }
 0x19a   :  { %v6712_v11 = vrot.slane %v6710_v47, 4  ;;  %v2435_v63 = vsel %vm14254_vm9, %v2430_v14, %v2434_v5  ;;  %v1269_v0 = vrot.slane %v1267_v3, 7  ;;  %v6713_v51 = vrot.slane %v13909_v27, 5 }
 0x19b   :  { %v11284_v59 = vrot.slane %v6509_v54, 9  ;;  %v11018_v49 = vcombine.low %v2425_v26, %v2435_v63  ;;  %v1622_v36 = vsel %vm14273_vm10, %v1264_v57, %v1621_v18  ;;  %v6717_v62 = vrot.slane %v13910_v7, 5 }
 0x19c   :  { %v6720_v47 = vrot.slane %v13911_v43, 5  ;;  %v1272_v8 = vor.u32 %v1270_v21, %v1269_v0  ;;  %v1274_v12 = vrot.slane %v1269_v0, 4  ;;  %1623 = vst [vmem:[#allocation2 + $0x174] sm:$0xf] %v1622_v36  ;;  %v6714_v50 = vsel %vm14956_vm14, %v6712_v11, %v6713_v51 }
 0x19d   :  { %v11869_v53 = vunpack.c.l.bf16 %v12067_v23  ;;  %12530 = vmatmul.mubr.bf16.gmra.mrb[52].mxu1 %v11018_v49  ;;  %v11331_v32 = vcombine.low %v15362_v42, %v6714_v50  ;;  %v6718_v48 = vsel %vm14956_vm14, %v11284_v59, %v6717_v62  ;;  %v6719_v44 = vrot.slane %v6717_v62, 4 }
 0x19e   :  { %v11870_v40 = vunpack.c.h.bf16 %v12067_v23  ;;  %v1273_v37 = vsel %vm14280_vm11, %v1265_v61, %v1272_v8  ;;  %v1626_v24 = vsel %vm14186_vm3, %v1274_v12, %v1625_v33  ;;  %v499_v55 = vsel %vm14186_vm3, 0, %v498_v19 }
 0x19f   :  { %v214_v15 = vmul.f32 %v15313_v22, %v11869_v53  ;;  %v1705_v16 = vld [vmem:[#allocation2 + $0x168] sm:$0xf]  ;;  %1624 = vst [vmem:[#allocation2 + $0x178] sm:$0xf] %v1273_v37  ;;  %1627 = vst [vmem:[#allocation2 + $0x17c] sm:$0x1] %v1626_v24  ;;  %12901 = vmatprep.mubr.bf16.mxu0 %v11331_v32  ;;  %v6721_v42 = vsel %vm14956_vm14, %v6719_v44, %v6720_v47  ;;  %v11873_v56 = vunpack.c.l.bf16 %v12068_v9  ;;  %v11874_v18 = vunpack.c.h.bf16 %v12068_v9 }
 0x1a0   :  { %v1706_v28 = vld [vmem:[#allocation2 + $0x16c] sm:$0xf]  ;;  %v215_v58 = vmul.f32 %v15313_v22, %v11870_v40  ;;  %500 = vst [vmem:[#allocation2 + $0x180] sm:$0x1] %v499_v55  ;;  %v609_v5 = vsel %vm14193_vm4, 0, %v608_v31  ;;  %v2437_v6 = vshrl.u32 %v1705_v16, 16  ;;  %v11332_v45 = vcombine.low %v6718_v48, %v6721_v42 }
 0x1a1   :  { %v1757_v38 = vld [vmem:[#allocation2 + $0x170] sm:$0x1]  ;;  %v2440_v39 = vshll.u32 %v1705_v16, 16  ;;  %v2446_v10 = vshll.u32 %v1706_v28, 16  ;;  %v2450_v25 = vshrl.u32 %v1706_v28, 16  ;;  %v284_v54 = vadd.f32 %v15339_v4, %v214_v15 }
 0x1a2   :  { %610 = vst [vmem:[#allocation2 + $0x188] sm:$0x1] %v609_v5  ;;  %v2456_v60 = vshll.u32 %v1757_v38, 16  ;;  %v285_v34 = vadd.f32 %v15339_v4, %v215_v58  ;;  %v2439_v46 = vrot.slane %v2437_v6, 4  ;;  %12902 = vmatmul.mubr.bf16.gmra.mrb[24].mxu0 %v11332_v45  ;;  %v216_v49 = vmul.f32 %v15313_v22, %v11873_v56  ;;  %v501_v32 = vld [vmem:[#allocation2 + $0x18c] sm:$0x1] }
 0x1a3   :  { %v2442_v41 = vrot.slane %v2440_v39, 5  ;;  %v2448_v52 = vrot.slane %v2446_v10, 5  ;;  %v2452_v30 = vrot.slane %v2450_v25, 4  ;;  %v1707_v14 = vld [vmem:[#allocation2 + $0x174] sm:$0xf]  ;;  %v348_v35 = vmax.f32 %v284_v54, 0.0 }
 0x1a4   :  { %v2458_v26 = vrot.slane %v2456_v60, 5  ;;  %v349_v3 = vmax.f32 %v285_v34, 0.0  ;;  %v2461_v21 = vshrl.u32 %v1707_v14, 16  ;;  %v2464_v11 = vshll.u32 %v1707_v14, 16  ;;  %v611_v15 = vld [vmem:[#allocation2 + $0x194] sm:$0x1] }
 0x1a5   :  { %v2443_v57 = vor.u32 %v2442_v41, %v2439_v46  ;;  %v2453_v61 = vor.u32 %v2452_v30, %v2448_v52  ;;  %v11681_v23 = vpack.c.bf16 %v348_v35, %v348_v35  ;;  %v217_v36 = vmul.f32 %v15313_v22, %v11874_v18  ;;  %v6510_v55 = vld [vmem:[#allocation2 + $0xb4] sm:$0xe]  ;;  %v6511_v35 = vld [vmem:[#allocation2 + $0xc0] sm:$0xe] }
 0x1a6   :  { %v11682_v63 = vpack.c.bf16 %v349_v3, %v349_v3  ;;  %v1708_v51 = vld [vmem:[#allocation2 + $0x178] sm:$0xf]  ;;  %v1758_v59 = vld [vmem:[#allocation2 + $0x17c] sm:$0x1]  ;;  %v2463_v33 = vrot.slane %v2461_v21, 4  ;;  %v2466_v7 = vrot.slane %v2464_v11, 5  ;;  %v286_v5 = vadd.f32 %v15339_v4, %v216_v49 }
 0x1a7   :  { %v2444_v0 = vrot.slane %v2443_v57, 4  ;;  %v2454_v27 = vrot.slane %v2453_v61, 4  ;;  %v2470_v62 = vshll.u32 %v1708_v51, 16  ;;  %v2474_v43 = vshrl.u32 %v1708_v51, 16  ;;  %v1628_v24 = vld [vmem:[#allocation2 + $0x180] sm:$0xf] }
 0x1a8   :  { %v2480_v8 = vshll.u32 %v1758_v59, 16  ;;  %v1276_v12 = vshrl.u32 %v11681_v23, 16  ;;  %v2467_v53 = vor.u32 %v2466_v7, %v2463_v33  ;;  %v1279_v40 = vshll.u32 %v11681_v23, 16  ;;  %v13912_v23 = vld [vmem:[#allocation2 + $0xb8] sm:$0xf] }
 0x1a9   :  { %v2449_v47 = vsel %vm14254_vm9, %v2444_v0, %v2448_v52  ;;  %v2459_v19 = vsel %vm14254_vm9, %v2454_v27, %v2458_v26  ;;  %v2472_v31 = vrot.slane %v2470_v62, 5  ;;  %v2476_v9 = vrot.slane %v2474_v43, 4  ;;  %v1632_v58 = vld [vmem:[#allocation2 + $0x188] sm:$0x1]  ;;  %v13913_v0 = vld [vmem:[#allocation2 + $0xbc] sm:$0x1] }
 0x1aa   :  { %v11019_v50 = vcombine.low %v2449_v47, %v2459_v19  ;;  %v2482_v48 = vrot.slane %v2480_v8, 5  ;;  %v1278_v44 = vrot.slane %v1276_v12, 7  ;;  %v1284_v37 = vshrl.u32 %v11682_v63, 16  ;;  %v6512_v51 = vld [vmem:[#allocation2 + $0xe4] sm:$0xe] }
 0x1ab   :  { %v2468_v16 = vrot.slane %v2467_v53, 4  ;;  %v2477_v28 = vor.u32 %v2476_v9, %v2472_v31  ;;  %v1287_v42 = vshll.u32 %v11682_v63, 16  ;;  %v287_v39 = vadd.f32 %v15339_v4, %v217_v36  ;;  %v13914_v33 = vld [vmem:[#allocation2 + $0xc4] sm:$0xf]  ;;  %v5135_v62 = vld [vmem:[#allocation2 + $0xe8] sm:$0xf] }
 0x1ac   :  { %12533 = vmatprep.mubr.bf16.mxu1 %v11019_v50  ;;  %v1281_v56 = vor.u32 %v1279_v40, %v1278_v44  ;;  %v1282_v38 = vrot.slane %v1278_v44, 4  ;;  %v1286_v6 = vrot.slane %v1284_v37, 7  ;;  %v350_v60 = vmax.f32 %v286_v5, 0.0  ;;  %v13915_v8 = vld [vmem:[#allocation2 + $0xc8] sm:$0x1] }
 0x1ad   :  { %v2473_v10 = vsel %vm14254_vm9, %v2468_v16, %v2472_v31  ;;  %v2478_v25 = vrot.slane %v2477_v28, 4  ;;  %v502_v45 = vsel %vm14186_vm3, 0, %v501_v32  ;;  %v351_v41 = vmax.f32 %v287_v39, 0.0 }
 0x1ae   :  { %v1289_v54 = vor.u32 %v1287_v42, %v1286_v6  ;;  %v1291_v34 = vrot.slane %v1286_v6, 4  ;;  %v1629_v46 = vsel %vm14273_vm10, %v1281_v56, %v1628_v24  ;;  %503 = vst [vmem:[#allocation2 + $0x18c] sm:$0x1] %v502_v45  ;;  %v612_v30 = vsel %vm14193_vm4, 0, %v611_v15  ;;  %v5136_v42 = vld [vmem:[#allocation2 + $0xec] sm:$0x1] }
 0x1af   :  { %v2483_v52 = vsel %vm14254_vm9, %v2478_v25, %v2482_v48  ;;  %1630 = vst [vmem:[#allocation2 + $0x180] sm:$0xf] %v1629_v46  ;;  %v11683_v26 = vpack.c.bf16 %v350_v60, %v350_v60  ;;  %v11285_v14 = vrot.slane %v6510_v55, 9  ;;  %613 = vst [vmem:[#allocation2 + $0x194] sm:$0x1] %v612_v30  ;;  %v11684_v61 = vpack.c.bf16 %v351_v41, %v351_v41 }
 0x1b0   :  { %v11020_v3 = vcombine.low %v2473_v10, %v2483_v52  ;;  %v1290_v18 = vsel %vm14280_vm11, %v1282_v38, %v1289_v54  ;;  %v1633_v57 = vsel %vm14186_vm3, %v1291_v34, %v1632_v58  ;;  %v6724_v63 = vrot.slane %v13912_v23, 5 }
 0x1b1   :  { %1631 = vst [vmem:[#allocation2 + $0x184] sm:$0xf] %v1290_v18  ;;  %1634 = vst [vmem:[#allocation2 + $0x188] sm:$0x1] %v1633_v57  ;;  %v1293_v21 = vshrl.u32 %v11683_v26, 16  ;;  %v1296_v11 = vshll.u32 %v11683_v26, 16 }
 0x1b2   :  { %v6727_v27 = vrot.slane %v13913_v0, 5  ;;  %12534 = vmatmul.mubr.bf16.gmra.mrb[56].mxu1 %v11020_v3  ;;  %v1301_v59 = vshrl.u32 %v11684_v61, 16  ;;  %v1304_v49 = vshll.u32 %v11684_v61, 16  ;;  %v11286_v36 = vrot.slane %v6511_v35, 9  ;;  %v6513_v18 = vld [vmem:[#allocation2 + $0xf0] sm:$0xe] }
 0x1b3   :  { %v6731_v7 = vrot.slane %v13914_v33, 5  ;;  %v1295_v43 = vrot.slane %v1293_v21, 7  ;;  %v6725_v47 = vsel %vm14956_vm14, %v11285_v14, %v6724_v63  ;;  %v6726_v19 = vrot.slane %v6724_v63, 4  ;;  %v15452_v61 = vld [vmem:[#allocation2 + $0xf4] sm:$0xf] }
 0x1b4   :  { %v6734_v12 = vrot.slane %v13915_v8, 5  ;;  %v1303_v50 = vrot.slane %v1301_v59, 7  ;;  %v11287_v9 = vrot.slane %v6512_v51, 9  ;;  %v6738_v37 = vrot.slane %v5135_v62, 5  ;;  %v15454_v21 = vld [vmem:[#allocation2 + $0xf8] sm:$0x1] }
 0x1b5   :  { %v6732_v53 = vsel %vm14956_vm14, %v11286_v36, %v6731_v7  ;;  %v6733_v31 = vrot.slane %v6731_v7, 4  ;;  %v1298_v32 = vor.u32 %v1296_v11, %v1295_v43  ;;  %v1299_v48 = vrot.slane %v1295_v43, 4  ;;  %v1635_v44 = vld [vmem:[#allocation2 + $0x18c] sm:$0xf]  ;;  %v5141_v7 = vld [vmem:[#allocation2 + $0x100] sm:$0xf] }
 0x1b6   :  { %v6728_v40 = vsel %vm14956_vm14, %v6726_v19, %v6727_v27  ;;  %v15432_v24 = vld [vmem:[#allocation2 + $0x180] sm:$0xf]  ;;  %v1306_v15 = vor.u32 %v1304_v49, %v1303_v50  ;;  %v1308_v55 = vrot.slane %v1303_v50, 4  ;;  %v1639_v38 = vld [vmem:[#allocation2 + $0x194] sm:$0x1]  ;;  %v6740_v45 = vrot.slane %v6738_v37, 4 }
 0x1b7   :  { %v11333_v16 = vcombine.low %v6725_v47, %v6728_v40  ;;  %v6735_v28 = vsel %vm14956_vm14, %v6733_v31, %v6734_v12  ;;  %v2485_v58 = vshrl.u32 %v15432_v24, 16  ;;  %v2488_v5 = vshll.u32 %v15432_v24, 16  ;;  %v5142_v62 = vld [vmem:[#allocation2 + $0x104] sm:$0x1] }
 0x1b8   :  { %v1636_v56 = vsel %vm14273_vm10, %v1298_v32, %v1635_v44  ;;  %v11334_v6 = vcombine.low %v6732_v53, %v6735_v28  ;;  %v15440_v39 = vld [vmem:[#allocation2 + $0x184] sm:$0xf]  ;;  %v1759_v10 = vld [vmem:[#allocation2 + $0x188] sm:$0x1]  ;;  %v1307_v25 = vsel %vm14280_vm11, %v1299_v48, %v1306_v15  ;;  %v1640_v60 = vsel %vm14186_vm3, %v1308_v55, %v1639_v38  ;;  %v6515_v15 = vld [vmem:[#allocation2 + $0x108] sm:$0xe] }
 0x1b9   :  { %1637 = vst [vmem:[#allocation2 + $0x18c] sm:$0xf] %v1636_v56  ;;  %12905 = vmatprep.mubr.bf16.mxu0 %v11333_v16  ;;  %v2487_v54 = vrot.slane %v2485_v58, 4  ;;  %v2490_v34 = vrot.slane %v2488_v5, 5  ;;  %v2494_v46 = vshll.u32 %v15440_v39, 16  ;;  %v2498_v41 = vshrl.u32 %v15440_v39, 16 }
 0x1ba   :  { %1638 = vst [vmem:[#allocation2 + $0x190] sm:$0xf] %v1307_v25  ;;  %1641 = vst [vmem:[#allocation2 + $0x194] sm:$0x1] %v1640_v60  ;;  %12906 = vmatmul.mubr.bf16.gmra.mrb[28].mxu0 %v11334_v6  ;;  %v2504_v52 = vshll.u32 %v1759_v10, 16  ;;  %v6739_v30 = vsel %vm14956_vm14, %v11287_v9, %v6738_v37  ;;  %v6741_v26 = vrot.slane %v5136_v42, 5 }
 0x1bb   :  { %v2491_v14 = vor.u32 %v2490_v34, %v2487_v54  ;;  %v2496_v35 = vrot.slane %v2494_v46, 5  ;;  %v2500_v3 = vrot.slane %v2498_v41, 4  ;;  %v11288_v27 = vrot.slane %v6513_v18, 9  ;;  %v6514_v9 = vld [vmem:[#allocation2 + $0xfc] sm:$0xe] }
 0x1bc   :  { %v6742_v57 = vsel %vm14956_vm14, %v6740_v45, %v6741_v26  ;;  %v2506_v63 = vrot.slane %v2504_v52, 5  ;;  %v6745_v36 = vrot.slane %v15452_v61, 5  ;;  %v6748_v33 = vrot.slane %v15454_v21, 5  ;;  %v5144_v37 = vld [vmem:[#allocation2 + $0x10c] sm:$0xf] }
 0x1bd   :  { %v2492_v11 = vrot.slane %v2491_v14, 4  ;;  %v2501_v23 = vor.u32 %v2500_v3, %v2496_v35  ;;  %v11335_v0 = vcombine.low %v6739_v30, %v6742_v57  ;;  %v5145_v58 = vld [vmem:[#allocation2 + $0x110] sm:$0x1]  ;;  %v11289_v56 = vrot.slane %v6514_v9, 9  ;;  %v5147_v10 = vld [vmem:[#allocation2 + $0x118] sm:$0xf] }
 0x1be   :  { %v6746_v40 = vsel %vm14956_vm14, %v11288_v27, %v6745_v36  ;;  %v6747_v42 = vrot.slane %v6745_v36, 4  ;;  %v6752_v38 = vrot.slane %v5141_v7, 5  ;;  %v6755_v6 = vrot.slane %v5142_v62, 5  ;;  %v5148_v34 = vld [vmem:[#allocation2 + $0x11c] sm:$0x1] }
 0x1bf   :  { %v2497_v51 = vsel %vm14254_vm9, %v2492_v11, %v2496_v35  ;;  %v2502_v59 = vrot.slane %v2501_v23, 4  ;;  %12909 = vmatprep.mubr.bf16.mxu0 %v11335_v0  ;;  %v11290_v45 = vrot.slane %v6515_v15, 9  ;;  %v6759_v54 = vrot.slane %v5144_v37, 5  ;;  %v6516_v46 = vld [vmem:[#allocation2 + $0x114] sm:$0xe] }
 0x1c0   :  { %v15458_v49 = vld [vmem:[#allocation2 + $0x18c] sm:$0xf]  ;;  %v6749_v60 = vsel %vm14956_vm14, %v6747_v42, %v6748_v33  ;;  %v6753_v30 = vsel %vm14956_vm14, %v11289_v56, %v6752_v38  ;;  %v6754_v26 = vrot.slane %v6752_v38, 4  ;;  %v15476_v35 = vld [vmem:[#allocation2 + $0x4] sm:$0xf]  ;;  %v6762_v11 = vrot.slane %v5145_v58, 5 }
 0x1c1   :  { %v15462_v43 = vld [vmem:[#allocation2 + $0x190] sm:$0xf]  ;;  %v1760_v47 = vld [vmem:[#allocation2 + $0x194] sm:$0x1]  ;;  %v2509_v19 = vshrl.u32 %v15458_v49, 16  ;;  %v2512_v8 = vshll.u32 %v15458_v49, 16  ;;  %v2507_v12 = vsel %vm14254_vm9, %v2502_v59, %v2506_v63  ;;  %v11336_v52 = vcombine.low %v6746_v40, %v6749_v60 }
 0x1c2   :  { %v2518_v50 = vshll.u32 %v15462_v43, 16  ;;  %v2522_v53 = vshrl.u32 %v15462_v43, 16  ;;  %v2528_v31 = vshll.u32 %v1760_v47, 16  ;;  %v11021_v32 = vcombine.low %v2497_v51, %v2507_v12  ;;  %v13917_v3 = vld [vmem:[#allocation2] sm:$0xf] }
 0x1c3   :  { %v2511_v48 = vrot.slane %v2509_v19, 4  ;;  %v2514_v44 = vrot.slane %v2512_v8, 5  ;;  %v11031_v18 = vcombine.low %v13917_v3, %v15476_v35  ;;  %v6761_v57 = vrot.slane %v6759_v54, 4  ;;  %12910 = vmatmul.mubr.bf16.gmra.mrb[32].mxu0 %v11336_v52  ;;  %v5150_v51 = vld [vmem:[#allocation2 + $0x124] sm:$0xf] }
 0x1c4   :  { %v2520_v55 = vrot.slane %v2518_v50, 5  ;;  %v2524_v16 = vrot.slane %v2522_v53, 4  ;;  %v2530_v28 = vrot.slane %v2528_v31, 5  ;;  %12537 = vmatprep.mubr.bf16.mxu1 %v11021_v32  ;;  %v6756_v63 = vsel %vm14956_vm14, %v6754_v26, %v6755_v6  ;;  %v5153_v62 = vld [vmem:[#allocation2 + $0x130] sm:$0xf] }
 0x1c5   :  { %v2515_v5 = vor.u32 %v2514_v44, %v2511_v48  ;;  %v6760_v0 = vsel %vm14956_vm14, %v11290_v45, %v6759_v54  ;;  %v11291_v27 = vrot.slane %v6516_v46, 9  ;;  %v11337_v36 = vcombine.low %v6753_v30, %v6756_v63  ;;  %v5151_v8 = vld [vmem:[#allocation2 + $0x128] sm:$0x1]  ;;  %v6517_v12 = vld [vmem:[#allocation2 + $0x120] sm:$0xe] }
 0x1c6   :  { %v2525_v25 = vor.u32 %v2524_v16, %v2520_v55  ;;  %v6763_v33 = vsel %vm14956_vm14, %v6761_v57, %v6762_v11  ;;  %v6766_v7 = vrot.slane %v5147_v10, 5  ;;  %v6769_v19 = vrot.slane %v5148_v34, 5  ;;  %v5154_v9 = vld [vmem:[#allocation2 + $0x134] sm:$0x1]  ;;  %v6518_v32 = vld [vmem:[#allocation2 + $0x12c] sm:$0xe] }
 0x1c7   :  { %v2516_v41 = vrot.slane %v2515_v5, 4  ;;  %12913 = vmatprep.mubr.bf16.mxu0 %v11337_v36  ;;  %v6773_v31 = vrot.slane %v5150_v51, 5  ;;  %v11338_v48 = vcombine.low %v6760_v0, %v6763_v33  ;;  %v6780_v44 = vrot.slane %v5153_v62, 5  ;;  %v5156_v5 = vld [vmem:[#allocation2 + $0x13c] sm:$0xf] }
 0x1c8   :  { %v2526_v14 = vrot.slane %v2525_v25, 4  ;;  %v6767_v50 = vsel %vm14956_vm14, %v11291_v27, %v6766_v7  ;;  %v6768_v53 = vrot.slane %v6766_v7, 4  ;;  %v11292_v37 = vrot.slane %v6517_v12, 9  ;;  %v5159_v56 = vld [vmem:[#allocation2 + $0x148] sm:$0xf] }
 0x1c9   :  { %v2521_v23 = vsel %vm14254_vm9, %v2516_v41, %v2520_v55  ;;  %v6775_v15 = vrot.slane %v6773_v31, 4  ;;  %v6776_v55 = vrot.slane %v5151_v8, 5  ;;  %v6782_v42 = vrot.slane %v6780_v44, 4  ;;  %v13918_v38 = vld [vmem:[#allocation2 + $0xc] sm:$0xf] }
 0x1ca   :  { %v2531_v59 = vsel %vm14254_vm9, %v2526_v14, %v2530_v28  ;;  %v6770_v40 = vsel %vm14956_vm14, %v6768_v53, %v6769_v19  ;;  %v11293_v28 = vrot.slane %v6518_v32, 9  ;;  %v6783_v58 = vrot.slane %v5154_v9, 5  ;;  %v15493_v6 = vld [vmem:[#allocation2 + $0x10] sm:$0xf]  ;;  %v13920_v25 = vld [vmem:[#allocation2 + $0x18] sm:$0xf] }
 0x1cb   :  { %v11022_v47 = vcombine.low %v2521_v23, %v2531_v59  ;;  %v11339_v16 = vcombine.low %v6767_v50, %v6770_v40  ;;  %v11032_v10 = vcombine.low %v13918_v38, %v15493_v6  ;;  %12914 = vmatmul.mubr.bf16.gmra.mrb[36].mxu0 %v11338_v48  ;;  %v15496_v60 = vld [vmem:[#allocation2 + $0x1c] sm:$0xf]  ;;  %v6774_v54 = vsel %vm14956_vm14, %v11292_v37, %v6773_v31  ;;  %v13754_v41 = vld [vmem:[%s17261_s3 + $0x88] sm:$0xff]   ;;  %v5157_v26 = vld [vmem:[#allocation2 + $0x140] sm:$0x1] }
 0x1cc   :  { %v11033_v45 = vcombine.low %v13920_v25, %v15496_v60  ;;  %v6777_v34 = vsel %vm14956_vm14, %v6775_v15, %v6776_v55  ;;  %v6787_v46 = vrot.slane %v5156_v5, 5  ;;  %v6781_v52 = vsel %vm14956_vm14, %v11293_v28, %v6780_v44  ;;  %v6519_v14 = vld [vmem:[#allocation2 + $0x138] sm:$0xe]  ;;  %v6520_v57 = vld [vmem:[#allocation2 + $0x144] sm:$0xe]  ;;  %v13760_v59 = vld [vmem:[%s17261_s3 + $0x90] sm:$0xff]  }
 0x1cd   :  { %12538 = vmatmul.mubr.bf16.gmra.mrb[60].mxu1 %v11022_v47  ;;  %12917 = vmatprep.mubr.bf16.mxu0 %v11339_v16  ;;  %v6784_v30 = vsel %vm14956_vm14, %v6782_v42, %v6783_v58  ;;  %v6794_v3 = vrot.slane %v5159_v56, 5  ;;  %v11340_v11 = vcombine.low %v6774_v54, %v6777_v34  ;;  %v13922_v23 = vld [vmem:[%s17261_s3 + $0x80] sm:$0xff]   ;;  %v11294_v0 = vrot.slane %v6519_v14, 9  ;;  %v5162_v62 = vld [vmem:[#allocation2 + $0x154] sm:$0xf]  ;;  %v13766_v28 = vld [vmem:[%s17261_s3 + $0x98] sm:$0xff]  }
 0x1ce   :  { %12557 = vmatprep.mubr.bf16.mxu1 %v11031_v18  ;;  %v5160_v18 = vld [vmem:[#allocation2 + $0x14c] sm:$0x1]  ;;  %v11341_v63 = vcombine.low %v6781_v52, %v6784_v30  ;;  %v6789_v27 = vrot.slane %v6787_v46, 4  ;;  %v6790_v51 = vrot.slane %v5157_v26, 5  ;;  %v11295_v36 = vrot.slane %v6520_v57, 9  ;;  %v12069_v58 = vld [vmem:[%s17262_s0 + $0xf8] sm:$0xff]  }
 0x1cf   :  { %v6796_v33 = vrot.slane %v6794_v3, 4  ;;  %v6797_v7 = vrot.slane %v5160_v18, 5  ;;  %v15516_v47 = vld [vmem:[#allocation2 + $0x160] sm:$0xf]  ;;  %v13923_v19 = vld [vmem:[#allocation2 + $0x24] sm:$0xf]  ;;  %v6788_v9 = vsel %vm14956_vm14, %v11294_v0, %v6787_v46  ;;  %v11877_v30 = vunpack.c.l.bf16 %v12069_v58 }
 0x1d0   :  { %v15518_v8 = vld [vmem:[#allocation2 + $0x28] sm:$0xf]  ;;  %v13925_v50 = vld [vmem:[#allocation2 + $0x30] sm:$0xf]  ;;  %v15521_v53 = vld [vmem:[#allocation2 + $0x34] sm:$0xf]  ;;  %v6791_v32 = vsel %vm14956_vm14, %v6789_v27, %v6790_v51  ;;  %v6795_v40 = vsel %vm14956_vm14, %v11295_v36, %v6794_v3  ;;  %v11878_v26 = vunpack.c.h.bf16 %v12069_v58 }
 0x1d1   :  { %v11034_v12 = vcombine.low %v13923_v19, %v15518_v8  ;;  %v11035_v31 = vcombine.low %v13925_v50, %v15521_v53  ;;  %v6521_v48 = vld [vmem:[#allocation2 + $0x150] sm:$0xe]  ;;  %v6801_v44 = vrot.slane %v5162_v62, 5  ;;  %v6798_v37 = vsel %vm14956_vm14, %v6796_v33, %v6797_v7  ;;  %v5163_v15 = vld [vmem:[#allocation2 + $0x158] sm:$0x1]  ;;  %v13772_v14 = vld [vmem:[%s17261_s3 + $0xa0] sm:$0xff]  }
 0x1d2   :  { %v6522_v55 = vld [vmem:[#allocation2 + $0x15c] sm:$0xe]  ;;  %v6808_v16 = vrot.slane %v15516_v47, 5  ;;  %v5166_v42 = vld [vmem:[#allocation2 + $0x164] sm:$0x1]  ;;  %v11342_v5 = vcombine.low %v6788_v9, %v6791_v32  ;;  %v11296_v56 = vrot.slane %v6521_v48, 9  ;;  %v11343_v25 = vcombine.low %v6795_v40, %v6798_v37 }
 0x1d3   :  { %12918 = vmatmul.mubr.bf16.gmra.mrb[40].mxu0 %v11340_v11  ;;  %v15539_v38 = vld [vmem:[#allocation2 + $0x16c] sm:$0xf]  ;;  %v6804_v54 = vrot.slane %v5163_v15, 5  ;;  %v11297_v34 = vrot.slane %v6522_v55, 9  ;;  %v614_v46 = vld [vmem:[#allocation2 + $0x1a0] sm:$0x1]  ;;  %v218_v7 = vmul.f32 %v15313_v22, %v11877_v30  ;;  %v219_v62 = vmul.f32 %v15313_v22, %v11878_v26 }
 0x1d4   :  { %12921 = vmatprep.mubr.bf16.mxu0 %v11341_v63  ;;  %v6811_v52 = vrot.slane %v5166_v42, 5  ;;  %v453_v3 = vld [vmem:[#allocation2 + $0xcc] sm:$0x1]  ;;  %v13927_v18 = vld [vmem:[#allocation2 + $0x3c] sm:$0xf]  ;;  %v615_v47 = vsel %vm14193_vm4, 0, %v614_v46  ;;  %v6802_v19 = vsel %vm14956_vm14, %v11296_v56, %v6801_v44 }
 0x1d5   :  { %12558 = vmatmul.mubr.bf16.vlgmr.msra.gmra.mrb[0].mxu1 %v11032_v10  ;;  %v504_v10 = vld [vmem:[#allocation2 + $0x198] sm:$0x1]  ;;  %v15544_v57 = vld [vmem:[#allocation2 + $0x40] sm:$0xf]  ;;  %v13929_v27 = vld [vmem:[#allocation2 + $0x48] sm:$0xf]  ;;  %v6809_v50 = vsel %vm14956_vm14, %v11297_v34, %v6808_v16  ;;  %v288_v48 = vadd.f32 %v15339_v4, %v218_v7 }
 0x1d6   :  { %12622 = vmatpush3.bf16.msra.mxu1 %v13922_v23  ;;  %12561 = vmatprep.mubr.bf16.mxu1 %v11033_v45  ;;  %v6803_v45 = vrot.slane %v6801_v44, 4  ;;  %v11036_v11 = vcombine.low %v13927_v18, %v15544_v57  ;;  %v6815_v23 = vrot.slane %v15539_v38, 5  ;;  %v15548_v63 = vld [vmem:[#allocation2 + $0x178] sm:$0xf]  ;;  %v505_v0 = vsel %vm14186_vm3, 0, %v504_v10  ;;  %v13782_v40 = vld [vmem:[%s17261_s3 + $0xa8] sm:$0xff]  }
 0x1d7   :  { %12623 = vmatprep.subr.bf16.mxu1 %v13754_v41  ;;  %v15552_v51 = vld [vmem:[#allocation2 + $0x4c] sm:$0xf]  ;;  %v5169_v36 = vld [vmem:[#allocation2 + $0x170] sm:$0x1]  ;;  %v6523_v33 = vld [vmem:[#allocation2 + $0x168] sm:$0xe]  ;;  %v289_v44 = vadd.f32 %v15339_v4, %v219_v62 }
 0x1d8   :  { %506 = vst [vmem:[#allocation2 + $0x198] sm:$0x1] %v505_v0  ;;  %616 = vst [vmem:[#allocation2 + $0x1a0] sm:$0x1] %v615_v47  ;;  %v6524_v9 = vld [vmem:[#allocation2 + $0x174] sm:$0xe] }
 0x1d9   :  { %v6822_v32 = vrot.slane %v15548_v63, 5  ;;  %v11298_v37 = vrot.slane %v6523_v33, 9  ;;  %v6817_v15 = vrot.slane %v6815_v23, 4  ;;  %v6818_v55 = vrot.slane %v5169_v36, 5  ;;  %v15575_v10 = vld [vmem:[#allocation2 + $0x184] sm:$0xf] }
 0x1da   :  { %12624 = vmatpush3.bf16.msra.mxu1 %v13754_v41  ;;  %v6810_v41 = vrot.slane %v6808_v16, 4  ;;  %v5172_v16 = vld [vmem:[#allocation2 + $0x17c] sm:$0x1]  ;;  %v352_v42 = vmax.f32 %v288_v48, 0.0  ;;  %v353_v58 = vmax.f32 %v289_v44, 0.0  ;;  %v11299_v56 = vrot.slane %v6524_v9, 9 }
 0x1db   :  { %12625 = vmatprep.subr.bf16.mxu1 %v13760_v59  ;;  %12922 = vmatmul.mubr.bf16.gmra.mrb[44].mxu0 %v11342_v5  ;;  %v6824_v38 = vrot.slane %v6822_v32, 4  ;;  %v6825_v4 = vrot.slane %v5172_v16, 5  ;;  %v13931_v34 = vld [vmem:[#allocation2 + $0x54] sm:$0xf]  ;;  %v15580_v46 = vld [vmem:[#allocation2 + $0x58] sm:$0xf]  ;;  %v6819_v30 = vsel %vm14956_vm14, %v6817_v15, %v6818_v55 }
 0x1dc   :  { %12925 = vmatprep.mubr.bf16.mxu0 %v11343_v25  ;;  %v6812_v22 = vsel %vm14956_vm14, %v6810_v41, %v6811_v52  ;;  %v11685_v25 = vpack.c.bf16 %v352_v42, %v352_v42  ;;  %v11038_v41 = vcombine.low %v13931_v34, %v15580_v46  ;;  %v6816_v52 = vsel %vm14956_vm14, %v11298_v37, %v6815_v23  ;;  %v6525_v26 = vld [vmem:[#allocation2 + $0x180] sm:$0xe]  ;;  %v6526_v7 = vld [vmem:[#allocation2 + $0x18c] sm:$0xe]  ;;  %v5178_v47 = vld [vmem:[#allocation2 + $0x194] sm:$0x1] }
 0x1dd   :  { %12562 = vmatmul.mubr.bf16.gmra.mrb[4].mxu1 %v11034_v12  ;;  %v6805_v12 = vsel %vm14956_vm14, %v6803_v45, %v6804_v54  ;;  %v11345_v5 = vcombine.low %v6809_v50, %v6812_v22  ;;  %v11686_v45 = vpack.c.bf16 %v353_v58, %v353_v58  ;;  %v13792_v54 = vld [vmem:[%s17261_s3 + $0xb0] sm:$0xff]   ;;  %v6823_v23 = vsel %vm14956_vm14, %v11299_v56, %v6822_v32 }
 0x1de   :  { %12565 = vmatprep.mubr.bf16.mxu1 %v11035_v31  ;;  %12626 = vmatpush3.bf16.msra.mxu1 %v13760_v59  ;;  %v11037_v59 = vcombine.low %v13929_v27, %v15552_v51  ;;  %v454_v31 = vsel %vm14186_vm3, 0, %v453_v3  ;;  %v5175_v3 = vld [vmem:[#allocation2 + $0x188] sm:$0x1]  ;;  %v1310_v18 = vshrl.u32 %v11685_v25, 16  ;;  %v13933_v27 = vld [vmem:[#allocation2 + $0x60] sm:$0xf]  ;;  %v6826_v62 = vsel %vm14956_vm14, %v6824_v38, %v6825_v4 }
 0x1df   :  { %12627 = vmatprep.subr.bf16.mxu1 %v13766_v28  ;;  %455 = vst [vmem:[#allocation2 + $0xcc] sm:$0x1] %v454_v31  ;;  %v1318_v63 = vshrl.u32 %v11686_v45, 16  ;;  %v1321_v0 = vshll.u32 %v11686_v45, 16  ;;  %v6829_v33 = vrot.slane %v15575_v10, 5  ;;  %v13802_v31 = vld [vmem:[%s17261_s3 + $0xb8] sm:$0xff]   ;;  %v11346_v22 = vcombine.low %v6816_v52, %v6819_v30 }
 0x1e0   :  { %v11300_v9 = vrot.slane %v6525_v26, 9  ;;  %v6832_v48 = vrot.slane %v5175_v3, 5  ;;  %v1642_v32 = vld [vmem:[#allocation2 + $0x198] sm:$0xf]  ;;  %v1646_v44 = vld [vmem:[#allocation2 + $0x1a0] sm:$0x1]  ;;  %v11347_v16 = vcombine.low %v6823_v23, %v6826_v62 }
 0x1e1   :  { %v1320_v50 = vrot.slane %v1318_v63, 7  ;;  %v11301_v42 = vrot.slane %v6526_v7, 9  ;;  %v6839_v58 = vrot.slane %v5178_v47, 5  ;;  %v15607_v10 = vld [vmem:[%s17261_s3 + $0xc0] sm:$0xff]   ;;  %v15609_v45 = vld [vmem:[#allocation2 + $0x70] sm:$0xf] }
 0x1e2   :  { %12628 = vmatpush3.bf16.msra.mxu1 %v13766_v28  ;;  %v11344_v28 = vcombine.low %v6802_v19, %v6805_v12  ;;  %v1312_v12 = vrot.slane %v1310_v18, 7  ;;  %v13939_v23 = vld [vmem:[#allocation2 + $0x84] sm:$0xf]  ;;  %v13941_v62 = vld [vmem:[#allocation2 + $0x90] sm:$0xf] }
 0x1e3   :  { %12629 = vmatprep.subr.bf16.mxu1 %v13772_v14  ;;  %v1323_v15 = vor.u32 %v1321_v0, %v1320_v50  ;;  %v1325_v55 = vrot.slane %v1320_v50, 4  ;;  %v15627_v47 = vld [vmem:[#allocation2 + $0x94] sm:$0xf] }
 0x1e4   :  { %12926 = vmatmul.mubr.bf16.gmra.mrb[48].mxu0 %v11344_v28  ;;  %v6831_v28 = vrot.slane %v6829_v33, 4 }
 0x1e5   :  { %12566 = vmatmul.mubr.bf16.gmra.mrb[8].mxu1 %v11036_v11  ;;  %v1313_v11 = vshll.u32 %v11685_v25, 16  ;;  %12929 = vmatprep.mubr.bf16.mxu0 %v11345_v5  ;;  %v1647_v4 = vsel %vm14186_vm3, %v1325_v55, %v1646_v44  ;;  %v13935_v25 = vld [vmem:[#allocation2 + $0x6c] sm:$0xf]  ;;  %v507_v55 = vld [vmem:[#allocation2 + $0x1a4] sm:$0x1] }
 0x1e6   :  { %12569 = vmatprep.mubr.bf16.mxu1 %v11037_v59  ;;  %12630 = vmatpush3.bf16.msra.mxu1 %v13772_v14  ;;  %v5177_v14 = vld [vmem:[#allocation2 + $0x190] sm:$0xf]  ;;  %v15587_v59 = vld [vmem:[#allocation2 + $0x64] sm:$0xf]  ;;  %1648 = vst [vmem:[#allocation2 + $0x1a0] sm:$0x1] %v1647_v4  ;;  %v11040_v29 = vcombine.low %v13935_v25, %v15609_v45  ;;  %v6833_v52 = vsel %vm14956_vm14, %v6831_v28, %v6832_v48 }
 0x1e7   :  { %12631 = vmatprep.subr.bf16.mxu1 %v13782_v40  ;;  %v11039_v36 = vcombine.low %v13933_v27, %v15587_v59  ;;  %v6836_v19 = vrot.slane %v5177_v14, 5  ;;  %v1315_v37 = vor.u32 %v1313_v11, %v1312_v12  ;;  %v13943_v48 = vld [vmem:[#allocation2 + $0x9c] sm:$0xf]  ;;  %v13778_v28 = vld [vmem:[#allocation2 + $0x30] sm:$0xff]   ;;  %v13950_v25 = vld [vmem:[#allocation2 + $0xd8] sm:$0xf] }
 0x1e8   :  { %v15648_v4 = vld [vmem:[#allocation2 + $0xdc] sm:$0xf] }
 0x1e9   :  { %v6838_v5 = vrot.slane %v6836_v19, 4  ;;  %v1643_v38 = vsel %vm14273_vm10, %v1315_v37, %v1642_v32  ;;  %v6837_v30 = vsel %vm14956_vm14, %v11301_v42, %v6836_v19  ;;  %v11043_v19 = vcombine.low %v13941_v62, %v15627_v47  ;;  %v15634_v32 = vld [vmem:[#allocation2 + $0xa0] sm:$0xf]  ;;  %v13945_v37 = vld [vmem:[#allocation2 + $0xa8] sm:$0xf] }
 0x1ea   :  { %12632 = vmatpush3.bf16.msra.mxu1 %v13782_v40  ;;  %v1316_v40 = vrot.slane %v1312_v12, 4  ;;  %1644 = vst [vmem:[#allocation2 + $0x198] sm:$0xf] %v1643_v38  ;;  %v11044_v44 = vcombine.low %v13943_v48, %v15634_v32  ;;  %v13784_v42 = vld [vmem:[%s17261_s3 + $0x1c8] sm:$0xff]   ;;  %v13830_v48 = vld [vmem:[%s17261_s3 + $0x1f8] sm:$0xff]  }
 0x1eb   :  { %12633 = vmatprep.subr.bf16.mxu1 %v13792_v54  ;;  %v6840_v26 = vsel %vm14956_vm14, %v6838_v5, %v6839_v58  ;;  %v508_v58 = vsel %vm14186_vm3, 0, %v507_v55  ;;  %v13947_v5 = vld [vmem:[#allocation2 + $0xb4] sm:$0xf]  ;;  %v13962_v55 = vld [vmem:[#allocation2 + $0x120] sm:$0xf] }
 0x1ec   :  { %v1324_v56 = vsel %vm14280_vm11, %v1316_v40, %v1323_v15  ;;  %12930 = vmatmul.mubr.bf16.gmra.mrb[52].mxu0 %v11346_v22  ;;  %v11349_v3 = vcombine.low %v6837_v30, %v6840_v26  ;;  %v15637_v40 = vld [vmem:[#allocation2 + $0xac] sm:$0xf]  ;;  %509 = vst [vmem:[#allocation2 + $0x1a4] sm:$0x1] %v508_v58  ;;  %v13952_v30 = vld [vmem:[#allocation2 + $0xe4] sm:$0xf] }
 0x1ed   :  { %12570 = vmatmul.mubr.bf16.gmra.mrb[12].mxu1 %v11038_v41  ;;  %1645 = vst [vmem:[#allocation2 + $0x19c] sm:$0xf] %v1324_v56  ;;  %12933 = vmatprep.mubr.bf16.mxu0 %v11347_v16  ;;  %v6830_v41 = vsel %vm14956_vm14, %v11300_v9, %v6829_v33  ;;  %v5181_v11 = vld [vmem:[#allocation2 + $0x1a0] sm:$0x1]  ;;  %v15624_v33 = vld [vmem:[#allocation2 + $0x88] sm:$0xf]  ;;  %v11045_v15 = vcombine.low %v13945_v37, %v15637_v40 }
 0x1ee   :  { %12573 = vmatprep.mubr.bf16.mxu1 %v11039_v36  ;;  %12634 = vmatpush3.bf16.msra.mxu1 %v13792_v54  ;;  %v15612_v54 = vld [vmem:[#allocation2 + $0x7c] sm:$0xf]  ;;  %v11348_v14 = vcombine.low %v6830_v41, %v6833_v52  ;;  %v6846_v36 = vrot.slane %v5181_v11, 5  ;;  %v11042_v7 = vcombine.low %v13939_v23, %v15624_v33  ;;  %v13775_v16 = vld [vmem:[#allocation2 + $0x24] sm:$0xff]   ;;  %v15645_v56 = vld [vmem:[#allocation2 + $0xb8] sm:$0xf] }
 0x1ef   :  { %12635 = vmatprep.subr.bf16.mxu1 %v13802_v31  ;;  %v11041_v34 = vcombine.low %v13937_v20, %v15612_v54  ;;  %v13773_v9 = vld [vmem:[#allocation2 + $0x18] sm:$0xff]   ;;  %v11046_v38 = vcombine.low %v13947_v5, %v15645_v56  ;;  %v13951_v20 = vld [vmem:[%s17261_s3 + $0x1c0] sm:$0xff]   ;;  %v13783_v41 = vld [vmem:[#allocation2 + $0x48] sm:$0xff]   ;;  %v5600_v5 = vshll.u32 %v15452_v61, 16 }
 0x1f0   :  { %v13804_v52 = vld [vmem:[%s17261_s3 + $0x1d8] sm:$0xff]   ;;  %v15660_v26 = vld [vmem:[#allocation2 + $0xe8] sm:$0xf] }
 0x1f1   :  { %v6527_v63 = vld [vmem:[#allocation2 + $0x198] sm:$0xe]  ;;  %v13956_v23 = vld [vmem:[#allocation2 + $0xfc] sm:$0xf]  ;;  %v13795_v58 = vld [vmem:[#allocation2 + $0x84] sm:$0xff]  }
 0x1f2   :  { %12636 = vmatpush3.bf16.msra.mxu1 %v13802_v31  ;;  %v11302_v0 = vrot.slane %v6527_v63, 9  ;;  %v13812_v63 = vld [vmem:[%s17261_s3 + $0x1e0] sm:$0xff]   ;;  %v15684_v37 = vld [vmem:[#allocation2 + $0x118] sm:$0xf] }
 0x1f3   :  { %12701 = vmatprep.subr.bf16.mxu1 %v15607_v10  ;;  %17306 = vst [vmem:[#allocation6_spill] sm:$0xff] %v15684_v37 }
 0x1f4   :  { %v5180_v18 = vld [vmem:[#allocation2 + $0x19c] sm:$0xf]  ;;  %12934 = vmatmul.mubr.bf16.gmra.mrb[56].mxu0 %v11348_v14  ;;  %v11048_v14 = vcombine.low %v13952_v30, %v15660_v26  ;;  %v3543_v30 = vld [vmem:[#allocation2] sm:$0xe] }
 0x1f5   :  { %12574 = vmatmul.mubr.bf16.gmra.mrb[16].mxu1 %v11040_v29  ;;  %v6843_v27 = vrot.slane %v5180_v18, 5  ;;  %12937 = vmatprep.mubr.bf16.mxu0 %v11349_v3  ;;  %v11047_v29 = vcombine.low %v13950_v25, %v15648_v4  ;;  %v13954_v3 = vld [vmem:[#allocation2 + $0xf0] sm:$0xf]  ;;  %v15663_v18 = vld [vmem:[#allocation2 + $0xf4] sm:$0xf] }
 0x1f6   :  { %12577 = vmatprep.mubr.bf16.mxu1 %v11041_v34  ;;  %v13779_v34 = vld [vmem:[#allocation2 + $0x3c] sm:$0xff]   ;;  %v11049_v11 = vcombine.low %v13954_v3, %v15663_v18  ;;  %v13798_v25 = vld [vmem:[#allocation2 + $0x90] sm:$0xff]   ;;  %v15702_v3 = vrot.slane %v5600_v5, 5 }
 0x1f7   :  { %v6844_v12 = vsel %vm14956_vm14, %v11302_v0, %v6843_v27  ;;  %v6845_v50 = vrot.slane %v6843_v27, 4  ;;  %v13785_v0 = vld [vmem:[#allocation2 + $0x54] sm:$0xff]   ;;  %v13788_v27 = vld [vmem:[#allocation2 + $0x60] sm:$0xff]   ;;  %v3547_v5 = vld [vmem:[#allocation2 + $0x30] sm:$0xe] }
 0x1f8   :  { %17309 = vst [vmem:[#allocation9_spill] sm:$0xff] %v15702_v3 }
 0x1f9   :  { %v6847_v31 = vsel %vm14956_vm14, %v6845_v50, %v6846_v36  ;;  %v13818_v36 = vld [vmem:[%s17261_s3 + $0x1e8] sm:$0xff]  }
 0x1fa   :  { %v11350_v22 = vcombine.low %v6844_v12, %v6847_v31  ;;  %v15675_v12 = vld [vmem:[#allocation2 + $0x10c] sm:$0xf]  ;;  %v13824_v31 = vld [vmem:[%s17261_s3 + $0x1f0] sm:$0xff]  }
 0x1fb   :  { %17305 = vst [vmem:[#allocation5_spill] sm:$0xff] %v15675_v12 }
 0x1fc   :  { %12938 = vmatmul.mubr.bf16.gmra.mrb[60].mxu0 %v11350_v22  ;;  %v13789_v22 = vld [vmem:[#allocation2 + $0x6c] sm:$0xff]  }
 0x1fd   :  { %12578 = vmatmul.mubr.bf16.gmra.mrb[20].mxu1 %v11042_v7  ;;  %12957 = vmatprep.mubr.bf16.mxu0 %v13773_v9  ;;  %v15672_v7 = vld [vmem:[#allocation2 + $0x100] sm:$0xf]  ;;  %v13793_v9 = vld [vmem:[#allocation2 + $0x78] sm:$0xff]  }
 0x1fe   :  { %12581 = vmatprep.mubr.bf16.mxu1 %v11043_v19  ;;  %v11050_v62 = vcombine.low %v13956_v23, %v15672_v7  ;;  %v13958_v19 = vld [vmem:[#allocation2 + $0x108] sm:$0xf] }
 0x1ff   :  { %v11051_v50 = vcombine.low %v13958_v19, %v15675_v12 }
 0x204   :  { %12958 = vmatmul.mubr.bf16.vlgmr.msra.gmra.mrb[0].mxu0 %v13775_v16  ;;  %v15687_v16 = vld [vmem:[#allocation2 + $0x124] sm:$0xf] }
 0x205   :  { %12582 = vmatmul.mubr.bf16.gmra.mrb[24].mxu1 %v11044_v44  ;;  %13022 = vmatpush3.bf16.msra.mxu0 %v13951_v20  ;;  %v13960_v44 = vld [vmem:[#allocation2 + $0x114] sm:$0xf]  ;;  %17307 = vst [vmem:[#allocation7_spill] sm:$0xff] %v15687_v16  ;;  %v3651_v20 = vrot.slane %v15493_v6, 5 }
 0x206   :  { %12585 = vmatprep.mubr.bf16.mxu1 %v11045_v15  ;;  %12961 = vmatprep.mubr.bf16.mxu0 %v13778_v28  ;;  %v11052_v15 = vcombine.low %v13960_v44, %v15684_v37  ;;  %v11053_v28 = vcombine.low %v13962_v55, %v15687_v16  ;;  %v13970_v44 = vld [vmem:[#allocation2 + $0x20] sm:$0x1] }
 0x207   :  { %13023 = vmatprep.subr.bf16.mxu0 %v13784_v42 }
 0x209   :  { %13024 = vmatpush3.bf16.msra.mxu0 %v13784_v42  ;;  %v13835_v42 = vld [vmem:[%s17261_s3 + $0x200] sm:$0xff]  }
 0x20a   :  { %13025 = vmatprep.subr.bf16.mxu0 %v13794_v13 }
 0x20c   :  { %12962 = vmatmul.mubr.bf16.gmra.mrb[4].mxu0 %v13779_v34  ;;  %v13964_v34 = vld [vmem:[#allocation2 + $0x12c] sm:$0xf] }
 0x20d   :  { %12586 = vmatmul.mubr.bf16.gmra.mrb[28].mxu1 %v11046_v38  ;;  %12965 = vmatprep.mubr.bf16.mxu0 %v13783_v41  ;;  %v5604_v38 = vshrl.u32 %v15452_v61, 16  ;;  %v15698_v41 = vld [vmem:[#allocation2 + $0x130] sm:$0xf]  ;;  %v3658_v61 = vrot.slane %v15496_v60, 5 }
 0x20e   :  { %12589 = vmatprep.mubr.bf16.mxu1 %v11047_v29  ;;  %13026 = vmatpush3.bf16.msra.mxu0 %v13794_v13  ;;  %v3644_v29 = vrot.slane %v15476_v35, 5  ;;  %v5610_v13 = vshll.u32 %v15454_v21, 16  ;;  %17308 = vst [vmem:[#allocation8_spill] sm:$0xff] %v15698_v41  ;;  %v15706_v35 = vld [vmem:[#allocation2 + $0x13c] sm:$0xf] }
 0x20f   :  { %13027 = vmatprep.subr.bf16.mxu0 %v13804_v52  ;;  %17311 = vst [vmem:[#allocation11_spill] sm:$0xff] %v15706_v35  ;;  %v3545_v21 = vld [vmem:[#allocation2 + $0x18] sm:$0xe] }
 0x210   :  { %v3646_v19 = vrot.slane %v3644_v29, 4  ;;  %v15709_v60 = vrot.slane %v5610_v13, 5 }
 0x212   :  { %13028 = vmatpush3.bf16.msra.mxu0 %v13804_v52  ;;  %v11054_v52 = vcombine.low %v13964_v34, %v15698_v41  ;;  %17312 = vst [vmem:[#allocation12_spill] sm:$0xff] %v15709_v60  ;;  %v13973_v34 = vld [vmem:[#allocation2 + $0x150] sm:$0xf]  ;;  %v3551_v60 = vld [vmem:[#allocation2 + $0x60] sm:$0xe] }
 0x213   :  { %13029 = vmatprep.subr.bf16.mxu0 %v13812_v63  ;;  %v11079_v37 = vrot.slane %v3551_v60, 9 }
 0x214   :  { %12966 = vmatmul.mubr.bf16.gmra.mrb[8].mxu0 %v13785_v0  ;;  %v13968_v0 = vld [vmem:[#allocation2 + $0x8] sm:$0x1] }
 0x215   :  { %12590 = vmatmul.mubr.bf16.gmra.mrb[32].mxu1 %v11048_v14  ;;  %12969 = vmatprep.mubr.bf16.mxu0 %v13788_v27  ;;  %v3544_v14 = vld [vmem:[#allocation2 + $0xc] sm:$0xe]  ;;  %v3647_v27 = vrot.slane %v13968_v0, 5  ;;  %v15758_v0 = vld [vmem:[#allocation2 + $0x178] sm:$0xf] }
 0x216   :  { %12593 = vmatprep.mubr.bf16.mxu1 %v11049_v11  ;;  %13030 = vmatpush3.bf16.msra.mxu0 %v13812_v63  ;;  %v15704_v11 = vrot.slane %v5604_v38, 4  ;;  %v13966_v63 = vld [vmem:[#allocation2 + $0x138] sm:$0xf]  ;;  %v13971_v38 = vld [vmem:[#allocation2 + $0x144] sm:$0xf] }
 0x217   :  { %13031 = vmatprep.subr.bf16.mxu0 %v13818_v36  ;;  %v11055_v6 = vcombine.low %v13966_v63, %v15706_v35  ;;  %v15722_v63 = vld [vmem:[#allocation2 + $0x160] sm:$0xf]  ;;  %v13984_v35 = vld [vmem:[#allocation2 + $0x50] sm:$0x1] }
 0x218   :  { %17310 = vst [vmem:[#allocation10_spill] sm:$0xff] %v15704_v11  ;;  %17315 = vst [vmem:[#allocation15_spill] sm:$0xff] %v15722_v63  ;;  %v3689_v41 = vrot.slane %v13984_v35, 5  ;;  %v3714_v35 = vrot.slane %v15612_v54, 5 }
 0x21a   :  { %13032 = vmatpush3.bf16.msra.mxu0 %v13818_v36  ;;  %v13969_v36 = vld [vmem:[#allocation2 + $0x14] sm:$0x1] }
 0x21b   :  { %13033 = vmatprep.subr.bf16.mxu0 %v13824_v31  ;;  %v3654_v23 = vrot.slane %v13969_v36, 5 }
 0x21c   :  { %12970 = vmatmul.mubr.bf16.gmra.mrb[12].mxu0 %v13789_v22  ;;  %v13799_v22 = vld [vmem:[#allocation2 + $0x9c] sm:$0xff]  }
 0x21d   :  { %12594 = vmatmul.mubr.bf16.gmra.mrb[36].mxu1 %v11050_v62  ;;  %12973 = vmatprep.mubr.bf16.mxu0 %v13793_v9  ;;  %v11071_v62 = vrot.slane %v3543_v30, 9  ;;  %v11073_v9 = vrot.slane %v3545_v21, 9  ;;  %v15726_v21 = vld [vmem:[#allocation2 + $0x168] sm:$0xf] }
 0x21e   :  { %12597 = vmatprep.mubr.bf16.mxu1 %v11051_v50  ;;  %13034 = vmatpush3.bf16.msra.mxu0 %v13824_v31  ;;  %v11072_v50 = vrot.slane %v3544_v14, 9  ;;  %v3653_v31 = vrot.slane %v3651_v20, 4  ;;  %v15720_v14 = vld [vmem:[#allocation2 + $0x15c] sm:$0xf] }
 0x21f   :  { %13035 = vmatprep.subr.bf16.mxu0 %v13830_v48  ;;  %v15734_v36 = vsel %vm14956_vm14, %v11071_v62, %v3644_v29  ;;  %v15750_v55 = vsel %vm14956_vm14, %v11073_v9, %v3658_v61 }
 0x222   :  { %13036 = vmatpush3.bf16.msra.mxu0 %v13830_v48  ;;  %v3660_v48 = vrot.slane %v3658_v61, 4  ;;  %v3672_v61 = vrot.slane %v15521_v53, 5  ;;  %v13808_v53 = vld [vmem:[#allocation2 + $0xc0] sm:$0xff]  }
 0x223   :  { %13101 = vmatprep.subr.bf16.mxu0 %v13835_v42  ;;  %v3546_v42 = vld [vmem:[#allocation2 + $0x24] sm:$0xe] }
 0x224   :  { %12974 = vmatmul.mubr.bf16.gmra.mrb[16].mxu0 %v13795_v58  ;;  %v3665_v58 = vrot.slane %v15518_v8, 5  ;;  %v15728_v8 = vld [vmem:[#allocation2 + $0x16c] sm:$0xf]  ;;  %v11074_v62 = vrot.slane %v3546_v42, 9  ;;  %v3686_v42 = vrot.slane %v15552_v51, 5 }
 0x225   :  { %12598 = vmatmul.mubr.bf16.gmra.mrb[40].mxu1 %v11052_v15  ;;  %12977 = vmatprep.mubr.bf16.mxu0 %v13798_v25  ;;  %v3661_v15 = vrot.slane %v13970_v44, 5  ;;  %v15714_v25 = vld [vmem:[#allocation2 + $0x148] sm:$0xf]  ;;  %v15738_v44 = vsel %vm14956_vm14, %v3646_v19, %v3647_v27  ;;  %v11075_v27 = vrot.slane %v3547_v5, 9  ;;  %v15756_v19 = vld [vmem:[#allocation2 + $0x174] sm:$0xf] }
 0x226   :  { %12601 = vmatprep.mubr.bf16.mxu1 %v11053_v28  ;;  %v13803_v28 = vld [vmem:[#allocation2 + $0xa8] sm:$0xff]   ;;  %17313 = vst [vmem:[#allocation13_spill] sm:$0xff] %v15714_v25  ;;  %v11056_v13 = vcombine.low %v13971_v38, %v15714_v25  ;;  %v15742_v38 = vsel %vm14956_vm14, %v11072_v50, %v3651_v20  ;;  %v13805_v5 = vld [vmem:[#allocation2 + $0xb4] sm:$0xff]   ;;  %v15778_v9 = vsel %vm14956_vm14, %v11074_v62, %v3665_v58  ;;  %v3707_v62 = vrot.slane %v15609_v45, 5 }
 0x227   :  { %v15754_v29 = vsel %vm14956_vm14, %v3660_v48, %v3661_v15  ;;  %v13981_v50 = vld [vmem:[#allocation2 + $0x2c] sm:$0x1]  ;;  %v3548_v48 = vld [vmem:[#allocation2 + $0x3c] sm:$0xe]  ;;  %v3679_v15 = vrot.slane %v15544_v57, 5  ;;  %v15782_v57 = vsel %vm14956_vm14, %v11075_v27, %v3672_v61 }
 0x228   :  { %v3549_v20 = vld [vmem:[#allocation2 + $0x48] sm:$0xe]  ;;  %v13982_v51 = vld [vmem:[#allocation2 + $0x38] sm:$0x1]  ;;  %v11076_v3 = vrot.slane %v3548_v48, 9  ;;  %v3709_v12 = vrot.slane %v3707_v62, 4 }
 0x229   :  { %v3681_v11 = vrot.slane %v3679_v15, 4  ;;  %v13983_v27 = vld [vmem:[#allocation2 + $0x44] sm:$0x1]  ;;  %v11077_v25 = vrot.slane %v3549_v20, 9 }
 0x22a   :  { %v15799_v60 = vsel %vm14956_vm14, %v11076_v3, %v3679_v15  ;;  %v13988_v15 = vld [vmem:[#allocation2 + $0x80] sm:$0x1] }
 0x22c   :  { %12978 = vmatmul.mubr.bf16.gmra.mrb[20].mxu0 %v13799_v22  ;;  %v3693_v22 = vrot.slane %v15580_v46, 5 }
 0x22d   :  { %12602 = vmatmul.mubr.bf16.gmra.mrb[44].mxu1 %v11054_v52  ;;  %v15717_v52 = vld [vmem:[#allocation2 + $0x154] sm:$0xf]  ;;  %12981 = vmatprep.mubr.bf16.mxu0 %v13803_v28  ;;  %v3675_v28 = vrot.slane %v13982_v51, 5  ;;  %v3688_v51 = vrot.slane %v3686_v42, 4 }
 0x22e   :  { %12605 = vmatprep.mubr.bf16.mxu1 %v11055_v6  ;;  %17314 = vst [vmem:[#allocation14_spill] sm:$0xff] %v15717_v52  ;;  %v11057_v30 = vcombine.low %v13973_v34, %v15717_v52  ;;  %v15746_v34 = vsel %vm14956_vm14, %v3653_v31, %v3654_v23  ;;  %v3667_v23 = vrot.slane %v3665_v58, 4  ;;  %v3668_v31 = vrot.slane %v13981_v50, 5  ;;  %v3550_v6 = vld [vmem:[#allocation2 + $0x54] sm:$0xe] }
 0x22f   :  { %v3700_v50 = vrot.slane %v15587_v59, 5  ;;  %v3552_v58 = vld [vmem:[#allocation2 + $0x6c] sm:$0xe]  ;;  %v3682_v52 = vrot.slane %v13983_v27, 5  ;;  %v11078_v16 = vrot.slane %v3550_v6, 9  ;;  %v3695_v59 = vrot.slane %v3693_v22, 4 }
 0x230   :  { %v15787_v46 = vsel %vm14956_vm14, %v3667_v23, %v3668_v31  ;;  %v13986_v31 = vld [vmem:[#allocation2 + $0x68] sm:$0x1]  ;;  %v11080_v48 = vrot.slane %v3552_v58, 9  ;;  %v13987_v27 = vld [vmem:[#allocation2 + $0x74] sm:$0x1]  ;;  %v3721_v58 = vrot.slane %v15624_v33, 5  ;;  %v15812_v54 = vsel %vm14956_vm14, %v3688_v51, %v3689_v41 }
 0x231   :  { %v3702_v23 = vrot.slane %v3700_v50, 4  ;;  %v3710_v20 = vrot.slane %v13987_v27, 5  ;;  %v13809_v33 = vld [vmem:[#allocation2 + $0xcc] sm:$0xff]   ;;  %v13813_v27 = vld [vmem:[#allocation2 + $0xfc] sm:$0xff]  }
 0x232   :  { %v13993_v51 = vld [vmem:[#allocation2 + $0xbc] sm:$0x1] }
 0x234   :  { %12982 = vmatmul.mubr.bf16.gmra.mrb[24].mxu0 %v13805_v5  ;;  %v15803_v5 = vsel %vm14956_vm14, %v11077_v25, %v3686_v42  ;;  %v17316_v25 = vcombine.low %v15720_v14, %v15722_v63  ;;  %v13811_v14 = vld [vmem:[#allocation2 + $0xf0] sm:$0xff]   ;;  %v3717_v42 = vrot.slane %v13988_v15, 5  ;;  %v3749_v15 = vrot.slane %v15645_v56, 5 }
 0x235   :  { %12606 = vmatmul.mubr.bf16.gmra.mrb[48].mxu1 %v11056_v13  ;;  %v3674_v13 = vrot.slane %v3672_v61, 4  ;;  %v3703_v61 = vrot.slane %v13986_v31, 5  ;;  %12985 = vmatprep.mubr.bf16.mxu0 %v13808_v53  ;;  %v3554_v53 = vld [vmem:[#allocation2 + $0x84] sm:$0xe]  ;;  %v3556_v31 = vld [vmem:[#allocation2 + $0x9c] sm:$0xe] }
 0x236   :  { %12609 = vmatprep.mubr.bf16.mxu1 %v11057_v30  ;;  %v13985_v30 = vld [vmem:[#allocation2 + $0x5c] sm:$0x1] }
 0x237   :  { %v3696_v17 = vrot.slane %v13985_v30, 5  ;;  %v15795_v6 = vsel %vm14956_vm14, %v3674_v13, %v3675_v28  ;;  %v15808_v30 = vsel %vm14956_vm14, %v3681_v11, %v3682_v52  ;;  %v15816_v28 = vsel %vm14956_vm14, %v11078_v16, %v3693_v22  ;;  %v3555_v13 = vld [vmem:[#allocation2 + $0x90] sm:$0xe] }
 0x238   :  { %v15827_v11 = vsel %vm14956_vm14, %v11079_v37, %v3700_v50  ;;  %v15831_v41 = vsel %vm14956_vm14, %v3702_v23, %v3703_v61  ;;  %v15835_v16 = vsel %vm14956_vm14, %v11080_v48, %v3707_v62  ;;  %v11081_v52 = vrot.slane %v3553_v1, 9 }
 0x239   :  { %v15820_v3 = vsel %vm14956_vm14, %v3695_v59, %v3696_v17  ;;  %v17317_v17 = vcombine.low %v15726_v21, %v15728_v8  ;;  %v15842_v22 = vsel %vm14956_vm14, %v3709_v12, %v3710_v20  ;;  %v3716_v37 = vrot.slane %v3714_v35, 4  ;;  %v13989_v59 = vld [vmem:[#allocation2 + $0x8c] sm:$0x1]  ;;  %v3557_v20 = vld [vmem:[#allocation2 + $0xa8] sm:$0xe] }
 0x23a   :  { %v11082_v50 = vrot.slane %v3554_v53, 9  ;;  %v3723_v62 = vrot.slane %v3721_v58, 4  ;;  %v3724_v1 = vrot.slane %v13989_v59, 5  ;;  %v3728_v23 = vrot.slane %v15627_v47, 5  ;;  %v13992_v12 = vld [vmem:[#allocation2 + $0xb0] sm:$0x1] }
 0x23b   :  { %v3735_v61 = vrot.slane %v15634_v32, 5  ;;  %v11083_v47 = vrot.slane %v3555_v13, 9  ;;  %v3742_v53 = vrot.slane %v15637_v40, 5  ;;  %v11085_v8 = vrot.slane %v3557_v20, 9  ;;  %v8072_v21 = vld [vmem:[#allocation2 + $0x24] sm:$0xf] }
 0x23c   :  { %12986 = vmatmul.mubr.bf16.gmra.mrb[28].mxu0 %v13809_v33  ;;  %v15869_v32 = vsel %vm14956_vm14, %v11082_v50, %v3721_v58  ;;  %v3558_v33 = vld [vmem:[#allocation2 + $0xb4] sm:$0xe]  ;;  %v15874_v13 = vsel %vm14956_vm14, %v3723_v62, %v3724_v1  ;;  %v3730_v40 = vrot.slane %v3728_v23, 4  ;;  %v3745_v58 = vrot.slane %v13992_v12, 5  ;;  %v13814_v12 = vld [vmem:[#allocation2 + $0x108] sm:$0xff]  }
 0x23d   :  { %12610 = vmatmul.mubr.bf16.gmra.mrb[52].mxu1 %v17316_v25  ;;  %12989 = vmatprep.mubr.bf16.mxu0 %v13811_v14  ;;  %v15861_v25 = vsel %vm14956_vm14, %v11081_v52, %v3714_v35  ;;  %17318 = vst [vmem:[#allocation16_spill] sm:$0xff] %v15874_v13  ;;  %v13990_v14 = vld [vmem:[#allocation2 + $0x98] sm:$0x1]  ;;  %v11084_v35 = vrot.slane %v3556_v31, 9  ;;  %v3737_v48 = vrot.slane %v3735_v61, 4  ;;  %v17319_v50 = vcombine.low %v15756_v19, %v15758_v0 }
 0x23e   :  { %12613 = vmatprep.mubr.bf16.mxu1 %v17317_v17  ;;  %v15865_v17 = vsel %vm14956_vm14, %v3716_v37, %v3717_v42  ;;  %v3731_v59 = vrot.slane %v13990_v14, 5  ;;  %v8069_v52 = vld [vmem:[#allocation2 + $0x18] sm:$0xf]  ;;  %v13991_v37 = vld [vmem:[#allocation2 + $0xa4] sm:$0x1]  ;;  %v15883_v62 = vsel %vm14956_vm14, %v11083_v47, %v3728_v23  ;;  %v3744_v1 = vrot.slane %v3742_v53, 4 }
 0x23f   :  { %v3738_v42 = vrot.slane %v13991_v37, 5  ;;  %v11086_v31 = vrot.slane %v3558_v33, 9  ;;  %v8070_v14 = vld [vmem:[#allocation2 + $0x1c] sm:$0xf]  ;;  %v17320_v20 = vcombine.low %v15432_v24, %v15440_v39  ;;  %v3751_v37 = vrot.slane %v3749_v15, 4 }
 0x240   :  { %v3752_v0 = vrot.slane %v13993_v51, 5  ;;  %v8166_v19 = vshrl.u32 %v8069_v52, 16  ;;  %v15892_v23 = vsel %vm14956_vm14, %v3730_v40, %v3731_v59  ;;  %v15896_v47 = vsel %vm14956_vm14, %v11084_v35, %v3735_v61  ;;  %v8073_v39 = vld [vmem:[#allocation2 + $0x28] sm:$0xf]  ;;  %v3559_v33 = vld [vmem:[#allocation2 + $0xd8] sm:$0xe] }
 0x241   :  { %v3756_v24 = vrot.slane %v15648_v4, 5  ;;  %v8179_v45 = vshrl.u32 %v8070_v14, 16  ;;  %v8190_v51 = vshrl.u32 %v8072_v21, 16  ;;  %v8193_v63 = vshll.u32 %v8072_v21, 16 }
 0x242   :  { %v15905_v40 = vsel %vm14956_vm14, %v11085_v8, %v3742_v53  ;;  %v15909_v61 = vsel %vm14956_vm14, %v3744_v1, %v3745_v58  ;;  %v15913_v4 = vsel %vm14956_vm14, %v11086_v31, %v3749_v15  ;;  %v15917_v21 = vsel %vm14956_vm14, %v3751_v37, %v3752_v0  ;;  %v13994_v8 = vld [vmem:[#allocation2 + $0xe0] sm:$0x1]  ;;  %v13815_v37 = vld [vmem:[#allocation2 + $0x114] sm:$0xff]  }
 0x243   :  { %17321 = vst [vmem:[#allocation17_spill] sm:$0xff] %v15909_v61  ;;  %17322 = vst [vmem:[#allocation18_spill] sm:$0xff] %v15917_v21  ;;  %v8199_v59 = vshll.u32 %v8073_v39, 16  ;;  %v11087_v35 = vrot.slane %v3559_v33, 9  ;;  %v3759_v53 = vrot.slane %v13994_v8, 5  ;;  %v8203_v56 = vshrl.u32 %v8073_v39, 16 }
 0x244   :  { %12990 = vmatmul.mubr.bf16.gmra.mrb[32].mxu0 %v13813_v27  ;;  %v8168_v27 = vrot.slane %v8166_v19, 4  ;;  %v8071_v58 = vld [vmem:[#allocation2 + $0x20] sm:$0x1]  ;;  %v8181_v13 = vrot.slane %v8179_v45, 4  ;;  %v8192_v15 = vrot.slane %v8190_v51, 4  ;;  %v8195_v31 = vrot.slane %v8193_v63, 5 }
 0x245   :  { %12614 = vmatmul.mubr.bf16.gmra.mrb[56].mxu1 %v17319_v50  ;;  %v8169_v50 = vshll.u32 %v8069_v52, 16  ;;  %v15901_v52 = vsel %vm14956_vm14, %v3737_v48, %v3738_v42  ;;  %12993 = vmatprep.mubr.bf16.mxu0 %v13814_v12  ;;  %v3758_v42 = vrot.slane %v3756_v24, 4  ;;  %v17323_v12 = vcombine.low %v15458_v49, %v15462_v43  ;;  %v8074_v33 = vld [vmem:[#allocation2 + $0x2c] sm:$0x1]  ;;  %v13817_v45 = vld [vmem:[#allocation2 + $0x120] sm:$0xff]  }
 0x246   :  { %12617 = vmatprep.mubr.bf16.mxu1 %v17320_v20  ;;  %v8175_v20 = vshll.u32 %v8070_v14, 16  ;;  %v3560_v14 = vld [vmem:[#allocation2 + $0xe4] sm:$0xe]  ;;  %v3763_v39 = vrot.slane %v15660_v26, 5  ;;  %v17324_v63 = vcombine.low %v15734_v36, %v15738_v44  ;;  %v15938_v19 = vsel %vm14956_vm14, %v11087_v35, %v3756_v24  ;;  %v8076_v61 = vld [vmem:[#allocation2 + $0x34] sm:$0xf] }
 0x247   :  { %v8171_v48 = vrot.slane %v8169_v50, 5  ;;  %v11088_v43 = vrot.slane %v3560_v14, 9  ;;  %17325 = vst [vmem:[#allocation19_spill] sm:$0xff] %v15938_v19  ;;  %v8185_v50 = vshll.u32 %v8071_v58, 16  ;;  %v15940_v26 = vrot.slane %v8199_v59, 5  ;;  %v13819_v58 = vld [vmem:[#allocation2 + $0x12c] sm:$0xff]  }
 0x248   :  { %v15919_v1 = vrot.slane %v8175_v20, 5  ;;  %v13995_v20 = vld [vmem:[#allocation2 + $0xec] sm:$0x1]  ;;  %v8205_v0 = vrot.slane %v8203_v56, 4  ;;  %v15944_v36 = vsel %vm14956_vm14, %v3758_v42, %v3759_v53  ;;  %v8196_v14 = vor.u32 %v8195_v31, %v8192_v15  ;;  %v8079_v19 = vld [vmem:[#allocation2 + $0x40] sm:$0xf] }
 0x249   :  { %v3766_v51 = vrot.slane %v13995_v20, 5  ;;  %v8172_v8 = vor.u32 %v8171_v48, %v8168_v27  ;;  %17326 = vst [vmem:[#allocation20_spill] sm:$0xff] %v15944_v36  ;;  %v3765_v27 = vrot.slane %v3763_v39, 4  ;;  %v3561_v48 = vld [vmem:[#allocation2 + $0xf0] sm:$0xe]  ;;  %v3770_v20 = vrot.slane %v15663_v18, 5 }
 0x24a   :  { %v8182_v44 = vor.u32 %v8181_v13, %v15919_v1  ;;  %v15950_v56 = vsel %vm14956_vm14, %v11088_v43, %v3763_v39  ;;  %v8223_v42 = vshll.u32 %v8076_v61, 16  ;;  %v8227_v53 = vshrl.u32 %v8076_v61, 16  ;;  %v13816_v13 = vld [vmem:[%s17261_s3 + $0xc8] sm:$0xff]  }
 0x24b   :  { %v15952_v59 = vrot.slane %v8172_v8, 4  ;;  %v15959_v18 = vrot.slane %v8185_v50, 5  ;;  %v8206_v31 = vor.u32 %v8205_v0, %v15940_v26  ;;  %v3777_v39 = vrot.slane %v15672_v7, 5  ;;  %v8078_v8 = vld [vmem:[#allocation2 + $0x3c] sm:$0xf] }
 0x24c   :  { %12994 = vmatmul.mubr.bf16.gmra.mrb[36].mxu0 %v13815_v37  ;;  %v3562_v37 = vld [vmem:[#allocation2 + $0xfc] sm:$0xe]  ;;  %v11089_v43 = vrot.slane %v3561_v48, 9  ;;  %v3772_v15 = vrot.slane %v3770_v20, 4  ;;  %v13996_v50 = vld [vmem:[#allocation2 + $0xf8] sm:$0x1]  ;;  %v17328_v7 = vcombine.low %v15750_v55, %v15754_v29  ;;  %v15983_v55 = vsel %vm14956_vm14, %v3765_v27, %v3766_v51 }
 0x24d   :  { %12618 = vmatmul.mubr.bf16.gmra.mrb[60].mxu1 %v17323_v12  ;;  %v8075_v12 = vld [vmem:[#allocation2 + $0x30] sm:$0xf]  ;;  %12997 = vmatprep.mubr.bf16.mxu0 %v13817_v45  ;;  %v15965_v45 = vrot.slane %v8196_v14, 4  ;;  %v3773_v49 = vrot.slane %v13996_v50, 5  ;;  %v15979_v48 = vrot.slane %v8223_v42, 5  ;;  %v8241_v21 = vshll.u32 %v8078_v8, 16 }
 0x24e   :  { %12637 = vmatprep.mubr.bf16.mxu1 %v17324_v63  ;;  %v8209_v63 = vshll.u32 %v8074_v33, 16  ;;  %v8214_v24 = vshrl.u32 %v8075_v12, 16  ;;  %v8217_v35 = vshll.u32 %v8075_v12, 16  ;;  %v15963_v33 = vrot.slane %v8182_v44, 4  ;;  %v13820_v44 = vld [vmem:[#allocation2 + $0x138] sm:$0xff]   ;;  %v13822_v14 = vld [vmem:[%s17261_s3 + $0xd0] sm:$0xff]  }
 0x24f   :  { %v17327_v12 = vcombine.low %v15742_v38, %v15746_v34  ;;  %v13997_v38 = vld [vmem:[#allocation2 + $0x104] sm:$0x1]  ;;  %v8077_v50 = vld [vmem:[#allocation2 + $0x38] sm:$0x1]  ;;  %v15999_v51 = vsel %vm14956_vm14, %v11089_v43, %v3770_v20 }
 0x250   :  { %v15967_v61 = vrot.slane %v8209_v63, 5  ;;  %v8216_v36 = vrot.slane %v8214_v24, 4  ;;  %v8219_v0 = vrot.slane %v8217_v35, 5  ;;  %v11090_v63 = vrot.slane %v3562_v37, 9 }
 0x251   :  { %v3780_v34 = vrot.slane %v13997_v38, 5  ;;  %v8207_v24 = vrot.slane %v8206_v31, 4  ;;  %v3779_v35 = vrot.slane %v3777_v39, 4  ;;  %v8178_v37 = vsel %vm14254_vm9, %v15952_v59, %v15919_v1  ;;  %v8081_v31 = vld [vmem:[#allocation2 + $0x48] sm:$0xf] }
 0x252   :  { %v8251_v38 = vshrl.u32 %v8079_v19, 16  ;;  %v8188_v42 = vsel %vm14254_vm9, %v15963_v33, %v15959_v18  ;;  %v8220_v27 = vor.u32 %v8219_v0, %v8216_v36  ;;  %v16003_v1 = vsel %vm14956_vm14, %v3772_v15, %v3773_v49  ;;  %v13828_v36 = vld [vmem:[%s17261_s3 + $0xd8] sm:$0xff]   ;;  %v8082_v18 = vld [vmem:[#allocation2 + $0x4c] sm:$0xf]  ;;  %v13821_v0 = vld [vmem:[#allocation2 + $0x144] sm:$0xff]  }
 0x253   :  { %v8212_v20 = vsel %vm14254_vm9, %v8207_v24, %v15967_v61  ;;  %v16018_v49 = vsel %vm14956_vm14, %v3779_v35, %v3780_v34  ;;  %v8243_v15 = vrot.slane %v8241_v21, 5  ;;  %v8265_v43 = vshll.u32 %v8081_v31, 16  ;;  %v17332_v34 = vld [vmem:[#allocation5_spill] sm:$0xff]  ;;  %v13823_v24 = vld [vmem:[#allocation2 + $0x150] sm:$0xff]  }
 0x254   :  { %12998 = vmatmul.mubr.bf16.gmra.mrb[40].mxu0 %v13819_v58  ;;  %v8233_v58 = vshll.u32 %v8077_v50, 16  ;;  %17330 = vst [vmem:[#allocation4_spill] sm:$0xff] %v16018_v49  ;;  %v8253_v33 = vrot.slane %v8251_v38, 4  ;;  %v17333_v21 = vcombine.low %v15782_v57, %v15795_v6  ;;  %v16031_v35 = vcombine.low %v8178_v37, %v8188_v42  ;;  %v17334_v57 = vld [vmem:[#allocation6_spill] sm:$0xff] }
 0x255   :  { %12638 = vmatmul.mubr.bf16.vlgmr.msra.gmra.mrb[0].mxu1 %v17327_v12  ;;  %v8229_v12 = vrot.slane %v8227_v53, 4  ;;  %v8202_v53 = vsel %vm14254_vm9, %v15965_v45, %v15940_v26  ;;  %13001 = vmatprep.mubr.bf16.mxu0 %v13820_v44  ;;  %v8080_v26 = vld [vmem:[#allocation2 + $0x44] sm:$0x1]  ;;  %v8262_v45 = vshrl.u32 %v8081_v31, 16  ;;  %v8221_v44 = vrot.slane %v8220_v27, 4 }
 0x256   :  { %12702 = vmatpush3.bf16.msra.mxu1 %v15607_v10  ;;  %12641 = vmatprep.mubr.bf16.mxu1 %v17328_v7  ;;  %v8238_v10 = vshrl.u32 %v8078_v8, 16  ;;  %v8247_v7 = vshll.u32 %v8079_v19, 16  ;;  %v16007_v19 = vsel %vm14956_vm14, %v11090_v63, %v3777_v39  ;;  %v17331_v8 = vcombine.low %v15778_v9, %v15787_v46  ;;  %v3563_v9 = vld [vmem:[#allocation2 + $0x108] sm:$0xe] }
 0x257   :  { %12703 = vmatprep.subr.bf16.mxu1 %v13816_v13  ;;  %v8230_v59 = vor.u32 %v8229_v12, %v15979_v48  ;;  %v8257_v63 = vshll.u32 %v8080_v26, 16  ;;  %v3784_v12 = vrot.slane %v17332_v34, 5  ;;  %v8271_v46 = vshll.u32 %v8082_v18, 16  ;;  %v3564_v34 = vld [vmem:[#allocation2 + $0x114] sm:$0xe] }
 0x258   :  { %v16020_v39 = vrot.slane %v8247_v7, 5  ;;  %v13834_v7 = vld [vmem:[%s17261_s3 + $0xe0] sm:$0xff]   ;;  %v16036_v38 = vcombine.low %v8202_v53, %v8212_v20  ;;  %v8275_v6 = vshrl.u32 %v8082_v18, 16  ;;  %v8264_v31 = vrot.slane %v8262_v45, 4 }
 0x259   :  { %v8231_v50 = vrot.slane %v8230_v59, 4  ;;  %v8267_v59 = vrot.slane %v8265_v43, 5  ;;  %v8226_v53 = vsel %vm14254_vm9, %v8221_v44, %v15979_v48  ;;  %v16046_v26 = vrot.slane %v8257_v63, 5  ;;  %v563_v43 = vld [vmem:[#allocation2 + $0xd4] sm:$0x1]  ;;  %v13836_v48 = vld [vmem:[%s17261_s3 + $0xe8] sm:$0xff]  }
 0x25a   :  { %12704 = vmatpush3.bf16.msra.mxu1 %v13816_v13  ;;  %v8240_v13 = vrot.slane %v8238_v10, 4  ;;  %v8235_v10 = vrot.slane %v8233_v58, 5  ;;  %v8254_v42 = vor.u32 %v8253_v33, %v16020_v39  ;;  %v8085_v58 = vld [vmem:[#allocation2 + $0x58] sm:$0xf]  ;;  %v11091_v20 = vrot.slane %v3563_v9, 9 }
 0x25b   :  { %12705 = vmatprep.subr.bf16.mxu1 %v13822_v14  ;;  %v16050_v33 = vrot.slane %v8271_v46, 5  ;;  %v8295_v63 = vshll.u32 %v8085_v58, 16  ;;  %v8299_v9 = vshrl.u32 %v8085_v58, 16  ;;  %v3791_v27 = vrot.slane %v17334_v57, 5  ;;  %v13825_v46 = vld [vmem:[#allocation2 + $0x15c] sm:$0xff]  }
 0x25c   :  { %v8244_v37 = vor.u32 %v8243_v15, %v8240_v13  ;;  %13002 = vmatmul.mubr.bf16.gmra.mrb[44].mxu0 %v13821_v0  ;;  %v8236_v13 = vsel %vm14254_vm9, %v8231_v50, %v8235_v10  ;;  %v13998_v15 = vld [vmem:[#allocation2 + $0x110] sm:$0x1]  ;;  %v8277_v0 = vrot.slane %v8275_v6, 4  ;;  %v8268_v50 = vor.u32 %v8267_v59, %v8264_v31  ;;  %v8088_v58 = vld [vmem:[#allocation2 + $0x64] sm:$0xf] }
 0x25d   :  { %12642 = vmatmul.mubr.bf16.gmra.mrb[4].mxu1 %v17331_v8  ;;  %v3786_v8 = vrot.slane %v3784_v12, 4  ;;  %13005 = vmatprep.mubr.bf16.mxu0 %v13823_v24  ;;  %v3787_v18 = vrot.slane %v13998_v15, 5  ;;  %v17335_v10 = vcombine.low %v15799_v60, %v15808_v30  ;;  %v16059_v15 = vcombine.low %v8226_v53, %v8236_v13  ;;  %v13999_v30 = vld [vmem:[#allocation2 + $0x11c] sm:$0x1] }
 0x25e   :  { %12645 = vmatprep.mubr.bf16.mxu1 %v17333_v21  ;;  %12706 = vmatpush3.bf16.msra.mxu1 %v13822_v14  ;;  %v8084_v14 = vld [vmem:[#allocation2 + $0x54] sm:$0xf]  ;;  %v8083_v21 = vld [vmem:[#allocation2 + $0x50] sm:$0x1]  ;;  %v8245_v24 = vrot.slane %v8244_v37, 4  ;;  %v16063_v61 = vsel %vm14956_vm14, %v11091_v20, %v3784_v12  ;;  %v11092_v6 = vrot.slane %v3564_v34, 9  ;;  %v17337_v57 = vcombine.low %v15803_v5, %v15812_v54 }
 0x25f   :  { %12707 = vmatprep.subr.bf16.mxu1 %v13828_v36  ;;  %v8286_v45 = vshrl.u32 %v8084_v14, 16  ;;  %v8289_v44 = vshll.u32 %v8084_v14, 16  ;;  %v8087_v14 = vld [vmem:[#allocation2 + $0x60] sm:$0xf]  ;;  %v564_v37 = vsel %vm14193_vm4, 0, %v563_v43  ;;  %v16072_v60 = vsel %vm14956_vm14, %v3786_v8, %v3787_v18  ;;  %v13838_v54 = vld [vmem:[%s17261_s3 + $0xf0] sm:$0xff]  }
 0x260   :  { %v3794_v31 = vrot.slane %v13999_v30, 5  ;;  %v8281_v59 = vshll.u32 %v8083_v21, 16  ;;  %565 = vst [vmem:[#allocation2 + $0xd4] sm:$0x1] %v564_v37  ;;  %v8278_v53 = vor.u32 %v8277_v0, %v16050_v33  ;;  %v8086_v20 = vld [vmem:[#allocation2 + $0x5c] sm:$0x1] }
 0x261   :  { %v8288_v12 = vrot.slane %v8286_v45, 4  ;;  %v8291_v34 = vrot.slane %v8289_v44, 5  ;;  %v16075_v13 = vrot.slane %v8295_v63, 5  ;;  %v8301_v5 = vrot.slane %v8299_v9, 4  ;;  %v3565_v45 = vld [vmem:[#allocation2 + $0x120] sm:$0xe] }
 0x262   :  { %12708 = vmatpush3.bf16.msra.mxu1 %v13828_v36  ;;  %v8255_v36 = vrot.slane %v8254_v42, 4  ;;  %v13826_v42 = vld [vmem:[#allocation2 + $0x168] sm:$0xff]   ;;  %v3793_v21 = vrot.slane %v3791_v27, 4  ;;  %v8269_v18 = vrot.slane %v8268_v50, 4  ;;  %v8310_v43 = vshrl.u32 %v8087_v14, 16  ;;  %v13829_v30 = vld [vmem:[#allocation2 + $0x180] sm:$0xff]  }
 0x263   :  { %12709 = vmatprep.subr.bf16.mxu1 %v13834_v7  ;;  %v8313_v0 = vshll.u32 %v8087_v14, 16  ;;  %v8319_v44 = vshll.u32 %v8088_v58, 16  ;;  %v8323_v63 = vshrl.u32 %v8088_v58, 16  ;;  %v8302_v50 = vor.u32 %v8301_v5, %v16075_v13  ;;  %v3566_v14 = vld [vmem:[#allocation2 + $0x12c] sm:$0xe] }
 0x264   :  { %v8260_v8 = vsel %vm14254_vm9, %v8255_v36, %v16046_v26  ;;  %13006 = vmatmul.mubr.bf16.gmra.mrb[48].mxu0 %v13825_v46  ;;  %v8279_v26 = vrot.slane %v8278_v53, 4  ;;  %v8292_v36 = vor.u32 %v8291_v34, %v8288_v12  ;;  %v17338_v46 = vld [vmem:[#allocation7_spill] sm:$0xff]  ;;  %v17339_v12 = vcombine.low %v15816_v28, %v15820_v3  ;;  %v8089_v53 = vld [vmem:[#allocation2 + $0x68] sm:$0x1] }
 0x265   :  { %12646 = vmatmul.mubr.bf16.gmra.mrb[8].mxu1 %v17335_v10  ;;  %13009 = vmatprep.mubr.bf16.mxu0 %v13826_v42  ;;  %v16090_v10 = vsel %vm14956_vm14, %v11092_v6, %v3791_v27  ;;  %v3798_v37 = vrot.slane %v17338_v46, 5  ;;  %v13827_v42 = vld [vmem:[#allocation2 + $0x174] sm:$0xff]   ;;  %v16101_v27 = vsel %vm14956_vm14, %v3793_v21, %v3794_v31  ;;  %v11093_v6 = vrot.slane %v3565_v45, 9  ;;  %v14000_v21 = vld [vmem:[#allocation2 + $0x128] sm:$0x1] }
 0x266   :  { %12649 = vmatprep.mubr.bf16.mxu1 %v17337_v57  ;;  %12710 = vmatpush3.bf16.msra.mxu1 %v13834_v7  ;;  %v8250_v7 = vsel %vm14254_vm9, %v8245_v24, %v16020_v39  ;;  %v8283_v39 = vrot.slane %v8281_v59, 5  ;;  %v8305_v24 = vshll.u32 %v8086_v20, 16  ;;  %v13840_v57 = vld [vmem:[%s17261_s3 + $0xf8] sm:$0xff]   ;;  %v8090_v59 = vld [vmem:[#allocation2 + $0x6c] sm:$0xf]  ;;  %v8312_v20 = vrot.slane %v8310_v43, 4 }
 0x267   :  { %12711 = vmatprep.subr.bf16.mxu1 %v13836_v48  ;;  %v16097_v58 = vcombine.low %v8250_v7, %v8260_v8  ;;  %v8315_v34 = vrot.slane %v8313_v0, 5  ;;  %v16109_v5 = vrot.slane %v8319_v44, 5  ;;  %v8325_v7 = vrot.slane %v8323_v63, 4  ;;  %v8091_v9 = vld [vmem:[#allocation2 + $0x70] sm:$0xf] }
 0x268   :  { %v17340_v31 = vcombine.low %v15827_v11, %v15831_v41  ;;  %v8307_v8 = vrot.slane %v8305_v24, 5  ;;  %v3801_v46 = vrot.slane %v14000_v21, 5  ;;  %v8284_v28 = vsel %vm14254_vm9, %v8279_v26, %v8283_v39 }
 0x269   :  { %v8293_v3 = vrot.slane %v8292_v36, 4  ;;  %v8303_v43 = vrot.slane %v8302_v50, 4  ;;  %v3800_v0 = vrot.slane %v3798_v37, 4  ;;  %v8329_v11 = vshll.u32 %v8089_v53, 16  ;;  %v14001_v36 = vld [vmem:[#allocation2 + $0x134] sm:$0x1] }
 0x26a   :  { %12712 = vmatpush3.bf16.msra.mxu1 %v13836_v48  ;;  %v8274_v48 = vsel %vm14254_vm9, %v8269_v18, %v16050_v33  ;;  %v11094_v33 = vrot.slane %v3566_v14, 9  ;;  %v17341_v18 = vld [vmem:[#allocation8_spill] sm:$0xff]  ;;  %v8334_v41 = vshrl.u32 %v8090_v59, 16  ;;  %v8337_v63 = vshll.u32 %v8090_v59, 16  ;;  %v13831_v53 = vld [vmem:[#allocation2 + $0x18c] sm:$0xff]  }
 0x26b   :  { %12713 = vmatprep.subr.bf16.mxu1 %v13838_v54  ;;  %v3805_v45 = vrot.slane %v17341_v18, 5  ;;  %v8316_v24 = vor.u32 %v8315_v34, %v8312_v20  ;;  %v8326_v14 = vor.u32 %v8325_v7, %v16109_v5  ;;  %v16124_v39 = vsel %vm14956_vm14, %v11093_v6, %v3798_v37  ;;  %v17342_v34 = vld [vmem:[#allocation11_spill] sm:$0xff] }
 0x26c   :  { %13010 = vmatmul.mubr.bf16.gmra.mrb[52].mxu0 %v13827_v42  ;;  %v3808_v50 = vrot.slane %v14001_v36, 5  ;;  %v8298_v42 = vsel %vm14254_vm9, %v8293_v3, %v16075_v13  ;;  %v8308_v59 = vsel %vm14254_vm9, %v8303_v43, %v8307_v8  ;;  %v8331_v6 = vrot.slane %v8329_v11, 5  ;;  %v8094_v8 = vld [vmem:[#allocation2 + $0x7c] sm:$0xf] }
 0x26d   :  { %12650 = vmatmul.mubr.bf16.gmra.mrb[12].mxu1 %v17339_v12  ;;  %v8343_v12 = vshll.u32 %v8091_v9, 16  ;;  %13013 = vmatprep.mubr.bf16.mxu0 %v13829_v30  ;;  %v3807_v26 = vrot.slane %v3805_v45, 4  ;;  %v16137_v37 = vsel %vm14956_vm14, %v11094_v33, %v3805_v45  ;;  %v8092_v30 = vld [vmem:[#allocation2 + $0x74] sm:$0x1]  ;;  %v8336_v13 = vrot.slane %v8334_v41, 4  ;;  %v13832_v43 = vld [vmem:[#allocation2 + $0x198] sm:$0xff]  }
 0x26e   :  { %12653 = vmatprep.mubr.bf16.mxu1 %v17340_v31  ;;  %12714 = vmatpush3.bf16.msra.mxu1 %v13838_v54  ;;  %v8347_v31 = vshrl.u32 %v8091_v9, 16  ;;  %v16120_v54 = vcombine.low %v8274_v48, %v8284_v28  ;;  %v16133_v9 = vsel %vm14956_vm14, %v3800_v0, %v3801_v46  ;;  %v8093_v48 = vld [vmem:[#allocation2 + $0x78] sm:$0xf]  ;;  %v8339_v20 = vrot.slane %v8337_v63, 5  ;;  %v8102_v0 = vld [vmem:[#allocation2 + $0x9c] sm:$0xf] }
 0x26f   :  { %12715 = vmatprep.subr.bf16.mxu1 %v13840_v57  ;;  %v3812_v7 = vrot.slane %v17342_v34, 5  ;;  %v17343_v21 = vcombine.low %v15835_v16, %v15842_v22  ;;  %v8317_v46 = vrot.slane %v8316_v24, 4  ;;  %v8327_v33 = vrot.slane %v8326_v14, 4  ;;  %v3567_v28 = vld [vmem:[#allocation2 + $0x138] sm:$0xe] }
 0x270   :  { %v16146_v18 = vrot.slane %v8343_v12, 5  ;;  %v8349_v45 = vrot.slane %v8347_v31, 4  ;;  %v17344_v3 = vcombine.low %v15861_v25, %v15865_v17  ;;  %v16155_v11 = vsel %vm14956_vm14, %v3807_v26, %v3808_v50  ;;  %v8096_v12 = vld [vmem:[#allocation2 + $0x84] sm:$0xf]  ;;  %v14003_v17 = vld [vmem:[#allocation2 + $0x140] sm:$0x1] }
 0x271   :  { %17345 = vst [vmem:[#allocation5_spill] sm:$0xff] %v16155_v11  ;;  %v8358_v16 = vshrl.u32 %v8093_v48, 16  ;;  %v8361_v22 = vshll.u32 %v8093_v48, 16  ;;  %v16157_v41 = vcombine.low %v8298_v42, %v8308_v59  ;;  %v8353_v63 = vshll.u32 %v8092_v30, 16  ;;  %v8097_v34 = vld [vmem:[#allocation2 + $0x88] sm:$0xf] }
 0x272   :  { %12716 = vmatpush3.bf16.msra.mxu1 %v13840_v57  ;;  %v14002_v57 = vld [vmem:[%s17261_s3 + $0x100] sm:$0xff]   ;;  %v8367_v24 = vshll.u32 %v8094_v8, 16  ;;  %v8371_v14 = vshrl.u32 %v8094_v8, 16  ;;  %v8340_v31 = vor.u32 %v8339_v20, %v8336_v13  ;;  %v11095_v36 = vrot.slane %v3567_v28, 9 }
 0x273   :  { %13181 = vmatprep.subr.bf16.mxu1 %v14002_v57  ;;  %v3814_v25 = vrot.slane %v3812_v7, 4  ;;  %v3815_v57 = vrot.slane %v14003_v17, 5  ;;  %v8322_v26 = vsel %vm14254_vm9, %v8317_v46, %v16109_v5  ;;  %v8332_v50 = vsel %vm14254_vm9, %v8327_v33, %v8331_v6  ;;  %v3568_v59 = vld [vmem:[#allocation2 + $0x144] sm:$0xe]  ;;  %v8095_v8 = vld [vmem:[#allocation2 + $0x80] sm:$0x1] }
 0x274   :  { %13014 = vmatmul.mubr.bf16.gmra.mrb[56].mxu0 %v13831_v53  ;;  %v8350_v42 = vor.u32 %v8349_v45, %v16146_v18  ;;  %v8360_v30 = vrot.slane %v8358_v16, 4  ;;  %v8363_v48 = vrot.slane %v8361_v22, 5  ;;  %v8382_v13 = vshrl.u32 %v8096_v12, 16  ;;  %v17348_v33 = vld [vmem:[#allocation16_spill] sm:$0xff] }
 0x275   :  { %12654 = vmatmul.mubr.bf16.gmra.mrb[16].mxu1 %v17343_v21  ;;  %13017 = vmatprep.mubr.bf16.mxu0 %v13832_v43  ;;  %v8385_v20 = vshll.u32 %v8096_v12, 16  ;;  %v16167_v53 = vrot.slane %v8367_v24, 5  ;;  %v8373_v28 = vrot.slane %v8371_v14, 4  ;;  %v8395_v17 = vshrl.u32 %v8097_v34, 16  ;;  %v13833_v43 = vld [vmem:[#allocation2 + $0x1a4] sm:$0xff]  }
 0x276   :  { %12657 = vmatprep.mubr.bf16.mxu1 %v17344_v3  ;;  %v8391_v3 = vshll.u32 %v8097_v34, 16  ;;  %v16169_v21 = vrot.slane %v8340_v31, 4  ;;  %v16171_v5 = vrot.slane %v8353_v63, 5  ;;  %v16175_v6 = vsel %vm14956_vm14, %v11095_v36, %v3812_v7  ;;  %v17350_v63 = vld [vmem:[#allocation13_spill] sm:$0xff]  ;;  %v8098_v12 = vld [vmem:[#allocation2 + $0x8c] sm:$0x1] }
 0x277   :  { %17346 = vst [vmem:[#allocation6_spill] sm:$0xff] %v16175_v6  ;;  %v16179_v46 = vsel %vm14956_vm14, %v3814_v25, %v3815_v57  ;;  %v17349_v45 = vcombine.low %v15869_v32, %v17348_v33  ;;  %v16184_v16 = vcombine.low %v8322_v26, %v8332_v50  ;;  %v16186_v22 = vrot.slane %v8350_v42, 4  ;;  %v8099_v34 = vld [vmem:[#allocation2 + $0x90] sm:$0xf]  ;;  %v8103_v6 = vld [vmem:[#allocation2 + $0xa0] sm:$0xf] }
 0x278   :  { %17347 = vst [vmem:[#allocation3_spill] sm:$0xff] %v16179_v46  ;;  %v11096_v24 = vrot.slane %v3568_v59, 9  ;;  %v3819_v14 = vrot.slane %v17350_v63, 5  ;;  %v17351_v7 = vcombine.low %v15883_v62, %v15892_v23  ;;  %v8364_v31 = vor.u32 %v8363_v48, %v8360_v30  ;;  %v14004_v62 = vld [vmem:[#allocation2 + $0x14c] sm:$0x1]  ;;  %v17353_v32 = vld [vmem:[#allocation15_spill] sm:$0xff] }
 0x279   :  { %v8377_v36 = vshll.u32 %v8095_v8, 16  ;;  %v8384_v25 = vrot.slane %v8382_v13, 4  ;;  %v8387_v57 = vrot.slane %v8385_v20, 5  ;;  %v8374_v26 = vor.u32 %v8373_v28, %v16167_v53  ;;  %v3569_v48 = vld [vmem:[#allocation2 + $0x150] sm:$0xe]  ;;  %v17352_v13 = vld [vmem:[#allocation14_spill] sm:$0xff] }
 0x27a   :  { %v16195_v50 = vrot.slane %v8391_v3, 5  ;;  %v8397_v42 = vrot.slane %v8395_v17, 4  ;;  %v3822_v23 = vrot.slane %v14004_v62, 5  ;;  %v8401_v30 = vshll.u32 %v8098_v12, 16  ;;  %v3570_v3 = vld [vmem:[#allocation2 + $0x15c] sm:$0xe] }
 0x27b   :  { %v3826_v20 = vrot.slane %v17352_v13, 5  ;;  %v16204_v8 = vsel %vm14956_vm14, %v11096_v24, %v3819_v14  ;;  %v3821_v28 = vrot.slane %v3819_v14, 4  ;;  %v8406_v33 = vshrl.u32 %v8099_v34, 16  ;;  %v8100_v62 = vld [vmem:[#allocation2 + $0x94] sm:$0xf] }
 0x27c   :  { %13018 = vmatmul.mubr.bf16.gmra.mrb[60].mxu0 %v13833_v43  ;;  %v8409_v17 = vshll.u32 %v8099_v34, 16  ;;  %v8365_v63 = vrot.slane %v8364_v31, 4  ;;  %v8379_v12 = vrot.slane %v8377_v36, 5  ;;  %v8375_v43 = vrot.slane %v8374_v26, 4  ;;  %v14005_v59 = vld [vmem:[#allocation2 + $0x158] sm:$0x1] }
 0x27d   :  { %12658 = vmatmul.mubr.bf16.gmra.mrb[20].mxu1 %v17349_v45  ;;  %13037 = vmatprep.mubr.bf16.mxu0 %v16031_v35  ;;  %v8356_v45 = vsel %vm14254_vm9, %v16186_v22, %v16171_v5  ;;  %v8398_v13 = vor.u32 %v8397_v42, %v16195_v50  ;;  %v11097_v24 = vrot.slane %v3569_v48, 9  ;;  %v3833_v14 = vrot.slane %v17353_v32, 5  ;;  %v14006_v42 = vld [vmem:[#allocation2 + $0x164] sm:$0x1] }
 0x27e   :  { %12661 = vmatprep.mubr.bf16.mxu1 %v17351_v7  ;;  %v8388_v7 = vor.u32 %v8387_v57, %v8384_v25  ;;  %v8403_v44 = vrot.slane %v8401_v30, 5  ;;  %v3828_v34 = vrot.slane %v3826_v20, 4  ;;  %v3829_v35 = vrot.slane %v14005_v59, 5  ;;  %v17355_v57 = vld [vmem:[#allocation17_spill] sm:$0xff]  ;;  %v13837_v59 = vld [vmem:[%s17261_s3 + $0x208] sm:$0xff]  }
 0x27f   :  { %v11098_v46 = vrot.slane %v3570_v3, 9  ;;  %v17354_v5 = vcombine.low %v15896_v47, %v15901_v52  ;;  %v8408_v22 = vrot.slane %v8406_v33, 4  ;;  %v8411_v31 = vrot.slane %v8409_v17, 5 }
 0x280   :  { %v8415_v36 = vshll.u32 %v8100_v62, 16  ;;  %v8419_v25 = vshrl.u32 %v8100_v62, 16  ;;  %v17356_v26 = vcombine.low %v15905_v40, %v17355_v57  ;;  %v8389_v32 = vrot.slane %v8388_v7, 4  ;;  %v8101_v62 = vld [vmem:[#allocation2 + $0x98] sm:$0x1] }
 0x281   :  { %v3836_v30 = vrot.slane %v14006_v42, 5  ;;  %v8430_v48 = vshrl.u32 %v8102_v0, 16  ;;  %v8433_v11 = vshll.u32 %v8102_v0, 16  ;;  %v8399_v3 = vrot.slane %v8398_v13, 4  ;;  %v17361_v42 = vld [vmem:[#allocation20_spill] sm:$0xff] }
 0x282   :  { %v3835_v47 = vrot.slane %v3833_v14, 4  ;;  %v8439_v52 = vshll.u32 %v8103_v6, 16  ;;  %v8443_v33 = vshrl.u32 %v8103_v6, 16  ;;  %v16224_v17 = vsel %vm14956_vm14, %v3821_v28, %v3822_v23 }
 0x283   :  { %v8370_v40 = vsel %vm14254_vm9, %v8365_v63, %v16167_v53  ;;  %v8380_v7 = vsel %vm14254_vm9, %v8375_v43, %v8379_v12  ;;  %v16233_v0 = vsel %vm14956_vm14, %v11097_v24, %v3826_v20  ;;  %v16238_v6 = vsel %vm14956_vm14, %v3828_v34, %v3829_v35  ;;  %v14007_v53 = vld [vmem:[%s17261_s3 + $0x200] sm:$0xff]   ;;  %v13839_v24 = vld [vmem:[%s17261_s3 + $0x210] sm:$0xff]  }
 0x284   :  { %13038 = vmatmul.mubr.bf16.vlgmr.msra.gmra.mrb[0].mxu0 %v16036_v38  ;;  %v8412_v23 = vor.u32 %v8411_v31, %v8408_v22  ;;  %v16240_v28 = vrot.slane %v8415_v36, 5  ;;  %v8421_v13 = vrot.slane %v8419_v25, 4  ;;  %v8394_v38 = vsel %vm14254_vm9, %v8389_v32, %v16195_v50  ;;  %v8104_v63 = vld [vmem:[#allocation2 + $0xa4] sm:$0x1]  ;;  %v8105_v22 = vld [vmem:[#allocation2 + $0xa8] sm:$0xf] }
 0x285   :  { %12662 = vmatmul.mubr.bf16.gmra.mrb[24].mxu1 %v17354_v5  ;;  %13102 = vmatpush3.bf16.msra.mxu0 %v14007_v53  ;;  %v16251_v20 = vsel %vm14956_vm14, %v11098_v46, %v3833_v14  ;;  %v8432_v12 = vrot.slane %v8430_v48, 4  ;;  %v8435_v43 = vrot.slane %v8433_v11, 5  ;;  %v8404_v34 = vsel %vm14254_vm9, %v8399_v3, %v8403_v44  ;;  %v17358_v31 = vld [vmem:[#allocation18_spill] sm:$0xff]  ;;  %v17360_v32 = vld [vmem:[#allocation19_spill] sm:$0xff] }
 0x286   :  { %12665 = vmatprep.mubr.bf16.mxu1 %v17356_v26  ;;  %13041 = vmatprep.mubr.bf16.mxu0 %v16059_v15  ;;  %v16260_v15 = vsel %vm14956_vm14, %v3835_v47, %v3836_v30  ;;  %v16262_v50 = vrot.slane %v8439_v52, 5  ;;  %v8445_v35 = vrot.slane %v8443_v33, 4  ;;  %v17357_v11 = vsel %vm14254_vm9, %v16169_v21, %v16146_v18  ;;  %v8106_v26 = vld [vmem:[#allocation2 + $0xac] sm:$0xf] }
 0x287   :  { %13103 = vmatprep.subr.bf16.mxu0 %v13837_v59  ;;  %v16269_v46 = vcombine.low %v17357_v11, %v8356_v45  ;;  %v11144_v14 = vcombine.low %v16204_v8, %v16224_v17  ;;  %v16273_v5 = vcombine.low %v8370_v40, %v8380_v7  ;;  %v8425_v44 = vshll.u32 %v8101_v62, 16  ;;  %v3571_v45 = vld [vmem:[#allocation2 + $0x168] sm:$0xe]  ;;  %v14008_v47 = vld [vmem:[#allocation2 + $0x16c] sm:$0xf] }
 0x288   :  { %v17359_v36 = vcombine.low %v15913_v4, %v17358_v31  ;;  %v11145_v25 = vcombine.low %v16233_v0, %v16238_v6  ;;  %v16280_v57 = vrot.slane %v8412_v23, 4  ;;  %v8422_v18 = vor.u32 %v8421_v13, %v16240_v28  ;;  %v3572_v40 = vld [vmem:[#allocation2 + $0x174] sm:$0xe]  ;;  %v14009_v7 = vld [vmem:[#allocation2 + $0x178] sm:$0xf] }
 0x289   :  { %v8449_v21 = vshll.u32 %v8104_v63, 16  ;;  %v17362_v30 = vcombine.low %v17360_v32, %v17361_v42  ;;  %13104 = vmatpush3.bf16.msra.mxu0 %v13837_v59  ;;  %v16286_v48 = vcombine.low %v8394_v38, %v8404_v34  ;;  %v8436_v3 = vor.u32 %v8435_v43, %v8432_v12  ;;  %v13841_v59 = vld [vmem:[%s17261_s3 + $0x218] sm:$0xff]   ;;  %v14010_v11 = vld [vmem:[#allocation2 + $0x170] sm:$0x1]  ;;  %v8108_v31 = vld [vmem:[#allocation2 + $0xb4] sm:$0xf] }
 0x28a   :  { %v3840_v52 = vrot.slane %v14008_v47, 5  ;;  %13105 = vmatprep.subr.bf16.mxu0 %v13839_v24  ;;  %v8446_v33 = vor.u32 %v8445_v35, %v16262_v50  ;;  %v3847_v62 = vrot.slane %v14009_v7, 5  ;;  %v8454_v23 = vshrl.u32 %v8105_v22, 16  ;;  %v14011_v32 = vld [vmem:[#allocation2 + $0x17c] sm:$0x1] }
 0x28b   :  { %v8457_v13 = vshll.u32 %v8105_v22, 16  ;;  %v16294_v53 = vrot.slane %v8425_v44, 5  ;;  %v11099_v38 = vrot.slane %v3571_v45, 9  ;;  %v8463_v63 = vshll.u32 %v8106_v26, 16  ;;  %v8109_v42 = vld [vmem:[#allocation2 + $0xb8] sm:$0xf] }
 0x28c   :  { %v8467_v34 = vshrl.u32 %v8106_v26, 16  ;;  %13042 = vmatmul.mubr.bf16.gmra.mrb[4].mxu0 %v16097_v58  ;;  %v8418_v12 = vsel %vm14254_vm9, %v16280_v57, %v16240_v28  ;;  %v8423_v43 = vrot.slane %v8422_v18, 4  ;;  %v8451_v35 = vrot.slane %v8449_v21, 5  ;;  %v13844_v28 = vld [vmem:[%s17261_s3 + $0x220] sm:$0xff]   ;;  %v8107_v57 = vld [vmem:[#allocation2 + $0xb0] sm:$0x1] }
 0x28d   :  { %12666 = vmatmul.mubr.bf16.gmra.mrb[28].mxu1 %v17359_v36  ;;  %v3843_v22 = vrot.slane %v14010_v11, 5  ;;  %13045 = vmatprep.mubr.bf16.mxu0 %v16120_v54  ;;  %v8437_v44 = vrot.slane %v8436_v3, 4  ;;  %v3842_v36 = vrot.slane %v3840_v52, 4  ;;  %v11100_v45 = vrot.slane %v3572_v40, 9  ;;  %v8132_v0 = vld [vmem:[#allocation2 + $0x12c] sm:$0xf] }
 0x28e   :  { %12669 = vmatprep.mubr.bf16.mxu1 %v17362_v30  ;;  %13106 = vmatpush3.bf16.msra.mxu0 %v13839_v24  ;;  %v3850_v26 = vrot.slane %v14011_v32, 5  ;;  %v8447_v58 = vrot.slane %v8446_v33, 4  ;;  %v3849_v30 = vrot.slane %v3847_v62, 4  ;;  %v8456_v47 = vrot.slane %v8454_v23, 4  ;;  %v8110_v23 = vld [vmem:[#allocation2 + $0xbc] sm:$0x1] }
 0x28f   :  { %v8459_v7 = vrot.slane %v8457_v13, 5  ;;  %13107 = vmatprep.subr.bf16.mxu0 %v13841_v59  ;;  %v16305_v18 = vrot.slane %v8463_v63, 5  ;;  %v8469_v54 = vrot.slane %v8467_v34, 4  ;;  %v8478_v24 = vshrl.u32 %v8108_v31, 16  ;;  %v17364_v63 = vld [vmem:[#allocation10_spill] sm:$0xff]  ;;  %v17365_v32 = vld [vmem:[#allocation9_spill] sm:$0xff] }
 0x290   :  { %v8481_v21 = vshll.u32 %v8108_v31, 16  ;;  %v17363_v3 = vcombine.low %v15950_v56, %v15983_v55  ;;  %v8428_v33 = vsel %vm14254_vm9, %v8423_v43, %v16294_v53  ;;  %v16315_v40 = vsel %vm14956_vm14, %v11099_v38, %v3840_v52  ;;  %v3573_v38 = vld [vmem:[#allocation2 + $0x180] sm:$0xe]  ;;  %v8133_v6 = vld [vmem:[#allocation2 + $0x130] sm:$0xf] }
 0x291   :  { %v8487_v13 = vshll.u32 %v8109_v42, 16  ;;  %v8491_v11 = vshrl.u32 %v8109_v42, 16  ;;  %v17366_v34 = vor.u32 %v17364_v63, %v17365_v32  ;;  %v17367_v56 = vcombine.low %v15999_v51, %v16003_v1 }
 0x292   :  { %v8442_v55 = vsel %vm14254_vm9, %v8437_v44, %v16262_v50  ;;  %v16330_v52 = vsel %vm14956_vm14, %v3842_v36, %v3843_v22  ;;  %v16334_v53 = vsel %vm14956_vm14, %v11100_v45, %v3847_v62  ;;  %13108 = vmatpush3.bf16.msra.mxu0 %v13841_v59  ;;  %v8452_v43 = vsel %vm14254_vm9, %v8447_v58, %v8451_v35  ;;  %v8111_v50 = vld [vmem:[#allocation2 + $0xc0] sm:$0xf]  ;;  %v8112_v44 = vld [vmem:[#allocation2 + $0xc4] sm:$0xf]  ;;  %v13849_v22 = vld [vmem:[%s17261_s3 + $0x228] sm:$0xff]  }
 0x293   :  { %v16320_v4 = vrot.slane %v17366_v34, 4  ;;  %v16340_v51 = vsel %vm14956_vm14, %v3849_v30, %v3850_v26  ;;  %v8460_v1 = vor.u32 %v8459_v7, %v8456_v47  ;;  %v8473_v31 = vshll.u32 %v8107_v57, 16  ;;  %13109 = vmatprep.subr.bf16.mxu0 %v13844_v28  ;;  %v14012_v58 = vld [vmem:[#allocation2 + $0x184] sm:$0xf] }
 0x294   :  { %v8470_v62 = vor.u32 %v8469_v54, %v16305_v18  ;;  %v8480_v59 = vrot.slane %v8478_v24, 4  ;;  %v8483_v36 = vrot.slane %v8481_v21, 5  ;;  %v8497_v45 = vshll.u32 %v8110_v23, 16  ;;  %13046 = vmatmul.mubr.bf16.gmra.mrb[8].mxu0 %v16157_v41  ;;  %v13854_v21 = vld [vmem:[%s17261_s3 + $0x230] sm:$0xff]  }
 0x295   :  { %12670 = vmatmul.mubr.bf16.gmra.mrb[32].mxu1 %v17363_v3  ;;  %v16347_v35 = vrot.slane %v8487_v13, 5  ;;  %v8493_v26 = vrot.slane %v8491_v11, 4  ;;  %v11101_v42 = vrot.slane %v3573_v38, 9  ;;  %v3854_v30 = vrot.slane %v14012_v58, 5  ;;  %13049 = vmatprep.mubr.bf16.mxu0 %v16184_v16 }
 0x296   :  { %12673 = vmatprep.mubr.bf16.mxu1 %v17367_v56  ;;  %v8502_v47 = vshrl.u32 %v8111_v50, 16  ;;  %v8505_v7 = vshll.u32 %v8111_v50, 16  ;;  %v8511_v57 = vshll.u32 %v8112_v44, 16  ;;  %v8515_v3 = vshrl.u32 %v8112_v44, 16  ;;  %13110 = vmatpush3.bf16.msra.mxu0 %v13844_v28  ;;  %v17368_v28 = vld [vmem:[#allocation4_spill] sm:$0xff] }
 0x297   :  { %v16350_v63 = vcombine.low %v8418_v12, %v8428_v33  ;;  %v16352_v54 = vcombine.low %v8442_v55, %v8452_v43  ;;  %v8461_v24 = vrot.slane %v8460_v1, 4  ;;  %13111 = vmatprep.subr.bf16.mxu0 %v13849_v22  ;;  %v8471_v23 = vrot.slane %v8470_v62, 4  ;;  %v8114_v12 = vld [vmem:[#allocation2 + $0xcc] sm:$0xf]  ;;  %v8115_v1 = vld [vmem:[#allocation2 + $0xd0] sm:$0xf] }
 0x298   :  { %v8475_v13 = vrot.slane %v8473_v31, 5  ;;  %v16361_v11 = vrot.slane %v8497_v45, 5  ;;  %v17369_v33 = vcombine.low %v16007_v19, %v17368_v28  ;;  %v8484_v34 = vor.u32 %v8483_v36, %v8480_v59  ;;  %v16371_v43 = vld [vmem:[#allocation2 + $0x18c] sm:$0xe]  ;;  %v8113_v50 = vld [vmem:[#allocation2 + $0xc8] sm:$0x1] }
 0x299   :  { %v8494_v56 = vor.u32 %v8493_v26, %v16347_v35  ;;  %v16369_v55 = vsel %vm14956_vm14, %v11101_v42, %v3854_v30  ;;  %v3856_v38 = vrot.slane %v3854_v30, 4  ;;  %v17370_v31 = vcombine.low %v16063_v61, %v16072_v60  ;;  %v14013_v45 = vld [vmem:[#allocation2 + $0x188] sm:$0x1]  ;;  %v8117_v30 = vld [vmem:[#allocation2 + $0xf0] sm:$0xf]  ;;  %v13859_v61 = vld [vmem:[%s17261_s3 + $0x238] sm:$0xff]  }
 0x29a   :  { %v8504_v44 = vrot.slane %v8502_v47, 4  ;;  %v8507_v62 = vrot.slane %v8505_v7, 5  ;;  %v16376_v19 = vrot.slane %v8511_v57, 5  ;;  %v8517_v59 = vrot.slane %v8515_v3, 4  ;;  %13112 = vmatpush3.bf16.msra.mxu0 %v13849_v22  ;;  %v8118_v57 = vld [vmem:[#allocation2 + $0xf4] sm:$0xf] }
 0x29b   :  { %v8466_v36 = vsel %vm14254_vm9, %v8461_v24, %v16305_v18  ;;  %v3857_v26 = vrot.slane %v14013_v45, 5  ;;  %v8526_v42 = vshrl.u32 %v8114_v12, 16  ;;  %v8529_v58 = vshll.u32 %v8114_v12, 16  ;;  %13113 = vmatprep.subr.bf16.mxu0 %v13854_v21  ;;  %v14014_v24 = vld [vmem:[#allocation2 + $0x190] sm:$0xf] }
 0x29c   :  { %v8476_v60 = vsel %vm14254_vm9, %v8471_v23, %v8475_v13  ;;  %v11102_v47 = vrot.slane %v16371_v43, 9  ;;  %v8535_v22 = vshll.u32 %v8115_v1, 16  ;;  %v8539_v7 = vshrl.u32 %v8115_v1, 16  ;;  %13050 = vmatmul.mubr.bf16.gmra.mrb[12].mxu0 %v16269_v46 }
 0x29d   :  { %12674 = vmatmul.mubr.bf16.gmra.mrb[36].mxu1 %v17369_v33  ;;  %v8485_v18 = vrot.slane %v8484_v34, 4  ;;  %v8495_v3 = vrot.slane %v8494_v56, 4  ;;  %v3861_v12 = vrot.slane %v14014_v24, 5  ;;  %v8521_v28 = vshll.u32 %v8113_v50, 16  ;;  %13053 = vmatprep.mubr.bf16.mxu0 %v16273_v5  ;;  %v8120_v56 = vld [vmem:[#allocation2 + $0xfc] sm:$0xf] }
 0x29e   :  { %12677 = vmatprep.mubr.bf16.mxu1 %v17370_v31  ;;  %v8508_v33 = vor.u32 %v8507_v62, %v8504_v44  ;;  %v8518_v31 = vor.u32 %v8517_v59, %v16376_v19  ;;  %v8550_v45 = vshrl.u32 %v8117_v30, 16  ;;  %v8553_v16 = vshll.u32 %v8117_v30, 16  ;;  %13114 = vmatpush3.bf16.msra.mxu0 %v13854_v21  ;;  %v14015_v59 = vld [vmem:[#allocation2 + $0x194] sm:$0x1] }
 0x29f   :  { %v8528_v23 = vrot.slane %v8526_v42, 4  ;;  %v8531_v13 = vrot.slane %v8529_v58, 5  ;;  %v8559_v43 = vshll.u32 %v8118_v57, 16  ;;  %v8563_v1 = vshrl.u32 %v8118_v57, 16  ;;  %13115 = vmatprep.subr.bf16.mxu0 %v13859_v61 }
 0x2a0   :  { %v16390_v41 = vcombine.low %v8466_v36, %v8476_v60  ;;  %v16394_v46 = vsel %vm14956_vm14, %v3856_v38, %v3857_v26  ;;  %v16396_v34 = vrot.slane %v8535_v22, 5  ;;  %v8541_v5 = vrot.slane %v8539_v7, 4  ;;  %v8119_v36 = vld [vmem:[#allocation2 + $0xf8] sm:$0x1]  ;;  %v8121_v26 = vld [vmem:[#allocation2 + $0x100] sm:$0xf] }
 0x2a1   :  { %v17371_v50 = vcombine.low %v16090_v10, %v16101_v27  ;;  %v8490_v21 = vsel %vm14254_vm9, %v8485_v18, %v16347_v35  ;;  %v8500_v44 = vsel %vm14254_vm9, %v8495_v3, %v16361_v11  ;;  %v3863_v62 = vrot.slane %v3861_v12, 4  ;;  %v617_v60 = vld [vmem:[#allocation2 + $0x1ac] sm:$0x1]  ;;  %v8116_v22 = vld [vmem:[#allocation2 + $0xd4] sm:$0x1] }
 0x2a2   :  { %v3864_v38 = vrot.slane %v14015_v59, 5  ;;  %v17372_v42 = vcombine.low %v16124_v39, %v16133_v9  ;;  %v8509_v58 = vrot.slane %v8508_v33, 4  ;;  %v8523_v10 = vrot.slane %v8521_v28, 5  ;;  %13116 = vmatpush3.bf16.msra.mxu0 %v13859_v61 }
 0x2a3   :  { %v8552_v27 = vrot.slane %v8550_v45, 4  ;;  %v8555_v30 = vrot.slane %v8553_v16, 5  ;;  %v8519_v35 = vrot.slane %v8518_v31, 4  ;;  %v8532_v7 = vor.u32 %v8531_v13, %v8528_v23  ;;  %v8122_v23 = vld [vmem:[#allocation2 + $0x104] sm:$0x1] }
 0x2a4   :  { %v16410_v57 = vrot.slane %v8559_v43, 5  ;;  %v8565_v11 = vrot.slane %v8563_v1, 4  ;;  %v8542_v18 = vor.u32 %v8541_v5, %v16396_v34  ;;  %v8569_v3 = vshll.u32 %v8119_v36, 16  ;;  %13054 = vmatmul.mubr.bf16.gmra.mrb[16].mxu0 %v16286_v48  ;;  %v8123_v48 = vld [vmem:[#allocation2 + $0x108] sm:$0xf] }
 0x2a5   :  { %12678 = vmatmul.mubr.bf16.gmra.mrb[40].mxu1 %v17371_v50  ;;  %v8574_v24 = vshrl.u32 %v8120_v56, 16  ;;  %v8577_v50 = vshll.u32 %v8120_v56, 16  ;;  %v16416_v39 = vsel %vm14956_vm14, %v11102_v47, %v3861_v12  ;;  %v8583_v9 = vshll.u32 %v8121_v26, 16  ;;  %13057 = vmatprep.mubr.bf16.mxu0 %v16350_v63  ;;  %v8124_v13 = vld [vmem:[#allocation2 + $0x10c] sm:$0xf] }
 0x2a6   :  { %12681 = vmatprep.mubr.bf16.mxu1 %v17372_v42  ;;  %v8587_v16 = vshrl.u32 %v8121_v26, 16  ;;  %v618_v61 = vsel %vm14193_vm4, 0, %v617_v60  ;;  %v16421_v28 = vcombine.low %v8490_v21, %v8500_v44  ;;  %v16425_v33 = vsel %vm14956_vm14, %v3863_v62, %v3864_v38  ;;  %v8126_v21 = vld [vmem:[#allocation2 + $0x114] sm:$0xf]  ;;  %v17373_v44 = vld [vmem:[#allocation5_spill] sm:$0xff]  ;;  %v17375_v42 = vld [vmem:[#allocation6_spill] sm:$0xff] }
 0x2a7   :  { %v8545_v31 = vshll.u32 %v8116_v22, 16  ;;  %v8556_v45 = vor.u32 %v8555_v30, %v8552_v27  ;;  %619 = vst [vmem:[#allocation2 + $0x1ac] sm:$0x1] %v618_v61  ;;  %v8514_v47 = vsel %vm14254_vm9, %v8509_v58, %v16376_v19  ;;  %v8524_v49 = vsel %vm14254_vm9, %v8519_v35, %v8523_v10  ;;  %v8127_v26 = vld [vmem:[#allocation2 + $0x118] sm:$0xf]  ;;  %v17376_v58 = vld [vmem:[#allocation3_spill] sm:$0xff] }
 0x2a8   :  { %v16432_v12 = vrot.slane %v8532_v7, 4  ;;  %v8566_v63 = vor.u32 %v8565_v11, %v16410_v57  ;;  %v8543_v43 = vrot.slane %v8542_v18, 4  ;;  %v8571_v1 = vrot.slane %v8569_v3, 5 }
 0x2a9   :  { %v8576_v5 = vrot.slane %v8574_v24, 4  ;;  %v8579_v56 = vrot.slane %v8577_v50, 5  ;;  %v17374_v62 = vcombine.low %v16137_v37, %v17373_v44  ;;  %v16438_v59 = vrot.slane %v8583_v9, 5 }
 0x2aa   :  { %v8589_v19 = vrot.slane %v8587_v16, 4  ;;  %v8598_v38 = vshrl.u32 %v8123_v48, 16  ;;  %v8601_v36 = vshll.u32 %v8123_v48, 16  ;;  %v17377_v10 = vcombine.low %v17375_v42, %v17376_v58 }
 0x2ab   :  { %v8547_v27 = vrot.slane %v8545_v31, 5  ;;  %v8557_v30 = vrot.slane %v8556_v45, 4  ;;  %v8607_v60 = vshll.u32 %v8124_v13, 16  ;;  %v8611_v35 = vshrl.u32 %v8124_v13, 16  ;;  %v8129_v45 = vld [vmem:[#allocation2 + $0x120] sm:$0xf] }
 0x2ac   :  { %v8567_v22 = vrot.slane %v8566_v63, 4  ;;  %v8593_v7 = vshll.u32 %v8122_v23, 16  ;;  %v8622_v11 = vshrl.u32 %v8126_v21, 16  ;;  %v8625_v18 = vshll.u32 %v8126_v21, 16  ;;  %13058 = vmatmul.mubr.bf16.gmra.mrb[20].mxu0 %v16352_v54  ;;  %v8128_v54 = vld [vmem:[#allocation2 + $0x11c] sm:$0x1] }
 0x2ad   :  { %12682 = vmatmul.mubr.bf16.gmra.mrb[44].mxu1 %v17374_v62  ;;  %v11445_v37 = vcombine.low %v8514_v47, %v8524_v49  ;;  %v8538_v3 = vsel %vm14254_vm9, %v16432_v12, %v16396_v34  ;;  %v8631_v24 = vshll.u32 %v8127_v26, 16  ;;  %v8635_v50 = vshrl.u32 %v8127_v26, 16  ;;  %13061 = vmatprep.mubr.bf16.mxu0 %v16390_v41  ;;  %v8125_v34 = vld [vmem:[#allocation2 + $0x110] sm:$0x1] }
 0x2ae   :  { %12685 = vmatprep.mubr.bf16.mxu1 %v17377_v10  ;;  %v8580_v9 = vor.u32 %v8579_v56, %v8576_v5  ;;  %v8590_v16 = vor.u32 %v8589_v19, %v16438_v59  ;;  %v8600_v61 = vrot.slane %v8598_v38, 4  ;;  %v8603_v31 = vrot.slane %v8601_v36, 5  ;;  %v8130_v56 = vld [vmem:[#allocation2 + $0x124] sm:$0xf] }
 0x2af   :  { %v8548_v48 = vsel %vm14254_vm9, %v8543_v43, %v8547_v27  ;;  %v8562_v47 = vsel %vm14254_vm9, %v8557_v30, %v16410_v57  ;;  %v16455_v49 = vrot.slane %v8607_v60, 5  ;;  %v8613_v12 = vrot.slane %v8611_v35, 4 }
 0x2b0   :  { %v8572_v63 = vsel %vm14254_vm9, %v8567_v22, %v8571_v1  ;;  %v8595_v23 = vrot.slane %v8593_v7, 5  ;;  %v8624_v13 = vrot.slane %v8622_v11, 4  ;;  %v8627_v5 = vrot.slane %v8625_v18, 5  ;;  %v8131_v11 = vld [vmem:[#allocation2 + $0x128] sm:$0x1] }
 0x2b1   :  { %v16459_v41 = vrot.slane %v8631_v24, 5  ;;  %v8637_v21 = vrot.slane %v8635_v50, 4  ;;  %v8646_v43 = vshrl.u32 %v8129_v45, 16  ;;  %v8649_v44 = vshll.u32 %v8129_v45, 16  ;;  %v8135_v18 = vld [vmem:[#allocation2 + $0x138] sm:$0xf] }
 0x2b2   :  { %v8581_v57 = vrot.slane %v8580_v9, 4  ;;  %v8591_v62 = vrot.slane %v8590_v16, 4  ;;  %v8604_v19 = vor.u32 %v8603_v31, %v8600_v61  ;;  %v8617_v38 = vshll.u32 %v8125_v34, 16  ;;  %v8136_v16 = vld [vmem:[#allocation2 + $0x13c] sm:$0xf] }
 0x2b3   :  { %v8614_v1 = vor.u32 %v8613_v12, %v16455_v49  ;;  %v8641_v36 = vshll.u32 %v8128_v54, 16  ;;  %v8655_v26 = vshll.u32 %v8130_v56, 16  ;;  %v8659_v42 = vshrl.u32 %v8130_v56, 16 }
 0x2b4   :  { %v11149_v58 = vcombine.low %v16369_v55, %v16394_v46  ;;  %v11150_v8 = vcombine.low %v16416_v39, %v16425_v33  ;;  %v11446_v17 = vcombine.low %v8538_v3, %v8548_v48  ;;  %v8628_v10 = vor.u32 %v8627_v5, %v8624_v13  ;;  %13062 = vmatmul.mubr.bf16.gmra.mrb[24].mxu0 %v16421_v28 }
 0x2b5   :  { %12686 = vmatmul.mubr.bf16.gmra.mrb[48].mxu1 %v11144_v14  ;;  %v11447_v14 = vcombine.low %v8562_v47, %v8572_v63  ;;  %v8638_v27 = vor.u32 %v8637_v21, %v16459_v41  ;;  %v8648_v30 = vrot.slane %v8646_v43, 4  ;;  %v8651_v60 = vrot.slane %v8649_v44, 5  ;;  %13065 = vmatprep.mubr.bf16.mxu0 %v11445_v37 }
 0x2b6   :  { %12689 = vmatprep.mubr.bf16.mxu1 %v11145_v25  ;;  %v8586_v25 = vsel %vm14254_vm9, %v8581_v57, %v16438_v59  ;;  %v8596_v35 = vsel %vm14254_vm9, %v8591_v62, %v8595_v23  ;;  %v8605_v22 = vrot.slane %v8604_v19, 4  ;;  %v8619_v7 = vrot.slane %v8617_v38, 5  ;;  %v8138_v19 = vld [vmem:[#allocation2 + $0x144] sm:$0xf] }
 0x2b7   :  { %v8615_v3 = vrot.slane %v8614_v1, 4  ;;  %v8643_v24 = vrot.slane %v8641_v36, 5  ;;  %v16479_v50 = vrot.slane %v8655_v26, 5  ;;  %v8661_v9 = vrot.slane %v8659_v42, 4  ;;  %v8139_v1 = vld [vmem:[#allocation2 + $0x148] sm:$0xf] }
 0x2b8   :  { %v8670_v61 = vshrl.u32 %v8132_v0, 16  ;;  %v8673_v28 = vshll.u32 %v8132_v0, 16  ;;  %v8679_v31 = vshll.u32 %v8133_v6, 16  ;;  %v8683_v45 = vshrl.u32 %v8133_v6, 16  ;;  %v8137_v0 = vld [vmem:[#allocation2 + $0x140] sm:$0x1] }
 0x2b9   :  { %v8629_v48 = vrot.slane %v8628_v10, 4  ;;  %v8639_v59 = vrot.slane %v8638_v27, 4  ;;  %v8652_v47 = vor.u32 %v8651_v60, %v8648_v30  ;;  %v8665_v34 = vshll.u32 %v8131_v11, 16  ;;  %v8141_v27 = vld [vmem:[#allocation2 + $0x150] sm:$0xf] }
 0x2ba   :  { %v17378_v12 = vcombine.low %v16251_v20, %v16260_v15  ;;  %v8694_v54 = vshrl.u32 %v8135_v18, 16  ;;  %v8697_v37 = vshll.u32 %v8135_v18, 16  ;;  %v8703_v63 = vshll.u32 %v8136_v16, 16  ;;  %v8134_v20 = vld [vmem:[#allocation2 + $0x134] sm:$0x1] }
 0x2bb   :  { %v8707_v23 = vshrl.u32 %v8136_v16, 16  ;;  %v17379_v13 = vcombine.low %v16315_v40, %v16330_v52  ;;  %v11448_v5 = vcombine.low %v8586_v25, %v8596_v35  ;;  %v8610_v56 = vsel %vm14254_vm9, %v8605_v22, %v16455_v49 }
 0x2bc   :  { %v8620_v21 = vsel %vm14254_vm9, %v8615_v3, %v8619_v7  ;;  %v8662_v43 = vor.u32 %v8661_v9, %v16479_v50  ;;  %v8672_v15 = vrot.slane %v8670_v61, 4  ;;  %v8675_v44 = vrot.slane %v8673_v28, 5  ;;  %13066 = vmatmul.mubr.bf16.gmra.mrb[28].mxu0 %v11446_v17  ;;  %v8140_v28 = vld [vmem:[#allocation2 + $0x14c] sm:$0x1] }
 0x2bd   :  { %12690 = vmatmul.mubr.bf16.gmra.mrb[52].mxu1 %v17378_v12  ;;  %v16493_v57 = vrot.slane %v8679_v31, 5  ;;  %v8685_v62 = vrot.slane %v8683_v45, 4  ;;  %v8634_v40 = vsel %vm14254_vm9, %v8629_v48, %v16459_v41  ;;  %v8644_v52 = vsel %vm14254_vm9, %v8639_v59, %v8643_v24  ;;  %13069 = vmatprep.mubr.bf16.mxu0 %v11447_v14  ;;  %v8142_v31 = vld [vmem:[#allocation2 + $0x154] sm:$0xf]  ;;  %v8144_v59 = vld [vmem:[#allocation2 + $0x15c] sm:$0xf] }
 0x2be   :  { %12693 = vmatprep.mubr.bf16.mxu1 %v17379_v13  ;;  %v8653_v49 = vrot.slane %v8652_v47, 4  ;;  %v8667_v38 = vrot.slane %v8665_v34, 5  ;;  %v8696_v36 = vrot.slane %v8694_v54, 4  ;;  %v8699_v26 = vrot.slane %v8697_v37, 5  ;;  %v8145_v54 = vld [vmem:[#allocation2 + $0x160] sm:$0xf] }
 0x2bf   :  { %v16500_v42 = vrot.slane %v8703_v63, 5  ;;  %v8709_v10 = vrot.slane %v8707_v23, 4  ;;  %v8663_v30 = vrot.slane %v8662_v43, 4  ;;  %v8689_v60 = vshll.u32 %v8134_v20, 16  ;;  %v13842_v43 = vld [vmem:[#allocation2 + $0xc] sm:$0xff]  }
 0x2c0   :  { %v8718_v6 = vshrl.u32 %v8138_v19, 16  ;;  %v8721_v25 = vshll.u32 %v8138_v19, 16  ;;  %v8676_v41 = vor.u32 %v8675_v44, %v8672_v15  ;;  %v8686_v35 = vor.u32 %v8685_v62, %v16493_v57 }
 0x2c1   :  { %v8727_v22 = vshll.u32 %v8139_v1, 16  ;;  %v8731_v7 = vshrl.u32 %v8139_v1, 16  ;;  %v11449_v11 = vcombine.low %v8610_v56, %v8620_v21  ;;  %v16503_v18 = vcombine.low %v8634_v40, %v8644_v52  ;;  %v5137_v21 = vld [vmem:[#allocation2 + $0xf0] sm:$0xf] }
 0x2c2   :  { %v8742_v17 = vshrl.u32 %v8141_v27, 16  ;;  %v8745_v3 = vshll.u32 %v8141_v27, 16  ;;  %v17380_v24 = vcombine.low %v16334_v53, %v16340_v51  ;;  %v8658_v14 = vsel %vm14254_vm9, %v8653_v49, %v16479_v50 }
 0x2c3   :  { %v8700_v9 = vor.u32 %v8699_v26, %v8696_v36  ;;  %v8710_v16 = vor.u32 %v8709_v10, %v16500_v42  ;;  %v8713_v61 = vshll.u32 %v8137_v0, 16  ;;  %v8668_v45 = vsel %vm14254_vm9, %v8663_v30, %v8667_v38  ;;  %v8143_v30 = vld [vmem:[#allocation2 + $0x158] sm:$0x1] }
 0x2c4   :  { %v16517_v48 = vrot.slane %v8689_v60, 5  ;;  %v8720_v53 = vrot.slane %v8718_v6, 4  ;;  %v8723_v51 = vrot.slane %v8721_v25, 5  ;;  %v8677_v47 = vrot.slane %v8676_v41, 4  ;;  %13070 = vmatmul.mubr.bf16.gmra.mrb[32].mxu0 %v11448_v5  ;;  %v8146_v60 = vld [vmem:[#allocation2 + $0x164] sm:$0x1] }
 0x2c5   :  { %12694 = vmatmul.mubr.bf16.gmra.mrb[56].mxu1 %v17380_v24  ;;  %v8687_v50 = vrot.slane %v8686_v35, 4  ;;  %v16519_v34 = vrot.slane %v8727_v22, 5  ;;  %v8733_v12 = vrot.slane %v8731_v7, 4  ;;  %v8744_v37 = vrot.slane %v8742_v17, 4  ;;  %13073 = vmatprep.mubr.bf16.mxu0 %v11449_v11  ;;  %v8147_v6 = vld [vmem:[#allocation2 + $0x168] sm:$0xf] }
 0x2c6   :  { %12697 = vmatprep.mubr.bf16.mxu1 %v11149_v58  ;;  %v8747_v63 = vrot.slane %v8745_v3, 5  ;;  %v8751_v23 = vshll.u32 %v8142_v31, 16  ;;  %v8755_v13 = vshrl.u32 %v8142_v31, 16  ;;  %v8701_v55 = vrot.slane %v8700_v9, 4  ;;  %v8148_v41 = vld [vmem:[#allocation2 + $0x16c] sm:$0xf] }
 0x2c7   :  { %v8711_v46 = vrot.slane %v8710_v16, 4  ;;  %v8715_v58 = vrot.slane %v8713_v61, 5  ;;  %v8737_v56 = vshll.u32 %v8140_v28, 16  ;;  %v8724_v20 = vor.u32 %v8723_v51, %v8720_v53  ;;  %v13845_v31 = vld [vmem:[#allocation2 + $0x24] sm:$0xff]  }
 0x2c8   :  { %v8766_v15 = vshrl.u32 %v8144_v59, 16  ;;  %v8769_v44 = vshll.u32 %v8144_v59, 16  ;;  %v8775_v62 = vshll.u32 %v8145_v54, 16  ;;  %v11451_v19 = vcombine.low %v8658_v14, %v8668_v45  ;;  %v13843_v14 = vld [vmem:[#allocation2 + $0x18] sm:$0xff]  }
 0x2c9   :  { %v8682_v40 = vsel %vm14254_vm9, %v8677_v47, %v16493_v57  ;;  %v8734_v52 = vor.u32 %v8733_v12, %v16519_v34  ;;  %v8779_v49 = vshrl.u32 %v8145_v54, 16  ;;  %v8748_v5 = vor.u32 %v8747_v63, %v8744_v37 }
 0x2ca   :  { %v16525_v38 = vrot.slane %v8751_v23, 5  ;;  %v8757_v1 = vrot.slane %v8755_v13, 4  ;;  %v5591_v36 = vshrl.u32 %v5137_v21, 16  ;;  %v8692_v26 = vsel %vm14254_vm9, %v8687_v50, %v16517_v48  ;;  %v8150_v50 = vld [vmem:[#allocation2 + $0x174] sm:$0xf] }
 0x2cb   :  { %v8706_v57 = vsel %vm14254_vm9, %v8701_v55, %v16500_v42  ;;  %v8716_v10 = vsel %vm14254_vm9, %v8711_v46, %v8715_v58  ;;  %v16538_v27 = vrot.slane %v8737_v56, 5  ;;  %v16540_v0 = vrot.slane %v8724_v20, 4  ;;  %v17381_v42 = vld [vmem:[#allocation12_spill] sm:$0xff]  ;;  %v8149_v23 = vld [vmem:[#allocation2 + $0x170] sm:$0x1] }
 0x2cc   :  { %v8768_v39 = vrot.slane %v8766_v15, 4  ;;  %v8771_v33 = vrot.slane %v8769_v44, 5  ;;  %v8781_v25 = vrot.slane %v8779_v49, 4  ;;  %v5593_v35 = vrot.slane %v5591_v36, 4  ;;  %13074 = vmatmul.mubr.bf16.gmra.mrb[36].mxu0 %v16503_v18  ;;  %v8151_v13 = vld [vmem:[#allocation2 + $0x178] sm:$0xf] }
 0x2cd   :  { %12698 = vmatmul.mubr.bf16.gmra.mrb[60].mxu1 %v11150_v8  ;;  %v16542_v8 = vrot.slane %v8775_v62, 5  ;;  %v5594_v22 = vshll.u32 %v5137_v21, 16  ;;  %v5613_v7 = vsel %vm14254_vm9, %v16320_v4, %v17381_v42  ;;  %v16548_v11 = vrot.slane %v8734_v52, 4  ;;  %13077 = vmatprep.mubr.bf16.mxu0 %v11451_v19  ;;  %v8153_v58 = vld [vmem:[#allocation2 + $0x180] sm:$0xf]  ;;  %v14017_v19 = vld [vmem:[%s17261_s3 + $0x108] sm:$0xff]  }
 0x2ce   :  { %12717 = vmatprep.mubr.bf16.mxu1 %v13842_v43  ;;  %v16550_v17 = vrot.slane %v8748_v5, 4  ;;  %v8758_v3 = vor.u32 %v8757_v1, %v16525_v38  ;;  %v8761_v24 = vshll.u32 %v8143_v30, 16  ;;  %v8785_v9 = vshll.u32 %v8146_v60, 16  ;;  %v14016_v21 = vld [vmem:[%s17261_s3 + $0x100] sm:$0xff]  }
 0x2cf   :  { %v8790_v16 = vshrl.u32 %v8147_v6, 16  ;;  %v8793_v61 = vshll.u32 %v8147_v6, 16  ;;  %v5596_v28 = vrot.slane %v5594_v22, 5  ;;  %v11452_v45 = vcombine.low %v8682_v40, %v8692_v26  ;;  %v8154_v62 = vld [vmem:[#allocation2 + $0x184] sm:$0xf] }
 0x2d0   :  { %v11453_v48 = vcombine.low %v8706_v57, %v8716_v10  ;;  %v8799_v53 = vshll.u32 %v8148_v41, 16  ;;  %v8803_v4 = vshrl.u32 %v8148_v41, 16  ;;  %v8730_v51 = vsel %vm14254_vm9, %v16540_v0, %v16519_v34  ;;  %v13846_v57 = vld [vmem:[#allocation2 + $0x30] sm:$0xff]   ;;  %v13847_v0 = vld [vmem:[#allocation2 + $0x3c] sm:$0xff]  }
 0x2d1   :  { %v8772_v59 = vor.u32 %v8771_v33, %v8768_v39  ;;  %v8782_v47 = vor.u32 %v8781_v25, %v16542_v8  ;;  %v5597_v18 = vor.u32 %v5596_v28, %v5593_v35  ;;  %v8740_v12 = vsel %vm14254_vm9, %v16548_v11, %v16538_v27  ;;  %v14018_v41 = vld [vmem:[%s17261_s3 + $0x110] sm:$0xff]   ;;  %v8152_v22 = vld [vmem:[#allocation2 + $0x17c] sm:$0x1] }
 0x2d2   :  { %v8754_v54 = vsel %vm14254_vm9, %v16550_v17, %v16525_v38  ;;  %v8759_v37 = vrot.slane %v8758_v3, 4  ;;  %v8763_v63 = vrot.slane %v8761_v24, 5  ;;  %v8787_v34 = vrot.slane %v8785_v9, 5  ;;  %v8156_v24 = vld [vmem:[#allocation2 + $0x18c] sm:$0xf] }
 0x2d3   :  { %v8792_v55 = vrot.slane %v8790_v16, 4  ;;  %v8795_v46 = vrot.slane %v8793_v61, 5  ;;  %v5598_v56 = vrot.slane %v5597_v18, 4  ;;  %v16570_v43 = vrot.slane %v8799_v53, 5  ;;  %v8155_v16 = vld [vmem:[#allocation2 + $0x188] sm:$0x1] }
 0x2d4   :  { %v8805_v20 = vrot.slane %v8803_v4, 4  ;;  %v8814_v15 = vshrl.u32 %v8150_v50, 16  ;;  %v8817_v44 = vshll.u32 %v8150_v50, 16  ;;  %v8773_v40 = vrot.slane %v8772_v59, 4  ;;  %13078 = vmatmul.mubr.bf16.gmra.mrb[40].mxu0 %v11452_v45  ;;  %v8157_v53 = vld [vmem:[#allocation2 + $0x190] sm:$0xf] }
 0x2d5   :  { %12718 = vmatmul.mubr.bf16.vlgmr.msra.gmra.mrb[0].mxu1 %v13843_v14  ;;  %v8783_v52 = vrot.slane %v8782_v47, 4  ;;  %v8823_v49 = vshll.u32 %v8151_v13, 16  ;;  %v5603_v5 = vsel %vm14254_vm9, %v5598_v56, %v17365_v32  ;;  %v8827_v38 = vshrl.u32 %v8151_v13, 16  ;;  %13081 = vmatprep.mubr.bf16.mxu0 %v11453_v48 }
 0x2d6   :  { %13189 = vmatpush3.bf16.msra.mxu1 %v14016_v21  ;;  %12721 = vmatprep.mubr.bf16.mxu1 %v13845_v31  ;;  %v8838_v1 = vshrl.u32 %v8153_v58, 16  ;;  %v8841_v36 = vshll.u32 %v8153_v58, 16  ;;  %v16578_v26 = vcombine.low %v5603_v5, %v5613_v7  ;;  %v8764_v10 = vsel %vm14254_vm9, %v8759_v37, %v8763_v63  ;;  %v13848_v37 = vld [vmem:[#allocation2 + $0x48] sm:$0xff]  }
 0x2d7   :  { %13182 = vmatprep.subr.bf16.mxu1 %v14017_v19  ;;  %v8809_v27 = vshll.u32 %v8149_v23, 16  ;;  %v8847_v30 = vshll.u32 %v8154_v62, 16  ;;  %v8851_v60 = vshrl.u32 %v8154_v62, 16  ;;  %v8796_v39 = vor.u32 %v8795_v46, %v8792_v55  ;;  %v13850_v55 = vld [vmem:[#allocation2 + $0x54] sm:$0xff]  }
 0x2d8   :  { %v8806_v33 = vor.u32 %v8805_v20, %v16570_v43  ;;  %v8816_v32 = vrot.slane %v8814_v15, 4  ;;  %v8819_v6 = vrot.slane %v8817_v44, 5  ;;  %v11454_v25 = vcombine.low %v8730_v51, %v8740_v12  ;;  %v14019_v51 = vld [vmem:[%s17261_s3 + $0x118] sm:$0xff]  }
 0x2d9   :  { %v8778_v35 = vsel %vm14254_vm9, %v8773_v40, %v16542_v8  ;;  %v16589_v42 = vrot.slane %v8823_v49, 5  ;;  %v8788_v7 = vsel %vm14254_vm9, %v8783_v52, %v8787_v34  ;;  %v8829_v11 = vrot.slane %v8827_v38, 4  ;;  %v8159_v12 = vld [vmem:[#allocation2 + $0x198] sm:$0xf]  ;;  %v8158_v38 = vld [vmem:[#allocation2 + $0x194] sm:$0x1] }
 0x2da   :  { %13190 = vmatpush3.bf16.msra.mxu1 %v14017_v19  ;;  %v8840_v17 = vrot.slane %v8838_v1, 4  ;;  %v8843_v3 = vrot.slane %v8841_v36, 5  ;;  %v11455_v14 = vcombine.low %v8754_v54, %v8764_v10  ;;  %v8811_v9 = vrot.slane %v8809_v27, 5  ;;  %v8160_v54 = vld [vmem:[#allocation2 + $0x19c] sm:$0xf]  ;;  %v14020_v19 = vld [vmem:[%s17261_s3 + $0x120] sm:$0xff]  }
 0x2db   :  { %13183 = vmatprep.subr.bf16.mxu1 %v14018_v41  ;;  %v16593_v61 = vrot.slane %v8847_v30, 5  ;;  %v8853_v28 = vrot.slane %v8851_v60, 4  ;;  %v8797_v8 = vrot.slane %v8796_v39, 4  ;;  %v8807_v31 = vrot.slane %v8806_v33, 4  ;;  %v8162_v27 = vld [vmem:[#allocation2 + $0x1a4] sm:$0xf] }
 0x2dc   :  { %v8820_v45 = vor.u32 %v8819_v6, %v8816_v32  ;;  %v8833_v48 = vshll.u32 %v8152_v22, 16  ;;  %v11456_v4 = vcombine.low %v8778_v35, %v8788_v7  ;;  %v8830_v59 = vor.u32 %v8829_v11, %v16589_v42  ;;  %13082 = vmatmul.mubr.bf16.gmra.mrb[44].mxu0 %v11454_v25  ;;  %v8163_v33 = vld [vmem:[#allocation2 + $0x1a8] sm:$0xf]  ;;  %v8161_v35 = vld [vmem:[#allocation2 + $0x1a0] sm:$0x1] }
 0x2dd   :  { %12722 = vmatmul.mubr.bf16.gmra.mrb[4].mxu1 %v13846_v57  ;;  %v8844_v47 = vor.u32 %v8843_v3, %v8840_v17  ;;  %v8857_v50 = vshll.u32 %v8155_v16, 16  ;;  %v8862_v18 = vshrl.u32 %v8156_v24, 16  ;;  %v8854_v63 = vor.u32 %v8853_v28, %v16593_v61  ;;  %13085 = vmatprep.mubr.bf16.mxu0 %v11455_v14  ;;  %v14021_v32 = vld [vmem:[%s17261_s3 + $0x128] sm:$0xff]   ;;  %v13851_v22 = vld [vmem:[#allocation2 + $0x60] sm:$0xff]  }
 0x2de   :  { %12725 = vmatprep.mubr.bf16.mxu1 %v13847_v0  ;;  %13191 = vmatpush3.bf16.msra.mxu1 %v14018_v41  ;;  %v8865_v23 = vshll.u32 %v8156_v24, 16  ;;  %v8871_v13 = vshll.u32 %v8157_v53, 16  ;;  %v8875_v34 = vshrl.u32 %v8157_v53, 16  ;;  %v8802_v46 = vsel %vm14254_vm9, %v8797_v8, %v16570_v43  ;;  %v13852_v24 = vld [vmem:[#allocation2 + $0x6c] sm:$0xff]  }
 0x2df   :  { %13184 = vmatprep.subr.bf16.mxu1 %v14019_v51  ;;  %v8812_v58 = vsel %vm14254_vm9, %v8807_v31, %v8811_v9  ;;  %v8821_v56 = vrot.slane %v8820_v45, 4  ;;  %v8835_v21 = vrot.slane %v8833_v48, 5  ;;  %v8886_v20 = vshrl.u32 %v8159_v12, 16 }
 0x2e0   :  { %v8889_v15 = vshll.u32 %v8159_v12, 16  ;;  %v8895_v44 = vshll.u32 %v8160_v54, 16  ;;  %v8899_v62 = vshrl.u32 %v8160_v54, 16  ;;  %v8831_v40 = vrot.slane %v8830_v59, 4 }
 0x2e1   :  { %v8845_v52 = vrot.slane %v8844_v47, 4  ;;  %v8859_v49 = vrot.slane %v8857_v50, 5  ;;  %v8864_v5 = vrot.slane %v8862_v18, 4  ;;  %v8855_v43 = vrot.slane %v8854_v63, 4  ;;  %v8164_v63 = vld [vmem:[#allocation2 + $0x1ac] sm:$0x1] }
 0x2e2   :  { %13192 = vmatpush3.bf16.msra.mxu1 %v14019_v51  ;;  %v8867_v1 = vrot.slane %v8865_v23, 5  ;;  %v16608_v36 = vrot.slane %v8871_v13, 5  ;;  %v8877_v57 = vrot.slane %v8875_v34, 4  ;;  %v11457_v10 = vcombine.low %v8802_v46, %v8812_v58  ;;  %v14023_v23 = vld [vmem:[%s17261_s3 + $0x138] sm:$0xff]  }
 0x2e3   :  { %13185 = vmatprep.subr.bf16.mxu1 %v14020_v19  ;;  %v8888_v30 = vrot.slane %v8886_v20, 4  ;;  %v8891_v60 = vrot.slane %v8889_v15, 5  ;;  %v16610_v0 = vrot.slane %v8895_v44, 5  ;;  %v8901_v39 = vrot.slane %v8899_v62, 4  ;;  %v13853_v13 = vld [vmem:[#allocation2 + $0x78] sm:$0xff]  }
 0x2e4   :  { %v8826_v6 = vsel %vm14254_vm9, %v8821_v56, %v16589_v42  ;;  %v8836_v25 = vsel %vm14254_vm9, %v8831_v40, %v8835_v21  ;;  %v8881_v41 = vshll.u32 %v8158_v38, 16  ;;  %13086 = vmatmul.mubr.bf16.gmra.mrb[48].mxu0 %v11456_v4  ;;  %v8850_v7 = vsel %vm14254_vm9, %v8845_v52, %v16593_v61  ;;  %v14022_v61 = vld [vmem:[%s17261_s3 + $0x130] sm:$0xff]   ;;  %v14024_v44 = vld [vmem:[#allocation2 + $0x1c] sm:$0xf] }
 0x2e5   :  { %12726 = vmatmul.mubr.bf16.gmra.mrb[8].mxu1 %v13848_v37  ;;  %v8860_v11 = vsel %vm14254_vm9, %v8855_v43, %v8859_v49  ;;  %v8868_v17 = vor.u32 %v8867_v1, %v8864_v5  ;;  %v8878_v3 = vor.u32 %v8877_v57, %v16608_v36  ;;  %13089 = vmatprep.mubr.bf16.mxu0 %v11457_v10  ;;  %v8910_v42 = vshrl.u32 %v8162_v27, 16  ;;  %v13856_v10 = vld [vmem:[#allocation2 + $0x90] sm:$0xff]  }
 0x2e6   :  { %12729 = vmatprep.mubr.bf16.mxu1 %v13850_v55  ;;  %13193 = vmatpush3.bf16.msra.mxu1 %v14020_v19  ;;  %v8913_v14 = vshll.u32 %v8162_v27, 16  ;;  %v8919_v9 = vshll.u32 %v8163_v33, 16  ;;  %v8923_v16 = vshrl.u32 %v8163_v33, 16  ;;  %v8892_v28 = vor.u32 %v8891_v60, %v8888_v30  ;;  %v13855_v55 = vld [vmem:[#allocation2 + $0x84] sm:$0xff]   ;;  %v9479_v19 = vld [vmem:[#allocation2 + $0x18] sm:$0xe] }
 0x2e7   :  { %13186 = vmatprep.subr.bf16.mxu1 %v14021_v32  ;;  %v8902_v8 = vor.u32 %v8901_v39, %v16610_v0  ;;  %v8905_v31 = vshll.u32 %v8161_v35, 16  ;;  %v11458_v45 = vcombine.low %v8826_v6, %v8836_v25  ;;  %v11459_v48 = vcombine.low %v8850_v7, %v8860_v11  ;;  %v13857_v27 = vld [vmem:[#allocation2 + $0x9c] sm:$0xff]   ;;  %v9480_v6 = vld [vmem:[#allocation2 + $0x24] sm:$0xe]  ;;  %v14027_v25 = vld [vmem:[#allocation2 + $0x34] sm:$0xf] }
 0x2e8   :  { %v8869_v53 = vrot.slane %v8868_v17, 4  ;;  %v8879_v4 = vrot.slane %v8878_v3, 4  ;;  %v8883_v51 = vrot.slane %v8881_v41, 5  ;;  %v8912_v59 = vrot.slane %v8910_v42, 4  ;;  %v9481_v35 = vld [vmem:[#allocation2 + $0x30] sm:$0xe] }
 0x2e9   :  { %v8915_v47 = vrot.slane %v8913_v14, 5  ;;  %v8921_v50 = vrot.slane %v8919_v9, 5  ;;  %v8925_v18 = vrot.slane %v8923_v16, 4  ;;  %v8893_v12 = vrot.slane %v8892_v28, 4  ;;  %v14028_v3 = vld [vmem:[#allocation2 + $0x2c] sm:$0x1] }
 0x2ea   :  { %13194 = vmatpush3.bf16.msra.mxu1 %v14021_v32  ;;  %v8903_v54 = vrot.slane %v8902_v8, 4  ;;  %v8907_v37 = vrot.slane %v8905_v31, 5  ;;  %v8874_v34 = vsel %vm14254_vm9, %v8869_v53, %v16608_v36  ;;  %v8884_v46 = vsel %vm14254_vm9, %v8879_v4, %v8883_v51  ;;  %v14025_v36 = vld [vmem:[#allocation2 + $0x20] sm:$0x1]  ;;  %v14029_v9 = vld [vmem:[#allocation2 + $0x38] sm:$0x1] }
 0x2eb   :  { %13187 = vmatprep.subr.bf16.mxu1 %v14022_v61  ;;  %v8916_v58 = vor.u32 %v8915_v47, %v8912_v59  ;;  %v8926_v56 = vor.u32 %v8925_v18, %v8921_v50  ;;  %v8929_v21 = vshll.u32 %v8164_v63, 16  ;;  %v8898_v20 = vsel %vm14254_vm9, %v8893_v12, %v16610_v0  ;;  %v14026_v0 = vld [vmem:[#allocation2 + $0x28] sm:$0xf]  ;;  %v14030_v8 = vld [vmem:[#allocation2 + $0x40] sm:$0xf] }
 0x2ec   :  { %13090 = vmatmul.mubr.bf16.gmra.mrb[52].mxu0 %v11458_v45  ;;  %v8908_v15 = vsel %vm14254_vm9, %v8903_v54, %v8907_v37  ;;  %v9609_v62 = vrot.slane %v14024_v44, 5  ;;  %v11460_v40 = vcombine.low %v8874_v34, %v8884_v46  ;;  %v11471_v38 = vrot.slane %v9479_v19, 9  ;;  %v13858_v28 = vld [vmem:[#allocation2 + $0xa8] sm:$0xff]   ;;  %v9482_v53 = vld [vmem:[#allocation2 + $0x3c] sm:$0xe] }
 0x2ed   :  { %12730 = vmatmul.mubr.bf16.gmra.mrb[12].mxu1 %v13851_v22  ;;  %13093 = vmatprep.mubr.bf16.mxu0 %v11459_v48  ;;  %v11461_v52 = vcombine.low %v8898_v20, %v8908_v15  ;;  %v8917_v49 = vrot.slane %v8916_v58, 4  ;;  %v8927_v5 = vrot.slane %v8926_v56, 4  ;;  %v8931_v43 = vrot.slane %v8929_v21, 5  ;;  %v14031_v59 = vld [vmem:[#allocation2 + $0x4c] sm:$0xf]  ;;  %v13861_v58 = vld [vmem:[#allocation2 + $0xc0] sm:$0xff]  }
 0x2ee   :  { %12733 = vmatprep.mubr.bf16.mxu1 %v13852_v24  ;;  %13195 = vmatpush3.bf16.msra.mxu1 %v14022_v61  ;;  %v9611_v1 = vrot.slane %v9609_v62, 4  ;;  %v9612_v57 = vrot.slane %v14025_v36, 5  ;;  %v9616_v39 = vrot.slane %v14026_v0, 5  ;;  %v9610_v33 = vsel %vm14956_vm14, %v11471_v38, %v9609_v62  ;;  %v13860_v61 = vld [vmem:[#allocation2 + $0xb4] sm:$0xff]   ;;  %v14032_v37 = vld [vmem:[#allocation2 + $0x44] sm:$0x1] }
 0x2ef   :  { %13188 = vmatprep.subr.bf16.mxu1 %v14023_v23  ;;  %v8922_v30 = vsel %vm14254_vm9, %v8917_v49, %v8921_v50  ;;  %v8932_v60 = vsel %vm14254_vm9, %v8927_v5, %v8931_v43  ;;  %v9623_v41 = vrot.slane %v14027_v25, 5  ;;  %v11472_v11 = vrot.slane %v9480_v6, 9  ;;  %v9483_v50 = vld [vmem:[#allocation2 + $0x48] sm:$0xe]  ;;  %v9484_v20 = vld [vmem:[#allocation2 + $0x54] sm:$0xe] }
 0x2f0   :  { %v9613_v32 = vsel %vm14956_vm14, %v9611_v1, %v9612_v57  ;;  %v11462_v22 = vcombine.low %v8922_v30, %v8932_v60  ;;  %v9618_v17 = vrot.slane %v9616_v39, 4  ;;  %v9619_v24 = vrot.slane %v14028_v3, 5  ;;  %v14034_v15 = vld [vmem:[#allocation2 + $0x58] sm:$0xf]  ;;  %v13862_v62 = vld [vmem:[#allocation2 + $0xe4] sm:$0xff]  }
 0x2f1   :  { %v11519_v7 = vcombine.low %v9610_v33, %v9613_v32  ;;  %v11473_v42 = vrot.slane %v9481_v35, 9  ;;  %v9625_v14 = vrot.slane %v9623_v41, 4  ;;  %v9626_v16 = vrot.slane %v14029_v9, 5  ;;  %v9485_v19 = vld [vmem:[#allocation2 + $0x60] sm:$0xe] }
 0x2f2   :  { %13196 = vmatpush3.bf16.msra.mxu1 %v14023_v23  ;;  %v9630_v31 = vrot.slane %v14030_v8, 5  ;;  %v9617_v45 = vsel %vm14956_vm14, %v11472_v11, %v9616_v39  ;;  %v9620_v48 = vsel %vm14956_vm14, %v9618_v17, %v9619_v24  ;;  %v9637_v47 = vrot.slane %v14031_v59, 5  ;;  %v14036_v36 = vld [vmem:[#allocation2 + $0x5c] sm:$0x1]  ;;  %v14037_v30 = vld [vmem:[#allocation2 + $0x70] sm:$0xf] }
 0x2f3   :  { %v9624_v4 = vsel %vm14956_vm14, %v11473_v42, %v9623_v41  ;;  %v9627_v51 = vsel %vm14956_vm14, %v9625_v14, %v9626_v16  ;;  %v11520_v18 = vcombine.low %v9617_v45, %v9620_v48  ;;  %v11474_v12 = vrot.slane %v9482_v53, 9  ;;  %v14038_v33 = vld [vmem:[#allocation2 + $0x68] sm:$0x1]  ;;  %v14039_v6 = vld [vmem:[#allocation2 + $0x7c] sm:$0xf]  ;;  %v13863_v17 = vld [vmem:[#allocation2 + $0xf0] sm:$0xff]  }
 0x2f4   :  { %13094 = vmatmul.mubr.bf16.gmra.mrb[56].mxu0 %v11460_v40  ;;  %v9632_v54 = vrot.slane %v9630_v31, 4  ;;  %v9633_v63 = vrot.slane %v14032_v37, 5  ;;  %v11521_v23 = vcombine.low %v9624_v4, %v9627_v51  ;;  %v9639_v34 = vrot.slane %v9637_v47, 4  ;;  %v14035_v40 = vld [vmem:[#allocation2 + $0x64] sm:$0xf] }
 0x2f5   :  { %12734 = vmatmul.mubr.bf16.gmra.mrb[16].mxu1 %v13853_v13  ;;  %13097 = vmatprep.mubr.bf16.mxu0 %v11461_v52  ;;  %v11475_v13 = vrot.slane %v9483_v50, 9  ;;  %v9631_v56 = vsel %vm14956_vm14, %v11474_v12, %v9630_v31  ;;  %v9644_v44 = vrot.slane %v14034_v15, 5  ;;  %v9651_v52 = vrot.slane %v14035_v40, 5  ;;  %v9487_v41 = vld [vmem:[#allocation2 + $0x78] sm:$0xe] }
 0x2f6   :  { %12737 = vmatprep.mubr.bf16.mxu1 %v13855_v55  ;;  %v14033_v55 = vld [vmem:[#allocation2 + $0x50] sm:$0x1]  ;;  %v9634_v21 = vsel %vm14956_vm14, %v9632_v54, %v9633_v63  ;;  %v11476_v38 = vrot.slane %v9484_v20, 9  ;;  %v9647_v57 = vrot.slane %v14036_v36, 5  ;;  %v9658_v60 = vrot.slane %v14037_v30, 5 }
 0x2f7   :  { %v9640_v46 = vrot.slane %v14033_v55, 5  ;;  %v9638_v49 = vsel %vm14956_vm14, %v11475_v13, %v9637_v47  ;;  %v11522_v43 = vcombine.low %v9631_v56, %v9634_v21  ;;  %v9646_v1 = vrot.slane %v9644_v44, 4  ;;  %v9488_v14 = vld [vmem:[#allocation2 + $0x84] sm:$0xe]  ;;  %v14041_v9 = vld [vmem:[#allocation2 + $0x88] sm:$0xf] }
 0x2f8   :  { %v9653_v39 = vrot.slane %v9651_v52, 4  ;;  %v9654_v32 = vrot.slane %v14038_v33, 5  ;;  %v9665_v25 = vrot.slane %v14039_v6, 5  ;;  %v9645_v35 = vsel %vm14956_vm14, %v11476_v38, %v9644_v44  ;;  %v14042_v45 = vld [vmem:[#allocation2 + $0x80] sm:$0x1] }
 0x2f9   :  { %v9641_v5 = vsel %vm14956_vm14, %v9639_v34, %v9640_v46  ;;  %v9648_v3 = vsel %vm14956_vm14, %v9646_v1, %v9647_v57  ;;  %v9660_v42 = vrot.slane %v9658_v60, 4  ;;  %v9672_v16 = vrot.slane %v14041_v9, 5  ;;  %v9489_v53 = vld [vmem:[#allocation2 + $0x90] sm:$0xe]  ;;  %v14043_v12 = vld [vmem:[#allocation2 + $0x8c] sm:$0x1] }
 0x2fa   :  { %v11523_v0 = vcombine.low %v9638_v49, %v9641_v5  ;;  %v9655_v8 = vsel %vm14956_vm14, %v9653_v39, %v9654_v32  ;;  %v11479_v31 = vrot.slane %v9487_v41, 9  ;;  %v9668_v48 = vrot.slane %v14042_v45, 5  ;;  %v14044_v13 = vld [vmem:[#allocation2 + $0x94] sm:$0xf]  ;;  %v16691_v55 = vld [vmem:[#allocation2 + $0x9c] sm:$0xe] }
 0x2fb   :  { %v11524_v4 = vcombine.low %v9645_v35, %v9648_v3  ;;  %v11480_v59 = vrot.slane %v9488_v14, 9  ;;  %v9675_v54 = vrot.slane %v14043_v12, 5  ;;  %v9679_v34 = vrot.slane %v14044_v13, 5  ;;  %v16693_v46 = vld [vmem:[#allocation2 + $0xa0] sm:$0xf]  ;;  %v13866_v1 = vld [vmem:[#allocation2 + $0x114] sm:$0xff]  }
 0x2fc   :  { %13098 = vmatmul.mubr.bf16.gmra.mrb[60].mxu0 %v11462_v22  ;;  %v16685_v37 = vsel %vm14956_vm14, %v11479_v31, %v9665_v25  ;;  %v14046_v20 = vld [vmem:[#allocation2 + $0x98] sm:$0x1]  ;;  %v5134_v44 = vld [vmem:[#allocation2 + $0xe4] sm:$0xf]  ;;  %v14047_v49 = vld [vmem:[#allocation2 + $0xac] sm:$0xf] }
 0x2fd   :  { %12738 = vmatmul.mubr.bf16.gmra.mrb[20].mxu1 %v13856_v10  ;;  %13117 = vmatprep.mubr.bf16.mxu0 %v11519_v7  ;;  %v11477_v10 = vrot.slane %v9485_v19, 9  ;;  %v14040_v7 = vld [vmem:[#allocation2 + $0x74] sm:$0x1]  ;;  %v16700_v21 = vsel %vm14956_vm14, %v11480_v59, %v9672_v16  ;;  %v9682_v15 = vrot.slane %v14046_v20, 5  ;;  %v9693_v5 = vrot.slane %v14047_v49, 5 }
 0x2fe   :  { %12741 = vmatprep.mubr.bf16.mxu1 %v13857_v27  ;;  %v9486_v27 = vld [vmem:[#allocation2 + $0x6c] sm:$0xe]  ;;  %v9661_v11 = vrot.slane %v14040_v7, 5  ;;  %v9681_v57 = vrot.slane %v9679_v34, 4  ;;  %v14049_v30 = vld [vmem:[#allocation2 + $0xc4] sm:$0xf] }
 0x2ff   :  { %v11478_v22 = vrot.slane %v9486_v27, 9  ;;  %v9652_v24 = vsel %vm14956_vm14, %v11477_v10, %v9651_v52  ;;  %v9491_v52 = vld [vmem:[#allocation2 + $0xa8] sm:$0xe]  ;;  %v11482_v10 = vrot.slane %v16691_v55, 9  ;;  %v9492_v27 = vld [vmem:[#allocation2 + $0xb4] sm:$0xe] }
 0x300   :  { %v11525_v47 = vcombine.low %v9652_v24, %v9655_v8  ;;  %v16681_v50 = vsel %vm14956_vm14, %v9660_v42, %v9661_v11  ;;  %v14050_v39 = vld [vmem:[#allocation2 + $0xa4] sm:$0x1]  ;;  %v9493_v32 = vld [vmem:[#allocation2 + $0xc0] sm:$0xe]  ;;  %v5567_v6 = vshrl.u32 %v5134_v44, 16  ;;  %v11483_v41 = vrot.slane %v9491_v52, 9 }
 0x301   :  { %v16677_v51 = vsel %vm14956_vm14, %v11478_v22, %v9658_v60  ;;  %v9707_v60 = vrot.slane %v14049_v30, 5  ;;  %v9689_v33 = vrot.slane %v14050_v39, 5  ;;  %v9494_v35 = vld [vmem:[#allocation2 + $0xcc] sm:$0xe]  ;;  %v14051_v22 = vld [vmem:[#allocation2 + $0xd0] sm:$0xf] }
 0x302   :  { %v11526_v56 = vcombine.low %v16677_v51, %v16681_v50  ;;  %v9714_v7 = vrot.slane %v14051_v22, 5  ;;  %v14052_v11 = vld [vmem:[#allocation2 + $0xe8] sm:$0xf]  ;;  %v9695_v24 = vrot.slane %v9693_v5, 4  ;;  %v14053_v42 = vld [vmem:[#allocation2 + $0xb0] sm:$0x1]  ;;  %v16729_v13 = vsel %vm14956_vm14, %v11483_v41, %v9693_v5 }
 0x303   :  { %v5580_v3 = vshrl.u32 %v14052_v11, 16  ;;  %v9696_v14 = vrot.slane %v14053_v42, 5  ;;  %v11484_v9 = vrot.slane %v9492_v27, 9  ;;  %v11485_v31 = vrot.slane %v9493_v32, 9  ;;  %v14055_v45 = vld [vmem:[#allocation2 + $0xc8] sm:$0x1] }
 0x304   :  { %13118 = vmatmul.mubr.bf16.vlgmr.msra.gmra.mrb[0].mxu0 %v11520_v18  ;;  %v9674_v18 = vrot.slane %v9672_v16, 4  ;;  %v5569_v51 = vrot.slane %v5567_v6, 4  ;;  %v14056_v50 = vld [vmem:[#allocation2 + $0xd4] sm:$0x1]  ;;  %v13868_v55 = vld [vmem:[#allocation2 + $0x12c] sm:$0xff]  }
 0x305   :  { %12742 = vmatmul.mubr.bf16.gmra.mrb[24].mxu1 %v13858_v28  ;;  %13121 = vmatprep.mubr.bf16.mxu0 %v11521_v23  ;;  %v13864_v28 = vld [vmem:[#allocation2 + $0xfc] sm:$0xff]   ;;  %v11481_v23 = vrot.slane %v9489_v53, 9  ;;  %v16715_v53 = vsel %vm14956_vm14, %v9681_v57, %v9682_v15 }
 0x306   :  { %12745 = vmatprep.mubr.bf16.mxu1 %v13860_v61  ;;  %v9667_v61 = vrot.slane %v9665_v25, 4  ;;  %v16706_v40 = vsel %vm14956_vm14, %v9674_v18, %v9675_v54  ;;  %v5570_v25 = vshll.u32 %v5134_v44, 16  ;;  %v9717_v18 = vrot.slane %v14056_v50, 5  ;;  %v5146_v50 = vld [vmem:[#allocation2 + $0x114] sm:$0xf] }
 0x307   :  { %v16710_v36 = vsel %vm14956_vm14, %v11481_v23, %v9679_v34  ;;  %v5582_v54 = vrot.slane %v5580_v3, 4  ;;  %v11528_v15 = vcombine.low %v16700_v21, %v16706_v40  ;;  %v13869_v3 = vld [vmem:[#allocation2 + $0x138] sm:$0xff]  }
 0x308   :  { %v16689_v63 = vsel %vm14956_vm14, %v9667_v61, %v9668_v48  ;;  %v9709_v61 = vrot.slane %v9707_v60, 4  ;;  %v9710_v48 = vrot.slane %v14055_v45, 5  ;;  %v5572_v59 = vrot.slane %v5570_v25, 5  ;;  %v14059_v25 = vld [vmem:[#allocation2 + $0xf4] sm:$0xf] }
 0x309   :  { %v11527_v19 = vcombine.low %v16685_v37, %v16689_v63  ;;  %v13867_v37 = vld [vmem:[#allocation2 + $0x120] sm:$0xff]   ;;  %v11529_v44 = vcombine.low %v16710_v36, %v16715_v53  ;;  %v9721_v41 = vrot.slane %v14059_v25, 5 }
 0x30a   :  { %v16749_v20 = vsel %vm14956_vm14, %v9709_v61, %v9710_v48 }
 0x30c   :  { %13122 = vmatmul.mubr.bf16.gmra.mrb[4].mxu0 %v11522_v43  ;;  %v14048_v43 = vld [vmem:[#allocation2 + $0xb8] sm:$0xf] }
 0x30d   :  { %12746 = vmatmul.mubr.bf16.gmra.mrb[28].mxu1 %v13861_v58  ;;  %13125 = vmatprep.mubr.bf16.mxu0 %v11523_v0  ;;  %v9686_v58 = vrot.slane %v16693_v46, 5  ;;  %v9700_v38 = vrot.slane %v14048_v43, 5  ;;  %v16737_v46 = vsel %vm14956_vm14, %v9695_v24, %v9696_v14  ;;  %v14057_v43 = vld [vmem:[#allocation2 + $0xec] sm:$0x1]  ;;  %v14060_v24 = vld [vmem:[#allocation2 + $0xf8] sm:$0x1] }
 0x30e   :  { %12749 = vmatprep.mubr.bf16.mxu1 %v13862_v62  ;;  %v13865_v62 = vld [vmem:[#allocation2 + $0x108] sm:$0xff]   ;;  %v11531_v40 = vcombine.low %v16729_v13, %v16737_v46  ;;  %v9724_v42 = vrot.slane %v14060_v24, 5  ;;  %v14061_v14 = vld [vmem:[#allocation2 + $0x100] sm:$0xf]  ;;  %v14070_v46 = vld [vmem:[#allocation2 + $0x124] sm:$0xf] }
 0x30f   :  { %v9688_v0 = vrot.slane %v9686_v58, 4  ;;  %v9702_v16 = vrot.slane %v9700_v38, 4  ;;  %v16721_v63 = vsel %vm14956_vm14, %v11482_v10, %v9686_v58  ;;  %v16733_v34 = vsel %vm14956_vm14, %v11484_v9, %v9700_v38  ;;  %v5143_v10 = vld [vmem:[#allocation2 + $0x108] sm:$0xf] }
 0x310   :  { %v5586_v38 = vshll.u32 %v14057_v43, 16  ;;  %v9728_v9 = vrot.slane %v14061_v14, 5  ;;  %v5149_v14 = vld [vmem:[#allocation2 + $0x120] sm:$0xf] }
 0x311   :  { %v16725_v23 = vsel %vm14956_vm14, %v9688_v0, %v9689_v33 }
 0x312   :  { %v11530_v21 = vcombine.low %v16721_v63, %v16725_v23  ;;  %v5588_v22 = vrot.slane %v5586_v38, 5  ;;  %v14068_v23 = vld [vmem:[#allocation2 + $0x110] sm:$0x1] }
 0x314   :  { %13126 = vmatmul.mubr.bf16.gmra.mrb[8].mxu0 %v11524_v4  ;;  %v11486_v4 = vrot.slane %v9494_v35, 9 }
 0x315   :  { %12750 = vmatmul.mubr.bf16.gmra.mrb[32].mxu1 %v13863_v17  ;;  %13129 = vmatprep.mubr.bf16.mxu0 %v11525_v47  ;;  %v5576_v17 = vshll.u32 %v14052_v11, 16  ;;  %v9716_v47 = vrot.slane %v9714_v7, 4  ;;  %v5639_v11 = vshrl.u32 %v5143_v10, 16 }
 0x316   :  { %12753 = vmatprep.mubr.bf16.mxu1 %v13864_v28  ;;  %v14054_v28 = vld [vmem:[#allocation2 + $0xbc] sm:$0x1]  ;;  %v16757_v52 = vsel %vm14956_vm14, %v11486_v4, %v9714_v7  ;;  %v9496_v7 = vld [vmem:[#allocation2 + $0xfc] sm:$0xe] }
 0x317   :  { %v9703_v8 = vrot.slane %v14054_v28, 5  ;;  %v16717_v12 = vrot.slane %v5576_v17, 5  ;;  %v16761_v49 = vsel %vm14956_vm14, %v9716_v47, %v9717_v18  ;;  %v5642_v17 = vshll.u32 %v5143_v10, 16 }
 0x318   :  { %v11534_v33 = vcombine.low %v16757_v52, %v16761_v49  ;;  %v11488_v47 = vrot.slane %v9496_v7, 9  ;;  %v5663_v10 = vshrl.u32 %v5146_v50, 16 }
 0x319   :  { %v16741_v58 = vsel %vm14956_vm14, %v9702_v16, %v9703_v8  ;;  %v5583_v5 = vor.u32 %v5582_v54, %v16717_v12  ;;  %v14062_v16 = vld [vmem:[#allocation2 + $0x10c] sm:$0xf]  ;;  %v14063_v54 = vld [vmem:[#allocation2 + $0x104] sm:$0x1] }
 0x31a   :  { %v11532_v36 = vcombine.low %v16733_v34, %v16741_v58  ;;  %v5648_v28 = vshll.u32 %v14062_v16, 16  ;;  %v5652_v8 = vshrl.u32 %v14062_v16, 16  ;;  %v13872_v16 = vld [vmem:[#allocation2 + $0x15c] sm:$0xff]   ;;  %v14073_v58 = vld [vmem:[#allocation2 + $0x128] sm:$0x1] }
 0x31b   :  { %v5584_v35 = vrot.slane %v5583_v5, 4 }
 0x31c   :  { %13130 = vmatmul.mubr.bf16.gmra.mrb[12].mxu0 %v11526_v56  ;;  %v16745_v56 = vsel %vm14956_vm14, %v11485_v31, %v9707_v60  ;;  %v14058_v60 = vld [vmem:[#allocation2 + $0x100] sm:$0xf]  ;;  %v13870_v31 = vld [vmem:[#allocation2 + $0x144] sm:$0xff]   ;;  %v16785_v5 = vrot.slane %v5648_v28, 5 }
 0x31d   :  { %12754 = vmatmul.mubr.bf16.gmra.mrb[36].mxu1 %v13865_v62  ;;  %13133 = vmatprep.mubr.bf16.mxu0 %v11527_v19  ;;  %v5573_v62 = vor.u32 %v5572_v59, %v5569_v51  ;;  %v5140_v19 = vld [vmem:[#allocation2 + $0xfc] sm:$0xf]  ;;  %v11533_v57 = vcombine.low %v16745_v56, %v16749_v20  ;;  %v5624_v0 = vshll.u32 %v14058_v60, 16  ;;  %v5628_v39 = vshrl.u32 %v14058_v60, 16  ;;  %v14065_v60 = vld [vmem:[#allocation2 + $0x10c] sm:$0xf] }
 0x31e   :  { %12757 = vmatprep.mubr.bf16.mxu1 %v13866_v1  ;;  %v9495_v1 = vld [vmem:[#allocation2 + $0xf0] sm:$0xe]  ;;  %v5615_v27 = vshrl.u32 %v5140_v19, 16  ;;  %v5618_v30 = vshll.u32 %v5140_v19, 16  ;;  %v9723_v59 = vrot.slane %v9721_v41, 4  ;;  %v5589_v18 = vsel %vm14254_vm9, %v5584_v35, %v5588_v22 }
 0x31f   :  { %v5574_v32 = vrot.slane %v5573_v62, 4  ;;  %v11487_v6 = vrot.slane %v9495_v1, 9  ;;  %v16774_v48 = vrot.slane %v5624_v0, 5  ;;  %v5630_v53 = vrot.slane %v5628_v39, 4  ;;  %v14064_v62 = vld [vmem:[#allocation2 + $0x104] sm:$0x1] }
 0x320   :  { %v5617_v61 = vrot.slane %v5615_v27, 4  ;;  %v5620_v45 = vrot.slane %v5618_v30, 5  ;;  %v5634_v19 = vshll.u32 %v14064_v62, 16  ;;  %v9497_v1 = vld [vmem:[#allocation2 + $0x108] sm:$0xe]  ;;  %v5666_v27 = vshll.u32 %v5146_v50, 16 }
 0x321   :  { %v5579_v4 = vsel %vm14254_vm9, %v5574_v32, %v16717_v12  ;;  %v16781_v51 = vsel %vm14956_vm14, %v11487_v6, %v9721_v41  ;;  %v5654_v12 = vrot.slane %v5652_v8, 4  ;;  %v5631_v38 = vor.u32 %v5630_v53, %v16774_v48  ;;  %v14066_v39 = vld [vmem:[#allocation2 + $0x118] sm:$0xf]  ;;  %v14067_v22 = vld [vmem:[#allocation2 + $0x110] sm:$0x1] }
 0x322   :  { %v5621_v43 = vor.u32 %v5620_v45, %v5617_v61  ;;  %v16790_v30 = vsel %vm14956_vm14, %v9723_v59, %v9724_v42  ;;  %v9735_v0 = vrot.slane %v14065_v60, 5  ;;  %v5672_v32 = vshll.u32 %v14066_v39, 16  ;;  %v9498_v59 = vld [vmem:[#allocation2 + $0x114] sm:$0xe] }
 0x323   :  { %v5676_v6 = vshrl.u32 %v14066_v39, 16  ;;  %v16792_v25 = vcombine.low %v5579_v4, %v5589_v18  ;;  %v16796_v41 = vsel %vm14956_vm14, %v11488_v47, %v9728_v9  ;;  %v5658_v7 = vshll.u32 %v14067_v22, 16 }
 0x324   :  { %13134 = vmatmul.mubr.bf16.gmra.mrb[16].mxu0 %v11528_v15  ;;  %v5644_v15 = vrot.slane %v5642_v17, 5  ;;  %v5655_v24 = vor.u32 %v5654_v12, %v16785_v5  ;;  %v11489_v42 = vrot.slane %v9497_v1, 9  ;;  %v5632_v28 = vrot.slane %v5631_v38, 4  ;;  %v14071_v38 = vld [vmem:[#allocation2 + $0x11c] sm:$0x1] }
 0x325   :  { %12758 = vmatmul.mubr.bf16.gmra.mrb[40].mxu1 %v13867_v37  ;;  %13137 = vmatprep.mubr.bf16.mxu0 %v11529_v44  ;;  %v9731_v37 = vrot.slane %v14063_v54, 5  ;;  %v9730_v44 = vrot.slane %v9728_v9, 4  ;;  %v5622_v9 = vrot.slane %v5621_v43, 4  ;;  %v5665_v8 = vrot.slane %v5663_v10, 4  ;;  %v14069_v54 = vld [vmem:[#allocation2 + $0x118] sm:$0xf] }
 0x326   :  { %12761 = vmatprep.mubr.bf16.mxu1 %v13868_v55  ;;  %v5641_v55 = vrot.slane %v5639_v11, 4  ;;  %v13871_v11 = vld [vmem:[#allocation2 + $0x150] sm:$0xff]   ;;  %v9737_v63 = vrot.slane %v9735_v0, 4  ;;  %v16809_v61 = vrot.slane %v5672_v32, 5  ;;  %v5678_v45 = vrot.slane %v5676_v6, 4 }
 0x327   :  { %v16803_v17 = vsel %vm14956_vm14, %v9730_v44, %v9731_v37  ;;  %v5660_v4 = vrot.slane %v5658_v7, 5  ;;  %v5687_v47 = vshrl.u32 %v5149_v14, 16  ;;  %v5690_v50 = vshll.u32 %v5149_v14, 16  ;;  %v14072_v10 = vld [vmem:[#allocation2 + $0x11c] sm:$0x1]  ;;  %v13874_v7 = vld [vmem:[#allocation2 + $0x174] sm:$0xff]  }
 0x328   :  { %v5645_v35 = vor.u32 %v5644_v15, %v5641_v55  ;;  %v5656_v18 = vrot.slane %v5655_v24, 4  ;;  %v9742_v13 = vrot.slane %v14069_v54, 5  ;;  %v5700_v37 = vshrl.u32 %v14070_v46, 16  ;;  %v14076_v54 = vld [vmem:[#allocation2 + $0x128] sm:$0x1] }
 0x329   :  { %v5627_v55 = vsel %vm14254_vm9, %v5622_v9, %v16774_v48  ;;  %v16818_v44 = vsel %vm14956_vm14, %v11489_v42, %v9735_v0  ;;  %v11490_v12 = vrot.slane %v9498_v59, 9  ;;  %v5679_v43 = vor.u32 %v5678_v45, %v16809_v61  ;;  %v13873_v0 = vld [vmem:[#allocation2 + $0x168] sm:$0xff]  }
 0x32a   :  { %v5646_v53 = vrot.slane %v5645_v35, 4  ;;  %v5682_v1 = vshll.u32 %v14071_v38, 16  ;;  %v5689_v60 = vrot.slane %v5687_v47, 4  ;;  %v5692_v39 = vrot.slane %v5690_v50, 5  ;;  %v5155_v47 = vld [vmem:[#allocation2 + $0x138] sm:$0xf] }
 0x32b   :  { %v5661_v32 = vsel %vm14254_vm9, %v5656_v18, %v5660_v4  ;;  %v9744_v6 = vrot.slane %v9742_v13, 4  ;;  %v5702_v22 = vrot.slane %v5700_v37, 4  ;;  %v5680_v42 = vrot.slane %v5679_v43, 4  ;;  %v14077_v37 = vld [vmem:[#allocation2 + $0x134] sm:$0x1]  ;;  %v13875_v43 = vld [vmem:[#allocation2 + $0x180] sm:$0xff]  }
 0x32c   :  { %13138 = vmatmul.mubr.bf16.gmra.mrb[20].mxu0 %v11530_v21  ;;  %v9738_v21 = vrot.slane %v14068_v23, 5  ;;  %v5651_v48 = vsel %vm14254_vm9, %v5646_v53, %v16785_v5  ;;  %v11535_v5 = vcombine.low %v16781_v51, %v16790_v30  ;;  %v5684_v14 = vrot.slane %v5682_v1, 5  ;;  %v9500_v51 = vld [vmem:[#allocation2 + $0x12c] sm:$0xe]  ;;  %v14075_v23 = vld [vmem:[#allocation2 + $0x130] sm:$0xf] }
 0x32d   :  { %12762 = vmatmul.mubr.bf16.gmra.mrb[44].mxu1 %v13869_v3  ;;  %v5636_v3 = vrot.slane %v5634_v19, 5  ;;  %13141 = vmatprep.mubr.bf16.mxu0 %v11531_v40  ;;  %v5696_v40 = vshll.u32 %v14070_v46, 16  ;;  %v16850_v20 = vsel %vm14956_vm14, %v11490_v12, %v9742_v13  ;;  %v9752_v13 = vrot.slane %v14076_v54, 5 }
 0x32e   :  { %12765 = vmatprep.mubr.bf16.mxu1 %v13870_v31  ;;  %v5668_v31 = vrot.slane %v5666_v27, 5  ;;  %v16822_v19 = vsel %vm14956_vm14, %v9737_v63, %v9738_v21  ;;  %v9745_v27 = vrot.slane %v14072_v10, 5  ;;  %v9756_v21 = vrot.slane %v14075_v23, 5  ;;  %v13876_v10 = vld [vmem:[#allocation2 + $0x18c] sm:$0xff]   ;;  %v14081_v23 = vld [vmem:[#allocation2 + $0x148] sm:$0xf] }
 0x32f   :  { %v5637_v15 = vsel %vm14254_vm9, %v5632_v28, %v5636_v3  ;;  %v16833_v35 = vrot.slane %v5696_v40, 5  ;;  %v9499_v3 = vld [vmem:[#allocation2 + $0x120] sm:$0xe]  ;;  %v5152_v28 = vld [vmem:[#allocation2 + $0x12c] sm:$0xf]  ;;  %v11537_v56 = vcombine.low %v16818_v44, %v16822_v19  ;;  %v5685_v50 = vsel %vm14254_vm9, %v5680_v42, %v5684_v14 }
 0x330   :  { %v5669_v62 = vor.u32 %v5668_v31, %v5665_v8  ;;  %v16842_v24 = vcombine.low %v5627_v55, %v5637_v15  ;;  %v16844_v8 = vcombine.low %v5651_v48, %v5661_v32  ;;  %v16854_v30 = vsel %vm14956_vm14, %v9744_v6, %v9745_v27  ;;  %v14078_v15 = vld [vmem:[#allocation2 + $0x130] sm:$0xf] }
 0x331   :  { %v5703_v31 = vor.u32 %v5702_v22, %v16833_v35  ;;  %v11491_v63 = vrot.slane %v9499_v3, 9  ;;  %v5711_v4 = vshrl.u32 %v5152_v28, 16  ;;  %v5714_v59 = vshll.u32 %v5152_v28, 16  ;;  %v14080_v3 = vld [vmem:[#allocation2 + $0x134] sm:$0x1] }
 0x332   :  { %v5670_v34 = vrot.slane %v5669_v62, 4  ;;  %v11492_v46 = vrot.slane %v9500_v51, 9  ;;  %v9759_v55 = vrot.slane %v14077_v37, 5  ;;  %v5720_v62 = vshll.u32 %v14078_v15, 16  ;;  %v9501_v51 = vld [vmem:[#allocation2 + $0x138] sm:$0xe] }
 0x333   :  { %v5724_v12 = vshrl.u32 %v14078_v15, 16  ;;  %v9758_v38 = vrot.slane %v9756_v21, 4  ;;  %v5735_v1 = vshrl.u32 %v5155_v47, 16  ;;  %v5738_v48 = vshll.u32 %v5155_v47, 16  ;;  %v14082_v47 = vld [vmem:[#allocation2 + $0x140] sm:$0x1] }
 0x334   :  { %13142 = vmatmul.mubr.bf16.gmra.mrb[24].mxu0 %v11532_v36  ;;  %v5706_v36 = vshll.u32 %v14073_v58, 16  ;;  %v5675_v45 = vsel %vm14254_vm9, %v5670_v34, %v16809_v61  ;;  %v5704_v61 = vrot.slane %v5703_v31, 4  ;;  %v5713_v27 = vrot.slane %v5711_v4, 4  ;;  %v5158_v58 = vld [vmem:[#allocation2 + $0x144] sm:$0xf] }
 0x335   :  { %12766 = vmatmul.mubr.bf16.gmra.mrb[48].mxu1 %v13871_v11  ;;  %13145 = vmatprep.mubr.bf16.mxu0 %v11533_v57  ;;  %v11536_v11 = vcombine.low %v16796_v41, %v16803_v17  ;;  %v5693_v57 = vor.u32 %v5692_v39, %v5689_v60  ;;  %v5716_v60 = vrot.slane %v5714_v59, 5  ;;  %v14079_v39 = vld [vmem:[#allocation2 + $0x13c] sm:$0xf]  ;;  %v11538_v6 = vcombine.low %v16850_v20, %v16854_v30  ;;  %v9502_v41 = vld [vmem:[#allocation2 + $0x144] sm:$0xe] }
 0x336   :  { %12769 = vmatprep.mubr.bf16.mxu1 %v13872_v16  ;;  %v14074_v16 = vld [vmem:[#allocation2 + $0x124] sm:$0xf]  ;;  %v5708_v53 = vrot.slane %v5706_v36, 5  ;;  %v5748_v32 = vshrl.u32 %v14079_v39, 16  ;;  %v16867_v22 = vcombine.low %v5675_v45, %v5685_v50  ;;  %v5726_v34 = vrot.slane %v5724_v12, 4 }
 0x337   :  { %v9749_v9 = vrot.slane %v14074_v16, 5  ;;  %v5694_v40 = vrot.slane %v5693_v57, 4  ;;  %v5730_v42 = vshll.u32 %v14080_v3, 16  ;;  %v5737_v14 = vrot.slane %v5735_v1, 4  ;;  %v14084_v17 = vld [vmem:[#allocation2 + $0x148] sm:$0xf] }
 0x338   :  { %v5709_v36 = vsel %vm14254_vm9, %v5704_v61, %v5708_v53  ;;  %v5740_v16 = vrot.slane %v5738_v48, 5  ;;  %v5750_v57 = vrot.slane %v5748_v32, 4  ;;  %v5759_v31 = vshrl.u32 %v5158_v58, 16 }
 0x339   :  { %v9751_v18 = vrot.slane %v9749_v9, 4  ;;  %v16871_v52 = vsel %vm14956_vm14, %v11491_v63, %v9749_v9  ;;  %v5717_v9 = vor.u32 %v5716_v60, %v5713_v27  ;;  %v5762_v63 = vshll.u32 %v5158_v58, 16 }
 0x33a   :  { %v5772_v45 = vshrl.u32 %v14081_v23, 16  ;;  %v5754_v50 = vshll.u32 %v14082_v47, 16  ;;  %v11493_v12 = vrot.slane %v9501_v51, 9  ;;  %v5164_v47 = vld [vmem:[#allocation2 + $0x15c] sm:$0xf] }
 0x33b   :  { %v16875_v49 = vsel %vm14956_vm14, %v9751_v18, %v9752_v13  ;;  %v13877_v18 = vld [vmem:[#allocation2 + $0x198] sm:$0xff]   ;;  %v16904_v13 = vrot.slane %v5730_v42, 5  ;;  %v16909_v15 = vrot.slane %v5717_v9, 4  ;;  %v5764_v61 = vrot.slane %v5762_v63, 5 }
 0x33c   :  { %13146 = vmatmul.mubr.bf16.gmra.mrb[28].mxu0 %v11534_v33  ;;  %v5699_v33 = vsel %vm14254_vm9, %v5694_v40, %v16833_v35  ;;  %v16890_v35 = vsel %vm14956_vm14, %v9758_v38, %v9759_v55  ;;  %v11539_v4 = vcombine.low %v16871_v52, %v16875_v49  ;;  %v14083_v40 = vld [vmem:[#allocation2 + $0x13c] sm:$0xf]  ;;  %v5161_v55 = vld [vmem:[#allocation2 + $0x150] sm:$0xf]  ;;  %v5774_v1 = vrot.slane %v5772_v45, 4 }
 0x33d   :  { %12770 = vmatmul.mubr.bf16.gmra.mrb[52].mxu1 %v13873_v0  ;;  %13149 = vmatprep.mubr.bf16.mxu0 %v11535_v5  ;;  %v5744_v0 = vshll.u32 %v14079_v39, 16  ;;  %v16884_v5 = vrot.slane %v5720_v62, 5  ;;  %v16894_v53 = vcombine.low %v5699_v33, %v5709_v36  ;;  %v9763_v37 = vrot.slane %v14083_v40, 5  ;;  %v14086_v49 = vld [vmem:[#allocation2 + $0x14c] sm:$0x1] }
 0x33e   :  { %12773 = vmatprep.mubr.bf16.mxu1 %v13874_v7  ;;  %v16882_v7 = vsel %vm14956_vm14, %v11492_v46, %v9756_v21  ;;  %v5768_v21 = vshll.u32 %v14081_v23, 16  ;;  %v5741_v46 = vor.u32 %v5740_v16, %v5737_v14  ;;  %v5783_v27 = vshrl.u32 %v5161_v55, 16  ;;  %v14088_v14 = vld [vmem:[#allocation2 + $0x154] sm:$0xf] }
 0x33f   :  { %v16892_v28 = vrot.slane %v5744_v0, 5  ;;  %v5727_v59 = vor.u32 %v5726_v34, %v16884_v5  ;;  %v11540_v54 = vcombine.low %v16882_v7, %v16890_v35  ;;  %v5786_v60 = vshll.u32 %v5161_v55, 16  ;;  %v14087_v34 = vld [vmem:[#allocation2 + $0x14c] sm:$0x1]  ;;  %v14090_v55 = vld [vmem:[#allocation2 + $0x158] sm:$0x1] }
 0x340   :  { %v16912_v38 = vrot.slane %v5768_v21, 5  ;;  %v5742_v44 = vrot.slane %v5741_v46, 4  ;;  %v9765_v19 = vrot.slane %v9763_v37, 4  ;;  %v11494_v0 = vrot.slane %v9502_v41, 9 }
 0x341   :  { %v5751_v62 = vor.u32 %v5750_v57, %v16892_v28  ;;  %v5728_v48 = vrot.slane %v5727_v59, 4  ;;  %v9773_v33 = vrot.slane %v14086_v49, 5  ;;  %v5778_v58 = vshll.u32 %v14087_v34, 16 }
 0x342   :  { %v5723_v36 = vsel %vm14254_vm9, %v16909_v15, %v16884_v5  ;;  %v5775_v42 = vor.u32 %v5774_v1, %v16912_v38  ;;  %v5792_v16 = vshll.u32 %v14088_v14, 16  ;;  %v5785_v9 = vrot.slane %v5783_v27, 4  ;;  %v14092_v1 = vld [vmem:[#allocation2 + $0x158] sm:$0x1] }
 0x343   :  { %v5752_v32 = vrot.slane %v5751_v62, 4  ;;  %v5788_v57 = vrot.slane %v5786_v60, 5  ;;  %v5796_v51 = vshrl.u32 %v14088_v14, 16  ;;  %v5733_v23 = vsel %vm14254_vm9, %v5728_v48, %v16904_v13  ;;  %v9504_v60 = vld [vmem:[#allocation2 + $0x15c] sm:$0xe] }
 0x344   :  { %13150 = vmatmul.mubr.bf16.gmra.mrb[32].mxu0 %v11536_v11  ;;  %v9770_v11 = vrot.slane %v14084_v17, 5  ;;  %v9764_v5 = vsel %vm14956_vm14, %v11493_v12, %v9763_v37  ;;  %v5747_v20 = vsel %vm14254_vm9, %v5742_v44, %v16892_v28  ;;  %v5780_v59 = vrot.slane %v5778_v58, 5  ;;  %v14091_v12 = vld [vmem:[#allocation2 + $0x160] sm:$0xf] }
 0x345   :  { %12774 = vmatmul.mubr.bf16.gmra.mrb[56].mxu1 %v13875_v43  ;;  %13153 = vmatprep.mubr.bf16.mxu0 %v11537_v56  ;;  %v5761_v43 = vrot.slane %v5759_v31, 4  ;;  %v14085_v56 = vld [vmem:[#allocation2 + $0x140] sm:$0x1]  ;;  %v14089_v31 = vld [vmem:[#allocation2 + $0x154] sm:$0xf]  ;;  %v16943_v13 = vrot.slane %v5792_v16, 5  ;;  %v5789_v40 = vor.u32 %v5788_v57, %v5785_v9 }
 0x346   :  { %12777 = vmatprep.mubr.bf16.mxu1 %v13876_v10  ;;  %v5756_v10 = vrot.slane %v5754_v50, 5  ;;  %v9766_v39 = vrot.slane %v14085_v56, 5  ;;  %v9772_v52 = vrot.slane %v9770_v11, 4  ;;  %v9777_v63 = vrot.slane %v14089_v31, 5  ;;  %v14093_v44 = vld [vmem:[#allocation2 + $0x160] sm:$0xf] }
 0x347   :  { %v5765_v3 = vor.u32 %v5764_v61, %v5761_v43  ;;  %v16932_v45 = vsel %vm14956_vm14, %v11494_v0, %v9770_v11  ;;  %v9780_v15 = vrot.slane %v14090_v55, 5  ;;  %v5807_v28 = vshrl.u32 %v5164_v47, 16  ;;  %v14094_v16 = vld [vmem:[#allocation2 + $0x164] sm:$0x1]  ;;  %v9505_v57 = vld [vmem:[#allocation2 + $0x168] sm:$0xe] }
 0x348   :  { %v9767_v21 = vsel %vm14956_vm14, %v9765_v19, %v9766_v39  ;;  %v5757_v30 = vsel %vm14254_vm9, %v5752_v32, %v5756_v10  ;;  %v9779_v37 = vrot.slane %v9777_v63, 4  ;;  %v5810_v62 = vshll.u32 %v5164_v47, 16  ;;  %v5167_v19 = vld [vmem:[#allocation2 + $0x168] sm:$0xf]  ;;  %v14096_v31 = vld [vmem:[#allocation2 + $0x164] sm:$0x1] }
 0x349   :  { %v5766_v50 = vrot.slane %v5765_v3, 4  ;;  %v5816_v41 = vshll.u32 %v14091_v12, 16  ;;  %v5820_v17 = vshrl.u32 %v14091_v12, 16  ;;  %v16947_v11 = vcombine.low %v5723_v36, %v5733_v23 }
 0x34a   :  { %v16949_v43 = vcombine.low %v5747_v20, %v5757_v30  ;;  %v11541_v61 = vcombine.low %v9764_v5, %v9767_v21  ;;  %v5802_v48 = vshll.u32 %v14092_v1, 16  ;;  %v16960_v39 = vrot.slane %v5789_v40, 4  ;;  %v14097_v21 = vld [vmem:[#allocation2 + $0x16c] sm:$0xf]  ;;  %v5170_v30 = vld [vmem:[#allocation2 + $0x174] sm:$0xf] }
 0x34b   :  { %v9781_v32 = vsel %vm14956_vm14, %v9779_v37, %v9780_v15  ;;  %v16968_v49 = vrot.slane %v5816_v41, 5  ;;  %v11496_v58 = vrot.slane %v9504_v60, 9  ;;  %v5831_v36 = vshrl.u32 %v5167_v19, 16  ;;  %v14099_v37 = vld [vmem:[#allocation2 + $0x178] sm:$0xf] }
 0x34c   :  { %13154 = vmatmul.mubr.bf16.gmra.mrb[36].mxu0 %v11538_v6  ;;  %v16941_v6 = vsel %vm14956_vm14, %v9772_v52, %v9773_v33  ;;  %v5812_v52 = vrot.slane %v5810_v62, 5  ;;  %v5822_v33 = vrot.slane %v5820_v17, 4  ;;  %v16970_v34 = vrot.slane %v5802_v48, 5 }
 0x34d   :  { %12778 = vmatmul.mubr.bf16.gmra.mrb[60].mxu1 %v13877_v18  ;;  %13157 = vmatprep.mubr.bf16.mxu0 %v11539_v4  ;;  %v5776_v18 = vrot.slane %v5775_v42, 4  ;;  %v5798_v4 = vrot.slane %v5796_v51, 4  ;;  %v11542_v10 = vcombine.low %v16932_v45, %v16941_v6  ;;  %v5834_v3 = vshll.u32 %v5167_v19, 16  ;;  %v14095_v51 = vld [vmem:[#allocation2 + $0x16c] sm:$0xf] }
 0x34e   :  { %12829 = vmatprep.mubr.bf16.mxu1 %v16792_v25  ;;  %v9503_v25 = vld [vmem:[#allocation2 + $0x150] sm:$0xe]  ;;  %v9787_v9 = vrot.slane %v14094_v16, 5  ;;  %v9791_v7 = vrot.slane %v14095_v51, 5  ;;  %v5795_v35 = vsel %vm14254_vm9, %v16960_v39, %v16943_v13  ;;  %v5823_v5 = vor.u32 %v5822_v33, %v16968_v49 }
 0x34f   :  { %v11495_v46 = vrot.slane %v9503_v25, 9  ;;  %v5781_v56 = vsel %vm14254_vm9, %v5776_v18, %v5780_v59  ;;  %v5799_v0 = vor.u32 %v5798_v4, %v16943_v13  ;;  %v5840_v45 = vshll.u32 %v14097_v21, 16  ;;  %v9506_v4 = vld [vmem:[#allocation2 + $0x174] sm:$0xe] }
 0x350   :  { %v5844_v20 = vshrl.u32 %v14097_v21, 16  ;;  %v5833_v59 = vrot.slane %v5831_v36, 4  ;;  %v5836_v47 = vrot.slane %v5834_v3, 5  ;;  %v9798_v55 = vrot.slane %v14099_v37, 5  ;;  %v14107_v37 = vld [vmem:[#allocation2 + $0x19c] sm:$0xf] }
 0x351   :  { %v9778_v27 = vsel %vm14956_vm14, %v11495_v46, %v9777_v63  ;;  %v5826_v63 = vshll.u32 %v14096_v31, 16  ;;  %v9793_v46 = vrot.slane %v9791_v7, 4  ;;  %v5858_v62 = vshll.u32 %v5170_v30, 16 }
 0x352   :  { %v11543_v25 = vcombine.low %v9778_v27, %v9781_v32  ;;  %v5824_v41 = vrot.slane %v5823_v5, 4  ;;  %v16991_v17 = vrot.slane %v5840_v45, 5  ;;  %v5837_v48 = vor.u32 %v5836_v47, %v5833_v59 }
 0x353   :  { %v5828_v15 = vrot.slane %v5826_v63, 5  ;;  %v11498_v27 = vrot.slane %v9506_v4, 9  ;;  %v5860_v32 = vrot.slane %v5858_v62, 5  ;;  %v14105_v63 = vld [vmem:[#allocation2 + $0x188] sm:$0x1] }
 0x354   :  { %13158 = vmatmul.mubr.bf16.gmra.mrb[40].mxu0 %v11540_v54  ;;  %v16978_v54 = vrot.slane %v5799_v0, 4 }
 0x355   :  { %12830 = vmatmul.mubr.bf16.vlgmr.msra.gmra.mrb[32].mxu1 %v16578_v26  ;;  %v5771_v26 = vsel %vm14254_vm9, %v5766_v50, %v16912_v38  ;;  %v5809_v38 = vrot.slane %v5807_v28, 4  ;;  %13161 = vmatprep.mubr.bf16.mxu0 %v11541_v61  ;;  %v11497_v50 = vrot.slane %v9505_v57, 9  ;;  %v5855_v28 = vshrl.u32 %v5170_v30, 16 }
 0x356   :  { %12833 = vmatprep.mubr.bf16.mxu1 %v16842_v24  ;;  %v9784_v24 = vrot.slane %v14093_v44, 5  ;;  %v16972_v42 = vcombine.low %v5771_v26, %v5781_v56  ;;  %v5846_v61 = vrot.slane %v5844_v20, 4  ;;  %v9800_v44 = vrot.slane %v9798_v55, 4  ;;  %v14101_v56 = vld [vmem:[#allocation2 + $0x184] sm:$0xf] }
 0x357   :  { %v5813_v23 = vor.u32 %v5812_v52, %v5809_v38  ;;  %v9792_v26 = vsel %vm14956_vm14, %v11497_v50, %v9791_v7  ;;  %v5857_v0 = vrot.slane %v5855_v28, 4  ;;  %v14102_v38 = vld [vmem:[#allocation2 + $0x178] sm:$0xf]  ;;  %v5829_v36 = vsel %vm14254_vm9, %v5824_v41, %v5828_v15  ;;  %v14106_v50 = vld [vmem:[#allocation2 + $0x190] sm:$0xf] }
 0x358   :  { %v9786_v14 = vrot.slane %v9784_v24, 4  ;;  %v9785_v6 = vsel %vm14956_vm14, %v11496_v58, %v9784_v24  ;;  %v14100_v24 = vld [vmem:[#allocation2 + $0x17c] sm:$0x1]  ;;  %v5864_v52 = vshll.u32 %v14102_v38, 16  ;;  %v5868_v33 = vshrl.u32 %v14102_v38, 16 }
 0x359   :  { %v5814_v12 = vrot.slane %v5813_v23, 4  ;;  %v9801_v19 = vrot.slane %v14100_v24, 5  ;;  %v5847_v3 = vor.u32 %v5846_v61, %v16991_v17  ;;  %v9799_v51 = vsel %vm14956_vm14, %v11498_v27, %v9798_v55  ;;  %v14108_v28 = vld [vmem:[#allocation2 + $0x184] sm:$0xf]  ;;  %v9509_v41 = vld [vmem:[#allocation2 + $0x198] sm:$0xe] }
 0x35a   :  { %v9788_v18 = vsel %vm14956_vm14, %v9786_v14, %v9787_v9  ;;  %v14103_v14 = vld [vmem:[#allocation2 + $0x170] sm:$0x1]  ;;  %v17005_v9 = vrot.slane %v5837_v48, 4  ;;  %v9808_v23 = vrot.slane %v14105_v63, 5  ;;  %v5861_v5 = vor.u32 %v5860_v32, %v5857_v0  ;;  %v14109_v48 = vld [vmem:[#allocation2 + $0x194] sm:$0x1] }
 0x35b   :  { %v11544_v1 = vcombine.low %v9785_v6, %v9788_v18  ;;  %v5819_v58 = vsel %vm14254_vm9, %v5814_v12, %v16968_v49  ;;  %v5850_v16 = vshll.u32 %v14103_v14, 16  ;;  %v9802_v49 = vsel %vm14956_vm14, %v9800_v44, %v9801_v19  ;;  %v14110_v19 = vld [vmem:[#allocation2 + $0x190] sm:$0xf]  ;;  %v14111_v38 = vld [vmem:[#allocation2 + $0x1a0] sm:$0x1] }
 0x35c   :  { %13162 = vmatmul.mubr.bf16.gmra.mrb[44].mxu0 %v11542_v10  ;;  %v9805_v10 = vrot.slane %v14101_v56, 5  ;;  %v17018_v21 = vrot.slane %v5864_v52, 5  ;;  %v5870_v45 = vrot.slane %v5868_v33, 4  ;;  %v17020_v20 = vcombine.low %v5819_v58, %v5829_v36 }
 0x35d   :  { %12834 = vmatmul.mubr.bf16.gmra.mrb[36].mxu1 %v16844_v8  ;;  %v14098_v8 = vld [vmem:[#allocation2 + $0x170] sm:$0x1]  ;;  %13165 = vmatprep.mubr.bf16.mxu0 %v11543_v25  ;;  %v17022_v30 = vrot.slane %v5847_v3, 4  ;;  %v17024_v6 = vrot.slane %v5850_v16, 5  ;;  %v5843_v47 = vsel %vm14254_vm9, %v17005_v9, %v16991_v17  ;;  %v11546_v13 = vcombine.low %v9799_v51, %v9802_v49  ;;  %v14112_v3 = vld [vmem:[#allocation2 + $0x188] sm:$0x1] }
 0x35e   :  { %12837 = vmatprep.mubr.bf16.mxu1 %v16867_v22  ;;  %v9794_v40 = vrot.slane %v14098_v8, 5  ;;  %v5805_v22 = vsel %vm14254_vm9, %v16978_v54, %v16970_v34  ;;  %v9507_v34 = vld [vmem:[#allocation2 + $0x180] sm:$0xe]  ;;  %v9807_v31 = vrot.slane %v9805_v10, 4  ;;  %v9812_v18 = vrot.slane %v14106_v50, 5 }
 0x35f   :  { %v5173_v54 = vld [vmem:[#allocation2 + $0x180] sm:$0xf]  ;;  %v11499_v25 = vrot.slane %v9507_v34, 9  ;;  %v9819_v55 = vrot.slane %v14107_v37, 5  ;;  %v5871_v15 = vor.u32 %v5870_v45, %v17018_v21  ;;  %v5888_v62 = vshll.u32 %v14108_v28, 16 }
 0x360   :  { %v9795_v60 = vsel %vm14956_vm14, %v9793_v46, %v9794_v40  ;;  %v5879_v59 = vshrl.u32 %v5173_v54, 16  ;;  %v5176_v46 = vld [vmem:[#allocation2 + $0x18c] sm:$0xf]  ;;  %v5882_v8 = vshll.u32 %v5173_v54, 16  ;;  %v9809_v4 = vsel %vm14956_vm14, %v9807_v31, %v9808_v23  ;;  %v14113_v54 = vld [vmem:[#allocation2 + $0x1a8] sm:$0xf] }
 0x361   :  { %v11545_v57 = vcombine.low %v9792_v26, %v9795_v60  ;;  %v9806_v40 = vsel %vm14956_vm14, %v11499_v25, %v9805_v10  ;;  %v5892_v12 = vshrl.u32 %v14108_v28, 16  ;;  %v9815_v26 = vrot.slane %v14109_v48, 5 }
 0x362   :  { %v5881_v61 = vrot.slane %v5879_v59, 4  ;;  %v5903_v27 = vshrl.u32 %v5176_v46, 16  ;;  %v11547_v60 = vcombine.low %v9806_v40, %v9809_v4  ;;  %v9814_v44 = vrot.slane %v9812_v18, 4  ;;  %v14115_v4 = vld [vmem:[#allocation2 + $0x1ac] sm:$0x1] }
 0x363   :  { %v5906_v24 = vshll.u32 %v5176_v46, 16  ;;  %v5912_v56 = vshll.u32 %v14110_v19, 16  ;;  %v5916_v10 = vshrl.u32 %v14110_v19, 16  ;;  %v11501_v0 = vrot.slane %v9509_v41, 9 }
 0x364   :  { %13166 = vmatmul.mubr.bf16.gmra.mrb[48].mxu0 %v11544_v1  ;;  %v9821_v32 = vrot.slane %v9819_v55, 4  ;;  %v9822_v52 = vrot.slane %v14111_v38, 5  ;;  %v5872_v33 = vrot.slane %v5871_v15, 4  ;;  %v5884_v34 = vrot.slane %v5882_v8, 5 }
 0x365   :  { %12838 = vmatmul.mubr.bf16.gmra.mrb[40].mxu1 %v16894_v53  ;;  %v14104_v53 = vld [vmem:[#allocation2 + $0x17c] sm:$0x1]  ;;  %13169 = vmatprep.mubr.bf16.mxu0 %v11545_v57  ;;  %v5894_v58 = vrot.slane %v5892_v12, 4  ;;  %v5898_v14 = vshll.u32 %v14112_v3, 16  ;;  %v5179_v57 = vld [vmem:[#allocation2 + $0x198] sm:$0xf]  ;;  %v9816_v51 = vsel %vm14956_vm14, %v9814_v44, %v9815_v26  ;;  %v9820_v63 = vsel %vm14956_vm14, %v11501_v0, %v9819_v55 }
 0x366   :  { %12841 = vmatprep.mubr.bf16.mxu1 %v16947_v11  ;;  %v5874_v7 = vshll.u32 %v14104_v53, 16  ;;  %v17016_v11 = vcombine.low %v5795_v35, %v5805_v22  ;;  %v9508_v35 = vld [vmem:[#allocation2 + $0x18c] sm:$0xe]  ;;  %v17036_v22 = vrot.slane %v5861_v5, 4  ;;  %v5905_v53 = vrot.slane %v5903_v27, 4 }
 0x367   :  { %v11500_v1 = vrot.slane %v9508_v35, 9  ;;  %v9826_v49 = vrot.slane %v14113_v54, 5  ;;  %v5914_v25 = vrot.slane %v5912_v56, 5  ;;  %v5918_v31 = vrot.slane %v5916_v10, 4  ;;  %v9510_v5 = vld [vmem:[#allocation2 + $0x1a4] sm:$0xe] }
 0x368   :  { %v17030_v39 = vrot.slane %v5874_v7, 5  ;;  %v5867_v36 = vsel %vm14254_vm9, %v17036_v22, %v17018_v21  ;;  %v5908_v7 = vrot.slane %v5906_v24, 5  ;;  %v9823_v23 = vsel %vm14956_vm14, %v9821_v32, %v9822_v52  ;;  %v14114_v35 = vld [vmem:[#allocation2 + $0x19c] sm:$0xf]  ;;  %v14116_v22 = vld [vmem:[#allocation2 + $0x194] sm:$0x1] }
 0x369   :  { %v9813_v16 = vsel %vm14956_vm14, %v11500_v1, %v9812_v18  ;;  %v5885_v45 = vor.u32 %v5884_v34, %v5881_v61  ;;  %v5936_v50 = vshll.u32 %v14114_v35, 16  ;;  %v5940_v18 = vshrl.u32 %v14114_v35, 16  ;;  %v14117_v10 = vld [vmem:[#allocation2 + $0x1a0] sm:$0x1] }
 0x36a   :  { %v5877_v21 = vsel %vm14254_vm9, %v5872_v33, %v17030_v39  ;;  %v11548_v59 = vcombine.low %v9813_v16, %v9816_v51  ;;  %v11549_v46 = vcombine.low %v9820_v63, %v9823_v23  ;;  %v11502_v8 = vrot.slane %v9510_v5, 9 }
 0x36b   :  { %v9828_v40 = vrot.slane %v9826_v49, 4  ;;  %v9829_v37 = vrot.slane %v14115_v4, 5  ;;  %v5909_v55 = vor.u32 %v5908_v7, %v5905_v53  ;;  %v5919_v39 = vor.u32 %v5918_v31, %v5914_v25 }
 0x36c   :  { %13170 = vmatmul.mubr.bf16.gmra.mrb[52].mxu0 %v11546_v13  ;;  %v5930_v13 = vshll.u32 %v5179_v57, 16  ;;  %v5922_v15 = vshll.u32 %v14116_v22, 16  ;;  %v5886_v28 = vrot.slane %v5885_v45, 4  ;;  %v11259_v12 = vcombine.low %v5867_v36, %v5877_v21 }
 0x36d   :  { %12842 = vmatmul.mubr.bf16.gmra.mrb[44].mxu1 %v16949_v43  ;;  %v17041_v43 = vrot.slane %v5888_v62, 5  ;;  %13173 = vmatprep.mubr.bf16.mxu0 %v11547_v60  ;;  %v5900_v62 = vrot.slane %v5898_v14, 5  ;;  %v5938_v1 = vrot.slane %v5936_v50, 5  ;;  %v5942_v48 = vrot.slane %v5940_v18, 4 }
 0x36e   :  { %12845 = vmatprep.mubr.bf16.mxu1 %v16972_v42  ;;  %v5853_v42 = vsel %vm14254_vm9, %v17022_v30, %v17024_v6  ;;  %v5927_v6 = vshrl.u32 %v5179_v57, 16  ;;  %v5932_v61 = vrot.slane %v5930_v13, 5  ;;  %v9827_v26 = vsel %vm14956_vm14, %v11502_v8, %v9826_v49 }
 0x36f   :  { %v5895_v30 = vor.u32 %v5894_v58, %v17041_v43  ;;  %v9830_v27 = vsel %vm14956_vm14, %v9828_v40, %v9829_v37  ;;  %v5910_v60 = vrot.slane %v5909_v55, 4  ;;  %v5920_v44 = vrot.slane %v5919_v39, 4 }
 0x370   :  { %v5924_v17 = vrot.slane %v5922_v15, 5  ;;  %v5891_v9 = vsel %vm14254_vm9, %v5886_v28, %v17041_v43  ;;  %v5943_v56 = vor.u32 %v5942_v48, %v5938_v1  ;;  %v5946_v0 = vshll.u32 %v14117_v10, 16 }
 0x371   :  { %v5896_v41 = vrot.slane %v5895_v30, 4  ;;  %v5915_v2 = vsel %vm14254_vm9, %v5910_v60, %v5914_v25 }
 0x372   :  { %v5925_v32 = vsel %vm14254_vm9, %v5920_v44, %v5924_v17  ;;  %v5944_v34 = vrot.slane %v5943_v56, 4  ;;  %v5948_v43 = vrot.slane %v5946_v0, 5 }
 0x373   :  { %v5901_v24 = vsel %vm14254_vm9, %v5896_v41, %v5900_v62  ;;  %v11261_v52 = vcombine.low %v5915_v2, %v5925_v32 }
 0x374   :  { %13174 = vmatmul.mubr.bf16.gmra.mrb[56].mxu0 %v11548_v59  ;;  %v11260_v38 = vcombine.low %v5891_v9, %v5901_v24 }
 0x375   :  { %12846 = vmatmul.mubr.bf16.gmra.mrb[48].mxu1 %v17016_v11  ;;  %v11258_v11 = vcombine.low %v5843_v47, %v5853_v42  ;;  %13177 = vmatprep.mubr.bf16.mxu0 %v11549_v46  ;;  %v11550_v47 = vcombine.low %v9827_v26, %v9830_v27  ;;  %v5949_v42 = vsel %vm14254_vm9, %v5944_v34, %v5948_v43 }
 0x376   :  { %12849 = vmatprep.mubr.bf16.mxu1 %v17020_v20  ;;  %v5929_v20 = vrot.slane %v5927_v6, 4 }
 0x378   :  { %v5933_v19 = vor.u32 %v5932_v61, %v5929_v20 }
 0x37a   :  { %v5934_v33 = vrot.slane %v5933_v19, 4 }
 0x37c   :  { %13178 = vmatmul.mubr.bf16.gmra.mrb[60].mxu0 %v11550_v47  ;;  %v5939_v58 = vsel %vm14254_vm9, %v5934_v33, %v5938_v1 }
 0x37d   :  { %12850 = vmatmul.mubr.bf16.gmra.mrb[52].mxu1 %v11258_v11  ;;  %v11262_v36 = vcombine.low %v5939_v58, %v5949_v42 }
 0x37e   :  { %12853 = vmatprep.mubr.bf16.mxu1 %v11259_v12 }
 0x385   :  { %12854 = vmatmul.mubr.bf16.gmra.mrb[56].mxu1 %v11260_v38 }
 0x386   :  { %12857 = vmatprep.mubr.bf16.mxu1 %v11261_v52 }
 0x38d   :  { %12858 = vmatmul.mubr.bf16.gmra.mrb[60].mxu1 %v11262_v36 }
 0x3a8   :  { %v12719_v3 = vpop.f32.mrb[0].mxu1 }
 0x3a9   :  { %v4767_v14 = vpop.f32.mrb[1].mxu1 }
 0x3aa   :  { %v12720_v16 = vpop.f32.mrb[2].mxu1 }
 0x3ab   :  { %v4770_v57 = vpop.f32.mrb[3].mxu1 }
 0x3b0   :  { %v12723_v51 = vpop.f32.mrb[4].mxu1 }
 0x3b1   :  { %v4783_v53 = vpop.f32.mrb[5].mxu1 }
 0x3b2   :  { %v12724_v7 = vpop.f32.mrb[6].mxu1 }
 0x3b3   :  { %v4786_v54 = vpop.f32.mrb[7].mxu1 }
 0x3b8   :  { %v17087_v49 = vpop.f32.mrb[8].mxu1 }
 0x3b9   :  { %v17089_v25 = vpop.f32.mrb[9].mxu1 }
 0x3ba   :  { %v17091_v31 = vpop.f32.mrb[10].mxu1 }
 0x3bb   :  { %v17093_v63 = vpop.f32.mrb[11].mxu1 }
 0x3c0   :  { %v17095_v29 = vpop.f32.mrb[12].mxu1 }
 0x3c1   :  { %v17097_v23 = vpop.f32.mrb[13].mxu1 }
 0x3c2   :  { %v17099_v5 = vpop.f32.mrb[14].mxu1 }
 0x3c3   :  { %v17101_v21 = vpop.f32.mrb[15].mxu1 }
 0x3c8   :  { %v17103_v45 = vpop.f32.mrb[16].mxu1 }
 0x3c9   :  { %v17105_v30 = vpop.f32.mrb[17].mxu1 }
 0x3ca   :  { %v17107_v6 = vpop.f32.mrb[18].mxu1 }
 0x3cb   :  { %v17109_v59 = vpop.f32.mrb[19].mxu1 }
 0x3d0   :  { %v17111_v13 = vpop.f32.mrb[20].mxu1 }
 0x3d1   :  { %v17113_v35 = vpop.f32.mrb[21].mxu1 }
 0x3d2   :  { %v17115_v50 = vpop.f32.mrb[22].mxu1 }
 0x3d3   :  { %v17117_v18 = vpop.f32.mrb[23].mxu1 }
 0x3d7   :  { %v13119_v37 = vpop.f32.mrb[0].mxu0 }
 0x3d8   :  { %v17119_v46 = vpop.f32.mrb[24].mxu1  ;;  %v13197_v55 = vadd.f32 %v13119_v37, %v12719_v3  ;;  %v10058_v39 = vpop.f32.mrb[1].mxu0 }
 0x3d9   :  { %v17121_v8 = vpop.f32.mrb[25].mxu1  ;;  %v13198_v22 = vadd.f32 %v10058_v39, %v4767_v14  ;;  %v13120_v15 = vpop.f32.mrb[2].mxu0 }
 0x3da   :  { %v17123_v40 = vpop.f32.mrb[26].mxu1  ;;  %v13199_v11 = vadd.f32 %v13120_v15, %v12720_v16  ;;  %v10061_v28 = vpop.f32.mrb[3].mxu0  ;;  %v10449_v44 = vmul.f32 %v13197_v55, %v13197_v55 }
 0x3db   :  { %v17125_v4 = vpop.f32.mrb[27].mxu1  ;;  %v13200_v12 = vadd.f32 %v10061_v28, %v4770_v57  ;;  %v10447_v1 = vmul.f32 %v13198_v22, %v13198_v22 }
 0x3dc   :  { %v11887_v20 = vpack.c.bf16 %v13199_v11, %v13197_v55  ;;  %v10450_v56 = vmul.f32 %v13199_v11, %v13199_v11 }
 0x3dd   :  { %v10377_v48 = vadd.f32 %v13200_v12, %v13198_v22  ;;  %v10448_v26 = vmul.f32 %v13200_v12, %v13200_v12  ;;  %v11882_v27 = vpack.c.bf16 %v13200_v12, %v13198_v22 }
 0x3de   :  { %12070 = vst [vmem:[%s17265_s4 + $0x8] sm:$0xff] %v11887_v20  }
 0x3df   :  { %v10378_v17 = vadd.f32 %v13197_v55, %v10377_v48  ;;  %v10511_v9 = vadd.f32 %v10448_v26, %v10447_v1  ;;  %11883 = vst [vmem:[%s17265_s4] sm:$0xff] %v11882_v27   ;;  %v13123_v47 = vpop.f32.mrb[4].mxu0 }
 0x3e0   :  { %v17127_v62 = vpop.f32.mrb[28].mxu1  ;;  %v13201_v24 = vadd.f32 %v13123_v47, %v12723_v51  ;;  %v10074_v19 = vpop.f32.mrb[5].mxu0 }
 0x3e1   :  { %v17129_v41 = vpop.f32.mrb[29].mxu1  ;;  %v10512_v10 = vadd.f32 %v10511_v9, %v10449_v44  ;;  %v13202_v0 = vadd.f32 %v10074_v19, %v4783_v53  ;;  %v10379_v2 = vadd.f32 %v13199_v11, %v10378_v17  ;;  %v13124_v32 = vpop.f32.mrb[6].mxu0 }
 0x3e2   :  { %v17131_v61 = vpop.f32.mrb[30].mxu1  ;;  %v13203_v38 = vadd.f32 %v13124_v32, %v12724_v7  ;;  %v10077_v52 = vpop.f32.mrb[7].mxu0  ;;  %v10453_v57 = vmul.f32 %v13201_v24, %v13201_v24 }
 0x3e3   :  { %v17133_v60 = vpop.f32.mrb[31].mxu1  ;;  %v10380_v33 = vadd.f32 %v13202_v0, %v10379_v2  ;;  %v10451_v34 = vmul.f32 %v13202_v0, %v13202_v0  ;;  %v10513_v43 = vadd.f32 %v10512_v10, %v10450_v56  ;;  %v13204_v58 = vadd.f32 %v10077_v52, %v4786_v54 }
 0x3e4   :  { %v11897_v42 = vpack.c.bf16 %v13203_v38, %v13201_v24  ;;  %v10454_v55 = vmul.f32 %v13203_v38, %v13203_v38 }
 0x3e5   :  { %v10514_v36 = vadd.f32 %v10513_v43, %v10451_v34  ;;  %v10381_v3 = vadd.f32 %v13204_v58, %v10380_v33  ;;  %v10452_v14 = vmul.f32 %v13204_v58, %v13204_v58  ;;  %v11892_v16 = vpack.c.bf16 %v13204_v58, %v13202_v0 }
 0x3e6   :  { %12072 = vst [vmem:[%s17265_s4 + $0x18] sm:$0xff] %v11897_v42  }
 0x3e7   :  { %v10382_v51 = vadd.f32 %v13201_v24, %v10381_v3  ;;  %v10515_v53 = vadd.f32 %v10514_v36, %v10452_v14  ;;  %12071 = vst [vmem:[%s17265_s4 + $0x10] sm:$0xff] %v11892_v16   ;;  %v13127_v7 = vpop.f32.mrb[8].mxu0 }
 0x3e8   :  { %v13205_v37 = vadd.f32 %v13127_v7, %v17087_v49  ;;  %v10090_v54 = vpop.f32.mrb[9].mxu0 }
 0x3e9   :  { %v10516_v39 = vadd.f32 %v10515_v53, %v10453_v57  ;;  %v13206_v22 = vadd.f32 %v10090_v54, %v17089_v25  ;;  %v10383_v15 = vadd.f32 %v13203_v38, %v10382_v51  ;;  %v13128_v11 = vpop.f32.mrb[10].mxu0 }
 0x3ea   :  { %v13207_v28 = vadd.f32 %v13128_v11, %v17091_v31  ;;  %v10093_v12 = vpop.f32.mrb[11].mxu0  ;;  %v10457_v25 = vmul.f32 %v13205_v37, %v13205_v37 }
 0x3eb   :  { %v10384_v20 = vadd.f32 %v13206_v22, %v10383_v15  ;;  %v10455_v1 = vmul.f32 %v13206_v22, %v13206_v22  ;;  %v10517_v48 = vadd.f32 %v10516_v39, %v10454_v55  ;;  %v13208_v26 = vadd.f32 %v10093_v12, %v17093_v63 }
 0x3ec   :  { %v11907_v27 = vpack.c.bf16 %v13207_v28, %v13205_v37  ;;  %v10458_v56 = vmul.f32 %v13207_v28, %v13207_v28 }
 0x3ed   :  { %v10518_v44 = vadd.f32 %v10517_v48, %v10455_v1  ;;  %v10385_v17 = vadd.f32 %v13208_v26, %v10384_v20  ;;  %v10456_v9 = vmul.f32 %v13208_v26, %v13208_v26  ;;  %v11902_v49 = vpack.c.bf16 %v13208_v26, %v13206_v22 }
 0x3ee   :  { %12074 = vst [vmem:[%s17265_s4 + $0x28] sm:$0xff] %v11907_v27  }
 0x3ef   :  { %v10386_v47 = vadd.f32 %v13205_v37, %v10385_v17  ;;  %v10519_v24 = vadd.f32 %v10518_v44, %v10456_v9  ;;  %12073 = vst [vmem:[%s17265_s4 + $0x20] sm:$0xff] %v11902_v49   ;;  %v13131_v31 = vpop.f32.mrb[12].mxu0 }
 0x3f0   :  { %v13209_v19 = vadd.f32 %v13131_v31, %v17095_v29  ;;  %v10106_v63 = vpop.f32.mrb[13].mxu0 }
 0x3f1   :  { %v10520_v10 = vadd.f32 %v10519_v24, %v10457_v25  ;;  %v13210_v0 = vadd.f32 %v10106_v63, %v17097_v23  ;;  %v10387_v2 = vadd.f32 %v13207_v28, %v10386_v47  ;;  %v13132_v32 = vpop.f32.mrb[14].mxu0 }
 0x3f2   :  { %v13211_v38 = vadd.f32 %v13132_v32, %v17099_v5  ;;  %v10109_v52 = vpop.f32.mrb[15].mxu0  ;;  %v10461_v23 = vmul.f32 %v13209_v19, %v13209_v19 }
 0x3f3   :  { %v10388_v33 = vadd.f32 %v13210_v0, %v10387_v2  ;;  %v10459_v34 = vmul.f32 %v13210_v0, %v13210_v0  ;;  %v10521_v43 = vadd.f32 %v10520_v10, %v10458_v56  ;;  %v13212_v58 = vadd.f32 %v10109_v52, %v17101_v21 }
 0x3f4   :  { %v11917_v42 = vpack.c.bf16 %v13211_v38, %v13209_v19  ;;  %v10462_v53 = vmul.f32 %v13211_v38, %v13211_v38 }
 0x3f5   :  { %v10522_v36 = vadd.f32 %v10521_v43, %v10459_v34  ;;  %v10389_v3 = vadd.f32 %v13212_v58, %v10388_v33  ;;  %v10460_v14 = vmul.f32 %v13212_v58, %v13212_v58  ;;  %v11912_v29 = vpack.c.bf16 %v13212_v58, %v13210_v0 }
 0x3f6   :  { %12076 = vst [vmem:[%s17265_s4 + $0x38] sm:$0xff] %v11917_v42  }
 0x3f7   :  { %v10390_v16 = vadd.f32 %v13209_v19, %v10389_v3  ;;  %v10523_v57 = vadd.f32 %v10522_v36, %v10460_v14  ;;  %12075 = vst [vmem:[%s17265_s4 + $0x30] sm:$0xff] %v11912_v29   ;;  %v13135_v5 = vpop.f32.mrb[16].mxu0 }
 0x3f8   :  { %v13213_v51 = vadd.f32 %v13135_v5, %v17103_v45  ;;  %v10122_v21 = vpop.f32.mrb[17].mxu0 }
 0x3f9   :  { %v10524_v7 = vadd.f32 %v10523_v57, %v10461_v23  ;;  %v13214_v37 = vadd.f32 %v10122_v21, %v17105_v30  ;;  %v10391_v54 = vadd.f32 %v13211_v38, %v10390_v16  ;;  %v13136_v55 = vpop.f32.mrb[18].mxu0 }
 0x3fa   :  { %v13215_v39 = vadd.f32 %v13136_v55, %v17107_v6  ;;  %v10125_v22 = vpop.f32.mrb[19].mxu0  ;;  %v10465_v30 = vmul.f32 %v13213_v51, %v13213_v51 }
 0x3fb   :  { %v10392_v15 = vadd.f32 %v13214_v37, %v10391_v54  ;;  %v10463_v11 = vmul.f32 %v13214_v37, %v13214_v37  ;;  %v10525_v28 = vadd.f32 %v10524_v7, %v10462_v53  ;;  %v13216_v12 = vadd.f32 %v10125_v22, %v17109_v59 }
 0x3fc   :  { %v11927_v20 = vpack.c.bf16 %v13215_v39, %v13213_v51  ;;  %v10466_v9 = vmul.f32 %v13215_v39, %v13215_v39 }
 0x3fd   :  { %v10526_v1 = vadd.f32 %v10525_v28, %v10463_v11  ;;  %v10393_v48 = vadd.f32 %v13216_v12, %v10392_v15  ;;  %v10464_v26 = vmul.f32 %v13216_v12, %v13216_v12  ;;  %v11922_v45 = vpack.c.bf16 %v13216_v12, %v13214_v37 }
 0x3fe   :  { %12078 = vst [vmem:[%s17265_s4 + $0x48] sm:$0xff] %v11927_v20  }
 0x3ff   :  { %v10394_v27 = vadd.f32 %v13213_v51, %v10393_v48  ;;  %v10527_v44 = vadd.f32 %v10526_v1, %v10464_v26  ;;  %12077 = vst [vmem:[%s17265_s4 + $0x40] sm:$0xff] %v11922_v45   ;;  %v13139_v6 = vpop.f32.mrb[20].mxu0 }
 0x400   :  { %v13217_v17 = vadd.f32 %v13139_v6, %v17111_v13  ;;  %v10138_v59 = vpop.f32.mrb[21].mxu0 }
 0x401   :  { %v10528_v49 = vadd.f32 %v10527_v44, %v10465_v30  ;;  %v13218_v25 = vadd.f32 %v10138_v59, %v17113_v35  ;;  %v10395_v47 = vadd.f32 %v13215_v39, %v10394_v27  ;;  %v13140_v24 = vpop.f32.mrb[22].mxu0 }
 0x402   :  { %v13219_v31 = vadd.f32 %v13140_v24, %v17115_v50  ;;  %v10141_v19 = vpop.f32.mrb[23].mxu0  ;;  %v10469_v35 = vmul.f32 %v13217_v17, %v13217_v17 }
 0x403   :  { %v10396_v63 = vadd.f32 %v13218_v25, %v10395_v47  ;;  %v10467_v56 = vmul.f32 %v13218_v25, %v13218_v25  ;;  %v10529_v10 = vadd.f32 %v10528_v49, %v10466_v9  ;;  %v13220_v0 = vadd.f32 %v10141_v19, %v17117_v18 }
 0x404   :  { %v11937_v2 = vpack.c.bf16 %v13219_v31, %v13217_v17  ;;  %v10470_v58 = vmul.f32 %v13219_v31, %v13219_v31 }
 0x405   :  { %v10530_v32 = vadd.f32 %v10529_v10, %v10467_v56  ;;  %v10397_v38 = vadd.f32 %v13220_v0, %v10396_v63  ;;  %v10468_v52 = vmul.f32 %v13220_v0, %v13220_v0  ;;  %v11932_v13 = vpack.c.bf16 %v13220_v0, %v13218_v25 }
 0x406   :  { %12080 = vst [vmem:[%s17265_s4 + $0x58] sm:$0xff] %v11937_v2  }
 0x407   :  { %v10398_v33 = vadd.f32 %v13217_v17, %v10397_v38  ;;  %v10531_v34 = vadd.f32 %v10530_v32, %v10468_v52  ;;  %12079 = vst [vmem:[%s17265_s4 + $0x50] sm:$0xff] %v11932_v13   ;;  %v13143_v50 = vpop.f32.mrb[24].mxu0 }
 0x408   :  { %v13221_v43 = vadd.f32 %v13143_v50, %v17119_v46  ;;  %v10154_v18 = vpop.f32.mrb[25].mxu0 }
 0x409   :  { %v10532_v42 = vadd.f32 %v10531_v34, %v10469_v35  ;;  %v13222_v36 = vadd.f32 %v10154_v18, %v17121_v8  ;;  %v10399_v3 = vadd.f32 %v13219_v31, %v10398_v33  ;;  %v13144_v14 = vpop.f32.mrb[26].mxu0 }
 0x40a   :  { %v13223_v29 = vadd.f32 %v13144_v14, %v17123_v40  ;;  %v10157_v23 = vpop.f32.mrb[27].mxu0  ;;  %v10473_v8 = vmul.f32 %v13221_v43, %v13221_v43 }
 0x40b   :  { %v10400_v16 = vadd.f32 %v13222_v36, %v10399_v3  ;;  %v10471_v57 = vmul.f32 %v13222_v36, %v13222_v36  ;;  %v10533_v5 = vadd.f32 %v10532_v42, %v10470_v58  ;;  %v13224_v51 = vadd.f32 %v10157_v23, %v17125_v4 }
 0x40c   :  { %v11947_v21 = vpack.c.bf16 %v13223_v29, %v13221_v43  ;;  %v10474_v22 = vmul.f32 %v13223_v29, %v13223_v29 }
 0x40d   :  { %v10534_v53 = vadd.f32 %v10533_v5, %v10471_v57  ;;  %v10401_v7 = vadd.f32 %v13224_v51, %v10400_v16  ;;  %v10472_v37 = vmul.f32 %v13224_v51, %v13224_v51  ;;  %v11942_v46 = vpack.c.bf16 %v13224_v51, %v13222_v36 }
 0x40e   :  { %12082 = vst [vmem:[%s17265_s4 + $0x68] sm:$0xff] %v11947_v21  }
 0x40f   :  { %v10402_v54 = vadd.f32 %v13221_v43, %v10401_v7  ;;  %v10535_v55 = vadd.f32 %v10534_v53, %v10472_v37  ;;  %12081 = vst [vmem:[%s17265_s4 + $0x60] sm:$0xff] %v11942_v46   ;;  %v13147_v40 = vpop.f32.mrb[28].mxu0 }
 0x410   :  { %v13225_v39 = vadd.f32 %v13147_v40, %v17127_v62  ;;  %v10170_v4 = vpop.f32.mrb[29].mxu0 }
 0x411   :  { %v10536_v15 = vadd.f32 %v10535_v55, %v10473_v8  ;;  %v13226_v11 = vadd.f32 %v10170_v4, %v17129_v41  ;;  %v10403_v28 = vadd.f32 %v13223_v29, %v10402_v54  ;;  %v13148_v12 = vpop.f32.mrb[30].mxu0 }
 0x412   :  { %v13227_v20 = vadd.f32 %v13148_v12, %v17131_v61  ;;  %v10173_v1 = vpop.f32.mrb[31].mxu0  ;;  %v10477_v41 = vmul.f32 %v13225_v39, %v13225_v39 }
 0x413   :  { %v10404_v48 = vadd.f32 %v13226_v11, %v10403_v28  ;;  %v10475_v26 = vmul.f32 %v13226_v11, %v13226_v11  ;;  %v10537_v45 = vadd.f32 %v10536_v15, %v10474_v22  ;;  %v13228_v30 = vadd.f32 %v10173_v1, %v17133_v60 }
 0x414   :  { %v11957_v27 = vpack.c.bf16 %v13227_v20, %v13225_v39  ;;  %v10478_v25 = vmul.f32 %v13227_v20, %v13227_v20 }
 0x415   :  { %v10538_v44 = vadd.f32 %v10537_v45, %v10475_v26  ;;  %v10405_v6 = vadd.f32 %v13228_v30, %v10404_v48  ;;  %v10476_v17 = vmul.f32 %v13228_v30, %v13228_v30  ;;  %v11952_v62 = vpack.c.bf16 %v13228_v30, %v13226_v11 }
 0x416   :  { %12084 = vst [vmem:[%s17265_s4 + $0x78] sm:$0xff] %v11957_v27  }
 0x417   :  { %v10406_v59 = vadd.f32 %v13225_v39, %v10405_v6  ;;  %v10539_v9 = vadd.f32 %v10538_v44, %v10476_v17  ;;  %12083 = vst [vmem:[%s17265_s4 + $0x70] sm:$0xff] %v11952_v62   ;;  %v13151_v61 = vpop.f32.mrb[32].mxu0 }
 0x418   :  { %v10186_v49 = vpop.f32.mrb[33].mxu0 }
 0x419   :  { %v10540_v60 = vadd.f32 %v10539_v9, %v10477_v41  ;;  %v10407_v47 = vadd.f32 %v13227_v20, %v10406_v59  ;;  %v13152_v24 = vpop.f32.mrb[34].mxu0 }
 0x41a   :  { %v10189_v31 = vpop.f32.mrb[35].mxu0 }
 0x41b   :  { %v10541_v19 = vadd.f32 %v10540_v60, %v10478_v25 }
 0x41f   :  { %v13155_v63 = vpop.f32.mrb[36].mxu0 }
 0x420   :  { %v10202_v56 = vpop.f32.mrb[37].mxu0 }
 0x421   :  { %v13156_v10 = vpop.f32.mrb[38].mxu0 }
 0x422   :  { %v10205_v0 = vpop.f32.mrb[39].mxu0 }
 0x427   :  { %v13159_v18 = vpop.f32.mrb[40].mxu0 }
 0x428   :  { %v12831_v2 = vpop.f32.mrb[32].mxu1  ;;  %v10218_v42 = vpop.f32.mrb[41].mxu0 }
 0x429   :  { %v6305_v32 = vpop.f32.mrb[33].mxu1  ;;  %v13229_v38 = vadd.f32 %v13151_v61, %v12831_v2  ;;  %v13160_v23 = vpop.f32.mrb[42].mxu0 }
 0x42a   :  { %v12832_v52 = vpop.f32.mrb[34].mxu1  ;;  %v13230_v13 = vadd.f32 %v10186_v49, %v6305_v32  ;;  %v10221_v16 = vpop.f32.mrb[43].mxu0 }
 0x42b   :  { %v6308_v35 = vpop.f32.mrb[35].mxu1  ;;  %v13231_v33 = vadd.f32 %v13152_v24, %v12832_v52  ;;  %v10481_v57 = vmul.f32 %v13229_v38, %v13229_v38 }
 0x42c   :  { %v10408_v34 = vadd.f32 %v13230_v13, %v10407_v47  ;;  %v10479_v50 = vmul.f32 %v13230_v13, %v13230_v13  ;;  %v13232_v43 = vadd.f32 %v10189_v31, %v6308_v35 }
 0x42d   :  { %v11967_v58 = vpack.c.bf16 %v13231_v33, %v13229_v38  ;;  %v10482_v37 = vmul.f32 %v13231_v33, %v13231_v33 }
 0x42e   :  { %v10542_v36 = vadd.f32 %v10541_v19, %v10479_v50  ;;  %v10409_v3 = vadd.f32 %v13232_v43, %v10408_v34  ;;  %v10480_v14 = vmul.f32 %v13232_v43, %v13232_v43  ;;  %v11962_v29 = vpack.c.bf16 %v13232_v43, %v13230_v13 }
 0x42f   :  { %12086 = vst [vmem:[%s17265_s4 + $0x88] sm:$0xff] %v11967_v58   ;;  %v13163_v28 = vpop.f32.mrb[44].mxu0 }
 0x430   :  { %v10410_v5 = vadd.f32 %v13229_v38, %v10409_v3  ;;  %v10543_v51 = vadd.f32 %v10542_v36, %v10480_v14  ;;  %12085 = vst [vmem:[%s17265_s4 + $0x80] sm:$0xff] %v11962_v29   ;;  %v12835_v21 = vpop.f32.mrb[36].mxu1  ;;  %v10234_v20 = vpop.f32.mrb[45].mxu0 }
 0x431   :  { %v6321_v53 = vpop.f32.mrb[37].mxu1  ;;  %v13233_v7 = vadd.f32 %v13155_v63, %v12835_v21  ;;  %v13164_v30 = vpop.f32.mrb[46].mxu0 }
 0x432   :  { %v10544_v46 = vadd.f32 %v10543_v51, %v10481_v57  ;;  %v12836_v8 = vpop.f32.mrb[38].mxu1  ;;  %v13234_v54 = vadd.f32 %v10202_v56, %v6321_v53  ;;  %v10411_v55 = vadd.f32 %v13231_v33, %v10410_v5  ;;  %v10237_v27 = vpop.f32.mrb[47].mxu0 }
 0x433   :  { %v6324_v40 = vpop.f32.mrb[39].mxu1  ;;  %v13235_v39 = vadd.f32 %v13156_v10, %v12836_v8  ;;  %v10485_v44 = vmul.f32 %v13233_v7, %v13233_v7 }
 0x434   :  { %v10412_v4 = vadd.f32 %v13234_v54, %v10411_v55  ;;  %v10483_v22 = vmul.f32 %v13234_v54, %v13234_v54  ;;  %v10545_v15 = vadd.f32 %v10544_v46, %v10482_v37  ;;  %v13236_v11 = vadd.f32 %v10205_v0, %v6324_v40 }
 0x435   :  { %v11977_v12 = vpack.c.bf16 %v13235_v39, %v13233_v7  ;;  %v10486_v9 = vmul.f32 %v13235_v39, %v13235_v39 }
 0x436   :  { %v10546_v1 = vadd.f32 %v10545_v15, %v10483_v22  ;;  %v10413_v48 = vadd.f32 %v13236_v11, %v10412_v4  ;;  %v10484_v26 = vmul.f32 %v13236_v11, %v13236_v11  ;;  %v11972_v45 = vpack.c.bf16 %v13236_v11, %v13234_v54 }
 0x437   :  { %12088 = vst [vmem:[%s17265_s4 + $0x98] sm:$0xff] %v11977_v12   ;;  %v13167_v10 = vpop.f32.mrb[48].mxu0 }
 0x438   :  { %v10414_v6 = vadd.f32 %v13233_v7, %v10413_v48  ;;  %v10547_v17 = vadd.f32 %v10546_v1, %v10484_v26  ;;  %12087 = vst [vmem:[%s17265_s4 + $0x90] sm:$0xff] %v11972_v45   ;;  %v12839_v62 = vpop.f32.mrb[40].mxu1  ;;  %v10250_v2 = vpop.f32.mrb[49].mxu0 }
 0x439   :  { %v6337_v41 = vpop.f32.mrb[41].mxu1  ;;  %v13237_v59 = vadd.f32 %v13159_v18, %v12839_v62  ;;  %v13168_v35 = vpop.f32.mrb[50].mxu0 }
 0x43a   :  { %v10548_v61 = vadd.f32 %v10547_v17, %v10485_v44  ;;  %v12840_v49 = vpop.f32.mrb[42].mxu1  ;;  %v13238_v25 = vadd.f32 %v10218_v42, %v6337_v41  ;;  %v10415_v60 = vadd.f32 %v13235_v39, %v10414_v6  ;;  %v10253_v33 = vpop.f32.mrb[51].mxu0 }
 0x43b   :  { %v6340_v47 = vpop.f32.mrb[43].mxu1  ;;  %v13239_v24 = vadd.f32 %v13160_v23, %v12840_v49  ;;  %v10489_v34 = vmul.f32 %v13237_v59, %v13237_v59 }
 0x43c   :  { %v10416_v31 = vadd.f32 %v13238_v25, %v10415_v60  ;;  %v10487_v19 = vmul.f32 %v13238_v25, %v13238_v25  ;;  %v10549_v63 = vadd.f32 %v10548_v61, %v10486_v9  ;;  %v13240_v56 = vadd.f32 %v10221_v16, %v6340_v47 }
 0x43d   :  { %v11987_v0 = vpack.c.bf16 %v13239_v24, %v13237_v59  ;;  %v10490_v36 = vmul.f32 %v13239_v24, %v13239_v24 }
 0x43e   :  { %v10550_v32 = vadd.f32 %v10549_v63, %v10487_v19  ;;  %v10417_v38 = vadd.f32 %v13240_v56, %v10416_v31  ;;  %v10488_v52 = vmul.f32 %v13240_v56, %v13240_v56  ;;  %v11982_v13 = vpack.c.bf16 %v13240_v56, %v13238_v25 }
 0x43f   :  { %12090 = vst [vmem:[%s17265_s4 + $0xa8] sm:$0xff] %v11987_v0   ;;  %v13171_v7 = vpop.f32.mrb[52].mxu0 }
 0x440   :  { %v10418_v50 = vadd.f32 %v13237_v59, %v10417_v38  ;;  %v10551_v43 = vadd.f32 %v10550_v32, %v10488_v52  ;;  %12089 = vst [vmem:[%s17265_s4 + $0xa0] sm:$0xff] %v11982_v13   ;;  %v12843_v18 = vpop.f32.mrb[44].mxu1  ;;  %v10266_v46 = vpop.f32.mrb[53].mxu0 }
 0x441   :  { %v6353_v58 = vpop.f32.mrb[45].mxu1  ;;  %v13241_v42 = vadd.f32 %v13163_v28, %v12843_v18  ;;  %v13172_v39 = vpop.f32.mrb[54].mxu0 }
 0x442   :  { %v10552_v3 = vadd.f32 %v10551_v43, %v10489_v34  ;;  %v12844_v14 = vpop.f32.mrb[46].mxu1  ;;  %v13242_v29 = vadd.f32 %v10234_v20, %v6353_v58  ;;  %v10419_v23 = vadd.f32 %v13239_v24, %v10418_v50  ;;  %v10269_v4 = vpop.f32.mrb[55].mxu0 }
 0x443   :  { %v6356_v16 = vpop.f32.mrb[47].mxu1  ;;  %v13243_v57 = vadd.f32 %v13164_v30, %v12844_v14  ;;  %v10493_v22 = vmul.f32 %v13241_v42, %v13241_v42 }
 0x444   :  { %v10420_v5 = vadd.f32 %v13242_v29, %v10419_v23  ;;  %v10491_v51 = vmul.f32 %v13242_v29, %v13242_v29  ;;  %v10553_v21 = vadd.f32 %v10552_v3, %v10490_v36  ;;  %v13244_v53 = vadd.f32 %v10237_v27, %v6356_v16 }
 0x445   :  { %v11997_v37 = vpack.c.bf16 %v13243_v57, %v13241_v42  ;;  %v10494_v1 = vmul.f32 %v13243_v57, %v13243_v57 }
 0x446   :  { %v10554_v8 = vadd.f32 %v10553_v21, %v10491_v51  ;;  %v10421_v54 = vadd.f32 %v13244_v53, %v10420_v5  ;;  %v10492_v55 = vmul.f32 %v13244_v53, %v13244_v53  ;;  %v11992_v40 = vpack.c.bf16 %v13244_v53, %v13242_v29 }
 0x447   :  { %12092 = vst [vmem:[%s17265_s4 + $0xb8] sm:$0xff] %v11997_v37   ;;  %v13175_v59 = vpop.f32.mrb[56].mxu0 }
 0x448   :  { %v10422_v15 = vadd.f32 %v13241_v42, %v10421_v54  ;;  %v10555_v11 = vadd.f32 %v10554_v8, %v10492_v55  ;;  %12091 = vst [vmem:[%s17265_s4 + $0xb0] sm:$0xff] %v11992_v40   ;;  %v12847_v28 = vpop.f32.mrb[48].mxu1  ;;  %v10282_v61 = vpop.f32.mrb[57].mxu0 }
 0x449   :  { %v6369_v12 = vpop.f32.mrb[49].mxu1  ;;  %v13245_v20 = vadd.f32 %v13167_v10, %v12847_v28  ;;  %v13176_v24 = vpop.f32.mrb[58].mxu0 }
 0x44a   :  { %v10556_v48 = vadd.f32 %v10555_v11, %v10493_v22  ;;  %v12848_v26 = vpop.f32.mrb[50].mxu1  ;;  %v13246_v45 = vadd.f32 %v10250_v2, %v6369_v12  ;;  %v10423_v30 = vadd.f32 %v13243_v57, %v10422_v15  ;;  %v10285_v31 = vpop.f32.mrb[59].mxu0 }
 0x44b   :  { %v6372_v27 = vpop.f32.mrb[51].mxu1  ;;  %v13247_v44 = vadd.f32 %v13168_v35, %v12848_v26  ;;  %v10497_v19 = vmul.f32 %v13245_v20, %v13245_v20 }
 0x44c   :  { %v10424_v6 = vadd.f32 %v13246_v45, %v10423_v30  ;;  %v10495_v17 = vmul.f32 %v13246_v45, %v13246_v45  ;;  %v10557_v62 = vadd.f32 %v10556_v48, %v10494_v1  ;;  %v13248_v41 = vadd.f32 %v10253_v33, %v6372_v27 }
 0x44d   :  { %v12007_v9 = vpack.c.bf16 %v13247_v44, %v13245_v20  ;;  %v10498_v32 = vmul.f32 %v13247_v44, %v13247_v44 }
 0x44e   :  { %v10558_v49 = vadd.f32 %v10557_v62, %v10495_v17  ;;  %v10425_v25 = vadd.f32 %v13248_v41, %v10424_v6  ;;  %v10496_v60 = vmul.f32 %v13248_v41, %v13248_v41  ;;  %v12002_v47 = vpack.c.bf16 %v13248_v41, %v13246_v45 }
 0x44f   :  { %12094 = vst [vmem:[%s17265_s4 + $0xc8] sm:$0xff] %v12007_v9   ;;  %v13179_v42 = vpop.f32.mrb[60].mxu0 }
 0x450   :  { %v10426_v63 = vadd.f32 %v13245_v20, %v10425_v25  ;;  %v10559_v56 = vadd.f32 %v10558_v49, %v10496_v60  ;;  %12093 = vst [vmem:[%s17265_s4 + $0xc0] sm:$0xff] %v12002_v47   ;;  %v12851_v10 = vpop.f32.mrb[52].mxu1  ;;  %v10298_v3 = vpop.f32.mrb[61].mxu0 }
 0x451   :  { %v6385_v0 = vpop.f32.mrb[53].mxu1  ;;  %v13249_v2 = vadd.f32 %v13171_v7, %v12851_v10  ;;  %v13180_v57 = vpop.f32.mrb[62].mxu0 }
 0x452   :  { %v10560_v38 = vadd.f32 %v10559_v56, %v10497_v19  ;;  %v12852_v52 = vpop.f32.mrb[54].mxu1  ;;  %v13250_v13 = vadd.f32 %v10266_v46, %v6385_v0  ;;  %v10427_v35 = vadd.f32 %v13247_v44, %v10426_v63  ;;  %v10301_v5 = vpop.f32.mrb[63].mxu0 }
 0x453   :  { %v6388_v33 = vpop.f32.mrb[55].mxu1  ;;  %v13251_v34 = vadd.f32 %v13172_v39, %v12852_v52  ;;  %v10501_v51 = vmul.f32 %v13249_v2, %v13249_v2 }
 0x454   :  { %v10428_v50 = vadd.f32 %v13250_v13, %v10427_v35  ;;  %v10499_v43 = vmul.f32 %v13250_v13, %v13250_v13  ;;  %v10561_v18 = vadd.f32 %v10560_v38, %v10498_v32  ;;  %v13252_v58 = vadd.f32 %v10269_v4, %v6388_v33 }
 0x455   :  { %v12017_v36 = vpack.c.bf16 %v13251_v34, %v13249_v2  ;;  %v10502_v8 = vmul.f32 %v13251_v34, %v13251_v34 }
 0x456   :  { %v10562_v14 = vadd.f32 %v10561_v18, %v10499_v43  ;;  %v10429_v29 = vadd.f32 %v13252_v58, %v10428_v50  ;;  %v10500_v23 = vmul.f32 %v13252_v58, %v13252_v58  ;;  %v12012_v16 = vpack.c.bf16 %v13252_v58, %v13250_v13 }
 0x457   :  { %12096 = vst [vmem:[%s17265_s4 + $0xd8] sm:$0xff] %v12017_v36  }
 0x458   :  { %v10430_v21 = vadd.f32 %v13249_v2, %v10429_v29  ;;  %v10563_v53 = vadd.f32 %v10562_v14, %v10500_v23  ;;  %12095 = vst [vmem:[%s17265_s4 + $0xd0] sm:$0xff] %v12012_v16   ;;  %v12855_v7 = vpop.f32.mrb[56].mxu1 }
 0x459   :  { %v6401_v37 = vpop.f32.mrb[57].mxu1  ;;  %v13253_v46 = vadd.f32 %v13175_v59, %v12855_v7 }
 0x45a   :  { %v10564_v54 = vadd.f32 %v10563_v53, %v10501_v51  ;;  %v12856_v55 = vpop.f32.mrb[58].mxu1  ;;  %v13254_v40 = vadd.f32 %v10282_v61, %v6401_v37  ;;  %v10431_v39 = vadd.f32 %v13251_v34, %v10430_v21 }
 0x45b   :  { %v6404_v4 = vpop.f32.mrb[59].mxu1  ;;  %v13255_v22 = vadd.f32 %v13176_v24, %v12856_v55  ;;  %v10505_v30 = vmul.f32 %v13253_v46, %v13253_v46 }
 0x45c   :  { %v10432_v15 = vadd.f32 %v13254_v40, %v10431_v39  ;;  %v10503_v11 = vmul.f32 %v13254_v40, %v13254_v40  ;;  %v10565_v28 = vadd.f32 %v10564_v54, %v10502_v8  ;;  %v13256_v12 = vadd.f32 %v10285_v31, %v6404_v4 }
 0x45d   :  { %v12027_v20 = vpack.c.bf16 %v13255_v22, %v13253_v46  ;;  %v10506_v41 = vmul.f32 %v13255_v22, %v13255_v22 }
 0x45e   :  { %v10566_v1 = vadd.f32 %v10565_v28, %v10503_v11  ;;  %v10433_v48 = vadd.f32 %v13256_v12, %v10432_v15  ;;  %v10504_v26 = vmul.f32 %v13256_v12, %v13256_v12  ;;  %v12022_v45 = vpack.c.bf16 %v13256_v12, %v13254_v40 }
 0x45f   :  { %12098 = vst [vmem:[%s17265_s4 + $0xe8] sm:$0xff] %v12027_v20  }
 0x460   :  { %v10434_v27 = vadd.f32 %v13253_v46, %v10433_v48  ;;  %v10567_v44 = vadd.f32 %v10566_v1, %v10504_v26  ;;  %12097 = vst [vmem:[%s17265_s4 + $0xe0] sm:$0xff] %v12022_v45   ;;  %v12859_v6 = vpop.f32.mrb[60].mxu1 }
 0x461   :  { %v6417_v17 = vpop.f32.mrb[61].mxu1  ;;  %v13257_v62 = vadd.f32 %v13179_v42, %v12859_v6 }
 0x462   :  { %v10568_v59 = vadd.f32 %v10567_v44, %v10505_v30  ;;  %v12860_v9 = vpop.f32.mrb[62].mxu1  ;;  %v13258_v61 = vadd.f32 %v10298_v3, %v6417_v17  ;;  %v10435_v49 = vadd.f32 %v13255_v22, %v10434_v27 }
 0x463   :  { %v6420_v25 = vpop.f32.mrb[63].mxu1  ;;  %v13259_v60 = vadd.f32 %v13180_v57, %v12860_v9  ;;  %v10509_v32 = vmul.f32 %v13257_v62, %v13257_v62 }
 0x464   :  { %v10436_v47 = vadd.f32 %v13258_v61, %v10435_v49  ;;  %v10507_v24 = vmul.f32 %v13258_v61, %v13258_v61  ;;  %v10569_v31 = vadd.f32 %v10568_v59, %v10506_v41  ;;  %v13260_v19 = vadd.f32 %v10301_v5, %v6420_v25 }
 0x465   :  { %v12037_v63 = vpack.c.bf16 %v13259_v60, %v13257_v62  ;;  %v10510_v13 = vmul.f32 %v13259_v60, %v13259_v60 }
 0x466   :  { %v10570_v56 = vadd.f32 %v10569_v31, %v10507_v24  ;;  %v10437_v10 = vadd.f32 %v13260_v19, %v10436_v47  ;;  %v10508_v0 = vmul.f32 %v13260_v19, %v13260_v19  ;;  %v12032_v2 = vpack.c.bf16 %v13260_v19, %v13258_v61 }
 0x467   :  { %12100 = vst [vmem:[%s17265_s4 + $0xf8] sm:$0xff] %v12037_v63  }
 0x468   :  { %v10438_v38 = vadd.f32 %v13257_v62, %v10437_v10  ;;  %v10571_v52 = vadd.f32 %v10570_v56, %v10508_v0  ;;  %12099 = vst [vmem:[%s17265_s4 + $0xf0] sm:$0xff] %v12032_v2  }
 0x46a   :  { %v10439_v35 = vadd.f32 %v13259_v60, %v10438_v38  ;;  %v10572_v33 = vadd.f32 %v10571_v52, %v10509_v32 }
 0x46c   :  { %v10440_v34 = vrot.slane %v10439_v35, 4  ;;  %v10573_v50 = vadd.f32 %v10572_v33, %v10510_v13 }
 0x46e   :  { %v10441_v43 = vadd.f32 %v10440_v34, %v10439_v35  ;;  %v10574_v18 = vrot.slane %v10573_v50, 4 }
 0x470   :  { %v10442_v58 = vrot.slane %v10441_v43, 2  ;;  %v10575_v42 = vadd.f32 %v10574_v18, %v10573_v50 }
 0x472   :  { %v10443_v36 = vadd.f32 %v10442_v58, %v10441_v43  ;;  %v10576_v3 = vrot.slane %v10575_v42, 2 }
 0x474   :  { %v10444_v14 = vrot.slane %v10443_v36, 1  ;;  %v10577_v29 = vadd.f32 %v10576_v3, %v10575_v42 }
 0x476   :  { %v10445_v23 = vadd.f32 %v10444_v14, %v10443_v36  ;;  %v10578_v16 = vrot.slane %v10577_v29, 1 }
 0x478   :  { %10446 = vst [vmem:[%s17266_s5] sm:$0x1] %v10445_v23  ;;  %v10579_v57 = vadd.f32 %v10578_v16, %v10577_v29 }
 0x47a   :  { %10580 = vst [vmem:[%s17266_s5 + $0x1] sm:$0x1] %v10579_v57 }

</bundles_post_ra>
